<compile_context>
chip_gen: v7x
topology: tpu7x:2x2x1
jax: 0.10.0
libtpu: 0.0.40
codegen_flags: <defaults>
</compile_context>

<pallas_src>
import jax
import jax.numpy as jnp
from jax.experimental import pallas as pl
from jax.experimental.pallas import tpu as pltpu

IMAGE_SIZE = 28               # FashionMNIST spatial size
IN_CH = 1
OUT_CH = 16
NUM_CLASSES = 10
K = 3                         # conv kernel size
H = IMAGE_SIZE
HP = IMAGE_SIZE // 2          # pooled spatial size (14)
HP_PAD = 16                   # per-channel slab stride (14 -> 16, aligned stores)
FC_IN = OUT_CH * HP * HP      # 3136
N_PAD = 16                    # classes padded 10 -> 16
BT = 128                      # batch tile = lane width (do not raise: vreg pressure)

_HIGHEST = jax.lax.Precision.HIGHEST


def _fused_cnn_kernel(w_ref, b_ref, fcw_ref, fcb_ref, x_ref, o_ref, slab_ref):
    """Fused conv3x3(pad=1)+bias+ReLU+maxpool2x2+FC for one BT-image tile.

    w_ref   : (OUT_CH, 9)                 SMEM conv weights (scalar reads)
    b_ref   : (OUT_CH,)                   SMEM conv bias
    fcw_ref : (HP, N_PAD, OUT_CH*HP_PAD)  VMEM FC weights, permuted per row-pair
    fcb_ref : (N_PAD, BT)                 VMEM FC bias (accumulator init)
    x_ref   : (H+2, 2, HP+1, BT)          VMEM padded images, even/odd column planes
    o_ref   : (N_PAD, BT)                 VMEM logits, batch on lanes
    slab_ref: (OUT_CH*HP_PAD, BT)         VMEM pooled slab for one row-pair
    """
    # Zero once so the HP -> HP_PAD pad rows contribute exactly 0 to the matmul.
    slab_ref[...] = jnp.zeros_like(slab_ref)

    def row_pair(p, acc):
        row0 = 2 * p
        # taps[r][s][j, b] = x_pad[row0 + r, s + 2*j, b], shape (HP, BT).
        # Parity s%2 / offset s//2 are static -> contiguous sublane slices.
        taps = [[x_ref[row0 + r, s % 2, pl.ds(s // 2, HP), :]
                 for s in range(K + 1)]
                for r in range(K + 1)]

        for c in range(OUT_CH):            # unrolled: taps stay register-resident
            w = [w_ref[c, t] for t in range(K * K)]

            def conv(ro, so):
                # conv output at (out_row = row0+ro, out_col = 2j+so), j = 0..HP-1
                a = w[0] * taps[ro][so]
                for dh in range(K):
                    for dw in range(K):
                        if dh == 0 and dw == 0:
                            continue
                        a = a + w[dh * K + dw] * taps[ro + dh][so + dw]
                return a

            # 2x2 max over the four (row, column-phase) conv outputs, then
            # bias + ReLU (bias is shared, so it commutes with the max).
            m = jnp.maximum(jnp.maximum(conv(0, 0), conv(0, 1)),
                            jnp.maximum(conv(1, 0), conv(1, 1)))
            slab_ref[pl.ds(c * HP_PAD, HP), :] = jnp.maximum(m + b_ref[c], 0.0)

        # Fused FC contribution of this pooled row-pair on the MXU:
        # (N_PAD, OUT_CH*HP_PAD) @ (OUT_CH*HP_PAD, BT); features never leave VMEM.
        return acc + jnp.dot(fcw_ref[p], slab_ref[...],
                             preferred_element_type=jnp.float32,
                             precision=_HIGHEST)

    o_ref[...] = jax.lax.fori_loop(0, HP, row_pair, fcb_ref[...])


@jax.jit
def cnn_classifier_forward(x, conv_w, conv_b, fc_w, fc_b):
    """x: (B, 1, H, W) float32 NCHW -> logits (B, NUM_CLASSES)."""
    B = x.shape[0]
    B_pad = ((B + BT - 1) // BT) * BT
    nb = B_pad // BT
    f32 = jnp.float32

    w9 = conv_w.reshape(OUT_CH, K * K).astype(f32)                   # (16, 9)

    # Pad (conv padding=1) and split columns into even/odd planes, batch on lanes.
    xb = jnp.pad(x[:, 0].astype(f32), ((0, B_pad - B), (1, 1), (1, 1)))  # (B_pad,30,30)
    x_t = jnp.transpose(xb.reshape(B_pad, H + 2, HP + 1, 2), (1, 3, 2, 0))  # (30,2,15,B_pad)

    # FC weights: pad classes 10->16, permute to per-row-pair slabs, pad each
    # channel's 14 pooled columns to 16 (matches the slab layout in the kernel).
    w_fc = jnp.zeros((N_PAD, FC_IN), f32).at[:NUM_CLASSES].set(fc_w.astype(f32))
    fcw = jnp.pad(
        w_fc.reshape(N_PAD, OUT_CH, HP, HP).transpose(2, 0, 1, 3),   # (HP,N_PAD,OUT_CH,HP)
        ((0, 0), (0, 0), (0, 0), (0, HP_PAD - HP)),
    ).reshape(HP, N_PAD, OUT_CH * HP_PAD)                            # (14, 16, 256)

    b_fc = jnp.zeros((N_PAD,), f32).at[:NUM_CLASSES].set(fc_b.astype(f32))
    fcb = jnp.broadcast_to(b_fc[:, None], (N_PAD, BT))               # accumulator init

    logits_t = pl.pallas_call(
        _fused_cnn_kernel,
        out_shape=jax.ShapeDtypeStruct((N_PAD, B_pad), f32),
        grid=(nb,),
        in_specs=[
            pl.BlockSpec(memory_space=pltpu.MemorySpace.SMEM),        # conv weights
            pl.BlockSpec(memory_space=pltpu.MemorySpace.SMEM),        # conv bias
            pl.BlockSpec((HP, N_PAD, OUT_CH * HP_PAD),
                         lambda b: (0, 0, 0)),                        # FC w (resident)
            pl.BlockSpec((N_PAD, BT), lambda b: (0, 0)),              # FC bias (resident)
            pl.BlockSpec((H + 2, 2, HP + 1, BT), lambda b: (0, 0, 0, b)),  # images
        ],
        out_specs=pl.BlockSpec((N_PAD, BT), lambda b: (0, b)),
        scratch_shapes=[pltpu.VMEM((OUT_CH * HP_PAD, BT), f32)],      # pooled slab
        compiler_params=pltpu.CompilerParams(
            dimension_semantics=("parallel",)),
    )(w9, conv_b.astype(f32), fcw, fcb, x_t)

    return logits_t[:NUM_CLASSES, :B].T                               # (B, 10)


def reference_forward(x, conv_w, conv_b, fc_w, fc_b):
    """Pure-JAX reference matching the PyTorch forward."""
    y = jax.lax.conv_general_dilated(
        x, conv_w, window_strides=(1, 1), padding="SAME",
        dimension_numbers=("NCHW", "OIHW", "NCHW"), precision=_HIGHEST)
    y = y + conv_b.reshape(1, OUT_CH, 1, 1)
    y = jnp.maximum(y, 0.0)
    y = jax.lax.reduce_window(y, -jnp.inf, jax.lax.max,
                              (1, 1, 2, 2), (1, 1, 2, 2), "VALID")
    y = y.reshape(x.shape[0], -1)
    return jnp.dot(y, fc_w.T, precision=_HIGHEST) + fc_b


if __name__ == "__main__":
    key = jax.random.PRNGKey(0)
    kx, kw1, kb1, kw2, kb2 = jax.random.split(key, 5)

    batch = 2
    x = jax.random.normal(kx, (batch, IN_CH, IMAGE_SIZE, IMAGE_SIZE), jnp.float32)

    # Deterministic synthetic parameters (shapes match nn.Module __init__).
    conv_w = 0.1 * jax.random.normal(kw1, (OUT_CH, IN_CH, K, K), jnp.float32)
    conv_b = 0.1 * jax.random.normal(kb1, (OUT_CH,), jnp.float32)
    fc_w = 0.05 * jax.random.normal(kw2, (NUM_CLASSES, FC_IN), jnp.float32)
    fc_b = 0.05 * jax.random.normal(kb2, (NUM_CLASSES,), jnp.float32)

    logits = cnn_classifier_forward(x, conv_w, conv_b, fc_w, fc_b)
    logits = jax.block_until_ready(logits)

    ref = reference_forward(x, conv_w, conv_b, fc_w, fc_b)
    assert logits.shape == (batch, NUM_CLASSES)
    assert jnp.allclose(logits, ref, atol=1e-3, rtol=1e-3), (logits, ref)

    print("KERNEL_OK")
</pallas_src>

<mosaic_0001>
module attributes {stable_mosaic.version = 11 : i64} {
  func.func @_fused_cnn_kernel(%arg0: i32, %arg1: memref<16x9xf32, #tpu.memory_space<smem>>, %arg2: memref<16xf32, #tpu.memory_space<smem>>, %arg3: memref<14x16x256xf32, #tpu.memory_space<vmem>>, %arg4: memref<16x128xf32, #tpu.memory_space<vmem>>, %arg5: memref<30x2x15x128xf32, #tpu.memory_space<vmem>>, %arg6: memref<16x128xf32, #tpu.memory_space<vmem>>, %arg7: memref<256x128xf32, #tpu.memory_space<vmem>>) attributes {dimension_semantics = [#tpu.dimension_semantics<parallel>], iteration_bounds = array<i64: 1>, scalar_prefetch = 0 : i64, scratch_operands = 1 : i64, tpu.core_type = #tpu.core_type<tc>, window_params = [{transform_indices = @transform_0, window_bounds = array<i64: 16, 9>}, {transform_indices = @transform_1, window_bounds = array<i64: 16>}, {pipeline_mode = #tpu.pipeline_mode<synchronous>, transform_indices = @transform_2, window_bounds = array<i64: 14, 16, 256>}, {pipeline_mode = #tpu.pipeline_mode<synchronous>, transform_indices = @transform_3, window_bounds = array<i64: 16, 128>}, {transform_indices = @transform_4, window_bounds = array<i64: 30, 2, 15, 128>}, {transform_indices = @transform_5, window_bounds = array<i64: 16, 128>}]} {
    %cst = arith.constant 0.000000e+00 : f32
    %0 = vector.broadcast %cst : f32 to vector<256x128xf32>
    %c0 = arith.constant 0 : index
    %c0_0 = arith.constant 0 : index
    %1 = vector.load %arg7[%c0, %c0_0] : memref<256x128xf32, #tpu.memory_space<vmem>>, vector<256x128xf32>
    tpu.vector_store %arg7[%c0, %c0_0], %0 {strides = array<i32>} : memref<256x128xf32, #tpu.memory_space<vmem>>, vector<256x128xf32>,
    %c0_1 = arith.constant 0 : index
    %c0_2 = arith.constant 0 : index
    %2 = vector.load %arg4[%c0_1, %c0_2] : memref<16x128xf32, #tpu.memory_space<vmem>>, vector<16x128xf32>
    %c0_i32 = arith.constant 0 : i32
    %c14_i32 = arith.constant 14 : i32
    %3 = arith.addi %c0_i32, %c14_i32 : i32
    %c1_i32 = arith.constant 1 : i32
    %4 = scf.for %arg8 = %c0_i32 to %3 step %c1_i32 iter_args(%arg9 = %2) -> (vector<16x128xf32>)  : i32 {
      %c2_i32 = arith.constant 2 : i32
      %6 = arith.muli %c2_i32, %arg8 : i32
      %c0_i32_6 = arith.constant 0 : i32
      %7 = arith.addi %6, %c0_i32_6 : i32
      %8 = arith.index_cast %7 : i32 to index
      %c0_7 = arith.constant 0 : index
      %c0_8 = arith.constant 0 : index
      %c0_9 = arith.constant 0 : index
      %9 = vector.load %arg5[%8, %c0_7, %c0_8, %c0_9] : memref<30x2x15x128xf32, #tpu.memory_space<vmem>>, vector<1x1x14x128xf32>
      %10 = vector.shape_cast %9 : vector<1x1x14x128xf32> to vector<14x128xf32>
      %c0_i32_10 = arith.constant 0 : i32
      %11 = arith.addi %6, %c0_i32_10 : i32
      %12 = arith.index_cast %11 : i32 to index
      %c1 = arith.constant 1 : index
      %c0_11 = arith.constant 0 : index
      %c0_12 = arith.constant 0 : index
      %13 = vector.load %arg5[%12, %c1, %c0_11, %c0_12] : memref<30x2x15x128xf32, #tpu.memory_space<vmem>>, vector<1x1x14x128xf32>
      %14 = vector.shape_cast %13 : vector<1x1x14x128xf32> to vector<14x128xf32>
      %c0_i32_13 = arith.constant 0 : i32
      %15 = arith.addi %6, %c0_i32_13 : i32
      %16 = arith.index_cast %15 : i32 to index
      %c0_14 = arith.constant 0 : index
      %c1_15 = arith.constant 1 : index
      %c0_16 = arith.constant 0 : index
      %17 = vector.load %arg5[%16, %c0_14, %c1_15, %c0_16] : memref<30x2x15x128xf32, #tpu.memory_space<vmem>>, vector<1x1x14x128xf32>
      %18 = vector.shape_cast %17 : vector<1x1x14x128xf32> to vector<14x128xf32>
      %c0_i32_17 = arith.constant 0 : i32
      %19 = arith.addi %6, %c0_i32_17 : i32
      %20 = arith.index_cast %19 : i32 to index
      %c1_18 = arith.constant 1 : index
      %c1_19 = arith.constant 1 : index
      %c0_20 = arith.constant 0 : index
      %21 = vector.load %arg5[%20, %c1_18, %c1_19, %c0_20] : memref<30x2x15x128xf32, #tpu.memory_space<vmem>>, vector<1x1x14x128xf32>
      %22 = vector.shape_cast %21 : vector<1x1x14x128xf32> to vector<14x128xf32>
      %c1_i32_21 = arith.constant 1 : i32
      %23 = arith.addi %6, %c1_i32_21 : i32
      %24 = arith.index_cast %23 : i32 to index
      %c0_22 = arith.constant 0 : index
      %c0_23 = arith.constant 0 : index
      %c0_24 = arith.constant 0 : index
      %25 = vector.load %arg5[%24, %c0_22, %c0_23, %c0_24] : memref<30x2x15x128xf32, #tpu.memory_space<vmem>>, vector<1x1x14x128xf32>
      %26 = vector.shape_cast %25 : vector<1x1x14x128xf32> to vector<14x128xf32>
      %c1_i32_25 = arith.constant 1 : i32
      %27 = arith.addi %6, %c1_i32_25 : i32
      %28 = arith.index_cast %27 : i32 to index
      %c1_26 = arith.constant 1 : index
      %c0_27 = arith.constant 0 : index
      %c0_28 = arith.constant 0 : index
      %29 = vector.load %arg5[%28, %c1_26, %c0_27, %c0_28] : memref<30x2x15x128xf32, #tpu.memory_space<vmem>>, vector<1x1x14x128xf32>
      %30 = vector.shape_cast %29 : vector<1x1x14x128xf32> to vector<14x128xf32>
      %c1_i32_29 = arith.constant 1 : i32
      %31 = arith.addi %6, %c1_i32_29 : i32
      %32 = arith.index_cast %31 : i32 to index
      %c0_30 = arith.constant 0 : index
      %c1_31 = arith.constant 1 : index
      %c0_32 = arith.constant 0 : index
      %33 = vector.load %arg5[%32, %c0_30, %c1_31, %c0_32] : memref<30x2x15x128xf32, #tpu.memory_space<vmem>>, vector<1x1x14x128xf32>
      %34 = vector.shape_cast %33 : vector<1x1x14x128xf32> to vector<14x128xf32>
      %c1_i32_33 = arith.constant 1 : i32
      %35 = arith.addi %6, %c1_i32_33 : i32
      %36 = arith.index_cast %35 : i32 to index
      %c1_34 = arith.constant 1 : index
      %c1_35 = arith.constant 1 : index
      %c0_36 = arith.constant 0 : index
      %37 = vector.load %arg5[%36, %c1_34, %c1_35, %c0_36] : memref<30x2x15x128xf32, #tpu.memory_space<vmem>>, vector<1x1x14x128xf32>
      %38 = vector.shape_cast %37 : vector<1x1x14x128xf32> to vector<14x128xf32>
      %c2_i32_37 = arith.constant 2 : i32
      %39 = arith.addi %6, %c2_i32_37 : i32
      %40 = arith.index_cast %39 : i32 to index
      %c0_38 = arith.constant 0 : index
      %c0_39 = arith.constant 0 : index
      %c0_40 = arith.constant 0 : index
      %41 = vector.load %arg5[%40, %c0_38, %c0_39, %c0_40] : memref<30x2x15x128xf32, #tpu.memory_space<vmem>>, vector<1x1x14x128xf32>
      %42 = vector.shape_cast %41 : vector<1x1x14x128xf32> to vector<14x128xf32>
      %c2_i32_41 = arith.constant 2 : i32
      %43 = arith.addi %6, %c2_i32_41 : i32
      %44 = arith.index_cast %43 : i32 to index
      %c1_42 = arith.constant 1 : index
      %c0_43 = arith.constant 0 : index
      %c0_44 = arith.constant 0 : index
      %45 = vector.load %arg5[%44, %c1_42, %c0_43, %c0_44] : memref<30x2x15x128xf32, #tpu.memory_space<vmem>>, vector<1x1x14x128xf32>
      %46 = vector.shape_cast %45 : vector<1x1x14x128xf32> to vector<14x128xf32>
      %c2_i32_45 = arith.constant 2 : i32
      %47 = arith.addi %6, %c2_i32_45 : i32
      %48 = arith.index_cast %47 : i32 to index
      %c0_46 = arith.constant 0 : index
      %c1_47 = arith.constant 1 : index
      %c0_48 = arith.constant 0 : index
      %49 = vector.load %arg5[%48, %c0_46, %c1_47, %c0_48] : memref<30x2x15x128xf32, #tpu.memory_space<vmem>>, vector<1x1x14x128xf32>
      %50 = vector.shape_cast %49 : vector<1x1x14x128xf32> to vector<14x128xf32>
      %c2_i32_49 = arith.constant 2 : i32
      %51 = arith.addi %6, %c2_i32_49 : i32
      %52 = arith.index_cast %51 : i32 to index
      %c1_50 = arith.constant 1 : index
      %c1_51 = arith.constant 1 : index
      %c0_52 = arith.constant 0 : index
      %53 = vector.load %arg5[%52, %c1_50, %c1_51, %c0_52] : memref<30x2x15x128xf32, #tpu.memory_space<vmem>>, vector<1x1x14x128xf32>
      %54 = vector.shape_cast %53 : vector<1x1x14x128xf32> to vector<14x128xf32>
      %c3_i32 = arith.constant 3 : i32
      %55 = arith.addi %6, %c3_i32 : i32
      %56 = arith.index_cast %55 : i32 to index
      %c0_53 = arith.constant 0 : index
      %c0_54 = arith.constant 0 : index
      %c0_55 = arith.constant 0 : index
      %57 = vector.load %arg5[%56, %c0_53, %c0_54, %c0_55] : memref<30x2x15x128xf32, #tpu.memory_space<vmem>>, vector<1x1x14x128xf32>
      %58 = vector.shape_cast %57 : vector<1x1x14x128xf32> to vector<14x128xf32>
      %c3_i32_56 = arith.constant 3 : i32
      %59 = arith.addi %6, %c3_i32_56 : i32
      %60 = arith.index_cast %59 : i32 to index
      %c1_57 = arith.constant 1 : index
      %c0_58 = arith.constant 0 : index
      %c0_59 = arith.constant 0 : index
      %61 = vector.load %arg5[%60, %c1_57, %c0_58, %c0_59] : memref<30x2x15x128xf32, #tpu.memory_space<vmem>>, vector<1x1x14x128xf32>
      %62 = vector.shape_cast %61 : vector<1x1x14x128xf32> to vector<14x128xf32>
      %c3_i32_60 = arith.constant 3 : i32
      %63 = arith.addi %6, %c3_i32_60 : i32
      %64 = arith.index_cast %63 : i32 to index
      %c0_61 = arith.constant 0 : index
      %c1_62 = arith.constant 1 : index
      %c0_63 = arith.constant 0 : index
      %65 = vector.load %arg5[%64, %c0_61, %c1_62, %c0_63] : memref<30x2x15x128xf32, #tpu.memory_space<vmem>>, vector<1x1x14x128xf32>
      %66 = vector.shape_cast %65 : vector<1x1x14x128xf32> to vector<14x128xf32>
      %c3_i32_64 = arith.constant 3 : i32
      %67 = arith.addi %6, %c3_i32_64 : i32
      %68 = arith.index_cast %67 : i32 to index
      %c1_65 = arith.constant 1 : index
      %c1_66 = arith.constant 1 : index
      %c0_67 = arith.constant 0 : index
      %69 = vector.load %arg5[%68, %c1_65, %c1_66, %c0_67] : memref<30x2x15x128xf32, #tpu.memory_space<vmem>>, vector<1x1x14x128xf32>
      %70 = vector.shape_cast %69 : vector<1x1x14x128xf32> to vector<14x128xf32>
      %c0_68 = arith.constant 0 : index
      %c0_69 = arith.constant 0 : index
      %71 = memref.load %arg1[%c0_68, %c0_69] : memref<16x9xf32, #tpu.memory_space<smem>>
      %c0_70 = arith.constant 0 : index
      %c1_71 = arith.constant 1 : index
      %72 = memref.load %arg1[%c0_70, %c1_71] : memref<16x9xf32, #tpu.memory_space<smem>>
      %c0_72 = arith.constant 0 : index
      %c2 = arith.constant 2 : index
      %73 = memref.load %arg1[%c0_72, %c2] : memref<16x9xf32, #tpu.memory_space<smem>>
      %c0_73 = arith.constant 0 : index
      %c3 = arith.constant 3 : index
      %74 = memref.load %arg1[%c0_73, %c3] : memref<16x9xf32, #tpu.memory_space<smem>>
      %c0_74 = arith.constant 0 : index
      %c4 = arith.constant 4 : index
      %75 = memref.load %arg1[%c0_74, %c4] : memref<16x9xf32, #tpu.memory_space<smem>>
      %c0_75 = arith.constant 0 : index
      %c5 = arith.constant 5 : index
      %76 = memref.load %arg1[%c0_75, %c5] : memref<16x9xf32, #tpu.memory_space<smem>>
      %c0_76 = arith.constant 0 : index
      %c6 = arith.constant 6 : index
      %77 = memref.load %arg1[%c0_76, %c6] : memref<16x9xf32, #tpu.memory_space<smem>>
      %c0_77 = arith.constant 0 : index
      %c7 = arith.constant 7 : index
      %78 = memref.load %arg1[%c0_77, %c7] : memref<16x9xf32, #tpu.memory_space<smem>>
      %c0_78 = arith.constant 0 : index
      %c8 = arith.constant 8 : index
      %79 = memref.load %arg1[%c0_78, %c8] : memref<16x9xf32, #tpu.memory_space<smem>>
      %80 = vector.broadcast %71 : f32 to vector<14x128xf32>
      %81 = arith.mulf %80, %10 : vector<14x128xf32>
      %82 = vector.broadcast %72 : f32 to vector<14x128xf32>
      %83 = arith.mulf %82, %14 : vector<14x128xf32>
      %84 = arith.addf %81, %83 : vector<14x128xf32>
      %85 = vector.broadcast %73 : f32 to vector<14x128xf32>
      %86 = arith.mulf %85, %18 : vector<14x128xf32>
      %87 = arith.addf %84, %86 : vector<14x128xf32>
      %88 = vector.broadcast %74 : f32 to vector<14x128xf32>
      %89 = arith.mulf %88, %26 : vector<14x128xf32>
      %90 = arith.addf %87, %89 : vector<14x128xf32>
      %91 = vector.broadcast %75 : f32 to vector<14x128xf32>
      %92 = arith.mulf %91, %30 : vector<14x128xf32>
      %93 = arith.addf %90, %92 : vector<14x128xf32>
      %94 = vector.broadcast %76 : f32 to vector<14x128xf32>
      %95 = arith.mulf %94, %34 : vector<14x128xf32>
      %96 = arith.addf %93, %95 : vector<14x128xf32>
      %97 = vector.broadcast %77 : f32 to vector<14x128xf32>
      %98 = arith.mulf %97, %42 : vector<14x128xf32>
      %99 = arith.addf %96, %98 : vector<14x128xf32>
      %100 = vector.broadcast %78 : f32 to vector<14x128xf32>
      %101 = arith.mulf %100, %46 : vector<14x128xf32>
      %102 = arith.addf %99, %101 : vector<14x128xf32>
      %103 = vector.broadcast %79 : f32 to vector<14x128xf32>
      %104 = arith.mulf %103, %50 : vector<14x128xf32>
      %105 = arith.addf %102, %104 : vector<14x128xf32>
      %106 = vector.broadcast %71 : f32 to vector<14x128xf32>
      %107 = arith.mulf %106, %14 : vector<14x128xf32>
      %108 = vector.broadcast %72 : f32 to vector<14x128xf32>
      %109 = arith.mulf %108, %18 : vector<14x128xf32>
      %110 = arith.addf %107, %109 : vector<14x128xf32>
      %111 = vector.broadcast %73 : f32 to vector<14x128xf32>
      %112 = arith.mulf %111, %22 : vector<14x128xf32>
      %113 = arith.addf %110, %112 : vector<14x128xf32>
      %114 = vector.broadcast %74 : f32 to vector<14x128xf32>
      %115 = arith.mulf %114, %30 : vector<14x128xf32>
      %116 = arith.addf %113, %115 : vector<14x128xf32>
      %117 = vector.broadcast %75 : f32 to vector<14x128xf32>
      %118 = arith.mulf %117, %34 : vector<14x128xf32>
      %119 = arith.addf %116, %118 : vector<14x128xf32>
      %120 = vector.broadcast %76 : f32 to vector<14x128xf32>
      %121 = arith.mulf %120, %38 : vector<14x128xf32>
      %122 = arith.addf %119, %121 : vector<14x128xf32>
      %123 = vector.broadcast %77 : f32 to vector<14x128xf32>
      %124 = arith.mulf %123, %46 : vector<14x128xf32>
      %125 = arith.addf %122, %124 : vector<14x128xf32>
      %126 = vector.broadcast %78 : f32 to vector<14x128xf32>
      %127 = arith.mulf %126, %50 : vector<14x128xf32>
      %128 = arith.addf %125, %127 : vector<14x128xf32>
      %129 = vector.broadcast %79 : f32 to vector<14x128xf32>
      %130 = arith.mulf %129, %54 : vector<14x128xf32>
      %131 = arith.addf %128, %130 : vector<14x128xf32>
      %132 = arith.maximumf %105, %131 : vector<14x128xf32>
      %133 = vector.broadcast %71 : f32 to vector<14x128xf32>
      %134 = arith.mulf %133, %26 : vector<14x128xf32>
      %135 = vector.broadcast %72 : f32 to vector<14x128xf32>
      %136 = arith.mulf %135, %30 : vector<14x128xf32>
      %137 = arith.addf %134, %136 : vector<14x128xf32>
      %138 = vector.broadcast %73 : f32 to vector<14x128xf32>
      %139 = arith.mulf %138, %34 : vector<14x128xf32>
      %140 = arith.addf %137, %139 : vector<14x128xf32>
      %141 = vector.broadcast %74 : f32 to vector<14x128xf32>
      %142 = arith.mulf %141, %42 : vector<14x128xf32>
      %143 = arith.addf %140, %142 : vector<14x128xf32>
      %144 = vector.broadcast %75 : f32 to vector<14x128xf32>
      %145 = arith.mulf %144, %46 : vector<14x128xf32>
      %146 = arith.addf %143, %145 : vector<14x128xf32>
      %147 = vector.broadcast %76 : f32 to vector<14x128xf32>
      %148 = arith.mulf %147, %50 : vector<14x128xf32>
      %149 = arith.addf %146, %148 : vector<14x128xf32>
      %150 = vector.broadcast %77 : f32 to vector<14x128xf32>
      %151 = arith.mulf %150, %58 : vector<14x128xf32>
      %152 = arith.addf %149, %151 : vector<14x128xf32>
      %153 = vector.broadcast %78 : f32 to vector<14x128xf32>
      %154 = arith.mulf %153, %62 : vector<14x128xf32>
      %155 = arith.addf %152, %154 : vector<14x128xf32>
      %156 = vector.broadcast %79 : f32 to vector<14x128xf32>
      %157 = arith.mulf %156, %66 : vector<14x128xf32>
      %158 = arith.addf %155, %157 : vector<14x128xf32>
      %159 = vector.broadcast %71 : f32 to vector<14x128xf32>
      %160 = arith.mulf %159, %30 : vector<14x128xf32>
      %161 = vector.broadcast %72 : f32 to vector<14x128xf32>
      %162 = arith.mulf %161, %34 : vector<14x128xf32>
      %163 = arith.addf %160, %162 : vector<14x128xf32>
      %164 = vector.broadcast %73 : f32 to vector<14x128xf32>
      %165 = arith.mulf %164, %38 : vector<14x128xf32>
      %166 = arith.addf %163, %165 : vector<14x128xf32>
      %167 = vector.broadcast %74 : f32 to vector<14x128xf32>
      %168 = arith.mulf %167, %46 : vector<14x128xf32>
      %169 = arith.addf %166, %168 : vector<14x128xf32>
      %170 = vector.broadcast %75 : f32 to vector<14x128xf32>
      %171 = arith.mulf %170, %50 : vector<14x128xf32>
      %172 = arith.addf %169, %171 : vector<14x128xf32>
      %173 = vector.broadcast %76 : f32 to vector<14x128xf32>
      %174 = arith.mulf %173, %54 : vector<14x128xf32>
      %175 = arith.addf %172, %174 : vector<14x128xf32>
      %176 = vector.broadcast %77 : f32 to vector<14x128xf32>
      %177 = arith.mulf %176, %62 : vector<14x128xf32>
      %178 = arith.addf %175, %177 : vector<14x128xf32>
      %179 = vector.broadcast %78 : f32 to vector<14x128xf32>
      %180 = arith.mulf %179, %66 : vector<14x128xf32>
      %181 = arith.addf %178, %180 : vector<14x128xf32>
      %182 = vector.broadcast %79 : f32 to vector<14x128xf32>
      %183 = arith.mulf %182, %70 : vector<14x128xf32>
      %184 = arith.addf %181, %183 : vector<14x128xf32>
      %185 = arith.maximumf %158, %184 : vector<14x128xf32>
      %186 = arith.maximumf %132, %185 : vector<14x128xf32>
      %c0_79 = arith.constant 0 : index
      %187 = memref.load %arg2[%c0_79] : memref<16xf32, #tpu.memory_space<smem>>
      %188 = vector.broadcast %187 : f32 to vector<14x128xf32>
      %189 = arith.addf %186, %188 : vector<14x128xf32>
      %cst_80 = arith.constant 0.000000e+00 : f32
      %190 = vector.broadcast %cst_80 : f32 to vector<14x128xf32>
      %191 = arith.maximumf %189, %190 : vector<14x128xf32>
      %c0_81 = arith.constant 0 : index
      %c0_82 = arith.constant 0 : index
      %192 = vector.load %arg7[%c0_81, %c0_82] : memref<256x128xf32, #tpu.memory_space<vmem>>, vector<14x128xf32>
      tpu.vector_store %arg7[%c0_81, %c0_82], %191 {strides = array<i32>} : memref<256x128xf32, #tpu.memory_space<vmem>>, vector<14x128xf32>,
      %c1_83 = arith.constant 1 : index
      %c0_84 = arith.constant 0 : index
      %193 = memref.load %arg1[%c1_83, %c0_84] : memref<16x9xf32, #tpu.memory_space<smem>>
      %c1_85 = arith.constant 1 : index
      %c1_86 = arith.constant 1 : index
      %194 = memref.load %arg1[%c1_85, %c1_86] : memref<16x9xf32, #tpu.memory_space<smem>>
      %c1_87 = arith.constant 1 : index
      %c2_88 = arith.constant 2 : index
      %195 = memref.load %arg1[%c1_87, %c2_88] : memref<16x9xf32, #tpu.memory_space<smem>>
      %c1_89 = arith.constant 1 : index
      %c3_90 = arith.constant 3 : index
      %196 = memref.load %arg1[%c1_89, %c3_90] : memref<16x9xf32, #tpu.memory_space<smem>>
      %c1_91 = arith.constant 1 : index
      %c4_92 = arith.constant 4 : index
      %197 = memref.load %arg1[%c1_91, %c4_92] : memref<16x9xf32, #tpu.memory_space<smem>>
      %c1_93 = arith.constant 1 : index
      %c5_94 = arith.constant 5 : index
      %198 = memref.load %arg1[%c1_93, %c5_94] : memref<16x9xf32, #tpu.memory_space<smem>>
      %c1_95 = arith.constant 1 : index
      %c6_96 = arith.constant 6 : index
      %199 = memref.load %arg1[%c1_95, %c6_96] : memref<16x9xf32, #tpu.memory_space<smem>>
      %c1_97 = arith.constant 1 : index
      %c7_98 = arith.constant 7 : index
      %200 = memref.load %arg1[%c1_97, %c7_98] : memref<16x9xf32, #tpu.memory_space<smem>>
      %c1_99 = arith.constant 1 : index
      %c8_100 = arith.constant 8 : index
      %201 = memref.load %arg1[%c1_99, %c8_100] : memref<16x9xf32, #tpu.memory_space<smem>>
      %202 = vector.broadcast %193 : f32 to vector<14x128xf32>
      %203 = arith.mulf %202, %10 : vector<14x128xf32>
      %204 = vector.broadcast %194 : f32 to vector<14x128xf32>
      %205 = arith.mulf %204, %14 : vector<14x128xf32>
      %206 = arith.addf %203, %205 : vector<14x128xf32>
      %207 = vector.broadcast %195 : f32 to vector<14x128xf32>
      %208 = arith.mulf %207, %18 : vector<14x128xf32>
      %209 = arith.addf %206, %208 : vector<14x128xf32>
      %210 = vector.broadcast %196 : f32 to vector<14x128xf32>
      %211 = arith.mulf %210, %26 : vector<14x128xf32>
      %212 = arith.addf %209, %211 : vector<14x128xf32>
      %213 = vector.broadcast %197 : f32 to vector<14x128xf32>
      %214 = arith.mulf %213, %30 : vector<14x128xf32>
      %215 = arith.addf %212, %214 : vector<14x128xf32>
      %216 = vector.broadcast %198 : f32 to vector<14x128xf32>
      %217 = arith.mulf %216, %34 : vector<14x128xf32>
      %218 = arith.addf %215, %217 : vector<14x128xf32>
      %219 = vector.broadcast %199 : f32 to vector<14x128xf32>
      %220 = arith.mulf %219, %42 : vector<14x128xf32>
      %221 = arith.addf %218, %220 : vector<14x128xf32>
      %222 = vector.broadcast %200 : f32 to vector<14x128xf32>
      %223 = arith.mulf %222, %46 : vector<14x128xf32>
      %224 = arith.addf %221, %223 : vector<14x128xf32>
      %225 = vector.broadcast %201 : f32 to vector<14x128xf32>
      %226 = arith.mulf %225, %50 : vector<14x128xf32>
      %227 = arith.addf %224, %226 : vector<14x128xf32>
      %228 = vector.broadcast %193 : f32 to vector<14x128xf32>
      %229 = arith.mulf %228, %14 : vector<14x128xf32>
      %230 = vector.broadcast %194 : f32 to vector<14x128xf32>
      %231 = arith.mulf %230, %18 : vector<14x128xf32>
      %232 = arith.addf %229, %231 : vector<14x128xf32>
      %233 = vector.broadcast %195 : f32 to vector<14x128xf32>
      %234 = arith.mulf %233, %22 : vector<14x128xf32>
      %235 = arith.addf %232, %234 : vector<14x128xf32>
      %236 = vector.broadcast %196 : f32 to vector<14x128xf32>
      %237 = arith.mulf %236, %30 : vector<14x128xf32>
      %238 = arith.addf %235, %237 : vector<14x128xf32>
      %239 = vector.broadcast %197 : f32 to vector<14x128xf32>
      %240 = arith.mulf %239, %34 : vector<14x128xf32>
      %241 = arith.addf %238, %240 : vector<14x128xf32>
      %242 = vector.broadcast %198 : f32 to vector<14x128xf32>
      %243 = arith.mulf %242, %38 : vector<14x128xf32>
      %244 = arith.addf %241, %243 : vector<14x128xf32>
      %245 = vector.broadcast %199 : f32 to vector<14x128xf32>
      %246 = arith.mulf %245, %46 : vector<14x128xf32>
      %247 = arith.addf %244, %246 : vector<14x128xf32>
      %248 = vector.broadcast %200 : f32 to vector<14x128xf32>
      %249 = arith.mulf %248, %50 : vector<14x128xf32>
      %250 = arith.addf %247, %249 : vector<14x128xf32>
      %251 = vector.broadcast %201 : f32 to vector<14x128xf32>
      %252 = arith.mulf %251, %54 : vector<14x128xf32>
      %253 = arith.addf %250, %252 : vector<14x128xf32>
      %254 = arith.maximumf %227, %253 : vector<14x128xf32>
      %255 = vector.broadcast %193 : f32 to vector<14x128xf32>
      %256 = arith.mulf %255, %26 : vector<14x128xf32>
      %257 = vector.broadcast %194 : f32 to vector<14x128xf32>
      %258 = arith.mulf %257, %30 : vector<14x128xf32>
      %259 = arith.addf %256, %258 : vector<14x128xf32>
      %260 = vector.broadcast %195 : f32 to vector<14x128xf32>
      %261 = arith.mulf %260, %34 : vector<14x128xf32>
      %262 = arith.addf %259, %261 : vector<14x128xf32>
      %263 = vector.broadcast %196 : f32 to vector<14x128xf32>
      %264 = arith.mulf %263, %42 : vector<14x128xf32>
      %265 = arith.addf %262, %264 : vector<14x128xf32>
      %266 = vector.broadcast %197 : f32 to vector<14x128xf32>
      %267 = arith.mulf %266, %46 : vector<14x128xf32>
      %268 = arith.addf %265, %267 : vector<14x128xf32>
      %269 = vector.broadcast %198 : f32 to vector<14x128xf32>
      %270 = arith.mulf %269, %50 : vector<14x128xf32>
      %271 = arith.addf %268, %270 : vector<14x128xf32>
      %272 = vector.broadcast %199 : f32 to vector<14x128xf32>
      %273 = arith.mulf %272, %58 : vector<14x128xf32>
      %274 = arith.addf %271, %273 : vector<14x128xf32>
      %275 = vector.broadcast %200 : f32 to vector<14x128xf32>
      %276 = arith.mulf %275, %62 : vector<14x128xf32>
      %277 = arith.addf %274, %276 : vector<14x128xf32>
      %278 = vector.broadcast %201 : f32 to vector<14x128xf32>
      %279 = arith.mulf %278, %66 : vector<14x128xf32>
      %280 = arith.addf %277, %279 : vector<14x128xf32>
      %281 = vector.broadcast %193 : f32 to vector<14x128xf32>
      %282 = arith.mulf %281, %30 : vector<14x128xf32>
      %283 = vector.broadcast %194 : f32 to vector<14x128xf32>
      %284 = arith.mulf %283, %34 : vector<14x128xf32>
      %285 = arith.addf %282, %284 : vector<14x128xf32>
      %286 = vector.broadcast %195 : f32 to vector<14x128xf32>
      %287 = arith.mulf %286, %38 : vector<14x128xf32>
      %288 = arith.addf %285, %287 : vector<14x128xf32>
      %289 = vector.broadcast %196 : f32 to vector<14x128xf32>
      %290 = arith.mulf %289, %46 : vector<14x128xf32>
      %291 = arith.addf %288, %290 : vector<14x128xf32>
      %292 = vector.broadcast %197 : f32 to vector<14x128xf32>
      %293 = arith.mulf %292, %50 : vector<14x128xf32>
      %294 = arith.addf %291, %293 : vector<14x128xf32>
      %295 = vector.broadcast %198 : f32 to vector<14x128xf32>
      %296 = arith.mulf %295, %54 : vector<14x128xf32>
      %297 = arith.addf %294, %296 : vector<14x128xf32>
      %298 = vector.broadcast %199 : f32 to vector<14x128xf32>
      %299 = arith.mulf %298, %62 : vector<14x128xf32>
      %300 = arith.addf %297, %299 : vector<14x128xf32>
      %301 = vector.broadcast %200 : f32 to vector<14x128xf32>
      %302 = arith.mulf %301, %66 : vector<14x128xf32>
      %303 = arith.addf %300, %302 : vector<14x128xf32>
      %304 = vector.broadcast %201 : f32 to vector<14x128xf32>
      %305 = arith.mulf %304, %70 : vector<14x128xf32>
      %306 = arith.addf %303, %305 : vector<14x128xf32>
      %307 = arith.maximumf %280, %306 : vector<14x128xf32>
      %308 = arith.maximumf %254, %307 : vector<14x128xf32>
      %c1_101 = arith.constant 1 : index
      %309 = memref.load %arg2[%c1_101] : memref<16xf32, #tpu.memory_space<smem>>
      %310 = vector.broadcast %309 : f32 to vector<14x128xf32>
      %311 = arith.addf %308, %310 : vector<14x128xf32>
      %cst_102 = arith.constant 0.000000e+00 : f32
      %312 = vector.broadcast %cst_102 : f32 to vector<14x128xf32>
      %313 = arith.maximumf %311, %312 : vector<14x128xf32>
      %c16 = arith.constant 16 : index
      %c0_103 = arith.constant 0 : index
      %314 = vector.load %arg7[%c16, %c0_103] : memref<256x128xf32, #tpu.memory_space<vmem>>, vector<14x128xf32>
      tpu.vector_store %arg7[%c16, %c0_103], %313 {strides = array<i32>} : memref<256x128xf32, #tpu.memory_space<vmem>>, vector<14x128xf32>,
      %c2_104 = arith.constant 2 : index
      %c0_105 = arith.constant 0 : index
      %315 = memref.load %arg1[%c2_104, %c0_105] : memref<16x9xf32, #tpu.memory_space<smem>>
      %c2_106 = arith.constant 2 : index
      %c1_107 = arith.constant 1 : index
      %316 = memref.load %arg1[%c2_106, %c1_107] : memref<16x9xf32, #tpu.memory_space<smem>>
      %c2_108 = arith.constant 2 : index
      %c2_109 = arith.constant 2 : index
      %317 = memref.load %arg1[%c2_108, %c2_109] : memref<16x9xf32, #tpu.memory_space<smem>>
      %c2_110 = arith.constant 2 : index
      %c3_111 = arith.constant 3 : index
      %318 = memref.load %arg1[%c2_110, %c3_111] : memref<16x9xf32, #tpu.memory_space<smem>>
      %c2_112 = arith.constant 2 : index
      %c4_113 = arith.constant 4 : index
      %319 = memref.load %arg1[%c2_112, %c4_113] : memref<16x9xf32, #tpu.memory_space<smem>>
      %c2_114 = arith.constant 2 : index
      %c5_115 = arith.constant 5 : index
      %320 = memref.load %arg1[%c2_114, %c5_115] : memref<16x9xf32, #tpu.memory_space<smem>>
      %c2_116 = arith.constant 2 : index
      %c6_117 = arith.constant 6 : index
      %321 = memref.load %arg1[%c2_116, %c6_117] : memref<16x9xf32, #tpu.memory_space<smem>>
      %c2_118 = arith.constant 2 : index
      %c7_119 = arith.constant 7 : index
      %322 = memref.load %arg1[%c2_118, %c7_119] : memref<16x9xf32, #tpu.memory_space<smem>>
      %c2_120 = arith.constant 2 : index
      %c8_121 = arith.constant 8 : index
      %323 = memref.load %arg1[%c2_120, %c8_121] : memref<16x9xf32, #tpu.memory_space<smem>>
      %324 = vector.broadcast %315 : f32 to vector<14x128xf32>
      %325 = arith.mulf %324, %10 : vector<14x128xf32>
      %326 = vector.broadcast %316 : f32 to vector<14x128xf32>
      %327 = arith.mulf %326, %14 : vector<14x128xf32>
      %328 = arith.addf %325, %327 : vector<14x128xf32>
      %329 = vector.broadcast %317 : f32 to vector<14x128xf32>
      %330 = arith.mulf %329, %18 : vector<14x128xf32>
      %331 = arith.addf %328, %330 : vector<14x128xf32>
      %332 = vector.broadcast %318 : f32 to vector<14x128xf32>
      %333 = arith.mulf %332, %26 : vector<14x128xf32>
      %334 = arith.addf %331, %333 : vector<14x128xf32>
      %335 = vector.broadcast %319 : f32 to vector<14x128xf32>
      %336 = arith.mulf %335, %30 : vector<14x128xf32>
      %337 = arith.addf %334, %336 : vector<14x128xf32>
      %338 = vector.broadcast %320 : f32 to vector<14x128xf32>
      %339 = arith.mulf %338, %34 : vector<14x128xf32>
      %340 = arith.addf %337, %339 : vector<14x128xf32>
      %341 = vector.broadcast %321 : f32 to vector<14x128xf32>
      %342 = arith.mulf %341, %42 : vector<14x128xf32>
      %343 = arith.addf %340, %342 : vector<14x128xf32>
      %344 = vector.broadcast %322 : f32 to vector<14x128xf32>
      %345 = arith.mulf %344, %46 : vector<14x128xf32>
      %346 = arith.addf %343, %345 : vector<14x128xf32>
      %347 = vector.broadcast %323 : f32 to vector<14x128xf32>
      %348 = arith.mulf %347, %50 : vector<14x128xf32>
      %349 = arith.addf %346, %348 : vector<14x128xf32>
      %350 = vector.broadcast %315 : f32 to vector<14x128xf32>
      %351 = arith.mulf %350, %14 : vector<14x128xf32>
      %352 = vector.broadcast %316 : f32 to vector<14x128xf32>
      %353 = arith.mulf %352, %18 : vector<14x128xf32>
      %354 = arith.addf %351, %353 : vector<14x128xf32>
      %355 = vector.broadcast %317 : f32 to vector<14x128xf32>
      %356 = arith.mulf %355, %22 : vector<14x128xf32>
      %357 = arith.addf %354, %356 : vector<14x128xf32>
      %358 = vector.broadcast %318 : f32 to vector<14x128xf32>
      %359 = arith.mulf %358, %30 : vector<14x128xf32>
      %360 = arith.addf %357, %359 : vector<14x128xf32>
      %361 = vector.broadcast %319 : f32 to vector<14x128xf32>
      %362 = arith.mulf %361, %34 : vector<14x128xf32>
      %363 = arith.addf %360, %362 : vector<14x128xf32>
      %364 = vector.broadcast %320 : f32 to vector<14x128xf32>
      %365 = arith.mulf %364, %38 : vector<14x128xf32>
      %366 = arith.addf %363, %365 : vector<14x128xf32>
      %367 = vector.broadcast %321 : f32 to vector<14x128xf32>
      %368 = arith.mulf %367, %46 : vector<14x128xf32>
      %369 = arith.addf %366, %368 : vector<14x128xf32>
      %370 = vector.broadcast %322 : f32 to vector<14x128xf32>
      %371 = arith.mulf %370, %50 : vector<14x128xf32>
      %372 = arith.addf %369, %371 : vector<14x128xf32>
      %373 = vector.broadcast %323 : f32 to vector<14x128xf32>
      %374 = arith.mulf %373, %54 : vector<14x128xf32>
      %375 = arith.addf %372, %374 : vector<14x128xf32>
      %376 = arith.maximumf %349, %375 : vector<14x128xf32>
      %377 = vector.broadcast %315 : f32 to vector<14x128xf32>
      %378 = arith.mulf %377, %26 : vector<14x128xf32>
      %379 = vector.broadcast %316 : f32 to vector<14x128xf32>
      %380 = arith.mulf %379, %30 : vector<14x128xf32>
      %381 = arith.addf %378, %380 : vector<14x128xf32>
      %382 = vector.broadcast %317 : f32 to vector<14x128xf32>
      %383 = arith.mulf %382, %34 : vector<14x128xf32>
      %384 = arith.addf %381, %383 : vector<14x128xf32>
      %385 = vector.broadcast %318 : f32 to vector<14x128xf32>
      %386 = arith.mulf %385, %42 : vector<14x128xf32>
      %387 = arith.addf %384, %386 : vector<14x128xf32>
      %388 = vector.broadcast %319 : f32 to vector<14x128xf32>
      %389 = arith.mulf %388, %46 : vector<14x128xf32>
      %390 = arith.addf %387, %389 : vector<14x128xf32>
      %391 = vector.broadcast %320 : f32 to vector<14x128xf32>
      %392 = arith.mulf %391, %50 : vector<14x128xf32>
      %393 = arith.addf %390, %392 : vector<14x128xf32>
      %394 = vector.broadcast %321 : f32 to vector<14x128xf32>
      %395 = arith.mulf %394, %58 : vector<14x128xf32>
      %396 = arith.addf %393, %395 : vector<14x128xf32>
      %397 = vector.broadcast %322 : f32 to vector<14x128xf32>
      %398 = arith.mulf %397, %62 : vector<14x128xf32>
      %399 = arith.addf %396, %398 : vector<14x128xf32>
      %400 = vector.broadcast %323 : f32 to vector<14x128xf32>
      %401 = arith.mulf %400, %66 : vector<14x128xf32>
      %402 = arith.addf %399, %401 : vector<14x128xf32>
      %403 = vector.broadcast %315 : f32 to vector<14x128xf32>
      %404 = arith.mulf %403, %30 : vector<14x128xf32>
      %405 = vector.broadcast %316 : f32 to vector<14x128xf32>
      %406 = arith.mulf %405, %34 : vector<14x128xf32>
      %407 = arith.addf %404, %406 : vector<14x128xf32>
      %408 = vector.broadcast %317 : f32 to vector<14x128xf32>
      %409 = arith.mulf %408, %38 : vector<14x128xf32>
      %410 = arith.addf %407, %409 : vector<14x128xf32>
      %411 = vector.broadcast %318 : f32 to vector<14x128xf32>
      %412 = arith.mulf %411, %46 : vector<14x128xf32>
      %413 = arith.addf %410, %412 : vector<14x128xf32>
      %414 = vector.broadcast %319 : f32 to vector<14x128xf32>
      %415 = arith.mulf %414, %50 : vector<14x128xf32>
      %416 = arith.addf %413, %415 : vector<14x128xf32>
      %417 = vector.broadcast %320 : f32 to vector<14x128xf32>
      %418 = arith.mulf %417, %54 : vector<14x128xf32>
      %419 = arith.addf %416, %418 : vector<14x128xf32>
      %420 = vector.broadcast %321 : f32 to vector<14x128xf32>
      %421 = arith.mulf %420, %62 : vector<14x128xf32>
      %422 = arith.addf %419, %421 : vector<14x128xf32>
      %423 = vector.broadcast %322 : f32 to vector<14x128xf32>
      %424 = arith.mulf %423, %66 : vector<14x128xf32>
      %425 = arith.addf %422, %424 : vector<14x128xf32>
      %426 = vector.broadcast %323 : f32 to vector<14x128xf32>
      %427 = arith.mulf %426, %70 : vector<14x128xf32>
      %428 = arith.addf %425, %427 : vector<14x128xf32>
      %429 = arith.maximumf %402, %428 : vector<14x128xf32>
      %430 = arith.maximumf %376, %429 : vector<14x128xf32>
      %c2_122 = arith.constant 2 : index
      %431 = memref.load %arg2[%c2_122] : memref<16xf32, #tpu.memory_space<smem>>
      %432 = vector.broadcast %431 : f32 to vector<14x128xf32>
      %433 = arith.addf %430, %432 : vector<14x128xf32>
      %cst_123 = arith.constant 0.000000e+00 : f32
      %434 = vector.broadcast %cst_123 : f32 to vector<14x128xf32>
      %435 = arith.maximumf %433, %434 : vector<14x128xf32>
      %c32 = arith.constant 32 : index
      %c0_124 = arith.constant 0 : index
      %436 = vector.load %arg7[%c32, %c0_124] : memref<256x128xf32, #tpu.memory_space<vmem>>, vector<14x128xf32>
      tpu.vector_store %arg7[%c32, %c0_124], %435 {strides = array<i32>} : memref<256x128xf32, #tpu.memory_space<vmem>>, vector<14x128xf32>,
      %c3_125 = arith.constant 3 : index
      %c0_126 = arith.constant 0 : index
      %437 = memref.load %arg1[%c3_125, %c0_126] : memref<16x9xf32, #tpu.memory_space<smem>>
      %c3_127 = arith.constant 3 : index
      %c1_128 = arith.constant 1 : index
      %438 = memref.load %arg1[%c3_127, %c1_128] : memref<16x9xf32, #tpu.memory_space<smem>>
      %c3_129 = arith.constant 3 : index
      %c2_130 = arith.constant 2 : index
      %439 = memref.load %arg1[%c3_129, %c2_130] : memref<16x9xf32, #tpu.memory_space<smem>>
      %c3_131 = arith.constant 3 : index
      %c3_132 = arith.constant 3 : index
      %440 = memref.load %arg1[%c3_131, %c3_132] : memref<16x9xf32, #tpu.memory_space<smem>>
      %c3_133 = arith.constant 3 : index
      %c4_134 = arith.constant 4 : index
      %441 = memref.load %arg1[%c3_133, %c4_134] : memref<16x9xf32, #tpu.memory_space<smem>>
      %c3_135 = arith.constant 3 : index
      %c5_136 = arith.constant 5 : index
      %442 = memref.load %arg1[%c3_135, %c5_136] : memref<16x9xf32, #tpu.memory_space<smem>>
      %c3_137 = arith.constant 3 : index
      %c6_138 = arith.constant 6 : index
      %443 = memref.load %arg1[%c3_137, %c6_138] : memref<16x9xf32, #tpu.memory_space<smem>>
      %c3_139 = arith.constant 3 : index
      %c7_140 = arith.constant 7 : index
      %444 = memref.load %arg1[%c3_139, %c7_140] : memref<16x9xf32, #tpu.memory_space<smem>>
      %c3_141 = arith.constant 3 : index
      %c8_142 = arith.constant 8 : index
      %445 = memref.load %arg1[%c3_141, %c8_142] : memref<16x9xf32, #tpu.memory_space<smem>>
      %446 = vector.broadcast %437 : f32 to vector<14x128xf32>
      %447 = arith.mulf %446, %10 : vector<14x128xf32>
      %448 = vector.broadcast %438 : f32 to vector<14x128xf32>
      %449 = arith.mulf %448, %14 : vector<14x128xf32>
      %450 = arith.addf %447, %449 : vector<14x128xf32>
      %451 = vector.broadcast %439 : f32 to vector<14x128xf32>
      %452 = arith.mulf %451, %18 : vector<14x128xf32>
      %453 = arith.addf %450, %452 : vector<14x128xf32>
      %454 = vector.broadcast %440 : f32 to vector<14x128xf32>
      %455 = arith.mulf %454, %26 : vector<14x128xf32>
      %456 = arith.addf %453, %455 : vector<14x128xf32>
      %457 = vector.broadcast %441 : f32 to vector<14x128xf32>
      %458 = arith.mulf %457, %30 : vector<14x128xf32>
      %459 = arith.addf %456, %458 : vector<14x128xf32>
      %460 = vector.broadcast %442 : f32 to vector<14x128xf32>
      %461 = arith.mulf %460, %34 : vector<14x128xf32>
      %462 = arith.addf %459, %461 : vector<14x128xf32>
      %463 = vector.broadcast %443 : f32 to vector<14x128xf32>
      %464 = arith.mulf %463, %42 : vector<14x128xf32>
      %465 = arith.addf %462, %464 : vector<14x128xf32>
      %466 = vector.broadcast %444 : f32 to vector<14x128xf32>
      %467 = arith.mulf %466, %46 : vector<14x128xf32>
      %468 = arith.addf %465, %467 : vector<14x128xf32>
      %469 = vector.broadcast %445 : f32 to vector<14x128xf32>
      %470 = arith.mulf %469, %50 : vector<14x128xf32>
      %471 = arith.addf %468, %470 : vector<14x128xf32>
      %472 = vector.broadcast %437 : f32 to vector<14x128xf32>
      %473 = arith.mulf %472, %14 : vector<14x128xf32>
      %474 = vector.broadcast %438 : f32 to vector<14x128xf32>
      %475 = arith.mulf %474, %18 : vector<14x128xf32>
      %476 = arith.addf %473, %475 : vector<14x128xf32>
      %477 = vector.broadcast %439 : f32 to vector<14x128xf32>
      %478 = arith.mulf %477, %22 : vector<14x128xf32>
      %479 = arith.addf %476, %478 : vector<14x128xf32>
      %480 = vector.broadcast %440 : f32 to vector<14x128xf32>
      %481 = arith.mulf %480, %30 : vector<14x128xf32>
      %482 = arith.addf %479, %481 : vector<14x128xf32>
      %483 = vector.broadcast %441 : f32 to vector<14x128xf32>
      %484 = arith.mulf %483, %34 : vector<14x128xf32>
      %485 = arith.addf %482, %484 : vector<14x128xf32>
      %486 = vector.broadcast %442 : f32 to vector<14x128xf32>
      %487 = arith.mulf %486, %38 : vector<14x128xf32>
      %488 = arith.addf %485, %487 : vector<14x128xf32>
      %489 = vector.broadcast %443 : f32 to vector<14x128xf32>
      %490 = arith.mulf %489, %46 : vector<14x128xf32>
      %491 = arith.addf %488, %490 : vector<14x128xf32>
      %492 = vector.broadcast %444 : f32 to vector<14x128xf32>
      %493 = arith.mulf %492, %50 : vector<14x128xf32>
      %494 = arith.addf %491, %493 : vector<14x128xf32>
      %495 = vector.broadcast %445 : f32 to vector<14x128xf32>
      %496 = arith.mulf %495, %54 : vector<14x128xf32>
      %497 = arith.addf %494, %496 : vector<14x128xf32>
      %498 = arith.maximumf %471, %497 : vector<14x128xf32>
      %499 = vector.broadcast %437 : f32 to vector<14x128xf32>
      %500 = arith.mulf %499, %26 : vector<14x128xf32>
      %501 = vector.broadcast %438 : f32 to vector<14x128xf32>
      %502 = arith.mulf %501, %30 : vector<14x128xf32>
      %503 = arith.addf %500, %502 : vector<14x128xf32>
      %504 = vector.broadcast %439 : f32 to vector<14x128xf32>
      %505 = arith.mulf %504, %34 : vector<14x128xf32>
      %506 = arith.addf %503, %505 : vector<14x128xf32>
      %507 = vector.broadcast %440 : f32 to vector<14x128xf32>
      %508 = arith.mulf %507, %42 : vector<14x128xf32>
      %509 = arith.addf %506, %508 : vector<14x128xf32>
      %510 = vector.broadcast %441 : f32 to vector<14x128xf32>
      %511 = arith.mulf %510, %46 : vector<14x128xf32>
      %512 = arith.addf %509, %511 : vector<14x128xf32>
      %513 = vector.broadcast %442 : f32 to vector<14x128xf32>
      %514 = arith.mulf %513, %50 : vector<14x128xf32>
      %515 = arith.addf %512, %514 : vector<14x128xf32>
      %516 = vector.broadcast %443 : f32 to vector<14x128xf32>
      %517 = arith.mulf %516, %58 : vector<14x128xf32>
      %518 = arith.addf %515, %517 : vector<14x128xf32>
      %519 = vector.broadcast %444 : f32 to vector<14x128xf32>
      %520 = arith.mulf %519, %62 : vector<14x128xf32>
      %521 = arith.addf %518, %520 : vector<14x128xf32>
      %522 = vector.broadcast %445 : f32 to vector<14x128xf32>
      %523 = arith.mulf %522, %66 : vector<14x128xf32>
      %524 = arith.addf %521, %523 : vector<14x128xf32>
      %525 = vector.broadcast %437 : f32 to vector<14x128xf32>
      %526 = arith.mulf %525, %30 : vector<14x128xf32>
      %527 = vector.broadcast %438 : f32 to vector<14x128xf32>
      %528 = arith.mulf %527, %34 : vector<14x128xf32>
      %529 = arith.addf %526, %528 : vector<14x128xf32>
      %530 = vector.broadcast %439 : f32 to vector<14x128xf32>
      %531 = arith.mulf %530, %38 : vector<14x128xf32>
      %532 = arith.addf %529, %531 : vector<14x128xf32>
      %533 = vector.broadcast %440 : f32 to vector<14x128xf32>
      %534 = arith.mulf %533, %46 : vector<14x128xf32>
      %535 = arith.addf %532, %534 : vector<14x128xf32>
      %536 = vector.broadcast %441 : f32 to vector<14x128xf32>
      %537 = arith.mulf %536, %50 : vector<14x128xf32>
      %538 = arith.addf %535, %537 : vector<14x128xf32>
      %539 = vector.broadcast %442 : f32 to vector<14x128xf32>
      %540 = arith.mulf %539, %54 : vector<14x128xf32>
      %541 = arith.addf %538, %540 : vector<14x128xf32>
      %542 = vector.broadcast %443 : f32 to vector<14x128xf32>
      %543 = arith.mulf %542, %62 : vector<14x128xf32>
      %544 = arith.addf %541, %543 : vector<14x128xf32>
      %545 = vector.broadcast %444 : f32 to vector<14x128xf32>
      %546 = arith.mulf %545, %66 : vector<14x128xf32>
      %547 = arith.addf %544, %546 : vector<14x128xf32>
      %548 = vector.broadcast %445 : f32 to vector<14x128xf32>
      %549 = arith.mulf %548, %70 : vector<14x128xf32>
      %550 = arith.addf %547, %549 : vector<14x128xf32>
      %551 = arith.maximumf %524, %550 : vector<14x128xf32>
      %552 = arith.maximumf %498, %551 : vector<14x128xf32>
      %c3_143 = arith.constant 3 : index
      %553 = memref.load %arg2[%c3_143] : memref<16xf32, #tpu.memory_space<smem>>
      %554 = vector.broadcast %553 : f32 to vector<14x128xf32>
      %555 = arith.addf %552, %554 : vector<14x128xf32>
      %cst_144 = arith.constant 0.000000e+00 : f32
      %556 = vector.broadcast %cst_144 : f32 to vector<14x128xf32>
      %557 = arith.maximumf %555, %556 : vector<14x128xf32>
      %c48 = arith.constant 48 : index
      %c0_145 = arith.constant 0 : index
      %558 = vector.load %arg7[%c48, %c0_145] : memref<256x128xf32, #tpu.memory_space<vmem>>, vector<14x128xf32>
      tpu.vector_store %arg7[%c48, %c0_145], %557 {strides = array<i32>} : memref<256x128xf32, #tpu.memory_space<vmem>>, vector<14x128xf32>,
      %c4_146 = arith.constant 4 : index
      %c0_147 = arith.constant 0 : index
      %559 = memref.load %arg1[%c4_146, %c0_147] : memref<16x9xf32, #tpu.memory_space<smem>>
      %c4_148 = arith.constant 4 : index
      %c1_149 = arith.constant 1 : index
      %560 = memref.load %arg1[%c4_148, %c1_149] : memref<16x9xf32, #tpu.memory_space<smem>>
      %c4_150 = arith.constant 4 : index
      %c2_151 = arith.constant 2 : index
      %561 = memref.load %arg1[%c4_150, %c2_151] : memref<16x9xf32, #tpu.memory_space<smem>>
      %c4_152 = arith.constant 4 : index
      %c3_153 = arith.constant 3 : index
      %562 = memref.load %arg1[%c4_152, %c3_153] : memref<16x9xf32, #tpu.memory_space<smem>>
      %c4_154 = arith.constant 4 : index
      %c4_155 = arith.constant 4 : index
      %563 = memref.load %arg1[%c4_154, %c4_155] : memref<16x9xf32, #tpu.memory_space<smem>>
      %c4_156 = arith.constant 4 : index
      %c5_157 = arith.constant 5 : index
      %564 = memref.load %arg1[%c4_156, %c5_157] : memref<16x9xf32, #tpu.memory_space<smem>>
      %c4_158 = arith.constant 4 : index
      %c6_159 = arith.constant 6 : index
      %565 = memref.load %arg1[%c4_158, %c6_159] : memref<16x9xf32, #tpu.memory_space<smem>>
      %c4_160 = arith.constant 4 : index
      %c7_161 = arith.constant 7 : index
      %566 = memref.load %arg1[%c4_160, %c7_161] : memref<16x9xf32, #tpu.memory_space<smem>>
      %c4_162 = arith.constant 4 : index
      %c8_163 = arith.constant 8 : index
      %567 = memref.load %arg1[%c4_162, %c8_163] : memref<16x9xf32, #tpu.memory_space<smem>>
      %568 = vector.broadcast %559 : f32 to vector<14x128xf32>
      %569 = arith.mulf %568, %10 : vector<14x128xf32>
      %570 = vector.broadcast %560 : f32 to vector<14x128xf32>
      %571 = arith.mulf %570, %14 : vector<14x128xf32>
      %572 = arith.addf %569, %571 : vector<14x128xf32>
      %573 = vector.broadcast %561 : f32 to vector<14x128xf32>
      %574 = arith.mulf %573, %18 : vector<14x128xf32>
      %575 = arith.addf %572, %574 : vector<14x128xf32>
      %576 = vector.broadcast %562 : f32 to vector<14x128xf32>
      %577 = arith.mulf %576, %26 : vector<14x128xf32>
      %578 = arith.addf %575, %577 : vector<14x128xf32>
      %579 = vector.broadcast %563 : f32 to vector<14x128xf32>
      %580 = arith.mulf %579, %30 : vector<14x128xf32>
      %581 = arith.addf %578, %580 : vector<14x128xf32>
      %582 = vector.broadcast %564 : f32 to vector<14x128xf32>
      %583 = arith.mulf %582, %34 : vector<14x128xf32>
      %584 = arith.addf %581, %583 : vector<14x128xf32>
      %585 = vector.broadcast %565 : f32 to vector<14x128xf32>
      %586 = arith.mulf %585, %42 : vector<14x128xf32>
      %587 = arith.addf %584, %586 : vector<14x128xf32>
      %588 = vector.broadcast %566 : f32 to vector<14x128xf32>
      %589 = arith.mulf %588, %46 : vector<14x128xf32>
      %590 = arith.addf %587, %589 : vector<14x128xf32>
      %591 = vector.broadcast %567 : f32 to vector<14x128xf32>
      %592 = arith.mulf %591, %50 : vector<14x128xf32>
      %593 = arith.addf %590, %592 : vector<14x128xf32>
      %594 = vector.broadcast %559 : f32 to vector<14x128xf32>
      %595 = arith.mulf %594, %14 : vector<14x128xf32>
      %596 = vector.broadcast %560 : f32 to vector<14x128xf32>
      %597 = arith.mulf %596, %18 : vector<14x128xf32>
      %598 = arith.addf %595, %597 : vector<14x128xf32>
      %599 = vector.broadcast %561 : f32 to vector<14x128xf32>
      %600 = arith.mulf %599, %22 : vector<14x128xf32>
      %601 = arith.addf %598, %600 : vector<14x128xf32>
      %602 = vector.broadcast %562 : f32 to vector<14x128xf32>
      %603 = arith.mulf %602, %30 : vector<14x128xf32>
      %604 = arith.addf %601, %603 : vector<14x128xf32>
      %605 = vector.broadcast %563 : f32 to vector<14x128xf32>
      %606 = arith.mulf %605, %34 : vector<14x128xf32>
      %607 = arith.addf %604, %606 : vector<14x128xf32>
      %608 = vector.broadcast %564 : f32 to vector<14x128xf32>
      %609 = arith.mulf %608, %38 : vector<14x128xf32>
      %610 = arith.addf %607, %609 : vector<14x128xf32>
      %611 = vector.broadcast %565 : f32 to vector<14x128xf32>
      %612 = arith.mulf %611, %46 : vector<14x128xf32>
      %613 = arith.addf %610, %612 : vector<14x128xf32>
      %614 = vector.broadcast %566 : f32 to vector<14x128xf32>
      %615 = arith.mulf %614, %50 : vector<14x128xf32>
      %616 = arith.addf %613, %615 : vector<14x128xf32>
      %617 = vector.broadcast %567 : f32 to vector<14x128xf32>
      %618 = arith.mulf %617, %54 : vector<14x128xf32>
      %619 = arith.addf %616, %618 : vector<14x128xf32>
      %620 = arith.maximumf %593, %619 : vector<14x128xf32>
      %621 = vector.broadcast %559 : f32 to vector<14x128xf32>
      %622 = arith.mulf %621, %26 : vector<14x128xf32>
      %623 = vector.broadcast %560 : f32 to vector<14x128xf32>
      %624 = arith.mulf %623, %30 : vector<14x128xf32>
      %625 = arith.addf %622, %624 : vector<14x128xf32>
      %626 = vector.broadcast %561 : f32 to vector<14x128xf32>
      %627 = arith.mulf %626, %34 : vector<14x128xf32>
      %628 = arith.addf %625, %627 : vector<14x128xf32>
      %629 = vector.broadcast %562 : f32 to vector<14x128xf32>
      %630 = arith.mulf %629, %42 : vector<14x128xf32>
      %631 = arith.addf %628, %630 : vector<14x128xf32>
      %632 = vector.broadcast %563 : f32 to vector<14x128xf32>
      %633 = arith.mulf %632, %46 : vector<14x128xf32>
      %634 = arith.addf %631, %633 : vector<14x128xf32>
      %635 = vector.broadcast %564 : f32 to vector<14x128xf32>
      %636 = arith.mulf %635, %50 : vector<14x128xf32>
      %637 = arith.addf %634, %636 : vector<14x128xf32>
      %638 = vector.broadcast %565 : f32 to vector<14x128xf32>
      %639 = arith.mulf %638, %58 : vector<14x128xf32>
      %640 = arith.addf %637, %639 : vector<14x128xf32>
      %641 = vector.broadcast %566 : f32 to vector<14x128xf32>
      %642 = arith.mulf %641, %62 : vector<14x128xf32>
      %643 = arith.addf %640, %642 : vector<14x128xf32>
      %644 = vector.broadcast %567 : f32 to vector<14x128xf32>
      %645 = arith.mulf %644, %66 : vector<14x128xf32>
      %646 = arith.addf %643, %645 : vector<14x128xf32>
      %647 = vector.broadcast %559 : f32 to vector<14x128xf32>
      %648 = arith.mulf %647, %30 : vector<14x128xf32>
      %649 = vector.broadcast %560 : f32 to vector<14x128xf32>
      %650 = arith.mulf %649, %34 : vector<14x128xf32>
      %651 = arith.addf %648, %650 : vector<14x128xf32>
      %652 = vector.broadcast %561 : f32 to vector<14x128xf32>
      %653 = arith.mulf %652, %38 : vector<14x128xf32>
      %654 = arith.addf %651, %653 : vector<14x128xf32>
      %655 = vector.broadcast %562 : f32 to vector<14x128xf32>
      %656 = arith.mulf %655, %46 : vector<14x128xf32>
      %657 = arith.addf %654, %656 : vector<14x128xf32>
      %658 = vector.broadcast %563 : f32 to vector<14x128xf32>
      %659 = arith.mulf %658, %50 : vector<14x128xf32>
      %660 = arith.addf %657, %659 : vector<14x128xf32>
      %661 = vector.broadcast %564 : f32 to vector<14x128xf32>
      %662 = arith.mulf %661, %54 : vector<14x128xf32>
      %663 = arith.addf %660, %662 : vector<14x128xf32>
      %664 = vector.broadcast %565 : f32 to vector<14x128xf32>
      %665 = arith.mulf %664, %62 : vector<14x128xf32>
      %666 = arith.addf %663, %665 : vector<14x128xf32>
      %667 = vector.broadcast %566 : f32 to vector<14x128xf32>
      %668 = arith.mulf %667, %66 : vector<14x128xf32>
      %669 = arith.addf %666, %668 : vector<14x128xf32>
      %670 = vector.broadcast %567 : f32 to vector<14x128xf32>
      %671 = arith.mulf %670, %70 : vector<14x128xf32>
      %672 = arith.addf %669, %671 : vector<14x128xf32>
      %673 = arith.maximumf %646, %672 : vector<14x128xf32>
      %674 = arith.maximumf %620, %673 : vector<14x128xf32>
      %c4_164 = arith.constant 4 : index
      %675 = memref.load %arg2[%c4_164] : memref<16xf32, #tpu.memory_space<smem>>
      %676 = vector.broadcast %675 : f32 to vector<14x128xf32>
      %677 = arith.addf %674, %676 : vector<14x128xf32>
      %cst_165 = arith.constant 0.000000e+00 : f32
      %678 = vector.broadcast %cst_165 : f32 to vector<14x128xf32>
      %679 = arith.maximumf %677, %678 : vector<14x128xf32>
      %c64 = arith.constant 64 : index
      %c0_166 = arith.constant 0 : index
      %680 = vector.load %arg7[%c64, %c0_166] : memref<256x128xf32, #tpu.memory_space<vmem>>, vector<14x128xf32>
      tpu.vector_store %arg7[%c64, %c0_166], %679 {strides = array<i32>} : memref<256x128xf32, #tpu.memory_space<vmem>>, vector<14x128xf32>,
      %c5_167 = arith.constant 5 : index
      %c0_168 = arith.constant 0 : index
      %681 = memref.load %arg1[%c5_167, %c0_168] : memref<16x9xf32, #tpu.memory_space<smem>>
      %c5_169 = arith.constant 5 : index
      %c1_170 = arith.constant 1 : index
      %682 = memref.load %arg1[%c5_169, %c1_170] : memref<16x9xf32, #tpu.memory_space<smem>>
      %c5_171 = arith.constant 5 : index
      %c2_172 = arith.constant 2 : index
      %683 = memref.load %arg1[%c5_171, %c2_172] : memref<16x9xf32, #tpu.memory_space<smem>>
      %c5_173 = arith.constant 5 : index
      %c3_174 = arith.constant 3 : index
      %684 = memref.load %arg1[%c5_173, %c3_174] : memref<16x9xf32, #tpu.memory_space<smem>>
      %c5_175 = arith.constant 5 : index
      %c4_176 = arith.constant 4 : index
      %685 = memref.load %arg1[%c5_175, %c4_176] : memref<16x9xf32, #tpu.memory_space<smem>>
      %c5_177 = arith.constant 5 : index
      %c5_178 = arith.constant 5 : index
      %686 = memref.load %arg1[%c5_177, %c5_178] : memref<16x9xf32, #tpu.memory_space<smem>>
      %c5_179 = arith.constant 5 : index
      %c6_180 = arith.constant 6 : index
      %687 = memref.load %arg1[%c5_179, %c6_180] : memref<16x9xf32, #tpu.memory_space<smem>>
      %c5_181 = arith.constant 5 : index
      %c7_182 = arith.constant 7 : index
      %688 = memref.load %arg1[%c5_181, %c7_182] : memref<16x9xf32, #tpu.memory_space<smem>>
      %c5_183 = arith.constant 5 : index
      %c8_184 = arith.constant 8 : index
      %689 = memref.load %arg1[%c5_183, %c8_184] : memref<16x9xf32, #tpu.memory_space<smem>>
      %690 = vector.broadcast %681 : f32 to vector<14x128xf32>
      %691 = arith.mulf %690, %10 : vector<14x128xf32>
      %692 = vector.broadcast %682 : f32 to vector<14x128xf32>
      %693 = arith.mulf %692, %14 : vector<14x128xf32>
      %694 = arith.addf %691, %693 : vector<14x128xf32>
      %695 = vector.broadcast %683 : f32 to vector<14x128xf32>
      %696 = arith.mulf %695, %18 : vector<14x128xf32>
      %697 = arith.addf %694, %696 : vector<14x128xf32>
      %698 = vector.broadcast %684 : f32 to vector<14x128xf32>
      %699 = arith.mulf %698, %26 : vector<14x128xf32>
      %700 = arith.addf %697, %699 : vector<14x128xf32>
      %701 = vector.broadcast %685 : f32 to vector<14x128xf32>
      %702 = arith.mulf %701, %30 : vector<14x128xf32>
      %703 = arith.addf %700, %702 : vector<14x128xf32>
      %704 = vector.broadcast %686 : f32 to vector<14x128xf32>
      %705 = arith.mulf %704, %34 : vector<14x128xf32>
      %706 = arith.addf %703, %705 : vector<14x128xf32>
      %707 = vector.broadcast %687 : f32 to vector<14x128xf32>
      %708 = arith.mulf %707, %42 : vector<14x128xf32>
      %709 = arith.addf %706, %708 : vector<14x128xf32>
      %710 = vector.broadcast %688 : f32 to vector<14x128xf32>
      %711 = arith.mulf %710, %46 : vector<14x128xf32>
      %712 = arith.addf %709, %711 : vector<14x128xf32>
      %713 = vector.broadcast %689 : f32 to vector<14x128xf32>
      %714 = arith.mulf %713, %50 : vector<14x128xf32>
      %715 = arith.addf %712, %714 : vector<14x128xf32>
      %716 = vector.broadcast %681 : f32 to vector<14x128xf32>
      %717 = arith.mulf %716, %14 : vector<14x128xf32>
      %718 = vector.broadcast %682 : f32 to vector<14x128xf32>
      %719 = arith.mulf %718, %18 : vector<14x128xf32>
      %720 = arith.addf %717, %719 : vector<14x128xf32>
      %721 = vector.broadcast %683 : f32 to vector<14x128xf32>
      %722 = arith.mulf %721, %22 : vector<14x128xf32>
      %723 = arith.addf %720, %722 : vector<14x128xf32>
      %724 = vector.broadcast %684 : f32 to vector<14x128xf32>
      %725 = arith.mulf %724, %30 : vector<14x128xf32>
      %726 = arith.addf %723, %725 : vector<14x128xf32>
      %727 = vector.broadcast %685 : f32 to vector<14x128xf32>
      %728 = arith.mulf %727, %34 : vector<14x128xf32>
      %729 = arith.addf %726, %728 : vector<14x128xf32>
      %730 = vector.broadcast %686 : f32 to vector<14x128xf32>
      %731 = arith.mulf %730, %38 : vector<14x128xf32>
      %732 = arith.addf %729, %731 : vector<14x128xf32>
      %733 = vector.broadcast %687 : f32 to vector<14x128xf32>
      %734 = arith.mulf %733, %46 : vector<14x128xf32>
      %735 = arith.addf %732, %734 : vector<14x128xf32>
      %736 = vector.broadcast %688 : f32 to vector<14x128xf32>
      %737 = arith.mulf %736, %50 : vector<14x128xf32>
      %738 = arith.addf %735, %737 : vector<14x128xf32>
      %739 = vector.broadcast %689 : f32 to vector<14x128xf32>
      %740 = arith.mulf %739, %54 : vector<14x128xf32>
      %741 = arith.addf %738, %740 : vector<14x128xf32>
      %742 = arith.maximumf %715, %741 : vector<14x128xf32>
      %743 = vector.broadcast %681 : f32 to vector<14x128xf32>
      %744 = arith.mulf %743, %26 : vector<14x128xf32>
      %745 = vector.broadcast %682 : f32 to vector<14x128xf32>
      %746 = arith.mulf %745, %30 : vector<14x128xf32>
      %747 = arith.addf %744, %746 : vector<14x128xf32>
      %748 = vector.broadcast %683 : f32 to vector<14x128xf32>
      %749 = arith.mulf %748, %34 : vector<14x128xf32>
      %750 = arith.addf %747, %749 : vector<14x128xf32>
      %751 = vector.broadcast %684 : f32 to vector<14x128xf32>
      %752 = arith.mulf %751, %42 : vector<14x128xf32>
      %753 = arith.addf %750, %752 : vector<14x128xf32>
      %754 = vector.broadcast %685 : f32 to vector<14x128xf32>
      %755 = arith.mulf %754, %46 : vector<14x128xf32>
      %756 = arith.addf %753, %755 : vector<14x128xf32>
      %757 = vector.broadcast %686 : f32 to vector<14x128xf32>
      %758 = arith.mulf %757, %50 : vector<14x128xf32>
      %759 = arith.addf %756, %758 : vector<14x128xf32>
      %760 = vector.broadcast %687 : f32 to vector<14x128xf32>
      %761 = arith.mulf %760, %58 : vector<14x128xf32>
      %762 = arith.addf %759, %761 : vector<14x128xf32>
      %763 = vector.broadcast %688 : f32 to vector<14x128xf32>
      %764 = arith.mulf %763, %62 : vector<14x128xf32>
      %765 = arith.addf %762, %764 : vector<14x128xf32>
      %766 = vector.broadcast %689 : f32 to vector<14x128xf32>
      %767 = arith.mulf %766, %66 : vector<14x128xf32>
      %768 = arith.addf %765, %767 : vector<14x128xf32>
      %769 = vector.broadcast %681 : f32 to vector<14x128xf32>
      %770 = arith.mulf %769, %30 : vector<14x128xf32>
      %771 = vector.broadcast %682 : f32 to vector<14x128xf32>
      %772 = arith.mulf %771, %34 : vector<14x128xf32>
      %773 = arith.addf %770, %772 : vector<14x128xf32>
      %774 = vector.broadcast %683 : f32 to vector<14x128xf32>
      %775 = arith.mulf %774, %38 : vector<14x128xf32>
      %776 = arith.addf %773, %775 : vector<14x128xf32>
      %777 = vector.broadcast %684 : f32 to vector<14x128xf32>
      %778 = arith.mulf %777, %46 : vector<14x128xf32>
      %779 = arith.addf %776, %778 : vector<14x128xf32>
      %780 = vector.broadcast %685 : f32 to vector<14x128xf32>
      %781 = arith.mulf %780, %50 : vector<14x128xf32>
      %782 = arith.addf %779, %781 : vector<14x128xf32>
      %783 = vector.broadcast %686 : f32 to vector<14x128xf32>
      %784 = arith.mulf %783, %54 : vector<14x128xf32>
      %785 = arith.addf %782, %784 : vector<14x128xf32>
      %786 = vector.broadcast %687 : f32 to vector<14x128xf32>
      %787 = arith.mulf %786, %62 : vector<14x128xf32>
      %788 = arith.addf %785, %787 : vector<14x128xf32>
      %789 = vector.broadcast %688 : f32 to vector<14x128xf32>
      %790 = arith.mulf %789, %66 : vector<14x128xf32>
      %791 = arith.addf %788, %790 : vector<14x128xf32>
      %792 = vector.broadcast %689 : f32 to vector<14x128xf32>
      %793 = arith.mulf %792, %70 : vector<14x128xf32>
      %794 = arith.addf %791, %793 : vector<14x128xf32>
      %795 = arith.maximumf %768, %794 : vector<14x128xf32>
      %796 = arith.maximumf %742, %795 : vector<14x128xf32>
      %c5_185 = arith.constant 5 : index
      %797 = memref.load %arg2[%c5_185] : memref<16xf32, #tpu.memory_space<smem>>
      %798 = vector.broadcast %797 : f32 to vector<14x128xf32>
      %799 = arith.addf %796, %798 : vector<14x128xf32>
      %cst_186 = arith.constant 0.000000e+00 : f32
      %800 = vector.broadcast %cst_186 : f32 to vector<14x128xf32>
      %801 = arith.maximumf %799, %800 : vector<14x128xf32>
      %c80 = arith.constant 80 : index
      %c0_187 = arith.constant 0 : index
      %802 = vector.load %arg7[%c80, %c0_187] : memref<256x128xf32, #tpu.memory_space<vmem>>, vector<14x128xf32>
      tpu.vector_store %arg7[%c80, %c0_187], %801 {strides = array<i32>} : memref<256x128xf32, #tpu.memory_space<vmem>>, vector<14x128xf32>,
      %c6_188 = arith.constant 6 : index
      %c0_189 = arith.constant 0 : index
      %803 = memref.load %arg1[%c6_188, %c0_189] : memref<16x9xf32, #tpu.memory_space<smem>>
      %c6_190 = arith.constant 6 : index
      %c1_191 = arith.constant 1 : index
      %804 = memref.load %arg1[%c6_190, %c1_191] : memref<16x9xf32, #tpu.memory_space<smem>>
      %c6_192 = arith.constant 6 : index
      %c2_193 = arith.constant 2 : index
      %805 = memref.load %arg1[%c6_192, %c2_193] : memref<16x9xf32, #tpu.memory_space<smem>>
      %c6_194 = arith.constant 6 : index
      %c3_195 = arith.constant 3 : index
      %806 = memref.load %arg1[%c6_194, %c3_195] : memref<16x9xf32, #tpu.memory_space<smem>>
      %c6_196 = arith.constant 6 : index
      %c4_197 = arith.constant 4 : index
      %807 = memref.load %arg1[%c6_196, %c4_197] : memref<16x9xf32, #tpu.memory_space<smem>>
      %c6_198 = arith.constant 6 : index
      %c5_199 = arith.constant 5 : index
      %808 = memref.load %arg1[%c6_198, %c5_199] : memref<16x9xf32, #tpu.memory_space<smem>>
      %c6_200 = arith.constant 6 : index
      %c6_201 = arith.constant 6 : index
      %809 = memref.load %arg1[%c6_200, %c6_201] : memref<16x9xf32, #tpu.memory_space<smem>>
      %c6_202 = arith.constant 6 : index
      %c7_203 = arith.constant 7 : index
      %810 = memref.load %arg1[%c6_202, %c7_203] : memref<16x9xf32, #tpu.memory_space<smem>>
      %c6_204 = arith.constant 6 : index
      %c8_205 = arith.constant 8 : index
      %811 = memref.load %arg1[%c6_204, %c8_205] : memref<16x9xf32, #tpu.memory_space<smem>>
      %812 = vector.broadcast %803 : f32 to vector<14x128xf32>
      %813 = arith.mulf %812, %10 : vector<14x128xf32>
      %814 = vector.broadcast %804 : f32 to vector<14x128xf32>
      %815 = arith.mulf %814, %14 : vector<14x128xf32>
      %816 = arith.addf %813, %815 : vector<14x128xf32>
      %817 = vector.broadcast %805 : f32 to vector<14x128xf32>
      %818 = arith.mulf %817, %18 : vector<14x128xf32>
      %819 = arith.addf %816, %818 : vector<14x128xf32>
      %820 = vector.broadcast %806 : f32 to vector<14x128xf32>
      %821 = arith.mulf %820, %26 : vector<14x128xf32>
      %822 = arith.addf %819, %821 : vector<14x128xf32>
      %823 = vector.broadcast %807 : f32 to vector<14x128xf32>
      %824 = arith.mulf %823, %30 : vector<14x128xf32>
      %825 = arith.addf %822, %824 : vector<14x128xf32>
      %826 = vector.broadcast %808 : f32 to vector<14x128xf32>
      %827 = arith.mulf %826, %34 : vector<14x128xf32>
      %828 = arith.addf %825, %827 : vector<14x128xf32>
      %829 = vector.broadcast %809 : f32 to vector<14x128xf32>
      %830 = arith.mulf %829, %42 : vector<14x128xf32>
      %831 = arith.addf %828, %830 : vector<14x128xf32>
      %832 = vector.broadcast %810 : f32 to vector<14x128xf32>
      %833 = arith.mulf %832, %46 : vector<14x128xf32>
      %834 = arith.addf %831, %833 : vector<14x128xf32>
      %835 = vector.broadcast %811 : f32 to vector<14x128xf32>
      %836 = arith.mulf %835, %50 : vector<14x128xf32>
      %837 = arith.addf %834, %836 : vector<14x128xf32>
      %838 = vector.broadcast %803 : f32 to vector<14x128xf32>
      %839 = arith.mulf %838, %14 : vector<14x128xf32>
      %840 = vector.broadcast %804 : f32 to vector<14x128xf32>
      %841 = arith.mulf %840, %18 : vector<14x128xf32>
      %842 = arith.addf %839, %841 : vector<14x128xf32>
      %843 = vector.broadcast %805 : f32 to vector<14x128xf32>
      %844 = arith.mulf %843, %22 : vector<14x128xf32>
      %845 = arith.addf %842, %844 : vector<14x128xf32>
      %846 = vector.broadcast %806 : f32 to vector<14x128xf32>
      %847 = arith.mulf %846, %30 : vector<14x128xf32>
      %848 = arith.addf %845, %847 : vector<14x128xf32>
      %849 = vector.broadcast %807 : f32 to vector<14x128xf32>
      %850 = arith.mulf %849, %34 : vector<14x128xf32>
      %851 = arith.addf %848, %850 : vector<14x128xf32>
      %852 = vector.broadcast %808 : f32 to vector<14x128xf32>
      %853 = arith.mulf %852, %38 : vector<14x128xf32>
      %854 = arith.addf %851, %853 : vector<14x128xf32>
      %855 = vector.broadcast %809 : f32 to vector<14x128xf32>
      %856 = arith.mulf %855, %46 : vector<14x128xf32>
      %857 = arith.addf %854, %856 : vector<14x128xf32>
      %858 = vector.broadcast %810 : f32 to vector<14x128xf32>
      %859 = arith.mulf %858, %50 : vector<14x128xf32>
      %860 = arith.addf %857, %859 : vector<14x128xf32>
      %861 = vector.broadcast %811 : f32 to vector<14x128xf32>
      %862 = arith.mulf %861, %54 : vector<14x128xf32>
      %863 = arith.addf %860, %862 : vector<14x128xf32>
      %864 = arith.maximumf %837, %863 : vector<14x128xf32>
      %865 = vector.broadcast %803 : f32 to vector<14x128xf32>
      %866 = arith.mulf %865, %26 : vector<14x128xf32>
      %867 = vector.broadcast %804 : f32 to vector<14x128xf32>
      %868 = arith.mulf %867, %30 : vector<14x128xf32>
      %869 = arith.addf %866, %868 : vector<14x128xf32>
      %870 = vector.broadcast %805 : f32 to vector<14x128xf32>
      %871 = arith.mulf %870, %34 : vector<14x128xf32>
      %872 = arith.addf %869, %871 : vector<14x128xf32>
      %873 = vector.broadcast %806 : f32 to vector<14x128xf32>
      %874 = arith.mulf %873, %42 : vector<14x128xf32>
      %875 = arith.addf %872, %874 : vector<14x128xf32>
      %876 = vector.broadcast %807 : f32 to vector<14x128xf32>
      %877 = arith.mulf %876, %46 : vector<14x128xf32>
      %878 = arith.addf %875, %877 : vector<14x128xf32>
      %879 = vector.broadcast %808 : f32 to vector<14x128xf32>
      %880 = arith.mulf %879, %50 : vector<14x128xf32>
      %881 = arith.addf %878, %880 : vector<14x128xf32>
      %882 = vector.broadcast %809 : f32 to vector<14x128xf32>
      %883 = arith.mulf %882, %58 : vector<14x128xf32>
      %884 = arith.addf %881, %883 : vector<14x128xf32>
      %885 = vector.broadcast %810 : f32 to vector<14x128xf32>
      %886 = arith.mulf %885, %62 : vector<14x128xf32>
      %887 = arith.addf %884, %886 : vector<14x128xf32>
      %888 = vector.broadcast %811 : f32 to vector<14x128xf32>
      %889 = arith.mulf %888, %66 : vector<14x128xf32>
      %890 = arith.addf %887, %889 : vector<14x128xf32>
      %891 = vector.broadcast %803 : f32 to vector<14x128xf32>
      %892 = arith.mulf %891, %30 : vector<14x128xf32>
      %893 = vector.broadcast %804 : f32 to vector<14x128xf32>
      %894 = arith.mulf %893, %34 : vector<14x128xf32>
      %895 = arith.addf %892, %894 : vector<14x128xf32>
      %896 = vector.broadcast %805 : f32 to vector<14x128xf32>
      %897 = arith.mulf %896, %38 : vector<14x128xf32>
      %898 = arith.addf %895, %897 : vector<14x128xf32>
      %899 = vector.broadcast %806 : f32 to vector<14x128xf32>
      %900 = arith.mulf %899, %46 : vector<14x128xf32>
      %901 = arith.addf %898, %900 : vector<14x128xf32>
      %902 = vector.broadcast %807 : f32 to vector<14x128xf32>
      %903 = arith.mulf %902, %50 : vector<14x128xf32>
      %904 = arith.addf %901, %903 : vector<14x128xf32>
      %905 = vector.broadcast %808 : f32 to vector<14x128xf32>
      %906 = arith.mulf %905, %54 : vector<14x128xf32>
      %907 = arith.addf %904, %906 : vector<14x128xf32>
      %908 = vector.broadcast %809 : f32 to vector<14x128xf32>
      %909 = arith.mulf %908, %62 : vector<14x128xf32>
      %910 = arith.addf %907, %909 : vector<14x128xf32>
      %911 = vector.broadcast %810 : f32 to vector<14x128xf32>
      %912 = arith.mulf %911, %66 : vector<14x128xf32>
      %913 = arith.addf %910, %912 : vector<14x128xf32>
      %914 = vector.broadcast %811 : f32 to vector<14x128xf32>
      %915 = arith.mulf %914, %70 : vector<14x128xf32>
      %916 = arith.addf %913, %915 : vector<14x128xf32>
      %917 = arith.maximumf %890, %916 : vector<14x128xf32>
      %918 = arith.maximumf %864, %917 : vector<14x128xf32>
      %c6_206 = arith.constant 6 : index
      %919 = memref.load %arg2[%c6_206] : memref<16xf32, #tpu.memory_space<smem>>
      %920 = vector.broadcast %919 : f32 to vector<14x128xf32>
      %921 = arith.addf %918, %920 : vector<14x128xf32>
      %cst_207 = arith.constant 0.000000e+00 : f32
      %922 = vector.broadcast %cst_207 : f32 to vector<14x128xf32>
      %923 = arith.maximumf %921, %922 : vector<14x128xf32>
      %c96 = arith.constant 96 : index
      %c0_208 = arith.constant 0 : index
      %924 = vector.load %arg7[%c96, %c0_208] : memref<256x128xf32, #tpu.memory_space<vmem>>, vector<14x128xf32>
      tpu.vector_store %arg7[%c96, %c0_208], %923 {strides = array<i32>} : memref<256x128xf32, #tpu.memory_space<vmem>>, vector<14x128xf32>,
      %c7_209 = arith.constant 7 : index
      %c0_210 = arith.constant 0 : index
      %925 = memref.load %arg1[%c7_209, %c0_210] : memref<16x9xf32, #tpu.memory_space<smem>>
      %c7_211 = arith.constant 7 : index
      %c1_212 = arith.constant 1 : index
      %926 = memref.load %arg1[%c7_211, %c1_212] : memref<16x9xf32, #tpu.memory_space<smem>>
      %c7_213 = arith.constant 7 : index
      %c2_214 = arith.constant 2 : index
      %927 = memref.load %arg1[%c7_213, %c2_214] : memref<16x9xf32, #tpu.memory_space<smem>>
      %c7_215 = arith.constant 7 : index
      %c3_216 = arith.constant 3 : index
      %928 = memref.load %arg1[%c7_215, %c3_216] : memref<16x9xf32, #tpu.memory_space<smem>>
      %c7_217 = arith.constant 7 : index
      %c4_218 = arith.constant 4 : index
      %929 = memref.load %arg1[%c7_217, %c4_218] : memref<16x9xf32, #tpu.memory_space<smem>>
      %c7_219 = arith.constant 7 : index
      %c5_220 = arith.constant 5 : index
      %930 = memref.load %arg1[%c7_219, %c5_220] : memref<16x9xf32, #tpu.memory_space<smem>>
      %c7_221 = arith.constant 7 : index
      %c6_222 = arith.constant 6 : index
      %931 = memref.load %arg1[%c7_221, %c6_222] : memref<16x9xf32, #tpu.memory_space<smem>>
      %c7_223 = arith.constant 7 : index
      %c7_224 = arith.constant 7 : index
      %932 = memref.load %arg1[%c7_223, %c7_224] : memref<16x9xf32, #tpu.memory_space<smem>>
      %c7_225 = arith.constant 7 : index
      %c8_226 = arith.constant 8 : index
      %933 = memref.load %arg1[%c7_225, %c8_226] : memref<16x9xf32, #tpu.memory_space<smem>>
      %934 = vector.broadcast %925 : f32 to vector<14x128xf32>
      %935 = arith.mulf %934, %10 : vector<14x128xf32>
      %936 = vector.broadcast %926 : f32 to vector<14x128xf32>
      %937 = arith.mulf %936, %14 : vector<14x128xf32>
      %938 = arith.addf %935, %937 : vector<14x128xf32>
      %939 = vector.broadcast %927 : f32 to vector<14x128xf32>
      %940 = arith.mulf %939, %18 : vector<14x128xf32>
      %941 = arith.addf %938, %940 : vector<14x128xf32>
      %942 = vector.broadcast %928 : f32 to vector<14x128xf32>
      %943 = arith.mulf %942, %26 : vector<14x128xf32>
      %944 = arith.addf %941, %943 : vector<14x128xf32>
      %945 = vector.broadcast %929 : f32 to vector<14x128xf32>
      %946 = arith.mulf %945, %30 : vector<14x128xf32>
      %947 = arith.addf %944, %946 : vector<14x128xf32>
      %948 = vector.broadcast %930 : f32 to vector<14x128xf32>
      %949 = arith.mulf %948, %34 : vector<14x128xf32>
      %950 = arith.addf %947, %949 : vector<14x128xf32>
      %951 = vector.broadcast %931 : f32 to vector<14x128xf32>
      %952 = arith.mulf %951, %42 : vector<14x128xf32>
      %953 = arith.addf %950, %952 : vector<14x128xf32>
      %954 = vector.broadcast %932 : f32 to vector<14x128xf32>
      %955 = arith.mulf %954, %46 : vector<14x128xf32>
      %956 = arith.addf %953, %955 : vector<14x128xf32>
      %957 = vector.broadcast %933 : f32 to vector<14x128xf32>
      %958 = arith.mulf %957, %50 : vector<14x128xf32>
      %959 = arith.addf %956, %958 : vector<14x128xf32>
      %960 = vector.broadcast %925 : f32 to vector<14x128xf32>
      %961 = arith.mulf %960, %14 : vector<14x128xf32>
      %962 = vector.broadcast %926 : f32 to vector<14x128xf32>
      %963 = arith.mulf %962, %18 : vector<14x128xf32>
      %964 = arith.addf %961, %963 : vector<14x128xf32>
      %965 = vector.broadcast %927 : f32 to vector<14x128xf32>
      %966 = arith.mulf %965, %22 : vector<14x128xf32>
      %967 = arith.addf %964, %966 : vector<14x128xf32>
      %968 = vector.broadcast %928 : f32 to vector<14x128xf32>
      %969 = arith.mulf %968, %30 : vector<14x128xf32>
      %970 = arith.addf %967, %969 : vector<14x128xf32>
      %971 = vector.broadcast %929 : f32 to vector<14x128xf32>
      %972 = arith.mulf %971, %34 : vector<14x128xf32>
      %973 = arith.addf %970, %972 : vector<14x128xf32>
      %974 = vector.broadcast %930 : f32 to vector<14x128xf32>
      %975 = arith.mulf %974, %38 : vector<14x128xf32>
      %976 = arith.addf %973, %975 : vector<14x128xf32>
      %977 = vector.broadcast %931 : f32 to vector<14x128xf32>
      %978 = arith.mulf %977, %46 : vector<14x128xf32>
      %979 = arith.addf %976, %978 : vector<14x128xf32>
      %980 = vector.broadcast %932 : f32 to vector<14x128xf32>
      %981 = arith.mulf %980, %50 : vector<14x128xf32>
      %982 = arith.addf %979, %981 : vector<14x128xf32>
      %983 = vector.broadcast %933 : f32 to vector<14x128xf32>
      %984 = arith.mulf %983, %54 : vector<14x128xf32>
      %985 = arith.addf %982, %984 : vector<14x128xf32>
      %986 = arith.maximumf %959, %985 : vector<14x128xf32>
      %987 = vector.broadcast %925 : f32 to vector<14x128xf32>
      %988 = arith.mulf %987, %26 : vector<14x128xf32>
      %989 = vector.broadcast %926 : f32 to vector<14x128xf32>
      %990 = arith.mulf %989, %30 : vector<14x128xf32>
      %991 = arith.addf %988, %990 : vector<14x128xf32>
      %992 = vector.broadcast %927 : f32 to vector<14x128xf32>
      %993 = arith.mulf %992, %34 : vector<14x128xf32>
      %994 = arith.addf %991, %993 : vector<14x128xf32>
      %995 = vector.broadcast %928 : f32 to vector<14x128xf32>
      %996 = arith.mulf %995, %42 : vector<14x128xf32>
      %997 = arith.addf %994, %996 : vector<14x128xf32>
      %998 = vector.broadcast %929 : f32 to vector<14x128xf32>
      %999 = arith.mulf %998, %46 : vector<14x128xf32>
      %1000 = arith.addf %997, %999 : vector<14x128xf32>
      %1001 = vector.broadcast %930 : f32 to vector<14x128xf32>
      %1002 = arith.mulf %1001, %50 : vector<14x128xf32>
      %1003 = arith.addf %1000, %1002 : vector<14x128xf32>
      %1004 = vector.broadcast %931 : f32 to vector<14x128xf32>
      %1005 = arith.mulf %1004, %58 : vector<14x128xf32>
      %1006 = arith.addf %1003, %1005 : vector<14x128xf32>
      %1007 = vector.broadcast %932 : f32 to vector<14x128xf32>
      %1008 = arith.mulf %1007, %62 : vector<14x128xf32>
      %1009 = arith.addf %1006, %1008 : vector<14x128xf32>
      %1010 = vector.broadcast %933 : f32 to vector<14x128xf32>
      %1011 = arith.mulf %1010, %66 : vector<14x128xf32>
      %1012 = arith.addf %1009, %1011 : vector<14x128xf32>
      %1013 = vector.broadcast %925 : f32 to vector<14x128xf32>
      %1014 = arith.mulf %1013, %30 : vector<14x128xf32>
      %1015 = vector.broadcast %926 : f32 to vector<14x128xf32>
      %1016 = arith.mulf %1015, %34 : vector<14x128xf32>
      %1017 = arith.addf %1014, %1016 : vector<14x128xf32>
      %1018 = vector.broadcast %927 : f32 to vector<14x128xf32>
      %1019 = arith.mulf %1018, %38 : vector<14x128xf32>
      %1020 = arith.addf %1017, %1019 : vector<14x128xf32>
      %1021 = vector.broadcast %928 : f32 to vector<14x128xf32>
      %1022 = arith.mulf %1021, %46 : vector<14x128xf32>
      %1023 = arith.addf %1020, %1022 : vector<14x128xf32>
      %1024 = vector.broadcast %929 : f32 to vector<14x128xf32>
      %1025 = arith.mulf %1024, %50 : vector<14x128xf32>
      %1026 = arith.addf %1023, %1025 : vector<14x128xf32>
      %1027 = vector.broadcast %930 : f32 to vector<14x128xf32>
      %1028 = arith.mulf %1027, %54 : vector<14x128xf32>
      %1029 = arith.addf %1026, %1028 : vector<14x128xf32>
      %1030 = vector.broadcast %931 : f32 to vector<14x128xf32>
      %1031 = arith.mulf %1030, %62 : vector<14x128xf32>
      %1032 = arith.addf %1029, %1031 : vector<14x128xf32>
      %1033 = vector.broadcast %932 : f32 to vector<14x128xf32>
      %1034 = arith.mulf %1033, %66 : vector<14x128xf32>
      %1035 = arith.addf %1032, %1034 : vector<14x128xf32>
      %1036 = vector.broadcast %933 : f32 to vector<14x128xf32>
      %1037 = arith.mulf %1036, %70 : vector<14x128xf32>
      %1038 = arith.addf %1035, %1037 : vector<14x128xf32>
      %1039 = arith.maximumf %1012, %1038 : vector<14x128xf32>
      %1040 = arith.maximumf %986, %1039 : vector<14x128xf32>
      %c7_227 = arith.constant 7 : index
      %1041 = memref.load %arg2[%c7_227] : memref<16xf32, #tpu.memory_space<smem>>
      %1042 = vector.broadcast %1041 : f32 to vector<14x128xf32>
      %1043 = arith.addf %1040, %1042 : vector<14x128xf32>
      %cst_228 = arith.constant 0.000000e+00 : f32
      %1044 = vector.broadcast %cst_228 : f32 to vector<14x128xf32>
      %1045 = arith.maximumf %1043, %1044 : vector<14x128xf32>
      %c112 = arith.constant 112 : index
      %c0_229 = arith.constant 0 : index
      %1046 = vector.load %arg7[%c112, %c0_229] : memref<256x128xf32, #tpu.memory_space<vmem>>, vector<14x128xf32>
      tpu.vector_store %arg7[%c112, %c0_229], %1045 {strides = array<i32>} : memref<256x128xf32, #tpu.memory_space<vmem>>, vector<14x128xf32>,
      %c8_230 = arith.constant 8 : index
      %c0_231 = arith.constant 0 : index
      %1047 = memref.load %arg1[%c8_230, %c0_231] : memref<16x9xf32, #tpu.memory_space<smem>>
      %c8_232 = arith.constant 8 : index
      %c1_233 = arith.constant 1 : index
      %1048 = memref.load %arg1[%c8_232, %c1_233] : memref<16x9xf32, #tpu.memory_space<smem>>
      %c8_234 = arith.constant 8 : index
      %c2_235 = arith.constant 2 : index
      %1049 = memref.load %arg1[%c8_234, %c2_235] : memref<16x9xf32, #tpu.memory_space<smem>>
      %c8_236 = arith.constant 8 : index
      %c3_237 = arith.constant 3 : index
      %1050 = memref.load %arg1[%c8_236, %c3_237] : memref<16x9xf32, #tpu.memory_space<smem>>
      %c8_238 = arith.constant 8 : index
      %c4_239 = arith.constant 4 : index
      %1051 = memref.load %arg1[%c8_238, %c4_239] : memref<16x9xf32, #tpu.memory_space<smem>>
      %c8_240 = arith.constant 8 : index
      %c5_241 = arith.constant 5 : index
      %1052 = memref.load %arg1[%c8_240, %c5_241] : memref<16x9xf32, #tpu.memory_space<smem>>
      %c8_242 = arith.constant 8 : index
      %c6_243 = arith.constant 6 : index
      %1053 = memref.load %arg1[%c8_242, %c6_243] : memref<16x9xf32, #tpu.memory_space<smem>>
      %c8_244 = arith.constant 8 : index
      %c7_245 = arith.constant 7 : index
      %1054 = memref.load %arg1[%c8_244, %c7_245] : memref<16x9xf32, #tpu.memory_space<smem>>
      %c8_246 = arith.constant 8 : index
      %c8_247 = arith.constant 8 : index
      %1055 = memref.load %arg1[%c8_246, %c8_247] : memref<16x9xf32, #tpu.memory_space<smem>>
      %1056 = vector.broadcast %1047 : f32 to vector<14x128xf32>
      %1057 = arith.mulf %1056, %10 : vector<14x128xf32>
      %1058 = vector.broadcast %1048 : f32 to vector<14x128xf32>
      %1059 = arith.mulf %1058, %14 : vector<14x128xf32>
      %1060 = arith.addf %1057, %1059 : vector<14x128xf32>
      %1061 = vector.broadcast %1049 : f32 to vector<14x128xf32>
      %1062 = arith.mulf %1061, %18 : vector<14x128xf32>
      %1063 = arith.addf %1060, %1062 : vector<14x128xf32>
      %1064 = vector.broadcast %1050 : f32 to vector<14x128xf32>
      %1065 = arith.mulf %1064, %26 : vector<14x128xf32>
      %1066 = arith.addf %1063, %1065 : vector<14x128xf32>
      %1067 = vector.broadcast %1051 : f32 to vector<14x128xf32>
      %1068 = arith.mulf %1067, %30 : vector<14x128xf32>
      %1069 = arith.addf %1066, %1068 : vector<14x128xf32>
      %1070 = vector.broadcast %1052 : f32 to vector<14x128xf32>
      %1071 = arith.mulf %1070, %34 : vector<14x128xf32>
      %1072 = arith.addf %1069, %1071 : vector<14x128xf32>
      %1073 = vector.broadcast %1053 : f32 to vector<14x128xf32>
      %1074 = arith.mulf %1073, %42 : vector<14x128xf32>
      %1075 = arith.addf %1072, %1074 : vector<14x128xf32>
      %1076 = vector.broadcast %1054 : f32 to vector<14x128xf32>
      %1077 = arith.mulf %1076, %46 : vector<14x128xf32>
      %1078 = arith.addf %1075, %1077 : vector<14x128xf32>
      %1079 = vector.broadcast %1055 : f32 to vector<14x128xf32>
      %1080 = arith.mulf %1079, %50 : vector<14x128xf32>
      %1081 = arith.addf %1078, %1080 : vector<14x128xf32>
      %1082 = vector.broadcast %1047 : f32 to vector<14x128xf32>
      %1083 = arith.mulf %1082, %14 : vector<14x128xf32>
      %1084 = vector.broadcast %1048 : f32 to vector<14x128xf32>
      %1085 = arith.mulf %1084, %18 : vector<14x128xf32>
      %1086 = arith.addf %1083, %1085 : vector<14x128xf32>
      %1087 = vector.broadcast %1049 : f32 to vector<14x128xf32>
      %1088 = arith.mulf %1087, %22 : vector<14x128xf32>
      %1089 = arith.addf %1086, %1088 : vector<14x128xf32>
      %1090 = vector.broadcast %1050 : f32 to vector<14x128xf32>
      %1091 = arith.mulf %1090, %30 : vector<14x128xf32>
      %1092 = arith.addf %1089, %1091 : vector<14x128xf32>
      %1093 = vector.broadcast %1051 : f32 to vector<14x128xf32>
      %1094 = arith.mulf %1093, %34 : vector<14x128xf32>
      %1095 = arith.addf %1092, %1094 : vector<14x128xf32>
      %1096 = vector.broadcast %1052 : f32 to vector<14x128xf32>
      %1097 = arith.mulf %1096, %38 : vector<14x128xf32>
      %1098 = arith.addf %1095, %1097 : vector<14x128xf32>
      %1099 = vector.broadcast %1053 : f32 to vector<14x128xf32>
      %1100 = arith.mulf %1099, %46 : vector<14x128xf32>
      %1101 = arith.addf %1098, %1100 : vector<14x128xf32>
      %1102 = vector.broadcast %1054 : f32 to vector<14x128xf32>
      %1103 = arith.mulf %1102, %50 : vector<14x128xf32>
      %1104 = arith.addf %1101, %1103 : vector<14x128xf32>
      %1105 = vector.broadcast %1055 : f32 to vector<14x128xf32>
      %1106 = arith.mulf %1105, %54 : vector<14x128xf32>
      %1107 = arith.addf %1104, %1106 : vector<14x128xf32>
      %1108 = arith.maximumf %1081, %1107 : vector<14x128xf32>
      %1109 = vector.broadcast %1047 : f32 to vector<14x128xf32>
      %1110 = arith.mulf %1109, %26 : vector<14x128xf32>
      %1111 = vector.broadcast %1048 : f32 to vector<14x128xf32>
      %1112 = arith.mulf %1111, %30 : vector<14x128xf32>
      %1113 = arith.addf %1110, %1112 : vector<14x128xf32>
      %1114 = vector.broadcast %1049 : f32 to vector<14x128xf32>
      %1115 = arith.mulf %1114, %34 : vector<14x128xf32>
      %1116 = arith.addf %1113, %1115 : vector<14x128xf32>
      %1117 = vector.broadcast %1050 : f32 to vector<14x128xf32>
      %1118 = arith.mulf %1117, %42 : vector<14x128xf32>
      %1119 = arith.addf %1116, %1118 : vector<14x128xf32>
      %1120 = vector.broadcast %1051 : f32 to vector<14x128xf32>
      %1121 = arith.mulf %1120, %46 : vector<14x128xf32>
      %1122 = arith.addf %1119, %1121 : vector<14x128xf32>
      %1123 = vector.broadcast %1052 : f32 to vector<14x128xf32>
      %1124 = arith.mulf %1123, %50 : vector<14x128xf32>
      %1125 = arith.addf %1122, %1124 : vector<14x128xf32>
      %1126 = vector.broadcast %1053 : f32 to vector<14x128xf32>
      %1127 = arith.mulf %1126, %58 : vector<14x128xf32>
      %1128 = arith.addf %1125, %1127 : vector<14x128xf32>
      %1129 = vector.broadcast %1054 : f32 to vector<14x128xf32>
      %1130 = arith.mulf %1129, %62 : vector<14x128xf32>
      %1131 = arith.addf %1128, %1130 : vector<14x128xf32>
      %1132 = vector.broadcast %1055 : f32 to vector<14x128xf32>
      %1133 = arith.mulf %1132, %66 : vector<14x128xf32>
      %1134 = arith.addf %1131, %1133 : vector<14x128xf32>
      %1135 = vector.broadcast %1047 : f32 to vector<14x128xf32>
      %1136 = arith.mulf %1135, %30 : vector<14x128xf32>
      %1137 = vector.broadcast %1048 : f32 to vector<14x128xf32>
      %1138 = arith.mulf %1137, %34 : vector<14x128xf32>
      %1139 = arith.addf %1136, %1138 : vector<14x128xf32>
      %1140 = vector.broadcast %1049 : f32 to vector<14x128xf32>
      %1141 = arith.mulf %1140, %38 : vector<14x128xf32>
      %1142 = arith.addf %1139, %1141 : vector<14x128xf32>
      %1143 = vector.broadcast %1050 : f32 to vector<14x128xf32>
      %1144 = arith.mulf %1143, %46 : vector<14x128xf32>
      %1145 = arith.addf %1142, %1144 : vector<14x128xf32>
      %1146 = vector.broadcast %1051 : f32 to vector<14x128xf32>
      %1147 = arith.mulf %1146, %50 : vector<14x128xf32>
      %1148 = arith.addf %1145, %1147 : vector<14x128xf32>
      %1149 = vector.broadcast %1052 : f32 to vector<14x128xf32>
      %1150 = arith.mulf %1149, %54 : vector<14x128xf32>
      %1151 = arith.addf %1148, %1150 : vector<14x128xf32>
      %1152 = vector.broadcast %1053 : f32 to vector<14x128xf32>
      %1153 = arith.mulf %1152, %62 : vector<14x128xf32>
      %1154 = arith.addf %1151, %1153 : vector<14x128xf32>
      %1155 = vector.broadcast %1054 : f32 to vector<14x128xf32>
      %1156 = arith.mulf %1155, %66 : vector<14x128xf32>
      %1157 = arith.addf %1154, %1156 : vector<14x128xf32>
      %1158 = vector.broadcast %1055 : f32 to vector<14x128xf32>
      %1159 = arith.mulf %1158, %70 : vector<14x128xf32>
      %1160 = arith.addf %1157, %1159 : vector<14x128xf32>
      %1161 = arith.maximumf %1134, %1160 : vector<14x128xf32>
      %1162 = arith.maximumf %1108, %1161 : vector<14x128xf32>
      %c8_248 = arith.constant 8 : index
      %1163 = memref.load %arg2[%c8_248] : memref<16xf32, #tpu.memory_space<smem>>
      %1164 = vector.broadcast %1163 : f32 to vector<14x128xf32>
      %1165 = arith.addf %1162, %1164 : vector<14x128xf32>
      %cst_249 = arith.constant 0.000000e+00 : f32
      %1166 = vector.broadcast %cst_249 : f32 to vector<14x128xf32>
      %1167 = arith.maximumf %1165, %1166 : vector<14x128xf32>
      %c128 = arith.constant 128 : index
      %c0_250 = arith.constant 0 : index
      %1168 = vector.load %arg7[%c128, %c0_250] : memref<256x128xf32, #tpu.memory_space<vmem>>, vector<14x128xf32>
      tpu.vector_store %arg7[%c128, %c0_250], %1167 {strides = array<i32>} : memref<256x128xf32, #tpu.memory_space<vmem>>, vector<14x128xf32>,
      %c9 = arith.constant 9 : index
      %c0_251 = arith.constant 0 : index
      %1169 = memref.load %arg1[%c9, %c0_251] : memref<16x9xf32, #tpu.memory_space<smem>>
      %c9_252 = arith.constant 9 : index
      %c1_253 = arith.constant 1 : index
      %1170 = memref.load %arg1[%c9_252, %c1_253] : memref<16x9xf32, #tpu.memory_space<smem>>
      %c9_254 = arith.constant 9 : index
      %c2_255 = arith.constant 2 : index
      %1171 = memref.load %arg1[%c9_254, %c2_255] : memref<16x9xf32, #tpu.memory_space<smem>>
      %c9_256 = arith.constant 9 : index
      %c3_257 = arith.constant 3 : index
      %1172 = memref.load %arg1[%c9_256, %c3_257] : memref<16x9xf32, #tpu.memory_space<smem>>
      %c9_258 = arith.constant 9 : index
      %c4_259 = arith.constant 4 : index
      %1173 = memref.load %arg1[%c9_258, %c4_259] : memref<16x9xf32, #tpu.memory_space<smem>>
      %c9_260 = arith.constant 9 : index
      %c5_261 = arith.constant 5 : index
      %1174 = memref.load %arg1[%c9_260, %c5_261] : memref<16x9xf32, #tpu.memory_space<smem>>
      %c9_262 = arith.constant 9 : index
      %c6_263 = arith.constant 6 : index
      %1175 = memref.load %arg1[%c9_262, %c6_263] : memref<16x9xf32, #tpu.memory_space<smem>>
      %c9_264 = arith.constant 9 : index
      %c7_265 = arith.constant 7 : index
      %1176 = memref.load %arg1[%c9_264, %c7_265] : memref<16x9xf32, #tpu.memory_space<smem>>
      %c9_266 = arith.constant 9 : index
      %c8_267 = arith.constant 8 : index
      %1177 = memref.load %arg1[%c9_266, %c8_267] : memref<16x9xf32, #tpu.memory_space<smem>>
      %1178 = vector.broadcast %1169 : f32 to vector<14x128xf32>
      %1179 = arith.mulf %1178, %10 : vector<14x128xf32>
      %1180 = vector.broadcast %1170 : f32 to vector<14x128xf32>
      %1181 = arith.mulf %1180, %14 : vector<14x128xf32>
      %1182 = arith.addf %1179, %1181 : vector<14x128xf32>
      %1183 = vector.broadcast %1171 : f32 to vector<14x128xf32>
      %1184 = arith.mulf %1183, %18 : vector<14x128xf32>
      %1185 = arith.addf %1182, %1184 : vector<14x128xf32>
      %1186 = vector.broadcast %1172 : f32 to vector<14x128xf32>
      %1187 = arith.mulf %1186, %26 : vector<14x128xf32>
      %1188 = arith.addf %1185, %1187 : vector<14x128xf32>
      %1189 = vector.broadcast %1173 : f32 to vector<14x128xf32>
      %1190 = arith.mulf %1189, %30 : vector<14x128xf32>
      %1191 = arith.addf %1188, %1190 : vector<14x128xf32>
      %1192 = vector.broadcast %1174 : f32 to vector<14x128xf32>
      %1193 = arith.mulf %1192, %34 : vector<14x128xf32>
      %1194 = arith.addf %1191, %1193 : vector<14x128xf32>
      %1195 = vector.broadcast %1175 : f32 to vector<14x128xf32>
      %1196 = arith.mulf %1195, %42 : vector<14x128xf32>
      %1197 = arith.addf %1194, %1196 : vector<14x128xf32>
      %1198 = vector.broadcast %1176 : f32 to vector<14x128xf32>
      %1199 = arith.mulf %1198, %46 : vector<14x128xf32>
      %1200 = arith.addf %1197, %1199 : vector<14x128xf32>
      %1201 = vector.broadcast %1177 : f32 to vector<14x128xf32>
      %1202 = arith.mulf %1201, %50 : vector<14x128xf32>
      %1203 = arith.addf %1200, %1202 : vector<14x128xf32>
      %1204 = vector.broadcast %1169 : f32 to vector<14x128xf32>
      %1205 = arith.mulf %1204, %14 : vector<14x128xf32>
      %1206 = vector.broadcast %1170 : f32 to vector<14x128xf32>
      %1207 = arith.mulf %1206, %18 : vector<14x128xf32>
      %1208 = arith.addf %1205, %1207 : vector<14x128xf32>
      %1209 = vector.broadcast %1171 : f32 to vector<14x128xf32>
      %1210 = arith.mulf %1209, %22 : vector<14x128xf32>
      %1211 = arith.addf %1208, %1210 : vector<14x128xf32>
      %1212 = vector.broadcast %1172 : f32 to vector<14x128xf32>
      %1213 = arith.mulf %1212, %30 : vector<14x128xf32>
      %1214 = arith.addf %1211, %1213 : vector<14x128xf32>
      %1215 = vector.broadcast %1173 : f32 to vector<14x128xf32>
      %1216 = arith.mulf %1215, %34 : vector<14x128xf32>
      %1217 = arith.addf %1214, %1216 : vector<14x128xf32>
      %1218 = vector.broadcast %1174 : f32 to vector<14x128xf32>
      %1219 = arith.mulf %1218, %38 : vector<14x128xf32>
      %1220 = arith.addf %1217, %1219 : vector<14x128xf32>
      %1221 = vector.broadcast %1175 : f32 to vector<14x128xf32>
      %1222 = arith.mulf %1221, %46 : vector<14x128xf32>
      %1223 = arith.addf %1220, %1222 : vector<14x128xf32>
      %1224 = vector.broadcast %1176 : f32 to vector<14x128xf32>
      %1225 = arith.mulf %1224, %50 : vector<14x128xf32>
      %1226 = arith.addf %1223, %1225 : vector<14x128xf32>
      %1227 = vector.broadcast %1177 : f32 to vector<14x128xf32>
      %1228 = arith.mulf %1227, %54 : vector<14x128xf32>
      %1229 = arith.addf %1226, %1228 : vector<14x128xf32>
      %1230 = arith.maximumf %1203, %1229 : vector<14x128xf32>
      %1231 = vector.broadcast %1169 : f32 to vector<14x128xf32>
      %1232 = arith.mulf %1231, %26 : vector<14x128xf32>
      %1233 = vector.broadcast %1170 : f32 to vector<14x128xf32>
      %1234 = arith.mulf %1233, %30 : vector<14x128xf32>
      %1235 = arith.addf %1232, %1234 : vector<14x128xf32>
      %1236 = vector.broadcast %1171 : f32 to vector<14x128xf32>
      %1237 = arith.mulf %1236, %34 : vector<14x128xf32>
      %1238 = arith.addf %1235, %1237 : vector<14x128xf32>
      %1239 = vector.broadcast %1172 : f32 to vector<14x128xf32>
      %1240 = arith.mulf %1239, %42 : vector<14x128xf32>
      %1241 = arith.addf %1238, %1240 : vector<14x128xf32>
      %1242 = vector.broadcast %1173 : f32 to vector<14x128xf32>
      %1243 = arith.mulf %1242, %46 : vector<14x128xf32>
      %1244 = arith.addf %1241, %1243 : vector<14x128xf32>
      %1245 = vector.broadcast %1174 : f32 to vector<14x128xf32>
      %1246 = arith.mulf %1245, %50 : vector<14x128xf32>
      %1247 = arith.addf %1244, %1246 : vector<14x128xf32>
      %1248 = vector.broadcast %1175 : f32 to vector<14x128xf32>
      %1249 = arith.mulf %1248, %58 : vector<14x128xf32>
      %1250 = arith.addf %1247, %1249 : vector<14x128xf32>
      %1251 = vector.broadcast %1176 : f32 to vector<14x128xf32>
      %1252 = arith.mulf %1251, %62 : vector<14x128xf32>
      %1253 = arith.addf %1250, %1252 : vector<14x128xf32>
      %1254 = vector.broadcast %1177 : f32 to vector<14x128xf32>
      %1255 = arith.mulf %1254, %66 : vector<14x128xf32>
      %1256 = arith.addf %1253, %1255 : vector<14x128xf32>
      %1257 = vector.broadcast %1169 : f32 to vector<14x128xf32>
      %1258 = arith.mulf %1257, %30 : vector<14x128xf32>
      %1259 = vector.broadcast %1170 : f32 to vector<14x128xf32>
      %1260 = arith.mulf %1259, %34 : vector<14x128xf32>
      %1261 = arith.addf %1258, %1260 : vector<14x128xf32>
      %1262 = vector.broadcast %1171 : f32 to vector<14x128xf32>
      %1263 = arith.mulf %1262, %38 : vector<14x128xf32>
      %1264 = arith.addf %1261, %1263 : vector<14x128xf32>
      %1265 = vector.broadcast %1172 : f32 to vector<14x128xf32>
      %1266 = arith.mulf %1265, %46 : vector<14x128xf32>
      %1267 = arith.addf %1264, %1266 : vector<14x128xf32>
      %1268 = vector.broadcast %1173 : f32 to vector<14x128xf32>
      %1269 = arith.mulf %1268, %50 : vector<14x128xf32>
      %1270 = arith.addf %1267, %1269 : vector<14x128xf32>
      %1271 = vector.broadcast %1174 : f32 to vector<14x128xf32>
      %1272 = arith.mulf %1271, %54 : vector<14x128xf32>
      %1273 = arith.addf %1270, %1272 : vector<14x128xf32>
      %1274 = vector.broadcast %1175 : f32 to vector<14x128xf32>
      %1275 = arith.mulf %1274, %62 : vector<14x128xf32>
      %1276 = arith.addf %1273, %1275 : vector<14x128xf32>
      %1277 = vector.broadcast %1176 : f32 to vector<14x128xf32>
      %1278 = arith.mulf %1277, %66 : vector<14x128xf32>
      %1279 = arith.addf %1276, %1278 : vector<14x128xf32>
      %1280 = vector.broadcast %1177 : f32 to vector<14x128xf32>
      %1281 = arith.mulf %1280, %70 : vector<14x128xf32>
      %1282 = arith.addf %1279, %1281 : vector<14x128xf32>
      %1283 = arith.maximumf %1256, %1282 : vector<14x128xf32>
      %1284 = arith.maximumf %1230, %1283 : vector<14x128xf32>
      %c9_268 = arith.constant 9 : index
      %1285 = memref.load %arg2[%c9_268] : memref<16xf32, #tpu.memory_space<smem>>
      %1286 = vector.broadcast %1285 : f32 to vector<14x128xf32>
      %1287 = arith.addf %1284, %1286 : vector<14x128xf32>
      %cst_269 = arith.constant 0.000000e+00 : f32
      %1288 = vector.broadcast %cst_269 : f32 to vector<14x128xf32>
      %1289 = arith.maximumf %1287, %1288 : vector<14x128xf32>
      %c144 = arith.constant 144 : index
      %c0_270 = arith.constant 0 : index
      %1290 = vector.load %arg7[%c144, %c0_270] : memref<256x128xf32, #tpu.memory_space<vmem>>, vector<14x128xf32>
      tpu.vector_store %arg7[%c144, %c0_270], %1289 {strides = array<i32>} : memref<256x128xf32, #tpu.memory_space<vmem>>, vector<14x128xf32>,
      %c10 = arith.constant 10 : index
      %c0_271 = arith.constant 0 : index
      %1291 = memref.load %arg1[%c10, %c0_271] : memref<16x9xf32, #tpu.memory_space<smem>>
      %c10_272 = arith.constant 10 : index
      %c1_273 = arith.constant 1 : index
      %1292 = memref.load %arg1[%c10_272, %c1_273] : memref<16x9xf32, #tpu.memory_space<smem>>
      %c10_274 = arith.constant 10 : index
      %c2_275 = arith.constant 2 : index
      %1293 = memref.load %arg1[%c10_274, %c2_275] : memref<16x9xf32, #tpu.memory_space<smem>>
      %c10_276 = arith.constant 10 : index
      %c3_277 = arith.constant 3 : index
      %1294 = memref.load %arg1[%c10_276, %c3_277] : memref<16x9xf32, #tpu.memory_space<smem>>
      %c10_278 = arith.constant 10 : index
      %c4_279 = arith.constant 4 : index
      %1295 = memref.load %arg1[%c10_278, %c4_279] : memref<16x9xf32, #tpu.memory_space<smem>>
      %c10_280 = arith.constant 10 : index
      %c5_281 = arith.constant 5 : index
      %1296 = memref.load %arg1[%c10_280, %c5_281] : memref<16x9xf32, #tpu.memory_space<smem>>
      %c10_282 = arith.constant 10 : index
      %c6_283 = arith.constant 6 : index
      %1297 = memref.load %arg1[%c10_282, %c6_283] : memref<16x9xf32, #tpu.memory_space<smem>>
      %c10_284 = arith.constant 10 : index
      %c7_285 = arith.constant 7 : index
      %1298 = memref.load %arg1[%c10_284, %c7_285] : memref<16x9xf32, #tpu.memory_space<smem>>
      %c10_286 = arith.constant 10 : index
      %c8_287 = arith.constant 8 : index
      %1299 = memref.load %arg1[%c10_286, %c8_287] : memref<16x9xf32, #tpu.memory_space<smem>>
      %1300 = vector.broadcast %1291 : f32 to vector<14x128xf32>
      %1301 = arith.mulf %1300, %10 : vector<14x128xf32>
      %1302 = vector.broadcast %1292 : f32 to vector<14x128xf32>
      %1303 = arith.mulf %1302, %14 : vector<14x128xf32>
      %1304 = arith.addf %1301, %1303 : vector<14x128xf32>
      %1305 = vector.broadcast %1293 : f32 to vector<14x128xf32>
      %1306 = arith.mulf %1305, %18 : vector<14x128xf32>
      %1307 = arith.addf %1304, %1306 : vector<14x128xf32>
      %1308 = vector.broadcast %1294 : f32 to vector<14x128xf32>
      %1309 = arith.mulf %1308, %26 : vector<14x128xf32>
      %1310 = arith.addf %1307, %1309 : vector<14x128xf32>
      %1311 = vector.broadcast %1295 : f32 to vector<14x128xf32>
      %1312 = arith.mulf %1311, %30 : vector<14x128xf32>
      %1313 = arith.addf %1310, %1312 : vector<14x128xf32>
      %1314 = vector.broadcast %1296 : f32 to vector<14x128xf32>
      %1315 = arith.mulf %1314, %34 : vector<14x128xf32>
      %1316 = arith.addf %1313, %1315 : vector<14x128xf32>
      %1317 = vector.broadcast %1297 : f32 to vector<14x128xf32>
      %1318 = arith.mulf %1317, %42 : vector<14x128xf32>
      %1319 = arith.addf %1316, %1318 : vector<14x128xf32>
      %1320 = vector.broadcast %1298 : f32 to vector<14x128xf32>
      %1321 = arith.mulf %1320, %46 : vector<14x128xf32>
      %1322 = arith.addf %1319, %1321 : vector<14x128xf32>
      %1323 = vector.broadcast %1299 : f32 to vector<14x128xf32>
      %1324 = arith.mulf %1323, %50 : vector<14x128xf32>
      %1325 = arith.addf %1322, %1324 : vector<14x128xf32>
      %1326 = vector.broadcast %1291 : f32 to vector<14x128xf32>
      %1327 = arith.mulf %1326, %14 : vector<14x128xf32>
      %1328 = vector.broadcast %1292 : f32 to vector<14x128xf32>
      %1329 = arith.mulf %1328, %18 : vector<14x128xf32>
      %1330 = arith.addf %1327, %1329 : vector<14x128xf32>
      %1331 = vector.broadcast %1293 : f32 to vector<14x128xf32>
      %1332 = arith.mulf %1331, %22 : vector<14x128xf32>
      %1333 = arith.addf %1330, %1332 : vector<14x128xf32>
      %1334 = vector.broadcast %1294 : f32 to vector<14x128xf32>
      %1335 = arith.mulf %1334, %30 : vector<14x128xf32>
      %1336 = arith.addf %1333, %1335 : vector<14x128xf32>
      %1337 = vector.broadcast %1295 : f32 to vector<14x128xf32>
      %1338 = arith.mulf %1337, %34 : vector<14x128xf32>
      %1339 = arith.addf %1336, %1338 : vector<14x128xf32>
      %1340 = vector.broadcast %1296 : f32 to vector<14x128xf32>
      %1341 = arith.mulf %1340, %38 : vector<14x128xf32>
      %1342 = arith.addf %1339, %1341 : vector<14x128xf32>
      %1343 = vector.broadcast %1297 : f32 to vector<14x128xf32>
      %1344 = arith.mulf %1343, %46 : vector<14x128xf32>
      %1345 = arith.addf %1342, %1344 : vector<14x128xf32>
      %1346 = vector.broadcast %1298 : f32 to vector<14x128xf32>
      %1347 = arith.mulf %1346, %50 : vector<14x128xf32>
      %1348 = arith.addf %1345, %1347 : vector<14x128xf32>
      %1349 = vector.broadcast %1299 : f32 to vector<14x128xf32>
      %1350 = arith.mulf %1349, %54 : vector<14x128xf32>
      %1351 = arith.addf %1348, %1350 : vector<14x128xf32>
      %1352 = arith.maximumf %1325, %1351 : vector<14x128xf32>
      %1353 = vector.broadcast %1291 : f32 to vector<14x128xf32>
      %1354 = arith.mulf %1353, %26 : vector<14x128xf32>
      %1355 = vector.broadcast %1292 : f32 to vector<14x128xf32>
      %1356 = arith.mulf %1355, %30 : vector<14x128xf32>
      %1357 = arith.addf %1354, %1356 : vector<14x128xf32>
      %1358 = vector.broadcast %1293 : f32 to vector<14x128xf32>
      %1359 = arith.mulf %1358, %34 : vector<14x128xf32>
      %1360 = arith.addf %1357, %1359 : vector<14x128xf32>
      %1361 = vector.broadcast %1294 : f32 to vector<14x128xf32>
      %1362 = arith.mulf %1361, %42 : vector<14x128xf32>
      %1363 = arith.addf %1360, %1362 : vector<14x128xf32>
      %1364 = vector.broadcast %1295 : f32 to vector<14x128xf32>
      %1365 = arith.mulf %1364, %46 : vector<14x128xf32>
      %1366 = arith.addf %1363, %1365 : vector<14x128xf32>
      %1367 = vector.broadcast %1296 : f32 to vector<14x128xf32>
      %1368 = arith.mulf %1367, %50 : vector<14x128xf32>
      %1369 = arith.addf %1366, %1368 : vector<14x128xf32>
      %1370 = vector.broadcast %1297 : f32 to vector<14x128xf32>
      %1371 = arith.mulf %1370, %58 : vector<14x128xf32>
      %1372 = arith.addf %1369, %1371 : vector<14x128xf32>
      %1373 = vector.broadcast %1298 : f32 to vector<14x128xf32>
      %1374 = arith.mulf %1373, %62 : vector<14x128xf32>
      %1375 = arith.addf %1372, %1374 : vector<14x128xf32>
      %1376 = vector.broadcast %1299 : f32 to vector<14x128xf32>
      %1377 = arith.mulf %1376, %66 : vector<14x128xf32>
      %1378 = arith.addf %1375, %1377 : vector<14x128xf32>
      %1379 = vector.broadcast %1291 : f32 to vector<14x128xf32>
      %1380 = arith.mulf %1379, %30 : vector<14x128xf32>
      %1381 = vector.broadcast %1292 : f32 to vector<14x128xf32>
      %1382 = arith.mulf %1381, %34 : vector<14x128xf32>
      %1383 = arith.addf %1380, %1382 : vector<14x128xf32>
      %1384 = vector.broadcast %1293 : f32 to vector<14x128xf32>
      %1385 = arith.mulf %1384, %38 : vector<14x128xf32>
      %1386 = arith.addf %1383, %1385 : vector<14x128xf32>
      %1387 = vector.broadcast %1294 : f32 to vector<14x128xf32>
      %1388 = arith.mulf %1387, %46 : vector<14x128xf32>
      %1389 = arith.addf %1386, %1388 : vector<14x128xf32>
      %1390 = vector.broadcast %1295 : f32 to vector<14x128xf32>
      %1391 = arith.mulf %1390, %50 : vector<14x128xf32>
      %1392 = arith.addf %1389, %1391 : vector<14x128xf32>
      %1393 = vector.broadcast %1296 : f32 to vector<14x128xf32>
      %1394 = arith.mulf %1393, %54 : vector<14x128xf32>
      %1395 = arith.addf %1392, %1394 : vector<14x128xf32>
      %1396 = vector.broadcast %1297 : f32 to vector<14x128xf32>
      %1397 = arith.mulf %1396, %62 : vector<14x128xf32>
      %1398 = arith.addf %1395, %1397 : vector<14x128xf32>
      %1399 = vector.broadcast %1298 : f32 to vector<14x128xf32>
      %1400 = arith.mulf %1399, %66 : vector<14x128xf32>
      %1401 = arith.addf %1398, %1400 : vector<14x128xf32>
      %1402 = vector.broadcast %1299 : f32 to vector<14x128xf32>
      %1403 = arith.mulf %1402, %70 : vector<14x128xf32>
      %1404 = arith.addf %1401, %1403 : vector<14x128xf32>
      %1405 = arith.maximumf %1378, %1404 : vector<14x128xf32>
      %1406 = arith.maximumf %1352, %1405 : vector<14x128xf32>
      %c10_288 = arith.constant 10 : index
      %1407 = memref.load %arg2[%c10_288] : memref<16xf32, #tpu.memory_space<smem>>
      %1408 = vector.broadcast %1407 : f32 to vector<14x128xf32>
      %1409 = arith.addf %1406, %1408 : vector<14x128xf32>
      %cst_289 = arith.constant 0.000000e+00 : f32
      %1410 = vector.broadcast %cst_289 : f32 to vector<14x128xf32>
      %1411 = arith.maximumf %1409, %1410 : vector<14x128xf32>
      %c160 = arith.constant 160 : index
      %c0_290 = arith.constant 0 : index
      %1412 = vector.load %arg7[%c160, %c0_290] : memref<256x128xf32, #tpu.memory_space<vmem>>, vector<14x128xf32>
      tpu.vector_store %arg7[%c160, %c0_290], %1411 {strides = array<i32>} : memref<256x128xf32, #tpu.memory_space<vmem>>, vector<14x128xf32>,
      %c11 = arith.constant 11 : index
      %c0_291 = arith.constant 0 : index
      %1413 = memref.load %arg1[%c11, %c0_291] : memref<16x9xf32, #tpu.memory_space<smem>>
      %c11_292 = arith.constant 11 : index
      %c1_293 = arith.constant 1 : index
      %1414 = memref.load %arg1[%c11_292, %c1_293] : memref<16x9xf32, #tpu.memory_space<smem>>
      %c11_294 = arith.constant 11 : index
      %c2_295 = arith.constant 2 : index
      %1415 = memref.load %arg1[%c11_294, %c2_295] : memref<16x9xf32, #tpu.memory_space<smem>>
      %c11_296 = arith.constant 11 : index
      %c3_297 = arith.constant 3 : index
      %1416 = memref.load %arg1[%c11_296, %c3_297] : memref<16x9xf32, #tpu.memory_space<smem>>
      %c11_298 = arith.constant 11 : index
      %c4_299 = arith.constant 4 : index
      %1417 = memref.load %arg1[%c11_298, %c4_299] : memref<16x9xf32, #tpu.memory_space<smem>>
      %c11_300 = arith.constant 11 : index
      %c5_301 = arith.constant 5 : index
      %1418 = memref.load %arg1[%c11_300, %c5_301] : memref<16x9xf32, #tpu.memory_space<smem>>
      %c11_302 = arith.constant 11 : index
      %c6_303 = arith.constant 6 : index
      %1419 = memref.load %arg1[%c11_302, %c6_303] : memref<16x9xf32, #tpu.memory_space<smem>>
      %c11_304 = arith.constant 11 : index
      %c7_305 = arith.constant 7 : index
      %1420 = memref.load %arg1[%c11_304, %c7_305] : memref<16x9xf32, #tpu.memory_space<smem>>
      %c11_306 = arith.constant 11 : index
      %c8_307 = arith.constant 8 : index
      %1421 = memref.load %arg1[%c11_306, %c8_307] : memref<16x9xf32, #tpu.memory_space<smem>>
      %1422 = vector.broadcast %1413 : f32 to vector<14x128xf32>
      %1423 = arith.mulf %1422, %10 : vector<14x128xf32>
      %1424 = vector.broadcast %1414 : f32 to vector<14x128xf32>
      %1425 = arith.mulf %1424, %14 : vector<14x128xf32>
      %1426 = arith.addf %1423, %1425 : vector<14x128xf32>
      %1427 = vector.broadcast %1415 : f32 to vector<14x128xf32>
      %1428 = arith.mulf %1427, %18 : vector<14x128xf32>
      %1429 = arith.addf %1426, %1428 : vector<14x128xf32>
      %1430 = vector.broadcast %1416 : f32 to vector<14x128xf32>
      %1431 = arith.mulf %1430, %26 : vector<14x128xf32>
      %1432 = arith.addf %1429, %1431 : vector<14x128xf32>
      %1433 = vector.broadcast %1417 : f32 to vector<14x128xf32>
      %1434 = arith.mulf %1433, %30 : vector<14x128xf32>
      %1435 = arith.addf %1432, %1434 : vector<14x128xf32>
      %1436 = vector.broadcast %1418 : f32 to vector<14x128xf32>
      %1437 = arith.mulf %1436, %34 : vector<14x128xf32>
      %1438 = arith.addf %1435, %1437 : vector<14x128xf32>
      %1439 = vector.broadcast %1419 : f32 to vector<14x128xf32>
      %1440 = arith.mulf %1439, %42 : vector<14x128xf32>
      %1441 = arith.addf %1438, %1440 : vector<14x128xf32>
      %1442 = vector.broadcast %1420 : f32 to vector<14x128xf32>
      %1443 = arith.mulf %1442, %46 : vector<14x128xf32>
      %1444 = arith.addf %1441, %1443 : vector<14x128xf32>
      %1445 = vector.broadcast %1421 : f32 to vector<14x128xf32>
      %1446 = arith.mulf %1445, %50 : vector<14x128xf32>
      %1447 = arith.addf %1444, %1446 : vector<14x128xf32>
      %1448 = vector.broadcast %1413 : f32 to vector<14x128xf32>
      %1449 = arith.mulf %1448, %14 : vector<14x128xf32>
      %1450 = vector.broadcast %1414 : f32 to vector<14x128xf32>
      %1451 = arith.mulf %1450, %18 : vector<14x128xf32>
      %1452 = arith.addf %1449, %1451 : vector<14x128xf32>
      %1453 = vector.broadcast %1415 : f32 to vector<14x128xf32>
      %1454 = arith.mulf %1453, %22 : vector<14x128xf32>
      %1455 = arith.addf %1452, %1454 : vector<14x128xf32>
      %1456 = vector.broadcast %1416 : f32 to vector<14x128xf32>
      %1457 = arith.mulf %1456, %30 : vector<14x128xf32>
      %1458 = arith.addf %1455, %1457 : vector<14x128xf32>
      %1459 = vector.broadcast %1417 : f32 to vector<14x128xf32>
      %1460 = arith.mulf %1459, %34 : vector<14x128xf32>
      %1461 = arith.addf %1458, %1460 : vector<14x128xf32>
      %1462 = vector.broadcast %1418 : f32 to vector<14x128xf32>
      %1463 = arith.mulf %1462, %38 : vector<14x128xf32>
      %1464 = arith.addf %1461, %1463 : vector<14x128xf32>
      %1465 = vector.broadcast %1419 : f32 to vector<14x128xf32>
      %1466 = arith.mulf %1465, %46 : vector<14x128xf32>
      %1467 = arith.addf %1464, %1466 : vector<14x128xf32>
      %1468 = vector.broadcast %1420 : f32 to vector<14x128xf32>
      %1469 = arith.mulf %1468, %50 : vector<14x128xf32>
      %1470 = arith.addf %1467, %1469 : vector<14x128xf32>
      %1471 = vector.broadcast %1421 : f32 to vector<14x128xf32>
      %1472 = arith.mulf %1471, %54 : vector<14x128xf32>
      %1473 = arith.addf %1470, %1472 : vector<14x128xf32>
      %1474 = arith.maximumf %1447, %1473 : vector<14x128xf32>
      %1475 = vector.broadcast %1413 : f32 to vector<14x128xf32>
      %1476 = arith.mulf %1475, %26 : vector<14x128xf32>
      %1477 = vector.broadcast %1414 : f32 to vector<14x128xf32>
      %1478 = arith.mulf %1477, %30 : vector<14x128xf32>
      %1479 = arith.addf %1476, %1478 : vector<14x128xf32>
      %1480 = vector.broadcast %1415 : f32 to vector<14x128xf32>
      %1481 = arith.mulf %1480, %34 : vector<14x128xf32>
      %1482 = arith.addf %1479, %1481 : vector<14x128xf32>
      %1483 = vector.broadcast %1416 : f32 to vector<14x128xf32>
      %1484 = arith.mulf %1483, %42 : vector<14x128xf32>
      %1485 = arith.addf %1482, %1484 : vector<14x128xf32>
      %1486 = vector.broadcast %1417 : f32 to vector<14x128xf32>
      %1487 = arith.mulf %1486, %46 : vector<14x128xf32>
      %1488 = arith.addf %1485, %1487 : vector<14x128xf32>
      %1489 = vector.broadcast %1418 : f32 to vector<14x128xf32>
      %1490 = arith.mulf %1489, %50 : vector<14x128xf32>
      %1491 = arith.addf %1488, %1490 : vector<14x128xf32>
      %1492 = vector.broadcast %1419 : f32 to vector<14x128xf32>
      %1493 = arith.mulf %1492, %58 : vector<14x128xf32>
      %1494 = arith.addf %1491, %1493 : vector<14x128xf32>
      %1495 = vector.broadcast %1420 : f32 to vector<14x128xf32>
      %1496 = arith.mulf %1495, %62 : vector<14x128xf32>
      %1497 = arith.addf %1494, %1496 : vector<14x128xf32>
      %1498 = vector.broadcast %1421 : f32 to vector<14x128xf32>
      %1499 = arith.mulf %1498, %66 : vector<14x128xf32>
      %1500 = arith.addf %1497, %1499 : vector<14x128xf32>
      %1501 = vector.broadcast %1413 : f32 to vector<14x128xf32>
      %1502 = arith.mulf %1501, %30 : vector<14x128xf32>
      %1503 = vector.broadcast %1414 : f32 to vector<14x128xf32>
      %1504 = arith.mulf %1503, %34 : vector<14x128xf32>
      %1505 = arith.addf %1502, %1504 : vector<14x128xf32>
      %1506 = vector.broadcast %1415 : f32 to vector<14x128xf32>
      %1507 = arith.mulf %1506, %38 : vector<14x128xf32>
      %1508 = arith.addf %1505, %1507 : vector<14x128xf32>
      %1509 = vector.broadcast %1416 : f32 to vector<14x128xf32>
      %1510 = arith.mulf %1509, %46 : vector<14x128xf32>
      %1511 = arith.addf %1508, %1510 : vector<14x128xf32>
      %1512 = vector.broadcast %1417 : f32 to vector<14x128xf32>
      %1513 = arith.mulf %1512, %50 : vector<14x128xf32>
      %1514 = arith.addf %1511, %1513 : vector<14x128xf32>
      %1515 = vector.broadcast %1418 : f32 to vector<14x128xf32>
      %1516 = arith.mulf %1515, %54 : vector<14x128xf32>
      %1517 = arith.addf %1514, %1516 : vector<14x128xf32>
      %1518 = vector.broadcast %1419 : f32 to vector<14x128xf32>
      %1519 = arith.mulf %1518, %62 : vector<14x128xf32>
      %1520 = arith.addf %1517, %1519 : vector<14x128xf32>
      %1521 = vector.broadcast %1420 : f32 to vector<14x128xf32>
      %1522 = arith.mulf %1521, %66 : vector<14x128xf32>
      %1523 = arith.addf %1520, %1522 : vector<14x128xf32>
      %1524 = vector.broadcast %1421 : f32 to vector<14x128xf32>
      %1525 = arith.mulf %1524, %70 : vector<14x128xf32>
      %1526 = arith.addf %1523, %1525 : vector<14x128xf32>
      %1527 = arith.maximumf %1500, %1526 : vector<14x128xf32>
      %1528 = arith.maximumf %1474, %1527 : vector<14x128xf32>
      %c11_308 = arith.constant 11 : index
      %1529 = memref.load %arg2[%c11_308] : memref<16xf32, #tpu.memory_space<smem>>
      %1530 = vector.broadcast %1529 : f32 to vector<14x128xf32>
      %1531 = arith.addf %1528, %1530 : vector<14x128xf32>
      %cst_309 = arith.constant 0.000000e+00 : f32
      %1532 = vector.broadcast %cst_309 : f32 to vector<14x128xf32>
      %1533 = arith.maximumf %1531, %1532 : vector<14x128xf32>
      %c176 = arith.constant 176 : index
      %c0_310 = arith.constant 0 : index
      %1534 = vector.load %arg7[%c176, %c0_310] : memref<256x128xf32, #tpu.memory_space<vmem>>, vector<14x128xf32>
      tpu.vector_store %arg7[%c176, %c0_310], %1533 {strides = array<i32>} : memref<256x128xf32, #tpu.memory_space<vmem>>, vector<14x128xf32>,
      %c12 = arith.constant 12 : index
      %c0_311 = arith.constant 0 : index
      %1535 = memref.load %arg1[%c12, %c0_311] : memref<16x9xf32, #tpu.memory_space<smem>>
      %c12_312 = arith.constant 12 : index
      %c1_313 = arith.constant 1 : index
      %1536 = memref.load %arg1[%c12_312, %c1_313] : memref<16x9xf32, #tpu.memory_space<smem>>
      %c12_314 = arith.constant 12 : index
      %c2_315 = arith.constant 2 : index
      %1537 = memref.load %arg1[%c12_314, %c2_315] : memref<16x9xf32, #tpu.memory_space<smem>>
      %c12_316 = arith.constant 12 : index
      %c3_317 = arith.constant 3 : index
      %1538 = memref.load %arg1[%c12_316, %c3_317] : memref<16x9xf32, #tpu.memory_space<smem>>
      %c12_318 = arith.constant 12 : index
      %c4_319 = arith.constant 4 : index
      %1539 = memref.load %arg1[%c12_318, %c4_319] : memref<16x9xf32, #tpu.memory_space<smem>>
      %c12_320 = arith.constant 12 : index
      %c5_321 = arith.constant 5 : index
      %1540 = memref.load %arg1[%c12_320, %c5_321] : memref<16x9xf32, #tpu.memory_space<smem>>
      %c12_322 = arith.constant 12 : index
      %c6_323 = arith.constant 6 : index
      %1541 = memref.load %arg1[%c12_322, %c6_323] : memref<16x9xf32, #tpu.memory_space<smem>>
      %c12_324 = arith.constant 12 : index
      %c7_325 = arith.constant 7 : index
      %1542 = memref.load %arg1[%c12_324, %c7_325] : memref<16x9xf32, #tpu.memory_space<smem>>
      %c12_326 = arith.constant 12 : index
      %c8_327 = arith.constant 8 : index
      %1543 = memref.load %arg1[%c12_326, %c8_327] : memref<16x9xf32, #tpu.memory_space<smem>>
      %1544 = vector.broadcast %1535 : f32 to vector<14x128xf32>
      %1545 = arith.mulf %1544, %10 : vector<14x128xf32>
      %1546 = vector.broadcast %1536 : f32 to vector<14x128xf32>
      %1547 = arith.mulf %1546, %14 : vector<14x128xf32>
      %1548 = arith.addf %1545, %1547 : vector<14x128xf32>
      %1549 = vector.broadcast %1537 : f32 to vector<14x128xf32>
      %1550 = arith.mulf %1549, %18 : vector<14x128xf32>
      %1551 = arith.addf %1548, %1550 : vector<14x128xf32>
      %1552 = vector.broadcast %1538 : f32 to vector<14x128xf32>
      %1553 = arith.mulf %1552, %26 : vector<14x128xf32>
      %1554 = arith.addf %1551, %1553 : vector<14x128xf32>
      %1555 = vector.broadcast %1539 : f32 to vector<14x128xf32>
      %1556 = arith.mulf %1555, %30 : vector<14x128xf32>
      %1557 = arith.addf %1554, %1556 : vector<14x128xf32>
      %1558 = vector.broadcast %1540 : f32 to vector<14x128xf32>
      %1559 = arith.mulf %1558, %34 : vector<14x128xf32>
      %1560 = arith.addf %1557, %1559 : vector<14x128xf32>
      %1561 = vector.broadcast %1541 : f32 to vector<14x128xf32>
      %1562 = arith.mulf %1561, %42 : vector<14x128xf32>
      %1563 = arith.addf %1560, %1562 : vector<14x128xf32>
      %1564 = vector.broadcast %1542 : f32 to vector<14x128xf32>
      %1565 = arith.mulf %1564, %46 : vector<14x128xf32>
      %1566 = arith.addf %1563, %1565 : vector<14x128xf32>
      %1567 = vector.broadcast %1543 : f32 to vector<14x128xf32>
      %1568 = arith.mulf %1567, %50 : vector<14x128xf32>
      %1569 = arith.addf %1566, %1568 : vector<14x128xf32>
      %1570 = vector.broadcast %1535 : f32 to vector<14x128xf32>
      %1571 = arith.mulf %1570, %14 : vector<14x128xf32>
      %1572 = vector.broadcast %1536 : f32 to vector<14x128xf32>
      %1573 = arith.mulf %1572, %18 : vector<14x128xf32>
      %1574 = arith.addf %1571, %1573 : vector<14x128xf32>
      %1575 = vector.broadcast %1537 : f32 to vector<14x128xf32>
      %1576 = arith.mulf %1575, %22 : vector<14x128xf32>
      %1577 = arith.addf %1574, %1576 : vector<14x128xf32>
      %1578 = vector.broadcast %1538 : f32 to vector<14x128xf32>
      %1579 = arith.mulf %1578, %30 : vector<14x128xf32>
      %1580 = arith.addf %1577, %1579 : vector<14x128xf32>
      %1581 = vector.broadcast %1539 : f32 to vector<14x128xf32>
      %1582 = arith.mulf %1581, %34 : vector<14x128xf32>
      %1583 = arith.addf %1580, %1582 : vector<14x128xf32>
      %1584 = vector.broadcast %1540 : f32 to vector<14x128xf32>
      %1585 = arith.mulf %1584, %38 : vector<14x128xf32>
      %1586 = arith.addf %1583, %1585 : vector<14x128xf32>
      %1587 = vector.broadcast %1541 : f32 to vector<14x128xf32>
      %1588 = arith.mulf %1587, %46 : vector<14x128xf32>
      %1589 = arith.addf %1586, %1588 : vector<14x128xf32>
      %1590 = vector.broadcast %1542 : f32 to vector<14x128xf32>
      %1591 = arith.mulf %1590, %50 : vector<14x128xf32>
      %1592 = arith.addf %1589, %1591 : vector<14x128xf32>
      %1593 = vector.broadcast %1543 : f32 to vector<14x128xf32>
      %1594 = arith.mulf %1593, %54 : vector<14x128xf32>
      %1595 = arith.addf %1592, %1594 : vector<14x128xf32>
      %1596 = arith.maximumf %1569, %1595 : vector<14x128xf32>
      %1597 = vector.broadcast %1535 : f32 to vector<14x128xf32>
      %1598 = arith.mulf %1597, %26 : vector<14x128xf32>
      %1599 = vector.broadcast %1536 : f32 to vector<14x128xf32>
      %1600 = arith.mulf %1599, %30 : vector<14x128xf32>
      %1601 = arith.addf %1598, %1600 : vector<14x128xf32>
      %1602 = vector.broadcast %1537 : f32 to vector<14x128xf32>
      %1603 = arith.mulf %1602, %34 : vector<14x128xf32>
      %1604 = arith.addf %1601, %1603 : vector<14x128xf32>
      %1605 = vector.broadcast %1538 : f32 to vector<14x128xf32>
      %1606 = arith.mulf %1605, %42 : vector<14x128xf32>
      %1607 = arith.addf %1604, %1606 : vector<14x128xf32>
      %1608 = vector.broadcast %1539 : f32 to vector<14x128xf32>
      %1609 = arith.mulf %1608, %46 : vector<14x128xf32>
      %1610 = arith.addf %1607, %1609 : vector<14x128xf32>
      %1611 = vector.broadcast %1540 : f32 to vector<14x128xf32>
      %1612 = arith.mulf %1611, %50 : vector<14x128xf32>
      %1613 = arith.addf %1610, %1612 : vector<14x128xf32>
      %1614 = vector.broadcast %1541 : f32 to vector<14x128xf32>
      %1615 = arith.mulf %1614, %58 : vector<14x128xf32>
      %1616 = arith.addf %1613, %1615 : vector<14x128xf32>
      %1617 = vector.broadcast %1542 : f32 to vector<14x128xf32>
      %1618 = arith.mulf %1617, %62 : vector<14x128xf32>
      %1619 = arith.addf %1616, %1618 : vector<14x128xf32>
      %1620 = vector.broadcast %1543 : f32 to vector<14x128xf32>
      %1621 = arith.mulf %1620, %66 : vector<14x128xf32>
      %1622 = arith.addf %1619, %1621 : vector<14x128xf32>
      %1623 = vector.broadcast %1535 : f32 to vector<14x128xf32>
      %1624 = arith.mulf %1623, %30 : vector<14x128xf32>
      %1625 = vector.broadcast %1536 : f32 to vector<14x128xf32>
      %1626 = arith.mulf %1625, %34 : vector<14x128xf32>
      %1627 = arith.addf %1624, %1626 : vector<14x128xf32>
      %1628 = vector.broadcast %1537 : f32 to vector<14x128xf32>
      %1629 = arith.mulf %1628, %38 : vector<14x128xf32>
      %1630 = arith.addf %1627, %1629 : vector<14x128xf32>
      %1631 = vector.broadcast %1538 : f32 to vector<14x128xf32>
      %1632 = arith.mulf %1631, %46 : vector<14x128xf32>
      %1633 = arith.addf %1630, %1632 : vector<14x128xf32>
      %1634 = vector.broadcast %1539 : f32 to vector<14x128xf32>
      %1635 = arith.mulf %1634, %50 : vector<14x128xf32>
      %1636 = arith.addf %1633, %1635 : vector<14x128xf32>
      %1637 = vector.broadcast %1540 : f32 to vector<14x128xf32>
      %1638 = arith.mulf %1637, %54 : vector<14x128xf32>
      %1639 = arith.addf %1636, %1638 : vector<14x128xf32>
      %1640 = vector.broadcast %1541 : f32 to vector<14x128xf32>
      %1641 = arith.mulf %1640, %62 : vector<14x128xf32>
      %1642 = arith.addf %1639, %1641 : vector<14x128xf32>
      %1643 = vector.broadcast %1542 : f32 to vector<14x128xf32>
      %1644 = arith.mulf %1643, %66 : vector<14x128xf32>
      %1645 = arith.addf %1642, %1644 : vector<14x128xf32>
      %1646 = vector.broadcast %1543 : f32 to vector<14x128xf32>
      %1647 = arith.mulf %1646, %70 : vector<14x128xf32>
      %1648 = arith.addf %1645, %1647 : vector<14x128xf32>
      %1649 = arith.maximumf %1622, %1648 : vector<14x128xf32>
      %1650 = arith.maximumf %1596, %1649 : vector<14x128xf32>
      %c12_328 = arith.constant 12 : index
      %1651 = memref.load %arg2[%c12_328] : memref<16xf32, #tpu.memory_space<smem>>
      %1652 = vector.broadcast %1651 : f32 to vector<14x128xf32>
      %1653 = arith.addf %1650, %1652 : vector<14x128xf32>
      %cst_329 = arith.constant 0.000000e+00 : f32
      %1654 = vector.broadcast %cst_329 : f32 to vector<14x128xf32>
      %1655 = arith.maximumf %1653, %1654 : vector<14x128xf32>
      %c192 = arith.constant 192 : index
      %c0_330 = arith.constant 0 : index
      %1656 = vector.load %arg7[%c192, %c0_330] : memref<256x128xf32, #tpu.memory_space<vmem>>, vector<14x128xf32>
      tpu.vector_store %arg7[%c192, %c0_330], %1655 {strides = array<i32>} : memref<256x128xf32, #tpu.memory_space<vmem>>, vector<14x128xf32>,
      %c13 = arith.constant 13 : index
      %c0_331 = arith.constant 0 : index
      %1657 = memref.load %arg1[%c13, %c0_331] : memref<16x9xf32, #tpu.memory_space<smem>>
      %c13_332 = arith.constant 13 : index
      %c1_333 = arith.constant 1 : index
      %1658 = memref.load %arg1[%c13_332, %c1_333] : memref<16x9xf32, #tpu.memory_space<smem>>
      %c13_334 = arith.constant 13 : index
      %c2_335 = arith.constant 2 : index
      %1659 = memref.load %arg1[%c13_334, %c2_335] : memref<16x9xf32, #tpu.memory_space<smem>>
      %c13_336 = arith.constant 13 : index
      %c3_337 = arith.constant 3 : index
      %1660 = memref.load %arg1[%c13_336, %c3_337] : memref<16x9xf32, #tpu.memory_space<smem>>
      %c13_338 = arith.constant 13 : index
      %c4_339 = arith.constant 4 : index
      %1661 = memref.load %arg1[%c13_338, %c4_339] : memref<16x9xf32, #tpu.memory_space<smem>>
      %c13_340 = arith.constant 13 : index
      %c5_341 = arith.constant 5 : index
      %1662 = memref.load %arg1[%c13_340, %c5_341] : memref<16x9xf32, #tpu.memory_space<smem>>
      %c13_342 = arith.constant 13 : index
      %c6_343 = arith.constant 6 : index
      %1663 = memref.load %arg1[%c13_342, %c6_343] : memref<16x9xf32, #tpu.memory_space<smem>>
      %c13_344 = arith.constant 13 : index
      %c7_345 = arith.constant 7 : index
      %1664 = memref.load %arg1[%c13_344, %c7_345] : memref<16x9xf32, #tpu.memory_space<smem>>
      %c13_346 = arith.constant 13 : index
      %c8_347 = arith.constant 8 : index
      %1665 = memref.load %arg1[%c13_346, %c8_347] : memref<16x9xf32, #tpu.memory_space<smem>>
      %1666 = vector.broadcast %1657 : f32 to vector<14x128xf32>
      %1667 = arith.mulf %1666, %10 : vector<14x128xf32>
      %1668 = vector.broadcast %1658 : f32 to vector<14x128xf32>
      %1669 = arith.mulf %1668, %14 : vector<14x128xf32>
      %1670 = arith.addf %1667, %1669 : vector<14x128xf32>
      %1671 = vector.broadcast %1659 : f32 to vector<14x128xf32>
      %1672 = arith.mulf %1671, %18 : vector<14x128xf32>
      %1673 = arith.addf %1670, %1672 : vector<14x128xf32>
      %1674 = vector.broadcast %1660 : f32 to vector<14x128xf32>
      %1675 = arith.mulf %1674, %26 : vector<14x128xf32>
      %1676 = arith.addf %1673, %1675 : vector<14x128xf32>
      %1677 = vector.broadcast %1661 : f32 to vector<14x128xf32>
      %1678 = arith.mulf %1677, %30 : vector<14x128xf32>
      %1679 = arith.addf %1676, %1678 : vector<14x128xf32>
      %1680 = vector.broadcast %1662 : f32 to vector<14x128xf32>
      %1681 = arith.mulf %1680, %34 : vector<14x128xf32>
      %1682 = arith.addf %1679, %1681 : vector<14x128xf32>
      %1683 = vector.broadcast %1663 : f32 to vector<14x128xf32>
      %1684 = arith.mulf %1683, %42 : vector<14x128xf32>
      %1685 = arith.addf %1682, %1684 : vector<14x128xf32>
      %1686 = vector.broadcast %1664 : f32 to vector<14x128xf32>
      %1687 = arith.mulf %1686, %46 : vector<14x128xf32>
      %1688 = arith.addf %1685, %1687 : vector<14x128xf32>
      %1689 = vector.broadcast %1665 : f32 to vector<14x128xf32>
      %1690 = arith.mulf %1689, %50 : vector<14x128xf32>
      %1691 = arith.addf %1688, %1690 : vector<14x128xf32>
      %1692 = vector.broadcast %1657 : f32 to vector<14x128xf32>
      %1693 = arith.mulf %1692, %14 : vector<14x128xf32>
      %1694 = vector.broadcast %1658 : f32 to vector<14x128xf32>
      %1695 = arith.mulf %1694, %18 : vector<14x128xf32>
      %1696 = arith.addf %1693, %1695 : vector<14x128xf32>
      %1697 = vector.broadcast %1659 : f32 to vector<14x128xf32>
      %1698 = arith.mulf %1697, %22 : vector<14x128xf32>
      %1699 = arith.addf %1696, %1698 : vector<14x128xf32>
      %1700 = vector.broadcast %1660 : f32 to vector<14x128xf32>
      %1701 = arith.mulf %1700, %30 : vector<14x128xf32>
      %1702 = arith.addf %1699, %1701 : vector<14x128xf32>
      %1703 = vector.broadcast %1661 : f32 to vector<14x128xf32>
      %1704 = arith.mulf %1703, %34 : vector<14x128xf32>
      %1705 = arith.addf %1702, %1704 : vector<14x128xf32>
      %1706 = vector.broadcast %1662 : f32 to vector<14x128xf32>
      %1707 = arith.mulf %1706, %38 : vector<14x128xf32>
      %1708 = arith.addf %1705, %1707 : vector<14x128xf32>
      %1709 = vector.broadcast %1663 : f32 to vector<14x128xf32>
      %1710 = arith.mulf %1709, %46 : vector<14x128xf32>
      %1711 = arith.addf %1708, %1710 : vector<14x128xf32>
      %1712 = vector.broadcast %1664 : f32 to vector<14x128xf32>
      %1713 = arith.mulf %1712, %50 : vector<14x128xf32>
      %1714 = arith.addf %1711, %1713 : vector<14x128xf32>
      %1715 = vector.broadcast %1665 : f32 to vector<14x128xf32>
      %1716 = arith.mulf %1715, %54 : vector<14x128xf32>
      %1717 = arith.addf %1714, %1716 : vector<14x128xf32>
      %1718 = arith.maximumf %1691, %1717 : vector<14x128xf32>
      %1719 = vector.broadcast %1657 : f32 to vector<14x128xf32>
      %1720 = arith.mulf %1719, %26 : vector<14x128xf32>
      %1721 = vector.broadcast %1658 : f32 to vector<14x128xf32>
      %1722 = arith.mulf %1721, %30 : vector<14x128xf32>
      %1723 = arith.addf %1720, %1722 : vector<14x128xf32>
      %1724 = vector.broadcast %1659 : f32 to vector<14x128xf32>
      %1725 = arith.mulf %1724, %34 : vector<14x128xf32>
      %1726 = arith.addf %1723, %1725 : vector<14x128xf32>
      %1727 = vector.broadcast %1660 : f32 to vector<14x128xf32>
      %1728 = arith.mulf %1727, %42 : vector<14x128xf32>
      %1729 = arith.addf %1726, %1728 : vector<14x128xf32>
      %1730 = vector.broadcast %1661 : f32 to vector<14x128xf32>
      %1731 = arith.mulf %1730, %46 : vector<14x128xf32>
      %1732 = arith.addf %1729, %1731 : vector<14x128xf32>
      %1733 = vector.broadcast %1662 : f32 to vector<14x128xf32>
      %1734 = arith.mulf %1733, %50 : vector<14x128xf32>
      %1735 = arith.addf %1732, %1734 : vector<14x128xf32>
      %1736 = vector.broadcast %1663 : f32 to vector<14x128xf32>
      %1737 = arith.mulf %1736, %58 : vector<14x128xf32>
      %1738 = arith.addf %1735, %1737 : vector<14x128xf32>
      %1739 = vector.broadcast %1664 : f32 to vector<14x128xf32>
      %1740 = arith.mulf %1739, %62 : vector<14x128xf32>
      %1741 = arith.addf %1738, %1740 : vector<14x128xf32>
      %1742 = vector.broadcast %1665 : f32 to vector<14x128xf32>
      %1743 = arith.mulf %1742, %66 : vector<14x128xf32>
      %1744 = arith.addf %1741, %1743 : vector<14x128xf32>
      %1745 = vector.broadcast %1657 : f32 to vector<14x128xf32>
      %1746 = arith.mulf %1745, %30 : vector<14x128xf32>
      %1747 = vector.broadcast %1658 : f32 to vector<14x128xf32>
      %1748 = arith.mulf %1747, %34 : vector<14x128xf32>
      %1749 = arith.addf %1746, %1748 : vector<14x128xf32>
      %1750 = vector.broadcast %1659 : f32 to vector<14x128xf32>
      %1751 = arith.mulf %1750, %38 : vector<14x128xf32>
      %1752 = arith.addf %1749, %1751 : vector<14x128xf32>
      %1753 = vector.broadcast %1660 : f32 to vector<14x128xf32>
      %1754 = arith.mulf %1753, %46 : vector<14x128xf32>
      %1755 = arith.addf %1752, %1754 : vector<14x128xf32>
      %1756 = vector.broadcast %1661 : f32 to vector<14x128xf32>
      %1757 = arith.mulf %1756, %50 : vector<14x128xf32>
      %1758 = arith.addf %1755, %1757 : vector<14x128xf32>
      %1759 = vector.broadcast %1662 : f32 to vector<14x128xf32>
      %1760 = arith.mulf %1759, %54 : vector<14x128xf32>
      %1761 = arith.addf %1758, %1760 : vector<14x128xf32>
      %1762 = vector.broadcast %1663 : f32 to vector<14x128xf32>
      %1763 = arith.mulf %1762, %62 : vector<14x128xf32>
      %1764 = arith.addf %1761, %1763 : vector<14x128xf32>
      %1765 = vector.broadcast %1664 : f32 to vector<14x128xf32>
      %1766 = arith.mulf %1765, %66 : vector<14x128xf32>
      %1767 = arith.addf %1764, %1766 : vector<14x128xf32>
      %1768 = vector.broadcast %1665 : f32 to vector<14x128xf32>
      %1769 = arith.mulf %1768, %70 : vector<14x128xf32>
      %1770 = arith.addf %1767, %1769 : vector<14x128xf32>
      %1771 = arith.maximumf %1744, %1770 : vector<14x128xf32>
      %1772 = arith.maximumf %1718, %1771 : vector<14x128xf32>
      %c13_348 = arith.constant 13 : index
      %1773 = memref.load %arg2[%c13_348] : memref<16xf32, #tpu.memory_space<smem>>
      %1774 = vector.broadcast %1773 : f32 to vector<14x128xf32>
      %1775 = arith.addf %1772, %1774 : vector<14x128xf32>
      %cst_349 = arith.constant 0.000000e+00 : f32
      %1776 = vector.broadcast %cst_349 : f32 to vector<14x128xf32>
      %1777 = arith.maximumf %1775, %1776 : vector<14x128xf32>
      %c208 = arith.constant 208 : index
      %c0_350 = arith.constant 0 : index
      %1778 = vector.load %arg7[%c208, %c0_350] : memref<256x128xf32, #tpu.memory_space<vmem>>, vector<14x128xf32>
      tpu.vector_store %arg7[%c208, %c0_350], %1777 {strides = array<i32>} : memref<256x128xf32, #tpu.memory_space<vmem>>, vector<14x128xf32>,
      %c14 = arith.constant 14 : index
      %c0_351 = arith.constant 0 : index
      %1779 = memref.load %arg1[%c14, %c0_351] : memref<16x9xf32, #tpu.memory_space<smem>>
      %c14_352 = arith.constant 14 : index
      %c1_353 = arith.constant 1 : index
      %1780 = memref.load %arg1[%c14_352, %c1_353] : memref<16x9xf32, #tpu.memory_space<smem>>
      %c14_354 = arith.constant 14 : index
      %c2_355 = arith.constant 2 : index
      %1781 = memref.load %arg1[%c14_354, %c2_355] : memref<16x9xf32, #tpu.memory_space<smem>>
      %c14_356 = arith.constant 14 : index
      %c3_357 = arith.constant 3 : index
      %1782 = memref.load %arg1[%c14_356, %c3_357] : memref<16x9xf32, #tpu.memory_space<smem>>
      %c14_358 = arith.constant 14 : index
      %c4_359 = arith.constant 4 : index
      %1783 = memref.load %arg1[%c14_358, %c4_359] : memref<16x9xf32, #tpu.memory_space<smem>>
      %c14_360 = arith.constant 14 : index
      %c5_361 = arith.constant 5 : index
      %1784 = memref.load %arg1[%c14_360, %c5_361] : memref<16x9xf32, #tpu.memory_space<smem>>
      %c14_362 = arith.constant 14 : index
      %c6_363 = arith.constant 6 : index
      %1785 = memref.load %arg1[%c14_362, %c6_363] : memref<16x9xf32, #tpu.memory_space<smem>>
      %c14_364 = arith.constant 14 : index
      %c7_365 = arith.constant 7 : index
      %1786 = memref.load %arg1[%c14_364, %c7_365] : memref<16x9xf32, #tpu.memory_space<smem>>
      %c14_366 = arith.constant 14 : index
      %c8_367 = arith.constant 8 : index
      %1787 = memref.load %arg1[%c14_366, %c8_367] : memref<16x9xf32, #tpu.memory_space<smem>>
      %1788 = vector.broadcast %1779 : f32 to vector<14x128xf32>
      %1789 = arith.mulf %1788, %10 : vector<14x128xf32>
      %1790 = vector.broadcast %1780 : f32 to vector<14x128xf32>
      %1791 = arith.mulf %1790, %14 : vector<14x128xf32>
      %1792 = arith.addf %1789, %1791 : vector<14x128xf32>
      %1793 = vector.broadcast %1781 : f32 to vector<14x128xf32>
      %1794 = arith.mulf %1793, %18 : vector<14x128xf32>
      %1795 = arith.addf %1792, %1794 : vector<14x128xf32>
      %1796 = vector.broadcast %1782 : f32 to vector<14x128xf32>
      %1797 = arith.mulf %1796, %26 : vector<14x128xf32>
      %1798 = arith.addf %1795, %1797 : vector<14x128xf32>
      %1799 = vector.broadcast %1783 : f32 to vector<14x128xf32>
      %1800 = arith.mulf %1799, %30 : vector<14x128xf32>
      %1801 = arith.addf %1798, %1800 : vector<14x128xf32>
      %1802 = vector.broadcast %1784 : f32 to vector<14x128xf32>
      %1803 = arith.mulf %1802, %34 : vector<14x128xf32>
      %1804 = arith.addf %1801, %1803 : vector<14x128xf32>
      %1805 = vector.broadcast %1785 : f32 to vector<14x128xf32>
      %1806 = arith.mulf %1805, %42 : vector<14x128xf32>
      %1807 = arith.addf %1804, %1806 : vector<14x128xf32>
      %1808 = vector.broadcast %1786 : f32 to vector<14x128xf32>
      %1809 = arith.mulf %1808, %46 : vector<14x128xf32>
      %1810 = arith.addf %1807, %1809 : vector<14x128xf32>
      %1811 = vector.broadcast %1787 : f32 to vector<14x128xf32>
      %1812 = arith.mulf %1811, %50 : vector<14x128xf32>
      %1813 = arith.addf %1810, %1812 : vector<14x128xf32>
      %1814 = vector.broadcast %1779 : f32 to vector<14x128xf32>
      %1815 = arith.mulf %1814, %14 : vector<14x128xf32>
      %1816 = vector.broadcast %1780 : f32 to vector<14x128xf32>
      %1817 = arith.mulf %1816, %18 : vector<14x128xf32>
      %1818 = arith.addf %1815, %1817 : vector<14x128xf32>
      %1819 = vector.broadcast %1781 : f32 to vector<14x128xf32>
      %1820 = arith.mulf %1819, %22 : vector<14x128xf32>
      %1821 = arith.addf %1818, %1820 : vector<14x128xf32>
      %1822 = vector.broadcast %1782 : f32 to vector<14x128xf32>
      %1823 = arith.mulf %1822, %30 : vector<14x128xf32>
      %1824 = arith.addf %1821, %1823 : vector<14x128xf32>
      %1825 = vector.broadcast %1783 : f32 to vector<14x128xf32>
      %1826 = arith.mulf %1825, %34 : vector<14x128xf32>
      %1827 = arith.addf %1824, %1826 : vector<14x128xf32>
      %1828 = vector.broadcast %1784 : f32 to vector<14x128xf32>
      %1829 = arith.mulf %1828, %38 : vector<14x128xf32>
      %1830 = arith.addf %1827, %1829 : vector<14x128xf32>
      %1831 = vector.broadcast %1785 : f32 to vector<14x128xf32>
      %1832 = arith.mulf %1831, %46 : vector<14x128xf32>
      %1833 = arith.addf %1830, %1832 : vector<14x128xf32>
      %1834 = vector.broadcast %1786 : f32 to vector<14x128xf32>
      %1835 = arith.mulf %1834, %50 : vector<14x128xf32>
      %1836 = arith.addf %1833, %1835 : vector<14x128xf32>
      %1837 = vector.broadcast %1787 : f32 to vector<14x128xf32>
      %1838 = arith.mulf %1837, %54 : vector<14x128xf32>
      %1839 = arith.addf %1836, %1838 : vector<14x128xf32>
      %1840 = arith.maximumf %1813, %1839 : vector<14x128xf32>
      %1841 = vector.broadcast %1779 : f32 to vector<14x128xf32>
      %1842 = arith.mulf %1841, %26 : vector<14x128xf32>
      %1843 = vector.broadcast %1780 : f32 to vector<14x128xf32>
      %1844 = arith.mulf %1843, %30 : vector<14x128xf32>
      %1845 = arith.addf %1842, %1844 : vector<14x128xf32>
      %1846 = vector.broadcast %1781 : f32 to vector<14x128xf32>
      %1847 = arith.mulf %1846, %34 : vector<14x128xf32>
      %1848 = arith.addf %1845, %1847 : vector<14x128xf32>
      %1849 = vector.broadcast %1782 : f32 to vector<14x128xf32>
      %1850 = arith.mulf %1849, %42 : vector<14x128xf32>
      %1851 = arith.addf %1848, %1850 : vector<14x128xf32>
      %1852 = vector.broadcast %1783 : f32 to vector<14x128xf32>
      %1853 = arith.mulf %1852, %46 : vector<14x128xf32>
      %1854 = arith.addf %1851, %1853 : vector<14x128xf32>
      %1855 = vector.broadcast %1784 : f32 to vector<14x128xf32>
      %1856 = arith.mulf %1855, %50 : vector<14x128xf32>
      %1857 = arith.addf %1854, %1856 : vector<14x128xf32>
      %1858 = vector.broadcast %1785 : f32 to vector<14x128xf32>
      %1859 = arith.mulf %1858, %58 : vector<14x128xf32>
      %1860 = arith.addf %1857, %1859 : vector<14x128xf32>
      %1861 = vector.broadcast %1786 : f32 to vector<14x128xf32>
      %1862 = arith.mulf %1861, %62 : vector<14x128xf32>
      %1863 = arith.addf %1860, %1862 : vector<14x128xf32>
      %1864 = vector.broadcast %1787 : f32 to vector<14x128xf32>
      %1865 = arith.mulf %1864, %66 : vector<14x128xf32>
      %1866 = arith.addf %1863, %1865 : vector<14x128xf32>
      %1867 = vector.broadcast %1779 : f32 to vector<14x128xf32>
      %1868 = arith.mulf %1867, %30 : vector<14x128xf32>
      %1869 = vector.broadcast %1780 : f32 to vector<14x128xf32>
      %1870 = arith.mulf %1869, %34 : vector<14x128xf32>
      %1871 = arith.addf %1868, %1870 : vector<14x128xf32>
      %1872 = vector.broadcast %1781 : f32 to vector<14x128xf32>
      %1873 = arith.mulf %1872, %38 : vector<14x128xf32>
      %1874 = arith.addf %1871, %1873 : vector<14x128xf32>
      %1875 = vector.broadcast %1782 : f32 to vector<14x128xf32>
      %1876 = arith.mulf %1875, %46 : vector<14x128xf32>
      %1877 = arith.addf %1874, %1876 : vector<14x128xf32>
      %1878 = vector.broadcast %1783 : f32 to vector<14x128xf32>
      %1879 = arith.mulf %1878, %50 : vector<14x128xf32>
      %1880 = arith.addf %1877, %1879 : vector<14x128xf32>
      %1881 = vector.broadcast %1784 : f32 to vector<14x128xf32>
      %1882 = arith.mulf %1881, %54 : vector<14x128xf32>
      %1883 = arith.addf %1880, %1882 : vector<14x128xf32>
      %1884 = vector.broadcast %1785 : f32 to vector<14x128xf32>
      %1885 = arith.mulf %1884, %62 : vector<14x128xf32>
      %1886 = arith.addf %1883, %1885 : vector<14x128xf32>
      %1887 = vector.broadcast %1786 : f32 to vector<14x128xf32>
      %1888 = arith.mulf %1887, %66 : vector<14x128xf32>
      %1889 = arith.addf %1886, %1888 : vector<14x128xf32>
      %1890 = vector.broadcast %1787 : f32 to vector<14x128xf32>
      %1891 = arith.mulf %1890, %70 : vector<14x128xf32>
      %1892 = arith.addf %1889, %1891 : vector<14x128xf32>
      %1893 = arith.maximumf %1866, %1892 : vector<14x128xf32>
      %1894 = arith.maximumf %1840, %1893 : vector<14x128xf32>
      %c14_368 = arith.constant 14 : index
      %1895 = memref.load %arg2[%c14_368] : memref<16xf32, #tpu.memory_space<smem>>
      %1896 = vector.broadcast %1895 : f32 to vector<14x128xf32>
      %1897 = arith.addf %1894, %1896 : vector<14x128xf32>
      %cst_369 = arith.constant 0.000000e+00 : f32
      %1898 = vector.broadcast %cst_369 : f32 to vector<14x128xf32>
      %1899 = arith.maximumf %1897, %1898 : vector<14x128xf32>
      %c224 = arith.constant 224 : index
      %c0_370 = arith.constant 0 : index
      %1900 = vector.load %arg7[%c224, %c0_370] : memref<256x128xf32, #tpu.memory_space<vmem>>, vector<14x128xf32>
      tpu.vector_store %arg7[%c224, %c0_370], %1899 {strides = array<i32>} : memref<256x128xf32, #tpu.memory_space<vmem>>, vector<14x128xf32>,
      %c15 = arith.constant 15 : index
      %c0_371 = arith.constant 0 : index
      %1901 = memref.load %arg1[%c15, %c0_371] : memref<16x9xf32, #tpu.memory_space<smem>>
      %c15_372 = arith.constant 15 : index
      %c1_373 = arith.constant 1 : index
      %1902 = memref.load %arg1[%c15_372, %c1_373] : memref<16x9xf32, #tpu.memory_space<smem>>
      %c15_374 = arith.constant 15 : index
      %c2_375 = arith.constant 2 : index
      %1903 = memref.load %arg1[%c15_374, %c2_375] : memref<16x9xf32, #tpu.memory_space<smem>>
      %c15_376 = arith.constant 15 : index
      %c3_377 = arith.constant 3 : index
      %1904 = memref.load %arg1[%c15_376, %c3_377] : memref<16x9xf32, #tpu.memory_space<smem>>
      %c15_378 = arith.constant 15 : index
      %c4_379 = arith.constant 4 : index
      %1905 = memref.load %arg1[%c15_378, %c4_379] : memref<16x9xf32, #tpu.memory_space<smem>>
      %c15_380 = arith.constant 15 : index
      %c5_381 = arith.constant 5 : index
      %1906 = memref.load %arg1[%c15_380, %c5_381] : memref<16x9xf32, #tpu.memory_space<smem>>
      %c15_382 = arith.constant 15 : index
      %c6_383 = arith.constant 6 : index
      %1907 = memref.load %arg1[%c15_382, %c6_383] : memref<16x9xf32, #tpu.memory_space<smem>>
      %c15_384 = arith.constant 15 : index
      %c7_385 = arith.constant 7 : index
      %1908 = memref.load %arg1[%c15_384, %c7_385] : memref<16x9xf32, #tpu.memory_space<smem>>
      %c15_386 = arith.constant 15 : index
      %c8_387 = arith.constant 8 : index
      %1909 = memref.load %arg1[%c15_386, %c8_387] : memref<16x9xf32, #tpu.memory_space<smem>>
      %1910 = vector.broadcast %1901 : f32 to vector<14x128xf32>
      %1911 = arith.mulf %1910, %10 : vector<14x128xf32>
      %1912 = vector.broadcast %1902 : f32 to vector<14x128xf32>
      %1913 = arith.mulf %1912, %14 : vector<14x128xf32>
      %1914 = arith.addf %1911, %1913 : vector<14x128xf32>
      %1915 = vector.broadcast %1903 : f32 to vector<14x128xf32>
      %1916 = arith.mulf %1915, %18 : vector<14x128xf32>
      %1917 = arith.addf %1914, %1916 : vector<14x128xf32>
      %1918 = vector.broadcast %1904 : f32 to vector<14x128xf32>
      %1919 = arith.mulf %1918, %26 : vector<14x128xf32>
      %1920 = arith.addf %1917, %1919 : vector<14x128xf32>
      %1921 = vector.broadcast %1905 : f32 to vector<14x128xf32>
      %1922 = arith.mulf %1921, %30 : vector<14x128xf32>
      %1923 = arith.addf %1920, %1922 : vector<14x128xf32>
      %1924 = vector.broadcast %1906 : f32 to vector<14x128xf32>
      %1925 = arith.mulf %1924, %34 : vector<14x128xf32>
      %1926 = arith.addf %1923, %1925 : vector<14x128xf32>
      %1927 = vector.broadcast %1907 : f32 to vector<14x128xf32>
      %1928 = arith.mulf %1927, %42 : vector<14x128xf32>
      %1929 = arith.addf %1926, %1928 : vector<14x128xf32>
      %1930 = vector.broadcast %1908 : f32 to vector<14x128xf32>
      %1931 = arith.mulf %1930, %46 : vector<14x128xf32>
      %1932 = arith.addf %1929, %1931 : vector<14x128xf32>
      %1933 = vector.broadcast %1909 : f32 to vector<14x128xf32>
      %1934 = arith.mulf %1933, %50 : vector<14x128xf32>
      %1935 = arith.addf %1932, %1934 : vector<14x128xf32>
      %1936 = vector.broadcast %1901 : f32 to vector<14x128xf32>
      %1937 = arith.mulf %1936, %14 : vector<14x128xf32>
      %1938 = vector.broadcast %1902 : f32 to vector<14x128xf32>
      %1939 = arith.mulf %1938, %18 : vector<14x128xf32>
      %1940 = arith.addf %1937, %1939 : vector<14x128xf32>
      %1941 = vector.broadcast %1903 : f32 to vector<14x128xf32>
      %1942 = arith.mulf %1941, %22 : vector<14x128xf32>
      %1943 = arith.addf %1940, %1942 : vector<14x128xf32>
      %1944 = vector.broadcast %1904 : f32 to vector<14x128xf32>
      %1945 = arith.mulf %1944, %30 : vector<14x128xf32>
      %1946 = arith.addf %1943, %1945 : vector<14x128xf32>
      %1947 = vector.broadcast %1905 : f32 to vector<14x128xf32>
      %1948 = arith.mulf %1947, %34 : vector<14x128xf32>
      %1949 = arith.addf %1946, %1948 : vector<14x128xf32>
      %1950 = vector.broadcast %1906 : f32 to vector<14x128xf32>
      %1951 = arith.mulf %1950, %38 : vector<14x128xf32>
      %1952 = arith.addf %1949, %1951 : vector<14x128xf32>
      %1953 = vector.broadcast %1907 : f32 to vector<14x128xf32>
      %1954 = arith.mulf %1953, %46 : vector<14x128xf32>
      %1955 = arith.addf %1952, %1954 : vector<14x128xf32>
      %1956 = vector.broadcast %1908 : f32 to vector<14x128xf32>
      %1957 = arith.mulf %1956, %50 : vector<14x128xf32>
      %1958 = arith.addf %1955, %1957 : vector<14x128xf32>
      %1959 = vector.broadcast %1909 : f32 to vector<14x128xf32>
      %1960 = arith.mulf %1959, %54 : vector<14x128xf32>
      %1961 = arith.addf %1958, %1960 : vector<14x128xf32>
      %1962 = arith.maximumf %1935, %1961 : vector<14x128xf32>
      %1963 = vector.broadcast %1901 : f32 to vector<14x128xf32>
      %1964 = arith.mulf %1963, %26 : vector<14x128xf32>
      %1965 = vector.broadcast %1902 : f32 to vector<14x128xf32>
      %1966 = arith.mulf %1965, %30 : vector<14x128xf32>
      %1967 = arith.addf %1964, %1966 : vector<14x128xf32>
      %1968 = vector.broadcast %1903 : f32 to vector<14x128xf32>
      %1969 = arith.mulf %1968, %34 : vector<14x128xf32>
      %1970 = arith.addf %1967, %1969 : vector<14x128xf32>
      %1971 = vector.broadcast %1904 : f32 to vector<14x128xf32>
      %1972 = arith.mulf %1971, %42 : vector<14x128xf32>
      %1973 = arith.addf %1970, %1972 : vector<14x128xf32>
      %1974 = vector.broadcast %1905 : f32 to vector<14x128xf32>
      %1975 = arith.mulf %1974, %46 : vector<14x128xf32>
      %1976 = arith.addf %1973, %1975 : vector<14x128xf32>
      %1977 = vector.broadcast %1906 : f32 to vector<14x128xf32>
      %1978 = arith.mulf %1977, %50 : vector<14x128xf32>
      %1979 = arith.addf %1976, %1978 : vector<14x128xf32>
      %1980 = vector.broadcast %1907 : f32 to vector<14x128xf32>
      %1981 = arith.mulf %1980, %58 : vector<14x128xf32>
      %1982 = arith.addf %1979, %1981 : vector<14x128xf32>
      %1983 = vector.broadcast %1908 : f32 to vector<14x128xf32>
      %1984 = arith.mulf %1983, %62 : vector<14x128xf32>
      %1985 = arith.addf %1982, %1984 : vector<14x128xf32>
      %1986 = vector.broadcast %1909 : f32 to vector<14x128xf32>
      %1987 = arith.mulf %1986, %66 : vector<14x128xf32>
      %1988 = arith.addf %1985, %1987 : vector<14x128xf32>
      %1989 = vector.broadcast %1901 : f32 to vector<14x128xf32>
      %1990 = arith.mulf %1989, %30 : vector<14x128xf32>
      %1991 = vector.broadcast %1902 : f32 to vector<14x128xf32>
      %1992 = arith.mulf %1991, %34 : vector<14x128xf32>
      %1993 = arith.addf %1990, %1992 : vector<14x128xf32>
      %1994 = vector.broadcast %1903 : f32 to vector<14x128xf32>
      %1995 = arith.mulf %1994, %38 : vector<14x128xf32>
      %1996 = arith.addf %1993, %1995 : vector<14x128xf32>
      %1997 = vector.broadcast %1904 : f32 to vector<14x128xf32>
      %1998 = arith.mulf %1997, %46 : vector<14x128xf32>
      %1999 = arith.addf %1996, %1998 : vector<14x128xf32>
      %2000 = vector.broadcast %1905 : f32 to vector<14x128xf32>
      %2001 = arith.mulf %2000, %50 : vector<14x128xf32>
      %2002 = arith.addf %1999, %2001 : vector<14x128xf32>
      %2003 = vector.broadcast %1906 : f32 to vector<14x128xf32>
      %2004 = arith.mulf %2003, %54 : vector<14x128xf32>
      %2005 = arith.addf %2002, %2004 : vector<14x128xf32>
      %2006 = vector.broadcast %1907 : f32 to vector<14x128xf32>
      %2007 = arith.mulf %2006, %62 : vector<14x128xf32>
      %2008 = arith.addf %2005, %2007 : vector<14x128xf32>
      %2009 = vector.broadcast %1908 : f32 to vector<14x128xf32>
      %2010 = arith.mulf %2009, %66 : vector<14x128xf32>
      %2011 = arith.addf %2008, %2010 : vector<14x128xf32>
      %2012 = vector.broadcast %1909 : f32 to vector<14x128xf32>
      %2013 = arith.mulf %2012, %70 : vector<14x128xf32>
      %2014 = arith.addf %2011, %2013 : vector<14x128xf32>
      %2015 = arith.maximumf %1988, %2014 : vector<14x128xf32>
      %2016 = arith.maximumf %1962, %2015 : vector<14x128xf32>
      %c15_388 = arith.constant 15 : index
      %2017 = memref.load %arg2[%c15_388] : memref<16xf32, #tpu.memory_space<smem>>
      %2018 = vector.broadcast %2017 : f32 to vector<14x128xf32>
      %2019 = arith.addf %2016, %2018 : vector<14x128xf32>
      %cst_389 = arith.constant 0.000000e+00 : f32
      %2020 = vector.broadcast %cst_389 : f32 to vector<14x128xf32>
      %2021 = arith.maximumf %2019, %2020 : vector<14x128xf32>
      %c240 = arith.constant 240 : index
      %c0_390 = arith.constant 0 : index
      %2022 = vector.load %arg7[%c240, %c0_390] : memref<256x128xf32, #tpu.memory_space<vmem>>, vector<14x128xf32>
      tpu.vector_store %arg7[%c240, %c0_390], %2021 {strides = array<i32>} : memref<256x128xf32, #tpu.memory_space<vmem>>, vector<14x128xf32>,
      %2023 = arith.index_cast %arg8 : i32 to index
      %c0_391 = arith.constant 0 : index
      %c0_392 = arith.constant 0 : index
      %2024 = vector.load %arg3[%2023, %c0_391, %c0_392] : memref<14x16x256xf32, #tpu.memory_space<vmem>>, vector<1x16x256xf32>
      %2025 = vector.shape_cast %2024 : vector<1x16x256xf32> to vector<16x256xf32>
      %c0_393 = arith.constant 0 : index
      %c0_394 = arith.constant 0 : index
      %2026 = vector.load %arg7[%c0_393, %c0_394] : memref<256x128xf32, #tpu.memory_space<vmem>>, vector<256x128xf32>
      %cst_395 = arith.constant dense<0.000000e+00> : vector<16x128xf32>
      %2027 = tpu.matmul %2025, %2026, %cst_395 {dimension_numbers = #tpu.dot_dimension_numbers<[1], [0], [0], [1], [0, 0, 1, 1], [], []>, precision = #tpu.contract_precision<fp32>} : vector<16x256xf32>, vector<256x128xf32>, vector<16x128xf32> -> vector<16x128xf32>
      %2028 = arith.addf %arg9, %2027 : vector<16x128xf32>
      scf.yield %2028 : vector<16x128xf32>
    }
    %c14_i32_3 = arith.constant 14 : i32
    %c0_4 = arith.constant 0 : index
    %c0_5 = arith.constant 0 : index
    %5 = vector.load %arg6[%c0_4, %c0_5] : memref<16x128xf32, #tpu.memory_space<vmem>>, vector<16x128xf32>
    tpu.vector_store %arg6[%c0_4, %c0_5], %4 {strides = array<i32>} : memref<16x128xf32, #tpu.memory_space<vmem>>, vector<16x128xf32>,
    return
  }
  func.func @transform_0(%arg0: i32) -> (i32, i32) {
    %c0_i32 = arith.constant 0 : i32
    %c0_i32_0 = arith.constant 0 : i32
    %c0_i32_1 = arith.constant 0 : i32
    return %c0_i32, %c0_i32_0 : i32, i32
  }
  func.func @transform_1(%arg0: i32) -> i32 {
    %c0_i32 = arith.constant 0 : i32
    %c0_i32_0 = arith.constant 0 : i32
    return %c0_i32 : i32
  }
  func.func @transform_2(%arg0: i32) -> (i32, i32, i32) {
    %c0_i32 = arith.constant 0 : i32
    %c0_i32_0 = arith.constant 0 : i32
    %c0_i32_1 = arith.constant 0 : i32
    %c0_i32_2 = arith.constant 0 : i32
    return %c0_i32, %c0_i32_0, %c0_i32_1 : i32, i32, i32
  }
  func.func @transform_3(%arg0: i32) -> (i32, i32) {
    %c0_i32 = arith.constant 0 : i32
    %c0_i32_0 = arith.constant 0 : i32
    %c0_i32_1 = arith.constant 0 : i32
    return %c0_i32, %c0_i32_0 : i32, i32
  }
  func.func @transform_4(%arg0: i32) -> (i32, i32, i32, i32) {
    %c0_i32 = arith.constant 0 : i32
    %c0_i32_0 = arith.constant 0 : i32
    %c0_i32_1 = arith.constant 0 : i32
    %c0_i32_2 = arith.constant 0 : i32
    return %c0_i32, %c0_i32_0, %c0_i32_1, %arg0 : i32, i32, i32, i32
  }
  func.func @transform_5(%arg0: i32) -> (i32, i32) {
    %c0_i32 = arith.constant 0 : i32
    %c0_i32_0 = arith.constant 0 : i32
    return %c0_i32, %arg0 : i32, i32
  }
}

</mosaic_0001>

<bundles_post_ra>
// kernel: cnn_classifier_forward.1
= control target key start
LH: loop header
LB: loop body
LE: loop exit
PB: predicated region body
PF: predicated region fallthrough
CT: control target
= control target key end

     0   :  { %10 = vsyncpa [#allocation4], 0  ;;  %s9207_s0 = inlined_call_operand.vmem [shape: f32[16,9], index: 0, kind: input, shape index: {}]   ;;  %s9208_s1 = inlined_call_operand.vmem [shape: f32[16], index: 1, kind: input, shape index: {}]   ;;  %s9209_s2 = inlined_call_operand.vmem [shape: f32[14,16,256], index: 2, kind: input, shape index: {}]   ;;  %s9210_s3 = inlined_call_operand.vmem [shape: f32[16,128], index: 3, kind: input, shape index: {}]   ;;  %s9211_s4 = inlined_call_operand.vmem [shape: f32[30,2,15,128], index: 4, kind: input, shape index: {}]   ;;  %s9212_s5 = inlined_call_operand.vmem [shape: f32[16,128], index: 5, kind: output, shape index: {}]  }
   0x1   :  { %s17_s20 = sshll.u32 %s9207_s0, 4  ;;  %s18_s20 = int_to_ptr.vmem [resolvable:$true] %s17_s20 }
   0x2   :  { %11 = vsyncpa [#allocation6], 0  ;;  %s30_s23 = sshll.u32 %s9208_s1, 4  ;;  %s4660_s24 = scalar_lea.vmem %s18_s20, 256  ;;  %s31_s23 = int_to_ptr.vmem [resolvable:$true] %s30_s23 }
   0x3   :  { %p4661_p0 = scmp.ne.s32.totalorder %s18_s20, %s4660_s24  ;;  %p4665_p1 = scmp.lt.s32.totalorder %s18_s20, %s18_s20 }
   0x4   :  { %p4666_p2 = scmp.lt.s32.totalorder %s4660_s24, %s4660_s24 }
   0x6   :  { %p4667_p3 = por %p4666_p2, %p4665_p1 }
   0x8   :  { %p4668_p4 = pnand %p4667_p3, %p4661_p0 }
   0xa   :  { %4671 = shalt.err (!%p4668_p4)
}
   0xb   :  { %s4712_s25 = smov [#allocation3]   ;;  %s4713_s26 = smov 128  }
   0xc   :  { %s4714_s27 = smov 8   ;;  %s4672_s28 = scalar_lea.vmem %s31_s23, 16 }
   0xd   :  { %23 = dma.vmem_to_smem %s18_s20, 256, %s4712_s25, [#allocation4], %s4713_s26, %s4713_s26, %s4714_s27  }
   0xe   :  { %p4673_p5 = scmp.ne.s32.totalorder %s31_s23, %s4672_s28  ;;  %p4677_p6 = scmp.lt.s32.totalorder %s31_s23, %s31_s23 }
   0xf   :  { %p4678_p7 = scmp.lt.s32.totalorder %s4672_s28, %s4672_s28 }
  0x11   :  { %p4679_p8 = por %p4678_p7, %p4677_p6 }
  0x13   :  { %p4680_p9 = pnand %p4679_p8, %p4673_p5 }
  0x15   :  { %4683 = shalt.err (!%p4680_p9)
}
  0x16   :  { %s4715_s0 = smov [#allocation5]  }
  0x17   :  { %33 = dma.vmem_to_smem %s31_s23, 16, %s4715_s0, [#allocation6]  }
  0x18   :  { %4696 = dma.done.wait [#allocation4], 256  }
  0x19   :  { %4697 = vsyncadd [#allocation4], 4294967040 }
  0x1a   :  { %4698 = dma.done.wait [#allocation6], 16  }
  0x1b   :  { %4699 = vsyncadd [#allocation6], 4294967280 }
  0x1c   :  { %46 = sfence }
  0x1d   :  { %v79_v0 = vld [vmem:[%s9210_s3] sm:$0xff]   ;;  %v80_v1 = vld [vmem:[%s9210_s3 + $0x8] sm:$0xff]   ;;  %v4716_v2 = vmov 0.0   ;;  %s4763_s3 = smov 0  }
  0x1e   :  { %48 = vst [vmem:[#allocation2 + $0x8] sm:$0xff] %v4716_v2  ;;  %50 = vst [vmem:[#allocation2 + $0x18] sm:$0xff] %v4716_v2 }
  0x1f   :  { %52 = vst [vmem:[#allocation2 + $0x28] sm:$0xff] %v4716_v2  ;;  %54 = vst [vmem:[#allocation2 + $0x38] sm:$0xff] %v4716_v2 }
  0x20   :  { %56 = vst [vmem:[#allocation2 + $0x48] sm:$0xff] %v4716_v2  ;;  %58 = vst [vmem:[#allocation2 + $0x58] sm:$0xff] %v4716_v2 }
  0x21   :  { %60 = vst [vmem:[#allocation2 + $0x68] sm:$0xff] %v4716_v2  ;;  %62 = vst [vmem:[#allocation2 + $0x78] sm:$0xff] %v4716_v2 }
  0x22   :  { %63 = vst [vmem:[#allocation2 + $0x80] sm:$0xff] %v4716_v2  ;;  %64 = vst [vmem:[#allocation2 + $0x88] sm:$0xff] %v4716_v2 }
  0x23   :  { %66 = vst [vmem:[#allocation2 + $0x98] sm:$0xff] %v4716_v2  ;;  %68 = vst [vmem:[#allocation2 + $0xa8] sm:$0xff] %v4716_v2 }
  0x24   :  { %70 = vst [vmem:[#allocation2 + $0xb8] sm:$0xff] %v4716_v2  ;;  %72 = vst [vmem:[#allocation2 + $0xc8] sm:$0xff] %v4716_v2 }
  0x25   :  { %74 = vst [vmem:[#allocation2 + $0xd8] sm:$0xff] %v4716_v2  ;;  %76 = vst [vmem:[#allocation2 + $0xe8] sm:$0xff] %v4716_v2 }
  0x26   :  { %78 = vst [vmem:[#allocation2 + $0xf8] sm:$0xff] %v4716_v2 }
  0x27 LB: > { %9393 = vst [vmem:[#allocation9_spill] sm:$0xff] %v4702_v1  ;;  %9394 = vst [vmem:[#allocation10_spill] sm:$0xff] %v4706_v0  ;;  %s3959_s7 = sld [smem:[#allocation3 + $0x400]]  ;;  %s3960_s8 = sld [smem:[#allocation3 + $0x401]]  ;;  %s4710_s3 = sphi %s4763_s3, %s86_s3   ;;  %v4706_v0 = vphi %v79_v0, %v9644_v0   ;;  %v4702_v1 = vphi %v80_v1, %v9643_v1  }
  0x28   : > { %s4041_s9 = sshll.u32 %s4710_s3, 6  ;;  %s3961_s10 = sld [smem:[#allocation3 + $0x402]] }
  0x29   : > { %s4778_s13 = scalar_lea.vmem %s9211_s4, %s4041_s9  ;;  %s3962_s14 = sld [smem:[#allocation3 + $0x403]] }
  0x2a   : > { %v4781_v3 = vld [vmem:[%s4778_s13] sm:$0xff]  ;;  %v4784_v4 = vld [vmem:[%s4778_s13 + $0x8] sm:$0x3f]  ;;  %v4787_v5 = vld [vmem:[%s4778_s13 + $0x10] sm:$0xff]  ;;  %s4789_s15 = sld [smem:[#allocation3 + $0x404]]  ;;  %s4797_s16 = sld [smem:[#allocation3 + $0x405]] }
  0x2b   : > { %9395 = vst [vmem:[#allocation11_spill] sm:$0xff] %v4781_v3  ;;  %9396 = vst [vmem:[#allocation12_spill] sm:$0xff] %v4784_v4  ;;  %v4792_v6 = vld [vmem:[%s4778_s13 + $0x18] sm:$0x3f]  ;;  %v4795_v7 = vld [vmem:[%s4778_s13 + $0x1] sm:$0xff]  ;;  %s4815_s17 = sld [smem:[#allocation3 + $0x406]] }
  0x2c   : > { %v4810_v13 = vld [vmem:[%s4778_s13 + $0x9] sm:$0x3f]  ;;  %v4813_v14 = vld [vmem:[%s4778_s13 + $0x11] sm:$0xff]  ;;  %v4826_v19 = vld [vmem:[%s4778_s13 + $0x20] sm:$0xff]  ;;  %s4842_s18 = sld [smem:[#allocation3 + $0x407]]  ;;  %s4861_s19 = sld [smem:[#allocation3 + $0x408]] }
  0x2d   : > { %v4799_v8 = vstv %s3959_s7  ;;  %v4805_v11 = vstv %s3960_s8  ;;  %v4829_v20 = vld [vmem:[%s4778_s13 + $0x28] sm:$0x3f]  ;;  %v4840_v25 = vld [vmem:[%s4778_s13 + $0x19] sm:$0x3f]  ;;  %s5027_s20 = sld [smem:[#allocation5 + $0x8]]  ;;  %s5043_s22 = sld [smem:[#allocation3 + $0x1]] }
  0x2e   : > { %v1495_v9 = vmul.f32 %v4799_v8, %v4781_v3  ;;  %v1496_v10 = vmul.f32 %v4799_v8, %v4784_v4  ;;  %v1537_v12 = vmul.f32 %v4787_v5, %v4799_v8  ;;  %v1498_v15 = vmul.f32 %v4787_v5, %v4805_v11  ;;  %9397 = vst [vmem:[#allocation13_spill] sm:$0xff] %v4840_v25  ;;  %v4849_v30 = vld [vmem:[%s4778_s13 + $0x30] sm:$0xff]  ;;  %v4852_v31 = vld [vmem:[%s4778_s13 + $0x38] sm:$0x3f]  ;;  %v4868_v40 = vld [vmem:[%s4778_s13 + $0x21] sm:$0xff]  ;;  %s5029_s21 = sld [smem:[#allocation3]] }
  0x2f   : > { %v1499_v16 = vmul.f32 %v4792_v6, %v4805_v11  ;;  %v4821_v17 = vstv %s3961_s10  ;;  %v1538_v18 = vmul.f32 %v4792_v6, %v4799_v8  ;;  %v4835_v23 = vstv %s3962_s14  ;;  %v4871_v41 = vld [vmem:[%s4778_s13 + $0x29] sm:$0x3f]  ;;  %v4883_v50 = vld [vmem:[%s4778_s13 + $0x40] sm:$0xff]  ;;  %s5045_s23 = sld [smem:[#allocation3 + $0x2]]  ;;  %s5058_s24 = sld [smem:[#allocation3 + $0x3]] }
  0x30   : > { %v1503_v21 = vmul.f32 %v4821_v17, %v4795_v7  ;;  %v1504_v22 = vmul.f32 %v4821_v17, %v4810_v13  ;;  %v1539_v24 = vmul.f32 %v4805_v11, %v4795_v7  ;;  %v1500_v26 = vadd.f32 %v1498_v15, %v1495_v9  ;;  %v4886_v51 = vld [vmem:[%s4778_s13 + $0x48] sm:$0x3f]  ;;  %v4900_v60 = vld [vmem:[%s4778_s13 + $0x50] sm:$0xff]  ;;  %v4903_v61 = vld [vmem:[%s4778_s13 + $0x58] sm:$0x3f]  ;;  %s5060_s25 = sld [smem:[#allocation3 + $0x4]] }
  0x31   : > { %v1501_v27 = vadd.f32 %v1499_v16, %v1496_v10  ;;  %v1508_v28 = vmul.f32 %v4826_v19, %v4835_v23  ;;  %v1509_v29 = vmul.f32 %v4829_v20, %v4835_v23  ;;  %v4855_v32 = vstv %s4789_s15  ;;  %v4911_v10 = vld [vmem:[%s4778_s13 + $0x31] sm:$0xff]  ;;  %s5075_s26 = sld [smem:[#allocation3 + $0x5]]  ;;  %s5077_s27 = sld [smem:[#allocation3 + $0x6]] }
  0x32   : > { %v1540_v33 = vmul.f32 %v4805_v11, %v4810_v13  ;;  %v1541_v34 = vadd.f32 %v1539_v24, %v1537_v12  ;;  %v1543_v35 = vmul.f32 %v4813_v14, %v4821_v17  ;;  %v1505_v36 = vadd.f32 %v1503_v21, %v1500_v26  ;;  %v4918_v21 = vld [vmem:[%s4778_s13 + $0x41] sm:$0xff]  ;;  %s5082_s28 = sld [smem:[#allocation3 + $0x7]]  ;;  %s5084_s0 = sld [smem:[#allocation3 + $0x8]] }
  0x33   : > { %v1506_v37 = vadd.f32 %v1504_v22, %v1501_v27  ;;  %v1513_v38 = vmul.f32 %v4849_v30, %v4855_v32  ;;  %v1514_v39 = vmul.f32 %v4852_v31, %v4855_v32  ;;  %v4874_v42 = vstv %s4797_s16  ;;  %v4921_v22 = vld [vmem:[%s4778_s13 + $0x49] sm:$0x3f]  ;;  %s5252_s1 = sld [smem:[#allocation5]]  ;;  %s5262_s30 = sld [smem:[#allocation3 + $0x481]] }
  0x34   : > { %v1542_v43 = vadd.f32 %v1540_v33, %v1538_v18  ;;  %v1544_v44 = vmul.f32 %v4840_v25, %v4821_v17  ;;  %v1545_v45 = vadd.f32 %v1543_v35, %v1541_v34  ;;  %v1510_v46 = vadd.f32 %v1508_v28, %v1505_v36  ;;  %s5260_s29 = sld [smem:[#allocation3 + $0x480]]  ;;  %s5272_s6 = sld [smem:[#allocation3 + $0x482]] }
  0x35   : > { %v1511_v47 = vadd.f32 %v1509_v29, %v1506_v37  ;;  %v1518_v48 = vmul.f32 %v4868_v40, %v4874_v42  ;;  %v1519_v49 = vmul.f32 %v4871_v41, %v4874_v42  ;;  %v4889_v52 = vstv %s4815_s17  ;;  %v4931_v29 = vld [vmem:[%s4778_s13 + $0x39] sm:$0x3f]  ;;  %s5274_s7 = sld [smem:[#allocation3 + $0x483]]  ;;  %s5290_s8 = sld [smem:[#allocation3 + $0x484]] }
  0x36   : > { %v1546_v53 = vadd.f32 %v1544_v44, %v1542_v43  ;;  %v1547_v54 = vmul.f32 %v4849_v30, %v4835_v23  ;;  %v1548_v55 = vmul.f32 %v4852_v31, %v4835_v23  ;;  %v1515_v56 = vadd.f32 %v1513_v38, %v1510_v46  ;;  %v4942_v44 = vld [vmem:[%s4778_s13 + $0x51] sm:$0xff]  ;;  %s5292_s9 = sld [smem:[#allocation3 + $0x485]]  ;;  %s5301_s10 = sld [smem:[#allocation3 + $0x486]] }
  0x37   : > { %v1516_v57 = vadd.f32 %v1514_v39, %v1511_v47  ;;  %v1523_v58 = vmul.f32 %v4883_v50, %v4889_v52  ;;  %v1524_v59 = vmul.f32 %v4886_v51, %v4889_v52  ;;  %v4906_v62 = vstv %s4842_s18  ;;  %s5303_s11 = sld [smem:[#allocation3 + $0x487]]  ;;  %s5325_s12 = sld [smem:[#allocation3 + $0x488]] }
  0x38   : > { %v1549_v63 = vadd.f32 %v1547_v54, %v1545_v45  ;;  %v1550_v2 = vadd.f32 %v1548_v55, %v1546_v53  ;;  %v1551_v9 = vmul.f32 %v4868_v40, %v4855_v32  ;;  %v1520_v12 = vadd.f32 %v1518_v48, %v1515_v56  ;;  %s5467_s14 = sld [smem:[#allocation5 + $0x9]]  ;;  %s5475_s15 = sld [smem:[#allocation3 + $0x80]] }
  0x39   : > { %v1521_v15 = vadd.f32 %v1519_v49, %v1516_v57  ;;  %v1528_v16 = vmul.f32 %v4900_v60, %v4906_v62  ;;  %v1529_v18 = vmul.f32 %v4903_v61, %v4906_v62  ;;  %v4924_v24 = vstv %s4861_s19  ;;  %v4949_v49 = vld [vmem:[%s4778_s13 + $0x59] sm:$0x3f]  ;;  %s5477_s16 = sld [smem:[#allocation3 + $0x81]]  ;;  %s5489_s17 = sld [smem:[#allocation3 + $0x82]] }
  0x3a   : > { %v1552_v26 = vmul.f32 %v4871_v41, %v4855_v32  ;;  %v1553_v27 = vadd.f32 %v1551_v9, %v1549_v63  ;;  %v1555_v28 = vmul.f32 %v4911_v10, %v4874_v42  ;;  %v1525_v33 = vadd.f32 %v1523_v58, %v1520_v12  ;;  %9398 = vst [vmem:[#allocation14_spill] sm:$0xff] %v4949_v49  ;;  %s5491_s18 = sld [smem:[#allocation3 + $0x83]]  ;;  %s5505_s19 = sld [smem:[#allocation3 + $0x84]] }
  0x3b   : > { %v1526_v34 = vadd.f32 %v1524_v59, %v1521_v15  ;;  %v1533_v35 = vmul.f32 %v4918_v21, %v4924_v24  ;;  %v1534_v36 = vmul.f32 %v4921_v22, %v4924_v24  ;;  %v1556_v38 = vmul.f32 %v4931_v29, %v4874_v42 }
  0x3c   : > { %v1554_v37 = vadd.f32 %v1552_v26, %v1550_v2  ;;  %v1557_v39 = vadd.f32 %v1555_v28, %v1553_v27  ;;  %v1559_v43 = vmul.f32 %v4900_v60, %v4889_v52  ;;  %v1530_v45 = vadd.f32 %v1528_v16, %v1525_v33  ;;  %v4976_v28 = vld [vmem:[%s4778_s13 + $0x60] sm:$0xff]  ;;  %v4979_v33 = vld [vmem:[%s4778_s13 + $0x68] sm:$0x3f] }
  0x3d   : > { %v1531_v46 = vadd.f32 %v1529_v18, %v1526_v34  ;;  %v1560_v47 = vmul.f32 %v4903_v61, %v4889_v52  ;;  %v1563_v48 = vmul.f32 %v4918_v21, %v4906_v62  ;;  %v1564_v55 = vmul.f32 %v4921_v22, %v4906_v62  ;;  %9399 = vst [vmem:[#allocation15_spill] sm:$0xff] %v4976_v28 }
  0x3e   : > { %v1558_v53 = vadd.f32 %v1556_v38, %v1554_v37  ;;  %v1561_v54 = vadd.f32 %v1559_v43, %v1557_v39  ;;  %v1567_v56 = vmul.f32 %v4942_v44, %v4924_v24  ;;  %v4955_v57 = vadd.f32 %v1533_v35, %v1530_v45  ;;  %9400 = vst [vmem:[#allocation16_spill] sm:$0xff] %v4979_v33 }
  0x3f   : > { %v4957_v58 = vadd.f32 %v1534_v36, %v1531_v46  ;;  %v1568_v59 = vmul.f32 %v4949_v49, %v4924_v24  ;;  %v1573_v63 = vmul.f32 %v4826_v19, %v4799_v8  ;;  %v1574_v12 = vmul.f32 %v4829_v20, %v4799_v8  ;;  %v4992_v46 = vld [vmem:[%s4778_s13 + $0x70] sm:$0xff] }
  0x40   : > { %v1562_v2 = vadd.f32 %v1560_v47, %v1558_v53  ;;  %v1565_v9 = vadd.f32 %v1563_v48, %v1561_v54  ;;  %v1575_v15 = vmul.f32 %v4849_v30, %v4805_v11  ;;  %v1576_v16 = vmul.f32 %v4852_v31, %v4805_v11 }
  0x41   : > { %v1579_v18 = vmul.f32 %v4868_v40, %v4821_v17  ;;  %v1580_v26 = vmul.f32 %v4871_v41, %v4821_v17  ;;  %v1583_v27 = vmul.f32 %v4883_v50, %v4835_v23  ;;  %v1584_v37 = vmul.f32 %v4886_v51, %v4835_v23 }
  0x42   : > { %v1566_v34 = vadd.f32 %v1564_v55, %v1562_v2  ;;  %v4981_v35 = vadd.f32 %v1567_v56, %v1565_v9  ;;  %v1577_v36 = vadd.f32 %v1575_v15, %v1573_v63  ;;  %v1578_v38 = vadd.f32 %v1576_v16, %v1574_v12  ;;  %v5001_v55 = vld [vmem:[%s4778_s13 + $0x78] sm:$0x3f]  ;;  %v5004_v56 = vld [vmem:[%s4778_s13 + $0x61] sm:$0xff]  ;;  %v5013_v12 = vld [vmem:[%s4778_s13 + $0x69] sm:$0x3f] }
  0x43   : > { %v1587_v39 = vmul.f32 %v4900_v60, %v4855_v32  ;;  %v1588_v43 = vmul.f32 %v4903_v61, %v4855_v32  ;;  %v1591_v45 = vmul.f32 %v4918_v21, %v4874_v42  ;;  %v1592_v54 = vmul.f32 %v4921_v22, %v4874_v42 }
  0x44   : > { %v4994_v47 = vadd.f32 %v1568_v59, %v1566_v34  ;;  %v1581_v53 = vadd.f32 %v1579_v18, %v1577_v36  ;;  %v1582_v63 = vadd.f32 %v1580_v26, %v1578_v38  ;;  %v1595_v2 = vmul.f32 %v4976_v28, %v4889_v52 }
  0x45   : > { %v1596_v9 = vmul.f32 %v4979_v33, %v4889_v52  ;;  %v1599_v59 = vmul.f32 %v4992_v46, %v4906_v62  ;;  %v1600_v18 = vmul.f32 %v5001_v55, %v4906_v62  ;;  %v1603_v26 = vmul.f32 %v5004_v56, %v4924_v24 }
  0x46   : > { %v1585_v16 = vadd.f32 %v1583_v27, %v1581_v53  ;;  %v1586_v34 = vadd.f32 %v1584_v37, %v1582_v63  ;;  %v1604_v36 = vmul.f32 %v5013_v12, %v4924_v24  ;;  %v1607_v38 = vmul.f32 %v4849_v30, %v4799_v8 }
  0x47   : > { %v1608_v48 = vmul.f32 %v4852_v31, %v4799_v8  ;;  %v1609_v53 = vmul.f32 %v4868_v40, %v4805_v11  ;;  %v1610_v37 = vmul.f32 %v4871_v41, %v4805_v11  ;;  %v1613_v63 = vmul.f32 %v4911_v10, %v4821_v17 }
  0x48   : > { %v1589_v27 = vadd.f32 %v1587_v39, %v1585_v16  ;;  %v1590_v15 = vadd.f32 %v1588_v43, %v1586_v34  ;;  %v1614_v1 = vmul.f32 %v4931_v29, %v4821_v17  ;;  %v1617_v8 = vmul.f32 %v4900_v60, %v4835_v23  ;;  %v5050_v34 = vld [vmem:[%s4778_s13 + $0x71] sm:$0xff] }
  0x49   : > { %v1618_v39 = vmul.f32 %v4903_v61, %v4835_v23  ;;  %v1611_v11 = vadd.f32 %v1609_v53, %v1607_v38  ;;  %v1612_v0 = vadd.f32 %v1610_v37, %v1608_v48  ;;  %v1621_v43 = vmul.f32 %v4918_v21, %v4855_v32  ;;  %9401 = vst [vmem:[#allocation17_spill] sm:$0xff] %v5050_v34 }
  0x4a   : > { %v1593_v16 = vadd.f32 %v1591_v45, %v1589_v27  ;;  %v1594_v17 = vadd.f32 %v1592_v54, %v1590_v15  ;;  %v1622_v33 = vmul.f32 %v4921_v22, %v4855_v32  ;;  %v1625_v28 = vmul.f32 %v4942_v44, %v4874_v42  ;;  %v5063_v45 = vld [vmem:[%s4778_s13 + $0x79] sm:$0x3f] }
  0x4b   : > { %v1626_v23 = vmul.f32 %v4949_v49, %v4874_v42  ;;  %9402 = vst [vmem:[#allocation18_spill] sm:$0xff] %v5063_v45  ;;  %v1615_v38 = vadd.f32 %v1613_v63, %v1611_v11  ;;  %v1616_v27 = vadd.f32 %v1614_v1, %v1612_v0  ;;  %v1629_v54 = vmul.f32 %v4992_v46, %v4889_v52 }
  0x4c   : > { %v1597_v48 = vadd.f32 %v1595_v2, %v1593_v16  ;;  %v1598_v32 = vadd.f32 %v1596_v9, %v1594_v17  ;;  %v1630_v15 = vmul.f32 %v5001_v55, %v4889_v52  ;;  %v1633_v42 = vmul.f32 %v5004_v56, %v4906_v62 }
  0x4d   : > { %v1634_v53 = vmul.f32 %v5013_v12, %v4906_v62  ;;  %v1619_v49 = vadd.f32 %v1617_v8, %v1615_v38  ;;  %v1620_v2 = vadd.f32 %v1618_v39, %v1616_v27  ;;  %v1637_v0 = vmul.f32 %v5050_v34, %v4924_v24 }
  0x4e   : > { %v1601_v37 = vadd.f32 %v1599_v59, %v1597_v48  ;;  %v1602_v1 = vadd.f32 %v1600_v18, %v1598_v32  ;;  %v1638_v52 = vmul.f32 %v5063_v45, %v4924_v24  ;;  %v1646_v9 = vstv %s5027_s20  ;;  %s5507_s20 = sld [smem:[#allocation3 + $0x85]] }
  0x4f   : > { %v5087_v62 = vstv %s5029_s21  ;;  %v1623_v63 = vadd.f32 %v1621_v43, %v1619_v49  ;;  %v1624_v8 = vadd.f32 %v1622_v33, %v1620_v2  ;;  %v5094_v24 = vstv %s5043_s22  ;;  %s5522_s21 = sld [smem:[#allocation3 + $0x86]]  ;;  %s5524_s22 = sld [smem:[#allocation3 + $0x87]] }
  0x50   : > { %v1605_v59 = vadd.f32 %v1603_v26, %v1601_v37  ;;  %v151_v39 = vmul.f32 %v5087_v62, %v4781_v3  ;;  %v1606_v16 = vadd.f32 %v1604_v36, %v1602_v1  ;;  %v152_v18 = vmul.f32 %v5087_v62, %v4784_v4 }
  0x51   : > { %v5097_v11 = vstv %s5045_s23  ;;  %v1627_v17 = vadd.f32 %v1625_v28, %v1623_v63  ;;  %v1628_v48 = vadd.f32 %v1626_v23, %v1624_v8  ;;  %v154_v38 = vmul.f32 %v4787_v5, %v5094_v24  ;;  %s5558_s23 = sld [smem:[#allocation3 + $0x88]] }
  0x52   : > { %v155_v49 = vmul.f32 %v4792_v6, %v5094_v24  ;;  %v159_v33 = vmul.f32 %v5097_v11, %v4795_v7  ;;  %v160_v26 = vmul.f32 %v5097_v11, %v4810_v13  ;;  %v5108_v36 = vstv %s5058_s24  ;;  %s5790_s24 = sld [smem:[#allocation5 + $0x1]] }
  0x53   : > { %v5111_v43 = vstv %s5060_s25  ;;  %v1631_v28 = vadd.f32 %v1629_v54, %v1627_v17  ;;  %v1632_v23 = vadd.f32 %v1630_v15, %v1628_v48  ;;  %v156_v27 = vadd.f32 %v154_v38, %v151_v39  ;;  %s5792_s25 = sld [smem:[#allocation3 + $0x500]] }
  0x54   : > { %v157_v32 = vadd.f32 %v155_v49, %v152_v18  ;;  %v164_v37 = vmul.f32 %v4826_v19, %v5108_v36  ;;  %v165_v2 = vmul.f32 %v4829_v20, %v5108_v36  ;;  %v169_v1 = vmul.f32 %v4849_v30, %v5111_v43 }
  0x55   : > { %v170_v63 = vmul.f32 %v4852_v31, %v5111_v43  ;;  %v1635_v8 = vadd.f32 %v1633_v42, %v1631_v28  ;;  %v1636_v4 = vadd.f32 %v1634_v53, %v1632_v23  ;;  %v161_v3 = vadd.f32 %v159_v33, %v156_v27 }
  0x56   : > { %v162_v45 = vadd.f32 %v160_v26, %v157_v32  ;;  %v5122_v54 = vstv %s5075_s26  ;;  %v5125_v15 = vstv %s5077_s27  ;;  %v5128_v39 = vstv %s5082_s28  ;;  %s5800_s26 = sld [smem:[#allocation3 + $0x501]]  ;;  %s5806_s27 = sld [smem:[#allocation3 + $0x502]] }
  0x57   : > { %v5131_v18 = vstv %s5084_s0  ;;  %v1639_v17 = vadd.f32 %v1637_v0, %v1635_v8  ;;  %v1640_v48 = vadd.f32 %v1638_v52, %v1636_v4  ;;  %v166_v38 = vadd.f32 %v164_v37, %v161_v3  ;;  %s5812_s28 = sld [smem:[#allocation3 + $0x503]]  ;;  %s5822_s0 = sld [smem:[#allocation3 + $0x504]] }
  0x58   : > { %v167_v49 = vadd.f32 %v165_v2, %v162_v45  ;;  %v174_v34 = vmul.f32 %v4868_v40, %v5122_v54  ;;  %v175_v42 = vmul.f32 %v4871_v41, %v5122_v54  ;;  %v179_v53 = vmul.f32 %v4883_v50, %v5125_v15 }
  0x59   : > { %v180_v33 = vmul.f32 %v4886_v51, %v5125_v15  ;;  %v1641_v26 = vmax.f32 %v1605_v59, %v1639_v17  ;;  %v1642_v28 = vmax.f32 %v1606_v16, %v1640_v48  ;;  %v171_v23 = vadd.f32 %v169_v1, %v166_v38 }
  0x5a   : > { %v172_v27 = vadd.f32 %v170_v63, %v167_v49  ;;  %v184_v3 = vmul.f32 %v4900_v60, %v5128_v39  ;;  %v185_v4 = vmul.f32 %v4903_v61, %v5128_v39  ;;  %v189_v45 = vmul.f32 %v4918_v21, %v5131_v18 }
  0x5b   : > { %v190_v0 = vmul.f32 %v4921_v22, %v5131_v18  ;;  %v9403_v52 = vmax.f32 %v4955_v57, %v4981_v35  ;;  %v9404_v59 = vmax.f32 %v4957_v58, %v4994_v47  ;;  %v176_v37 = vadd.f32 %v174_v34, %v171_v23 }
  0x5c   : > { %v177_v2 = vadd.f32 %v175_v42, %v172_v27  ;;  %v193_v1 = vmul.f32 %v4787_v5, %v5087_v62  ;;  %v194_v63 = vmul.f32 %v4792_v6, %v5087_v62  ;;  %v195_v8 = vmul.f32 %v5094_v24, %v4795_v7 }
  0x5d   : > { %v1643_v32 = vmax.f32 %v9403_v52, %v1641_v26  ;;  %v1644_v16 = vmax.f32 %v9404_v59, %v1642_v28  ;;  %v196_v17 = vmul.f32 %v5094_v24, %v4810_v13  ;;  %v181_v48 = vadd.f32 %v179_v53, %v176_v37 }
  0x5e   : > { %v182_v38 = vadd.f32 %v180_v33, %v177_v2  ;;  %v197_v58 = vadd.f32 %v195_v8, %v193_v1  ;;  %v199_v34 = vmul.f32 %v4813_v14, %v5097_v11  ;;  %v200_v49 = vmul.f32 %v4840_v25, %v5097_v11 }
  0x5f   : > { %v1647_v57 = vadd.f32 %v1646_v9, %v1643_v32  ;;  %v1648_v35 = vadd.f32 %v1646_v9, %v1644_v16  ;;  %v198_v47 = vadd.f32 %v196_v17, %v194_v63  ;;  %v186_v28 = vadd.f32 %v184_v3, %v181_v48  ;;  %v9406_v48 = vld [vmem:[#allocation14_spill] sm:$0xff] }
  0x60   : > { %v187_v23 = vadd.f32 %v185_v4, %v182_v38  ;;  %v201_v27 = vadd.f32 %v199_v34, %v197_v58  ;;  %v203_v32 = vmul.f32 %v4849_v30, %v5108_v36  ;;  %v204_v9 = vmul.f32 %v4852_v31, %v5108_v36 }
  0x61   : > { %v1649_v42 = vmax.f32 %v1647_v57, 0.0  ;;  %v1650_v26 = vmax.f32 %v1648_v35, 0.0  ;;  %v202_v52 = vadd.f32 %v200_v49, %v198_v47  ;;  %v5173_v33 = vadd.f32 %v189_v45, %v186_v28 }
  0x62   : > { %v5175_v59 = vadd.f32 %v190_v0, %v187_v23  ;;  %v207_v3 = vmul.f32 %v4868_v40, %v5111_v43  ;;  %v205_v4 = vadd.f32 %v203_v32, %v201_v27  ;;  %v208_v37 = vmul.f32 %v4871_v41, %v5111_v43 }
  0x63   : > { %1651 = vst [vmem:[#allocation2 + $0x80] sm:$0xff] %v1649_v42  ;;  %1652 = vst [vmem:[#allocation2 + $0x88] sm:$0x3f] %v1650_v26  ;;  %v5171_v53 = vand.u32 4294901760, %v1649_v42  ;;  %v206_v16 = vadd.f32 %v204_v9, %v202_v52  ;;  %v211_v2 = vmul.f32 %v4911_v10, %v5122_v54  ;;  %v212_v1 = vmul.f32 %v4931_v29, %v5122_v54 }
  0x64   : > { %v215_v45 = vmul.f32 %v4900_v60, %v5125_v15  ;;  %v216_v0 = vmul.f32 %v4903_v61, %v5125_v15  ;;  %v219_v63 = vmul.f32 %v4918_v21, %v5128_v39  ;;  %v209_v8 = vadd.f32 %v207_v3, %v205_v4 }
  0x65   : > { %9405 = vst [vmem:[#allocation19_spill] sm:$0xff] %v5171_v53  ;;  %v210_v17 = vadd.f32 %v208_v37, %v206_v16  ;;  %v220_v57 = vmul.f32 %v4921_v22, %v5128_v39  ;;  %v223_v35 = vmul.f32 %v4942_v44, %v5131_v18  ;;  %v224_v38 = vmul.f32 %v9406_v48, %v5131_v18 }
  0x66   : > { %v229_v58 = vmul.f32 %v4826_v19, %v5087_v62  ;;  %v230_v47 = vmul.f32 %v4829_v20, %v5087_v62  ;;  %v231_v34 = vmul.f32 %v4849_v30, %v5094_v24  ;;  %v213_v49 = vadd.f32 %v211_v2, %v209_v8 }
  0x67   : > { %v214_v42 = vadd.f32 %v212_v1, %v210_v17  ;;  %v232_v26 = vmul.f32 %v4852_v31, %v5094_v24  ;;  %v235_v28 = vmul.f32 %v4868_v40, %v5097_v11  ;;  %v236_v27 = vmul.f32 %v4871_v41, %v5097_v11 }
  0x68   : > { %v233_v23 = vadd.f32 %v231_v34, %v229_v58  ;;  %v239_v52 = vmul.f32 %v4883_v50, %v5108_v36  ;;  %v240_v32 = vmul.f32 %v4886_v51, %v5108_v36  ;;  %v217_v3 = vadd.f32 %v215_v45, %v213_v49  ;;  %v9409_v49 = vld [vmem:[#allocation15_spill] sm:$0xff] }
  0x69   : > { %v218_v4 = vadd.f32 %v216_v0, %v214_v42  ;;  %v234_v16 = vadd.f32 %v232_v26, %v230_v47  ;;  %v243_v37 = vmul.f32 %v4900_v60, %v5111_v43  ;;  %v244_v8 = vmul.f32 %v4903_v61, %v5111_v43  ;;  %v9410_v26 = vld [vmem:[#allocation16_spill] sm:$0xff] }
  0x6a   : > { %v5213_v9 = vld [vmem:[#allocation2 + $0x88] sm:$0xff]  ;;  %v237_v1 = vadd.f32 %v235_v28, %v233_v23  ;;  %v247_v17 = vmul.f32 %v4918_v21, %v5122_v54  ;;  %v221_v58 = vadd.f32 %v219_v63, %v217_v3  ;;  %v248_v45 = vmul.f32 %v4921_v22, %v5122_v54 }
  0x6b   : > { %9407 = vst [vmem:[#allocation14_spill] sm:$0xff] %v5213_v9  ;;  %v9226_v2 = vand.u32 4294901760, %v5213_v9  ;;  %v222_v34 = vadd.f32 %v220_v57, %v218_v4  ;;  %v238_v25 = vadd.f32 %v236_v27, %v234_v16  ;;  %v251_v42 = vmul.f32 %v9409_v49, %v5125_v15 }
  0x6c   : > { %v241_v47 = vadd.f32 %v239_v52, %v237_v1  ;;  %v252_v28 = vmul.f32 %v9410_v26, %v5125_v15  ;;  %v5233_v23 = vadd.f32 %v223_v35, %v221_v58  ;;  %v255_v27 = vmul.f32 %v4992_v46, %v5128_v39 }
  0x6d   : > { %v5227_v0 = vpack.c.bf16 %v9226_v2, %v5171_v53  ;;  %v5235_v63 = vadd.f32 %v224_v38, %v222_v34  ;;  %v242_v57 = vadd.f32 %v240_v32, %v238_v25  ;;  %v256_v52 = vmul.f32 %v5001_v55, %v5128_v39 }
  0x6e   : > { %v245_v3 = vadd.f32 %v243_v37, %v241_v47  ;;  %v259_v4 = vmul.f32 %v5004_v56, %v5131_v18  ;;  %v260_v16 = vmul.f32 %v5013_v12, %v5131_v18  ;;  %v263_v32 = vmul.f32 %v4849_v30, %v5087_v62 }
  0x6f   : > { %9408 = vst [vmem:[#allocation20_spill] sm:$0xff] %v5227_v0  ;;  %4278 = vmatprep.subr.bf16.mxu0 %v5227_v0  ;;  %v246_v38 = vadd.f32 %v244_v8, %v242_v57  ;;  %v264_v1 = vmul.f32 %v4852_v31, %v5087_v62  ;;  %v265_v58 = vmul.f32 %v4868_v40, %v5094_v24 }
  0x70   : > { %v249_v37 = vadd.f32 %v247_v17, %v245_v3  ;;  %v266_v34 = vmul.f32 %v4871_v41, %v5094_v24  ;;  %v269_v47 = vmul.f32 %v4911_v10, %v5097_v11  ;;  %v270_v17 = vmul.f32 %v4931_v29, %v5097_v11 }
  0x71   : > { %v250_v8 = vadd.f32 %v248_v45, %v246_v38  ;;  %v273_v62 = vmul.f32 %v4900_v60, %v5108_v36  ;;  %v267_v3 = vadd.f32 %v265_v58, %v263_v32  ;;  %v274_v24 = vmul.f32 %v4903_v61, %v5108_v36 }
  0x72   : > { %v253_v57 = vadd.f32 %v251_v42, %v249_v37  ;;  %v268_v2 = vadd.f32 %v266_v34, %v264_v1  ;;  %v277_v38 = vmul.f32 %v4918_v21, %v5111_v43  ;;  %v278_v11 = vmul.f32 %v4921_v22, %v5111_v43 }
  0x73   : > { %v254_v45 = vadd.f32 %v252_v28, %v250_v8  ;;  %v281_v25 = vmul.f32 %v4942_v44, %v5122_v54  ;;  %v271_v32 = vadd.f32 %v269_v47, %v267_v3  ;;  %v282_v36 = vmul.f32 %v9406_v48, %v5122_v54  ;;  %v9411_v8 = vld [vmem:[#allocation17_spill] sm:$0xff]  ;;  %v9412_v47 = vld [vmem:[#allocation18_spill] sm:$0xff] }
  0x74   : > { %v257_v42 = vadd.f32 %v255_v27, %v253_v57  ;;  %v272_v37 = vadd.f32 %v270_v17, %v268_v2  ;;  %v285_v28 = vmul.f32 %v4992_v46, %v5125_v15  ;;  %v286_v58 = vmul.f32 %v5001_v55, %v5125_v15 }
  0x75   : > { %v258_v1 = vadd.f32 %v256_v52, %v254_v45  ;;  %v289_v43 = vmul.f32 %v5004_v56, %v5128_v39  ;;  %v275_v27 = vadd.f32 %v273_v62, %v271_v32  ;;  %v290_v54 = vmul.f32 %v5013_v12, %v5128_v39  ;;  %v9413_v39 = vld [vmem:[#allocation11_spill] sm:$0xff] }
  0x76   : > { %v261_v2 = vadd.f32 %v259_v4, %v257_v42  ;;  %v276_v34 = vadd.f32 %v274_v24, %v272_v37  ;;  %v293_v15 = vmul.f32 %v9411_v8, %v5131_v18  ;;  %v294_v17 = vmul.f32 %v9412_v47, %v5131_v18  ;;  %v9414_v24 = vld [vmem:[#allocation12_spill] sm:$0xff] }
  0x77   : > { %v262_v52 = vadd.f32 %v260_v16, %v258_v1  ;;  %v302_v57 = vstv %s5252_s1  ;;  %v279_v3 = vadd.f32 %v277_v38, %v275_v27  ;;  %v5306_v4 = vstv %s5260_s29  ;;  %s5824_s1 = sld [smem:[#allocation3 + $0x505]]  ;;  %s5841_s29 = sld [smem:[#allocation3 + $0x506]] }
  0x78   : > { %v280_v45 = vadd.f32 %v278_v11, %v276_v34  ;;  %v5309_v62 = vstv %s5262_s30  ;;  %v1663_v16 = vmul.f32 %v5306_v4, %v9413_v39  ;;  %v1664_v42 = vmul.f32 %v5306_v4, %v9414_v24  ;;  %s5846_s30 = sld [smem:[#allocation3 + $0x507]] }
  0x79   : > { %v1666_v18 = vmul.f32 %v4787_v5, %v5309_v62  ;;  %v1667_v38 = vmul.f32 %v4792_v6, %v5309_v62  ;;  %v283_v11 = vadd.f32 %v281_v25, %v279_v3  ;;  %v5320_v37 = vstv %s5272_s6  ;;  %s5862_s6 = sld [smem:[#allocation3 + $0x508]] }
  0x7a   : > { %v284_v32 = vadd.f32 %v282_v36, %v280_v45  ;;  %v5323_v1 = vstv %s5274_s7  ;;  %v1671_v39 = vmul.f32 %v5320_v37, %v4795_v7  ;;  %v1672_v24 = vmul.f32 %v5320_v37, %v4810_v13  ;;  %s6011_s7 = sld [smem:[#allocation5 + $0xa]] }
  0x7b   : > { %v1668_v27 = vadd.f32 %v1666_v18, %v1663_v16  ;;  %v1669_v34 = vadd.f32 %v1667_v38, %v1664_v42  ;;  %v287_v35 = vadd.f32 %v285_v28, %v283_v11  ;;  %v1676_v25 = vmul.f32 %v4826_v19, %v5323_v1 }
  0x7c   : > { %v288_v0 = vadd.f32 %v286_v58, %v284_v32  ;;  %v1677_v36 = vmul.f32 %v4829_v20, %v5323_v1  ;;  %v5336_v16 = vstv %s5290_s8  ;;  %v5339_v42 = vstv %s5292_s9  ;;  %s6019_s8 = sld [smem:[#allocation3 + $0x100]]  ;;  %s6027_s9 = sld [smem:[#allocation3 + $0x101]] }
  0x7d   : > { %v1673_v3 = vadd.f32 %v1671_v39, %v1668_v27  ;;  %v1674_v45 = vadd.f32 %v1672_v24, %v1669_v34  ;;  %v291_v18 = vadd.f32 %v289_v43, %v287_v35  ;;  %v1681_v28 = vmul.f32 %v4849_v30, %v5336_v16 }
  0x7e   : > { %v292_v38 = vadd.f32 %v290_v54, %v288_v0  ;;  %v1682_v58 = vmul.f32 %v4852_v31, %v5336_v16  ;;  %v1686_v9 = vmul.f32 %v4868_v40, %v5339_v42  ;;  %v1687_v27 = vmul.f32 %v4871_v41, %v5339_v42 }
  0x7f   : > { %v1678_v11 = vadd.f32 %v1676_v25, %v1673_v3  ;;  %v1679_v32 = vadd.f32 %v1677_v36, %v1674_v45  ;;  %v295_v34 = vadd.f32 %v293_v15, %v291_v18  ;;  %v5350_v24 = vstv %s5301_s10  ;;  %s6037_s10 = sld [smem:[#allocation3 + $0x102]] }
  0x80   : > { %v296_v39 = vadd.f32 %v294_v17, %v292_v38  ;;  %v5353_v0 = vstv %s5303_s11  ;;  %v1691_v54 = vmul.f32 %v4883_v50, %v5350_v24  ;;  %v1692_v25 = vmul.f32 %v4886_v51, %v5350_v24  ;;  %s6039_s11 = sld [smem:[#allocation3 + $0x103]] }
  0x81   : > { %v1683_v35 = vadd.f32 %v1681_v28, %v1678_v11  ;;  %v1684_v43 = vadd.f32 %v1682_v58, %v1679_v32  ;;  %v297_v36 = vmax.f32 %v261_v2, %v295_v34  ;;  %v1696_v45 = vmul.f32 %v4900_v60, %v5353_v0 }
  0x82   : > { %v298_v3 = vmax.f32 %v262_v52, %v296_v39  ;;  %v1697_v15 = vmul.f32 %v4903_v61, %v5353_v0  ;;  %v5364_v38 = vstv %s5325_s12  ;;  %v1705_v28 = vmul.f32 %v4787_v5, %v5306_v4  ;;  %s6059_s12 = sld [smem:[#allocation3 + $0x104]] }
  0x83   : > { %v1688_v17 = vadd.f32 %v1686_v9, %v1683_v35  ;;  %v1689_v18 = vadd.f32 %v1687_v27, %v1684_v43  ;;  %v9415_v58 = vmax.f32 %v5173_v33, %v5233_v23  ;;  %v9416_v2 = vmax.f32 %v5175_v59, %v5235_v63 }
  0x84   : > { %v1701_v32 = vmul.f32 %v4918_v21, %v5364_v38  ;;  %v1702_v9 = vmul.f32 %v4921_v22, %v5364_v38  ;;  %v1706_v39 = vmul.f32 %v4792_v6, %v5306_v4  ;;  %v1707_v5 = vmul.f32 %v5309_v62, %v4795_v7 }
  0x85   : > { %v299_v11 = vmax.f32 %v9415_v58, %v297_v36  ;;  %v300_v52 = vmax.f32 %v9416_v2, %v298_v3  ;;  %v1693_v27 = vadd.f32 %v1691_v54, %v1688_v17  ;;  %v1694_v34 = vadd.f32 %v1692_v25, %v1689_v18  ;;  %v9417_v54 = vld [vmem:[#allocation13_spill] sm:$0xff] }
  0x86   : > { %v1708_v59 = vmul.f32 %v5309_v62, %v4810_v13  ;;  %v1711_v63 = vmul.f32 %v4813_v14, %v5320_v37  ;;  %v1709_v36 = vadd.f32 %v1707_v5, %v1705_v28  ;;  %v1712_v25 = vmul.f32 %v9417_v54, %v5320_v37 }
  0x87   : > { %v303_v33 = vadd.f32 %v302_v57, %v299_v11  ;;  %v304_v23 = vadd.f32 %v302_v57, %v300_v52  ;;  %v1698_v35 = vadd.f32 %v1696_v45, %v1693_v27  ;;  %v1699_v43 = vadd.f32 %v1697_v15, %v1694_v34 }
  0x88   : > { %v1710_v6 = vadd.f32 %v1708_v59, %v1706_v39  ;;  %v1715_v7 = vmul.f32 %v4849_v30, %v5323_v1  ;;  %v1713_v13 = vadd.f32 %v1711_v63, %v1709_v36  ;;  %v1716_v14 = vmul.f32 %v4852_v31, %v5323_v1 }
  0x89   : > { %v305_v3 = vmax.f32 %v303_v33, 0.0  ;;  %v306_v17 = vmax.f32 %v304_v23, 0.0  ;;  %v5390_v18 = vadd.f32 %v1701_v32, %v1698_v35  ;;  %v5392_v57 = vadd.f32 %v1702_v9, %v1699_v43 }
  0x8a   : > { %v1714_v15 = vadd.f32 %v1712_v25, %v1710_v6  ;;  %v1719_v28 = vmul.f32 %v4868_v40, %v5336_v16  ;;  %v1720_v58 = vmul.f32 %v4871_v41, %v5336_v16  ;;  %v1717_v11 = vadd.f32 %v1715_v7, %v1713_v13 }
  0x8b   : > { %308 = vst [vmem:[#allocation2 + $0x8] sm:$0x3f] %v306_v17  ;;  %v2869_v45 = vand.u32 4294901760, %v305_v3  ;;  %v1723_v2 = vmul.f32 %v4911_v10, %v5339_v42  ;;  %v1724_v52 = vmul.f32 %v4931_v29, %v5339_v42  ;;  %v1727_v32 = vmul.f32 %v4900_v60, %v5350_v24 }
  0x8c   : > { %v1718_v27 = vadd.f32 %v1716_v14, %v1714_v15  ;;  %v1728_v34 = vmul.f32 %v4903_v61, %v5350_v24  ;;  %v1731_v39 = vmul.f32 %v4918_v21, %v5353_v0  ;;  %v1721_v5 = vadd.f32 %v1719_v28, %v1717_v11 }
  0x8d   : > { %v5406_v9 = vsub.f32 %v305_v3, %v2869_v45  ;;  %v1732_v33 = vmul.f32 %v4921_v22, %v5353_v0  ;;  %v1735_v23 = vmul.f32 %v4942_v44, %v5364_v38  ;;  %v1736_v59 = vmul.f32 %v9406_v48, %v5364_v38 }
  0x8e   : > { %v1722_v63 = vadd.f32 %v1720_v58, %v1718_v27  ;;  %v1741_v35 = vmul.f32 %v4826_v19, %v5306_v4  ;;  %v1742_v43 = vmul.f32 %v4829_v20, %v5306_v4  ;;  %v1743_v36 = vmul.f32 %v4849_v30, %v5309_v62 }
  0x8f   : > { %9418 = vst [vmem:[#allocation15_spill] sm:$0xff] %v5406_v9  ;;  %v1725_v54 = vadd.f32 %v1723_v2, %v1721_v5  ;;  %v1744_v25 = vmul.f32 %v4852_v31, %v5309_v62  ;;  %v1747_v3 = vmul.f32 %v4868_v40, %v5320_v37  ;;  %v1748_v17 = vmul.f32 %v4871_v41, %v5320_v37  ;;  %v5752_v9 = vld [vmem:[%s4778_s13 + $0x70] sm:$0xff] }
  0x90   : > { %v1726_v6 = vadd.f32 %v1724_v52, %v1722_v63  ;;  %v1745_v7 = vadd.f32 %v1743_v36, %v1741_v35  ;;  %v1751_v19 = vmul.f32 %v4883_v50, %v5323_v1  ;;  %v1752_v20 = vmul.f32 %v4886_v51, %v5323_v1 }
  0x91   : > { %v1729_v14 = vadd.f32 %v1727_v32, %v1725_v54  ;;  %v1746_v15 = vadd.f32 %v1744_v25, %v1742_v43  ;;  %v1755_v28 = vmul.f32 %v4900_v60, %v5336_v16  ;;  %v1756_v58 = vmul.f32 %v4903_v61, %v5336_v16 }
  0x92   : > { %v2837_v13 = vld [vmem:[#allocation2 + $0x8] sm:$0xff]  ;;  %v1730_v2 = vadd.f32 %v1728_v34, %v1726_v6  ;;  %v1749_v27 = vadd.f32 %v1747_v3, %v1745_v7  ;;  %v1759_v52 = vmul.f32 %v4918_v21, %v5339_v42  ;;  %v1760_v51 = vmul.f32 %v4921_v22, %v5339_v42 }
  0x93   : > { %v2872_v11 = vand.u32 4294901760, %v2837_v13  ;;  %v1733_v5 = vadd.f32 %v1731_v39, %v1729_v14  ;;  %v1750_v50 = vadd.f32 %v1748_v17, %v1746_v15  ;;  %v1763_v32 = vmul.f32 %v9409_v49, %v5350_v24 }
  0x94   : > { %v1734_v43 = vadd.f32 %v1732_v33, %v1730_v2  ;;  %v1753_v36 = vadd.f32 %v1751_v19, %v1749_v27  ;;  %v1764_v25 = vmul.f32 %v9410_v26, %v5350_v24  ;;  %v1767_v39 = vmul.f32 %v4992_v46, %v5353_v0 }
  0x95   : > { %v5444_v63 = vpack.c.bf16 %v2872_v11, %v2869_v45  ;;  %v5446_v35 = vsub.f32 %v2837_v13, %v2872_v11  ;;  %v5448_v54 = vadd.f32 %v1735_v23, %v1733_v5  ;;  %v1754_v34 = vadd.f32 %v1752_v20, %v1750_v50 }
  0x96   : > { %v5455_v3 = vadd.f32 %v1736_v59, %v1734_v43  ;;  %v1757_v49 = vadd.f32 %v1755_v28, %v1753_v36  ;;  %v1768_v45 = vmul.f32 %v5001_v55, %v5353_v0  ;;  %v1771_v33 = vmul.f32 %v5004_v56, %v5364_v38 }
  0x97   : > { %9419 = vst [vmem:[#allocation16_spill] sm:$0xff] %v5444_v63  ;;  %9420 = vst [vmem:[#allocation17_spill] sm:$0xff] %v5446_v35  ;;  %4280 = vmatpush3.bf16.msra.mxu0 %v5444_v63  ;;  %v1739_v23 = vmax.f32 %v5390_v18, %v5448_v54  ;;  %v1758_v17 = vadd.f32 %v1756_v58, %v1754_v34  ;;  %v1772_v26 = vmul.f32 %v5013_v12, %v5364_v38  ;;  %v5548_v34 = vld [vmem:[%s4778_s13 + $0x18] sm:$0x3f] }
  0x98   : > { %v1775_v6 = vmul.f32 %v4849_v30, %v5306_v4  ;;  %v1740_v59 = vmax.f32 %v5392_v57, %v5455_v3  ;;  %v1761_v7 = vadd.f32 %v1759_v52, %v1757_v49  ;;  %v1776_v19 = vmul.f32 %v4852_v31, %v5306_v4 }
  0x99   : > { %v1777_v20 = vmul.f32 %v4868_v40, %v5309_v62  ;;  %v1762_v13 = vadd.f32 %v1760_v51, %v1758_v17  ;;  %v1778_v30 = vmul.f32 %v4871_v41, %v5309_v62  ;;  %v1781_v14 = vmul.f32 %v4911_v10, %v5320_v37  ;;  %v5533_v51 = vld [vmem:[%s4778_s13] sm:$0xff] }
  0x9a   : > { %v1782_v15 = vmul.f32 %v4931_v29, %v5320_v37  ;;  %v1765_v28 = vadd.f32 %v1763_v32, %v1761_v7  ;;  %v1785_v31 = vmul.f32 %v4900_v60, %v5323_v1  ;;  %v1786_v40 = vmul.f32 %v4903_v61, %v5323_v1  ;;  %9421 = vst [vmem:[#allocation18_spill] sm:$0xff] %v5533_v51  ;;  %v5543_v32 = vld [vmem:[%s4778_s13 + $0x10] sm:$0xff]  ;;  %v5561_v17 = vld [vmem:[%s4778_s13 + $0x1] sm:$0xff] }
  0x9b   : > { %v1779_v58 = vadd.f32 %v1777_v20, %v1775_v6  ;;  %v1766_v4 = vadd.f32 %v1764_v25, %v1762_v13  ;;  %v1780_v41 = vadd.f32 %v1778_v30, %v1776_v19  ;;  %v1789_v10 = vmul.f32 %v4918_v21, %v5336_v16  ;;  %v5566_v6 = vld [vmem:[%s4778_s13 + $0x9] sm:$0x3f]  ;;  %v5571_v13 = vld [vmem:[%s4778_s13 + $0x20] sm:$0xff] }
  0x9c   : > { %v1790_v29 = vmul.f32 %v4921_v22, %v5336_v16  ;;  %v1769_v62 = vadd.f32 %v1767_v39, %v1765_v28  ;;  %v1793_v60 = vmul.f32 %v4942_v44, %v5339_v42  ;;  %v1794_v61 = vmul.f32 %v9406_v48, %v5339_v42 }
  0x9d   : > { %v1783_v37 = vadd.f32 %v1781_v14, %v1779_v58  ;;  %v1770_v1 = vadd.f32 %v1768_v45, %v1766_v4  ;;  %v1784_v11 = vadd.f32 %v1782_v15, %v1780_v41  ;;  %v1797_v2 = vmul.f32 %v4992_v46, %v5350_v24  ;;  %v5576_v14 = vld [vmem:[%s4778_s13 + $0x28] sm:$0x3f] }
  0x9e   : > { %v1798_v27 = vmul.f32 %v5001_v55, %v5350_v24  ;;  %v5509_v44 = vadd.f32 %v1771_v33, %v1769_v62  ;;  %v1801_v48 = vmul.f32 %v5004_v56, %v5353_v0  ;;  %v1802_v46 = vmul.f32 %v5013_v12, %v5353_v0  ;;  %9423 = vst [vmem:[#allocation12_spill] sm:$0xff] %v5576_v14  ;;  %v5592_v62 = vld [vmem:[%s4778_s13 + $0x38] sm:$0x3f] }
  0x9f   : > { %v1787_v16 = vadd.f32 %v1785_v31, %v1783_v37  ;;  %v5515_v42 = vadd.f32 %v1772_v26, %v1770_v1  ;;  %v1788_v55 = vadd.f32 %v1786_v40, %v1784_v11  ;;  %v1805_v24 = vmul.f32 %v9411_v8, %v5364_v38  ;;  %v5597_v1 = vld [vmem:[%s4778_s13 + $0x21] sm:$0xff] }
  0xa0   : > { %v1806_v52 = vmul.f32 %v9412_v47, %v5364_v38  ;;  %v1814_v50 = vstv %s5467_s14  ;;  %v5527_v56 = vstv %s5475_s15  ;;  %v5530_v12 = vstv %s5477_s16  ;;  %v5538_v47 = vld [vmem:[%s4778_s13 + $0x8] sm:$0x3f]  ;;  %s6069_s14 = sld [smem:[#allocation3 + $0x105]]  ;;  %s6084_s15 = sld [smem:[#allocation3 + $0x106]] }
  0xa1   : > { %v1791_v5 = vadd.f32 %v1789_v10, %v1787_v16  ;;  %v1792_v0 = vadd.f32 %v1790_v29, %v1788_v55  ;;  %v319_v8 = vmul.f32 %v5533_v51, %v5527_v56  ;;  %9422 = vst [vmem:[#allocation11_spill] sm:$0xff] %v5538_v47  ;;  %v320_v38 = vmul.f32 %v5538_v47, %v5527_v56  ;;  %v5587_v10 = vld [vmem:[%s4778_s13 + $0x30] sm:$0xff]  ;;  %s6086_s16 = sld [smem:[#allocation3 + $0x107]] }
  0xa2   : > { %v322_v43 = vmul.f32 %v5543_v32, %v5530_v12  ;;  %v323_v25 = vmul.f32 %v5548_v34, %v5530_v12  ;;  %v5553_v39 = vstv %s5489_s17  ;;  %v5556_v49 = vstv %s5491_s18  ;;  %s6103_s17 = sld [smem:[#allocation3 + $0x108]]  ;;  %s6252_s18 = sld [smem:[#allocation5 + $0x2]] }
  0xa3   : > { %v1795_v36 = vadd.f32 %v1793_v60, %v1791_v5  ;;  %v1796_v45 = vadd.f32 %v1794_v61, %v1792_v0  ;;  %v327_v26 = vmul.f32 %v5561_v17, %v5553_v39  ;;  %v328_v7 = vmul.f32 %v5566_v6, %v5553_v39 }
  0xa4   : > { %v324_v33 = vadd.f32 %v322_v43, %v319_v8  ;;  %v325_v20 = vadd.f32 %v323_v25, %v320_v38  ;;  %v332_v30 = vmul.f32 %v5571_v13, %v5556_v49  ;;  %v333_v15 = vmul.f32 %v5576_v14, %v5556_v49  ;;  %v5613_v8 = vld [vmem:[%s4778_s13 + $0x40] sm:$0xff]  ;;  %v5618_v43 = vld [vmem:[%s4778_s13 + $0x48] sm:$0x3f] }
  0xa5   : > { %v1799_v19 = vadd.f32 %v1797_v2, %v1795_v36  ;;  %v1800_v28 = vadd.f32 %v1798_v27, %v1796_v45  ;;  %v5581_v31 = vstv %s5505_s19  ;;  %v5584_v40 = vstv %s5507_s20  ;;  %v5602_v2 = vld [vmem:[%s4778_s13 + $0x29] sm:$0x3f]  ;;  %9424 = vst [vmem:[#allocation13_spill] sm:$0xff] %v5613_v8  ;;  %9425 = vst [vmem:[#allocation21_spill] sm:$0xff] %v5618_v43  ;;  %v5624_v45 = vld [vmem:[%s4778_s13 + $0x50] sm:$0xff]  ;;  %s6254_s19 = sld [smem:[#allocation3 + $0x580]] }
  0xa6   : > { %v329_v58 = vadd.f32 %v327_v26, %v324_v33  ;;  %v330_v41 = vadd.f32 %v328_v7, %v325_v20  ;;  %v337_v29 = vmul.f32 %v5587_v10, %v5581_v31  ;;  %v338_v37 = vmul.f32 %v5592_v62, %v5581_v31  ;;  %v5629_v33 = vld [vmem:[%s4778_s13 + $0x58] sm:$0x3f]  ;;  %s6262_s20 = sld [smem:[#allocation3 + $0x581]] }
  0xa7   : > { %v1803_v4 = vadd.f32 %v1801_v48, %v1799_v19  ;;  %v1804_v60 = vadd.f32 %v1802_v46, %v1800_v28  ;;  %v342_v11 = vmul.f32 %v5597_v1, %v5584_v40  ;;  %v343_v27 = vmul.f32 %v5602_v2, %v5584_v40 }
  0xa8   : > { %v334_v61 = vadd.f32 %v332_v30, %v329_v58  ;;  %v335_v48 = vadd.f32 %v333_v15, %v330_v41  ;;  %v5607_v55 = vstv %s5522_s21  ;;  %v5610_v5 = vstv %s5524_s22  ;;  %s6264_s21 = sld [smem:[#allocation3 + $0x582]]  ;;  %s6286_s22 = sld [smem:[#allocation3 + $0x583]] }
  0xa9   : > { %v1807_v16 = vadd.f32 %v1805_v24, %v1803_v4  ;;  %v1808_v46 = vadd.f32 %v1806_v52, %v1804_v60  ;;  %v347_v38 = vmul.f32 %v5613_v8, %v5607_v55  ;;  %v348_v36 = vmul.f32 %v5618_v43, %v5607_v55 }
  0xaa   : > { %v339_v0 = vadd.f32 %v337_v29, %v334_v61  ;;  %v340_v25 = vadd.f32 %v338_v37, %v335_v48  ;;  %v352_v52 = vmul.f32 %v5624_v45, %v5610_v5  ;;  %v353_v26 = vmul.f32 %v5629_v33, %v5610_v5  ;;  %v5658_v29 = vld [vmem:[%s4778_s13 + $0x11] sm:$0xff]  ;;  %v5665_v37 = vld [vmem:[%s4778_s13 + $0x19] sm:$0x3f] }
  0xab   : > { %v1809_v24 = vmax.f32 %v5509_v44, %v1807_v16  ;;  %v1810_v7 = vmax.f32 %v5515_v42, %v1808_v46  ;;  %v5635_v20 = vstv %s5558_s23  ;;  %v361_v44 = vmul.f32 %v5543_v32, %v5527_v56  ;;  %9426 = vst [vmem:[#allocation22_spill] sm:$0xff] %v5658_v29  ;;  %9427 = vst [vmem:[#allocation23_spill] sm:$0xff] %v5665_v37  ;;  %s6288_s23 = sld [smem:[#allocation3 + $0x584]] }
  0xac   : > { %v344_v19 = vadd.f32 %v342_v11, %v339_v0  ;;  %v345_v15 = vadd.f32 %v343_v27, %v340_v25  ;;  %v357_v28 = vmul.f32 %v4918_v21, %v5635_v20  ;;  %v358_v58 = vmul.f32 %v4921_v22, %v5635_v20 }
  0xad   : > { %v1811_v30 = vmax.f32 %v1739_v23, %v1809_v24  ;;  %v1812_v42 = vmax.f32 %v1740_v59, %v1810_v7  ;;  %v362_v41 = vmul.f32 %v5548_v34, %v5527_v56  ;;  %v363_v18 = vmul.f32 %v5561_v17, %v5530_v12  ;;  %v5682_v7 = vld [vmem:[%s4778_s13 + $0x31] sm:$0xff] }
  0xae   : > { %v349_v4 = vadd.f32 %v347_v38, %v344_v19  ;;  %v350_v23 = vadd.f32 %v348_v36, %v345_v15  ;;  %v364_v21 = vmul.f32 %v5566_v6, %v5530_v12  ;;  %v367_v22 = vmul.f32 %v5658_v29, %v5553_v39 }
  0xaf   : > { %v1815_v54 = vadd.f32 %v1814_v50, %v1811_v30  ;;  %v1816_v57 = vadd.f32 %v1814_v50, %v1812_v42  ;;  %v365_v59 = vadd.f32 %v363_v18, %v361_v44  ;;  %v368_v60 = vmul.f32 %v5665_v37, %v5553_v39  ;;  %v5687_v44 = vld [vmem:[%s4778_s13 + $0x39] sm:$0x3f] }
  0xb0   : > { %v354_v3 = vadd.f32 %v352_v52, %v349_v4  ;;  %v355_v11 = vadd.f32 %v353_v26, %v350_v23  ;;  %v366_v27 = vadd.f32 %v364_v21, %v362_v41  ;;  %v371_v16 = vmul.f32 %v5587_v10, %v5556_v49  ;;  %v5698_v41 = vld [vmem:[%s4778_s13 + $0x41] sm:$0xff]  ;;  %v5708_v21 = vld [vmem:[%s4778_s13 + $0x51] sm:$0xff] }
  0xb1   : > { %v1817_v61 = vmax.f32 %v1815_v54, 0.0  ;;  %v1818_v48 = vmax.f32 %v1816_v57, 0.0  ;;  %v369_v0 = vadd.f32 %v367_v22, %v365_v59  ;;  %v372_v50 = vmul.f32 %v5592_v62, %v5556_v49  ;;  %v5703_v54 = vld [vmem:[%s4778_s13 + $0x49] sm:$0x3f] }
  0xb2   : > { %v5671_v46 = vadd.f32 %v357_v28, %v354_v3  ;;  %v5675_v36 = vadd.f32 %v358_v58, %v355_v11  ;;  %v370_v24 = vadd.f32 %v368_v60, %v366_v27  ;;  %v375_v25 = vmul.f32 %v5597_v1, %v5581_v31  ;;  %v5713_v3 = vld [vmem:[%s4778_s13 + $0x59] sm:$0x3f] }
  0xb3   : > { %v2923_v38 = vand.u32 4294901760, %v1817_v61  ;;  %1820 = vst [vmem:[#allocation2 + $0x98] sm:$0x3f] %v1818_v48  ;;  %v373_v52 = vadd.f32 %v371_v16, %v369_v0  ;;  %v376_v26 = vmul.f32 %v5602_v2, %v5581_v31  ;;  %v379_v19 = vmul.f32 %v5682_v7, %v5584_v40 }
  0xb4   : > { %v380_v30 = vmul.f32 %v5687_v44, %v5584_v40  ;;  %v374_v28 = vadd.f32 %v372_v50, %v370_v24  ;;  %v383_v58 = vmul.f32 %v5624_v45, %v5607_v55  ;;  %v384_v42 = vmul.f32 %v5629_v33, %v5607_v55 }
  0xb5   : > { %v5691_v15 = vsub.f32 %v1817_v61, %v2923_v38  ;;  %v377_v4 = vadd.f32 %v375_v25, %v373_v52  ;;  %v387_v18 = vmul.f32 %v5698_v41, %v5610_v5  ;;  %v388_v23 = vmul.f32 %v5703_v54, %v5610_v5 }
  0xb6   : > { %v391_v22 = vmul.f32 %v5708_v21, %v5635_v20  ;;  %v378_v57 = vadd.f32 %v376_v26, %v374_v28  ;;  %v392_v59 = vmul.f32 %v5713_v3, %v5635_v20  ;;  %v397_v60 = vmul.f32 %v5571_v13, %v5527_v56 }
  0xb7   : > { %9428 = vst [vmem:[#allocation24_spill] sm:$0xff] %v5691_v15  ;;  %v398_v61 = vmul.f32 %v5576_v14, %v5527_v56  ;;  %v381_v11 = vadd.f32 %v379_v19, %v377_v4  ;;  %v399_v27 = vmul.f32 %v5587_v10, %v5530_v12  ;;  %v400_v16 = vmul.f32 %v5592_v62, %v5530_v12 }
  0xb8   : > { %v403_v48 = vmul.f32 %v5597_v1, %v5553_v39  ;;  %v382_v0 = vadd.f32 %v380_v30, %v378_v57  ;;  %v404_v50 = vmul.f32 %v5602_v2, %v5553_v39  ;;  %v407_v24 = vmul.f32 %v5613_v8, %v5556_v49 }
  0xb9   : > { %v408_v25 = vmul.f32 %v5618_v43, %v5556_v49  ;;  %v385_v52 = vadd.f32 %v383_v58, %v381_v11  ;;  %v401_v26 = vadd.f32 %v399_v27, %v397_v60  ;;  %v402_v19 = vadd.f32 %v400_v16, %v398_v61  ;;  %v5742_v27 = vld [vmem:[%s4778_s13 + $0x60] sm:$0xff]  ;;  %v5747_v16 = vld [vmem:[%s4778_s13 + $0x68] sm:$0x3f] }
  0xba   : > { %v411_v28 = vmul.f32 %v5624_v45, %v5581_v31  ;;  %v2855_v4 = vld [vmem:[#allocation2 + $0x98] sm:$0xff]  ;;  %v386_v30 = vadd.f32 %v384_v42, %v382_v0  ;;  %v412_v57 = vmul.f32 %v5629_v33, %v5581_v31  ;;  %v415_v63 = vmul.f32 %v5698_v41, %v5584_v40  ;;  %9429 = vst [vmem:[#allocation25_spill] sm:$0xff] %v5742_v27 }
  0xbb   : > { %v416_v15 = vmul.f32 %v5703_v54, %v5584_v40  ;;  %v2926_v35 = vand.u32 4294901760, %v2855_v4  ;;  %v389_v58 = vadd.f32 %v387_v18, %v385_v52  ;;  %v405_v60 = vadd.f32 %v403_v48, %v401_v26  ;;  %9430 = vst [vmem:[#allocation26_spill] sm:$0xff] %v5747_v16 }
  0xbc   : > { %v406_v61 = vadd.f32 %v404_v50, %v402_v19  ;;  %v390_v11 = vadd.f32 %v388_v23, %v386_v30  ;;  %v419_v42 = vmul.f32 %v5742_v27, %v5607_v55  ;;  %v420_v0 = vmul.f32 %v5747_v16, %v5607_v55  ;;  %v5765_v30 = vld [vmem:[%s4778_s13 + $0x78] sm:$0x3f]  ;;  %v5770_v16 = vld [vmem:[%s4778_s13 + $0x61] sm:$0xff] }
  0xbd   : > { %v423_v18 = vmul.f32 %v5752_v9, %v5610_v5  ;;  %v5756_v48 = vpack.c.bf16 %v2926_v35, %v2923_v38  ;;  %v5758_v50 = vsub.f32 %v2855_v4, %v2926_v35  ;;  %v5760_v23 = vadd.f32 %v391_v22, %v389_v58  ;;  %v5778_v22 = vld [vmem:[%s4778_s13 + $0x69] sm:$0x3f] }
  0xbe   : > { %v409_v52 = vadd.f32 %v407_v24, %v405_v60  ;;  %v5762_v26 = vadd.f32 %v392_v59, %v390_v11  ;;  %v410_v19 = vadd.f32 %v408_v25, %v406_v61  ;;  %v424_v53 = vmul.f32 %v5765_v30, %v5610_v5 }
  0xbf   : > { %9431 = vst [vmem:[#allocation27_spill] sm:$0xff] %v5756_v48  ;;  %9432 = vst [vmem:[#allocation28_spill] sm:$0xff] %v5758_v50  ;;  %v427_v27 = vmul.f32 %v5770_v16, %v5635_v20  ;;  %4282 = vmatprep.subr.bf16.mxu0 %v5756_v48  ;;  %v428_v59 = vmul.f32 %v5778_v22, %v5635_v20  ;;  %v431_v24 = vmul.f32 %v5587_v10, %v5527_v56 }
  0xc0   : > { %v413_v38 = vadd.f32 %v411_v28, %v409_v52  ;;  %v414_v4 = vadd.f32 %v412_v57, %v410_v19  ;;  %v432_v58 = vmul.f32 %v5592_v62, %v5527_v56  ;;  %v433_v60 = vmul.f32 %v5597_v1, %v5530_v12 }
  0xc1   : > { %v434_v61 = vmul.f32 %v5602_v2, %v5530_v12  ;;  %v437_v11 = vmul.f32 %v5682_v7, %v5553_v39  ;;  %v438_v57 = vmul.f32 %v5687_v44, %v5553_v39  ;;  %v441_v19 = vmul.f32 %v5624_v45, %v5556_v49 }
  0xc2   : > { %v417_v28 = vadd.f32 %v415_v63, %v413_v38  ;;  %v418_v56 = vadd.f32 %v416_v15, %v414_v4  ;;  %v435_v52 = vadd.f32 %v433_v60, %v431_v24  ;;  %v442_v25 = vmul.f32 %v5629_v33, %v5556_v49 }
  0xc3   : > { %v436_v12 = vadd.f32 %v434_v61, %v432_v58  ;;  %v445_v38 = vmul.f32 %v5698_v41, %v5581_v31  ;;  %v446_v39 = vmul.f32 %v5703_v54, %v5581_v31  ;;  %v449_v4 = vmul.f32 %v5708_v21, %v5584_v40 }
  0xc4   : > { %v421_v63 = vadd.f32 %v419_v42, %v417_v28  ;;  %v422_v15 = vadd.f32 %v420_v0, %v418_v56  ;;  %v439_v24 = vadd.f32 %v437_v11, %v435_v52  ;;  %v450_v49 = vmul.f32 %v5713_v3, %v5584_v40  ;;  %v5836_v56 = vld [vmem:[%s4778_s13 + $0x79] sm:$0x3f] }
  0xc5   : > { %v440_v58 = vadd.f32 %v438_v57, %v436_v12  ;;  %v453_v60 = vmul.f32 %v5752_v9, %v5607_v55  ;;  %v454_v31 = vmul.f32 %v5765_v30, %v5607_v55  ;;  %v457_v61 = vmul.f32 %v5770_v16, %v5610_v5  ;;  %v5831_v57 = vld [vmem:[%s4778_s13 + $0x71] sm:$0xff]  ;;  %9433 = vst [vmem:[#allocation29_spill] sm:$0xff] %v5836_v56 }
  0xc6   : > { %v425_v42 = vadd.f32 %v423_v18, %v421_v63  ;;  %v426_v0 = vadd.f32 %v424_v53, %v422_v15  ;;  %v443_v28 = vadd.f32 %v441_v19, %v439_v24  ;;  %v458_v40 = vmul.f32 %v5778_v22, %v5610_v5 }
  0xc7   : > { %v444_v11 = vadd.f32 %v442_v25, %v440_v58  ;;  %v461_v55 = vmul.f32 %v5831_v57, %v5635_v20  ;;  %v462_v53 = vmul.f32 %v5836_v56, %v5635_v20  ;;  %v470_v63 = vstv %s5790_s24  ;;  %s6301_s24 = sld [smem:[#allocation3 + $0x585]] }
  0xc8   : > { %v429_v18 = vadd.f32 %v427_v27, %v425_v42  ;;  %v430_v52 = vadd.f32 %v428_v59, %v426_v0  ;;  %v447_v19 = vadd.f32 %v445_v38, %v443_v28  ;;  %v5844_v5 = vstv %s5792_s25  ;;  %s6303_s25 = sld [smem:[#allocation3 + $0x586]] }
  0xc9   : > { %v448_v27 = vadd.f32 %v446_v39, %v444_v11  ;;  %v1831_v25 = vmul.f32 %v5533_v51, %v5844_v5  ;;  %v1832_v12 = vmul.f32 %v5538_v47, %v5844_v5  ;;  %v5853_v15 = vstv %s5800_s26  ;;  %s6340_s26 = sld [smem:[#allocation3 + $0x587]] }
  0xca   : > { %v451_v20 = vadd.f32 %v449_v4, %v447_v19  ;;  %v1834_v59 = vmul.f32 %v5543_v32, %v5853_v15  ;;  %v1835_v38 = vmul.f32 %v5548_v34, %v5853_v15  ;;  %v5860_v39 = vstv %s5806_s27  ;;  %s6347_s27 = sld [smem:[#allocation3 + $0x588]] }
  0xcb   : > { %v452_v24 = vadd.f32 %v450_v49, %v448_v27  ;;  %v1839_v42 = vmul.f32 %v5561_v17, %v5860_v39  ;;  %v1840_v58 = vmul.f32 %v5566_v6, %v5860_v39  ;;  %v5869_v0 = vstv %s5812_s28  ;;  %s6577_s28 = sld [smem:[#allocation5 + $0xb]] }
  0xcc   : > { %v455_v4 = vadd.f32 %v453_v60, %v451_v20  ;;  %v1836_v28 = vadd.f32 %v1834_v59, %v1831_v25  ;;  %v1837_v11 = vadd.f32 %v1835_v38, %v1832_v12  ;;  %v1844_v19 = vmul.f32 %v5571_v13, %v5869_v0 }
  0xcd   : > { %v456_v35 = vadd.f32 %v454_v31, %v452_v24  ;;  %v1845_v49 = vmul.f32 %v5576_v14, %v5869_v0  ;;  %v5876_v27 = vstv %s5822_s0  ;;  %v5879_v48 = vstv %s5824_s1  ;;  %s6579_s0 = sld [smem:[#allocation3 + $0x180]]  ;;  %s6587_s1 = sld [smem:[#allocation3 + $0x181]] }
  0xce   : > { %v459_v50 = vadd.f32 %v457_v61, %v455_v4  ;;  %v1841_v47 = vadd.f32 %v1839_v42, %v1836_v28  ;;  %v1842_v51 = vadd.f32 %v1840_v58, %v1837_v11  ;;  %v1849_v60 = vmul.f32 %v5587_v10, %v5876_v27 }
  0xcf   : > { %v460_v25 = vadd.f32 %v458_v40, %v456_v35  ;;  %v1850_v12 = vmul.f32 %v5592_v62, %v5876_v27  ;;  %v1854_v31 = vmul.f32 %v5597_v1, %v5879_v48  ;;  %v1855_v20 = vmul.f32 %v5602_v2, %v5879_v48 }
  0xd0   : > { %v463_v59 = vadd.f32 %v461_v55, %v459_v50  ;;  %v1846_v38 = vadd.f32 %v1844_v19, %v1841_v47  ;;  %v1847_v24 = vadd.f32 %v1845_v49, %v1842_v51  ;;  %v5890_v61 = vstv %s5841_s29  ;;  %s6589_s29 = sld [smem:[#allocation3 + $0x182]] }
  0xd1   : > { %v464_v42 = vadd.f32 %v462_v53, %v460_v25  ;;  %v1859_v58 = vmul.f32 %v5613_v8, %v5890_v61  ;;  %v1860_v35 = vmul.f32 %v5618_v43, %v5890_v61  ;;  %v5897_v40 = vstv %s5846_s30  ;;  %s6611_s30 = sld [smem:[#allocation3 + $0x183]] }
  0xd2   : > { %v465_v4 = vmax.f32 %v429_v18, %v463_v59  ;;  %v1851_v28 = vadd.f32 %v1849_v60, %v1846_v38  ;;  %v1852_v11 = vadd.f32 %v1850_v12, %v1847_v24  ;;  %v1864_v56 = vmul.f32 %v5624_v45, %v5897_v40 }
  0xd3   : > { %v466_v50 = vmax.f32 %v430_v52, %v464_v42  ;;  %v1865_v51 = vmul.f32 %v5629_v33, %v5897_v40  ;;  %v5904_v47 = vstv %s5862_s6  ;;  %v1873_v55 = vmul.f32 %v5543_v32, %v5844_v5  ;;  %s6613_s6 = sld [smem:[#allocation3 + $0x184]] }
  0xd4   : > { %v9434_v53 = vmax.f32 %v5671_v46, %v5760_v23  ;;  %v1856_v49 = vadd.f32 %v1854_v31, %v1851_v28  ;;  %v1857_v18 = vadd.f32 %v1855_v20, %v1852_v11  ;;  %v1869_v60 = vmul.f32 %v5698_v41, %v5904_v47 }
  0xd5   : > { %v9435_v52 = vmax.f32 %v5675_v36, %v5762_v26  ;;  %v1870_v12 = vmul.f32 %v5703_v54, %v5904_v47  ;;  %v1874_v59 = vmul.f32 %v5548_v34, %v5844_v5  ;;  %v1875_v38 = vmul.f32 %v5561_v17, %v5853_v15 }
  0xd6   : > { %v467_v19 = vmax.f32 %v9434_v53, %v465_v4  ;;  %v1861_v23 = vadd.f32 %v1859_v58, %v1856_v49  ;;  %v1862_v31 = vadd.f32 %v1860_v35, %v1857_v18  ;;  %v1876_v20 = vmul.f32 %v5566_v6, %v5853_v15 }
  0xd7   : > { %v468_v25 = vmax.f32 %v9435_v52, %v466_v50  ;;  %v1877_v42 = vadd.f32 %v1875_v38, %v1873_v55  ;;  %v1879_v36 = vmul.f32 %v5658_v29, %v5860_v39  ;;  %v1880_v26 = vmul.f32 %v5665_v37, %v5860_v39 }
  0xd8   : > { %v471_v46 = vadd.f32 %v470_v63, %v467_v19  ;;  %v1866_v28 = vadd.f32 %v1864_v56, %v1861_v23  ;;  %v1867_v11 = vadd.f32 %v1865_v51, %v1862_v31  ;;  %v1878_v50 = vadd.f32 %v1876_v20, %v1874_v59 }
  0xd9   : > { %v472_v24 = vadd.f32 %v470_v63, %v468_v25  ;;  %v1881_v52 = vadd.f32 %v1879_v36, %v1877_v42  ;;  %v1883_v58 = vmul.f32 %v5587_v10, %v5869_v0  ;;  %v1884_v35 = vmul.f32 %v5592_v62, %v5869_v0 }
  0xda   : > { %v473_v4 = vmax.f32 %v471_v46, 0.0  ;;  %v5932_v55 = vadd.f32 %v1869_v60, %v1866_v28  ;;  %v5934_v19 = vadd.f32 %v1870_v12, %v1867_v11  ;;  %v1882_v49 = vadd.f32 %v1880_v26, %v1878_v50 }
  0xdb   : > { %v474_v53 = vmax.f32 %v472_v24, 0.0  ;;  %v1885_v18 = vadd.f32 %v1883_v58, %v1881_v52  ;;  %v1887_v56 = vmul.f32 %v5597_v1, %v5876_v27  ;;  %v1888_v51 = vmul.f32 %v5602_v2, %v5876_v27 }
  0xdc   : > { %v2875_v63 = vand.u32 4294901760, %v473_v4  ;;  %v1891_v25 = vmul.f32 %v5682_v7, %v5879_v48  ;;  %v1886_v38 = vadd.f32 %v1884_v35, %v1882_v49  ;;  %v1892_v60 = vmul.f32 %v5687_v44, %v5879_v48 }
  0xdd   : > { %476 = vst [vmem:[#allocation2 + $0x18] sm:$0x3f] %v474_v53  ;;  %v1895_v12 = vmul.f32 %v5624_v45, %v5890_v61  ;;  %v1889_v46 = vadd.f32 %v1887_v56, %v1885_v18  ;;  %v1896_v23 = vmul.f32 %v5629_v33, %v5890_v61  ;;  %v1899_v31 = vmul.f32 %v5698_v41, %v5897_v40 }
  0xde   : > { %v5942_v59 = vsub.f32 %v473_v4, %v2875_v63  ;;  %v1900_v20 = vmul.f32 %v5703_v54, %v5897_v40  ;;  %v1890_v24 = vadd.f32 %v1888_v51, %v1886_v38  ;;  %v1903_v42 = vmul.f32 %v5708_v21, %v5904_v47 }
  0xdf   : > { %v1904_v36 = vmul.f32 %v5713_v3, %v5904_v47  ;;  %v1909_v26 = vmul.f32 %v5571_v13, %v5844_v5  ;;  %v1893_v4 = vadd.f32 %v1891_v25, %v1889_v46  ;;  %v1910_v28 = vmul.f32 %v5576_v14, %v5844_v5 }
  0xe0   : > { %9436 = vst [vmem:[#allocation30_spill] sm:$0xff] %v5942_v59  ;;  %v1911_v11 = vmul.f32 %v5587_v10, %v5853_v15  ;;  %v1912_v50 = vmul.f32 %v5592_v62, %v5853_v15  ;;  %v1894_v53 = vadd.f32 %v1892_v60, %v1890_v24  ;;  %v1915_v52 = vmul.f32 %v5597_v1, %v5860_v39 }
  0xe1   : > { %v1916_v58 = vmul.f32 %v5602_v2, %v5860_v39  ;;  %v1919_v35 = vmul.f32 %v5613_v8, %v5869_v0  ;;  %v1897_v49 = vadd.f32 %v1895_v12, %v1893_v4  ;;  %v1920_v51 = vmul.f32 %v5618_v43, %v5869_v0 }
  0xe2   : > { %v1913_v18 = vadd.f32 %v1911_v11, %v1909_v26  ;;  %v1914_v56 = vadd.f32 %v1912_v50, %v1910_v28  ;;  %v1898_v38 = vadd.f32 %v1896_v23, %v1894_v53  ;;  %v1923_v60 = vmul.f32 %v5624_v45, %v5876_v27  ;;  %v9437_v28 = vld [vmem:[#allocation25_spill] sm:$0xff]  ;;  %v9438_v11 = vld [vmem:[#allocation26_spill] sm:$0xff] }
  0xe3   : > { %v1924_v46 = vmul.f32 %v5629_v33, %v5876_v27  ;;  %v1927_v24 = vmul.f32 %v5698_v41, %v5879_v48  ;;  %v1901_v37 = vadd.f32 %v1899_v31, %v1897_v49  ;;  %v1928_v4 = vmul.f32 %v5703_v54, %v5879_v48 }
  0xe4   : > { %v2839_v25 = vld [vmem:[#allocation2 + $0x18] sm:$0xff]  ;;  %v1917_v29 = vadd.f32 %v1915_v52, %v1913_v18  ;;  %v1918_v12 = vadd.f32 %v1916_v58, %v1914_v56  ;;  %v1902_v26 = vadd.f32 %v1900_v20, %v1898_v38  ;;  %v1931_v23 = vmul.f32 %v9437_v28, %v5890_v61 }
  0xe5   : > { %v2878_v59 = vand.u32 4294901760, %v2839_v25  ;;  %v1932_v50 = vmul.f32 %v9438_v11, %v5890_v61  ;;  %v5990_v8 = vadd.f32 %v1903_v42, %v1901_v37  ;;  %v1935_v20 = vmul.f32 %v5752_v9, %v5897_v40 }
  0xe6   : > { %v1921_v14 = vadd.f32 %v1919_v35, %v1917_v29  ;;  %v5992_v31 = vadd.f32 %v1904_v36, %v1902_v26  ;;  %v1922_v52 = vadd.f32 %v1920_v51, %v1918_v12  ;;  %v1936_v58 = vmul.f32 %v5765_v30, %v5897_v40 }
  0xe7   : > { %v5986_v53 = vpack.c.bf16 %v2878_v59, %v2875_v63  ;;  %v5988_v43 = vsub.f32 %v2839_v25, %v2878_v59  ;;  %v1939_v37 = vmul.f32 %v5770_v16, %v5904_v47  ;;  %v1940_v29 = vmul.f32 %v5778_v22, %v5904_v47 }
  0xe8   : > { %v1925_v49 = vadd.f32 %v1923_v60, %v1921_v14  ;;  %v1926_v42 = vadd.f32 %v1924_v46, %v1922_v52  ;;  %v1943_v36 = vmul.f32 %v5587_v10, %v5844_v5  ;;  %v1944_v35 = vmul.f32 %v5592_v62, %v5844_v5 }
  0xe9   : > { %9439 = vst [vmem:[#allocation25_spill] sm:$0xff] %v5986_v53  ;;  %9440 = vst [vmem:[#allocation26_spill] sm:$0xff] %v5988_v43  ;;  %4284 = vmatpush3.bf16.msra.mxu0 %v5986_v53  ;;  %v1945_v14 = vmul.f32 %v5597_v1, %v5853_v15  ;;  %v1946_v56 = vmul.f32 %v5602_v2, %v5853_v15  ;;  %v1949_v51 = vmul.f32 %v5682_v7, %v5860_v39 }
  0xea   : > { %v1929_v18 = vadd.f32 %v1927_v24, %v1925_v49  ;;  %v1930_v25 = vadd.f32 %v1928_v4, %v1926_v42  ;;  %v1950_v38 = vmul.f32 %v5687_v44, %v5860_v39  ;;  %v1953_v5 = vmul.f32 %v5624_v45, %v5869_v0 }
  0xeb   : > { %v1954_v60 = vmul.f32 %v5629_v33, %v5869_v0  ;;  %v1947_v24 = vadd.f32 %v1945_v14, %v1943_v36  ;;  %v1948_v15 = vadd.f32 %v1946_v56, %v1944_v35  ;;  %v1957_v12 = vmul.f32 %v5698_v41, %v5876_v27 }
  0xec   : > { %v1933_v46 = vadd.f32 %v1931_v23, %v1929_v18  ;;  %v1934_v26 = vadd.f32 %v1932_v50, %v1930_v25  ;;  %v1958_v4 = vmul.f32 %v5703_v54, %v5876_v27  ;;  %v1961_v39 = vmul.f32 %v5708_v21, %v5879_v48  ;;  %v4530_v25 = vld [vmem:[#allocation2 + $0x80] sm:$0xff] }
  0xed   : > { %v1962_v52 = vmul.f32 %v5713_v3, %v5879_v48  ;;  %v1951_v23 = vadd.f32 %v1949_v51, %v1947_v24  ;;  %v1952_v49 = vadd.f32 %v1950_v38, %v1948_v15  ;;  %v1965_v50 = vmul.f32 %v5752_v9, %v5890_v61  ;;  %v9442_v38 = vld [vmem:[#allocation19_spill] sm:$0xff]  ;;  %v4531_v24 = vld [vmem:[#allocation2 + $0x88] sm:$0xff] }
  0xee   : > { %v1937_v0 = vadd.f32 %v1935_v20, %v1933_v46  ;;  %v1938_v42 = vadd.f32 %v1936_v58, %v1934_v26  ;;  %v1966_v27 = vmul.f32 %v5765_v30, %v5890_v61  ;;  %v1969_v36 = vmul.f32 %v5770_v16, %v5897_v40  ;;  %v9441_v58 = vld [vmem:[#allocation29_spill] sm:$0xff]  ;;  %v9447_v26 = vld [vmem:[#allocation18_spill] sm:$0xff] }
  0xef   : > { %v1970_v48 = vmul.f32 %v5778_v22, %v5897_v40  ;;  %v1955_v18 = vadd.f32 %v1953_v5, %v1951_v23  ;;  %v1956_v20 = vadd.f32 %v1954_v60, %v1952_v49  ;;  %v1973_v14 = vmul.f32 %v5831_v57, %v5904_v47  ;;  %v9444_v5 = vld [vmem:[#allocation14_spill] sm:$0xff]  ;;  %v9448_v23 = vld [vmem:[#allocation11_spill] sm:$0xff] }
  0xf0   : > { %v6049_v35 = vadd.f32 %v1939_v37, %v1937_v0  ;;  %v1942_v56 = vadd.f32 %v1940_v29, %v1938_v42  ;;  %v1974_v51 = vmul.f32 %v9441_v58, %v5904_v47  ;;  %v6057_v46 = vsub.f32 %v4530_v25, %v9442_v38 }
  0xf1   : > { %v1959_v40 = vadd.f32 %v1957_v12, %v1955_v18  ;;  %v1960_v37 = vadd.f32 %v1958_v4, %v1956_v20  ;;  %v9445_v60 = vand.u32 4294901760, %v9444_v5  ;;  %v6066_v29 = vstv %s6019_s8  ;;  %s6632_s8 = sld [smem:[#allocation3 + $0x186]] }
  0xf2   : > { %9443 = vst [vmem:[#allocation29_spill] sm:$0xff] %v6057_v46  ;;  %v9256_v47 = vand.u32 4294901760, %v6057_v46  ;;  %v487_v0 = vmul.f32 %v9447_v26, %v6066_v29  ;;  %v488_v12 = vmul.f32 %v9448_v23, %v6066_v29  ;;  %v6076_v4 = vstv %s6027_s9  ;;  %s6657_s9 = sld [smem:[#allocation3 + $0x187]] }
  0xf3   : > { %v6063_v15 = vsub.f32 %v4531_v24, %v9445_v60  ;;  %v1963_v49 = vadd.f32 %v1961_v39, %v1959_v40  ;;  %v1964_v42 = vadd.f32 %v1962_v52, %v1960_v37  ;;  %v490_v20 = vmul.f32 %v5543_v32, %v6076_v4 }
  0xf4   : > { %v3111_v25 = vsub.f32 %v6057_v46, %v9256_v47  ;;  %v491_v38 = vmul.f32 %v5548_v34, %v6076_v4  ;;  %v6091_v24 = vstv %s6037_s10  ;;  %v6094_v39 = vstv %s6039_s11  ;;  %s6661_s10 = sld [smem:[#allocation3 + $0x188]]  ;;  %s6811_s11 = sld [smem:[#allocation5 + $0x3]] }
  0xf5   : > { %9446 = vst [vmem:[#allocation19_spill] sm:$0xff] %v6063_v15  ;;  %v9257_v18 = vand.u32 4294901760, %v6063_v15  ;;  %v1967_v52 = vadd.f32 %v1965_v50, %v1963_v49  ;;  %v1968_v40 = vadd.f32 %v1966_v27, %v1964_v42  ;;  %v492_v5 = vadd.f32 %v490_v20, %v487_v0  ;;  %v9449_v0 = vld [vmem:[#allocation12_spill] sm:$0xff] }
  0xf6   : > { %v3112_v60 = vand.u32 4294901760, %v3111_v25  ;;  %v493_v26 = vadd.f32 %v491_v38, %v488_v12  ;;  %v495_v23 = vmul.f32 %v5561_v17, %v6091_v24  ;;  %v496_v47 = vmul.f32 %v5566_v6, %v6091_v24 }
  0xf7   : > { %v3118_v37 = vsub.f32 %v6063_v15, %v9257_v18  ;;  %v1971_v61 = vadd.f32 %v1969_v36, %v1967_v52  ;;  %v1972_v59 = vadd.f32 %v1970_v48, %v1968_v40  ;;  %v500_v50 = vmul.f32 %v5571_v13, %v6094_v39 }
  0xf8   : > { %v497_v27 = vadd.f32 %v495_v23, %v492_v5  ;;  %v498_v49 = vadd.f32 %v496_v47, %v493_v26  ;;  %v501_v12 = vmul.f32 %v9449_v0, %v6094_v39  ;;  %v6110_v42 = vstv %s6059_s12  ;;  %s6813_s12 = sld [smem:[#allocation3 + $0x600]] }
  0xf9   : > { %v3119_v63 = vand.u32 4294901760, %v3118_v37  ;;  %v1975_v20 = vadd.f32 %v1973_v14, %v1971_v61  ;;  %v1976_v25 = vadd.f32 %v1974_v51, %v1972_v59  ;;  %v505_v48 = vmul.f32 %v5587_v10, %v6110_v42 }
  0xfa   : > { %v502_v38 = vadd.f32 %v500_v50, %v497_v27  ;;  %v503_v52 = vadd.f32 %v501_v12, %v498_v49  ;;  %v506_v40 = vmul.f32 %v5592_v62, %v6110_v42  ;;  %v6117_v37 = vstv %s6069_s14  ;;  %v9452_v50 = vld [vmem:[#allocation13_spill] sm:$0xff]  ;;  %s6821_s14 = sld [smem:[#allocation3 + $0x601]] }
  0xfb   : > { %v4309_v36 = vpack.c.bf16 %v3119_v63, %v3112_v60  ;;  %v1977_v47 = vmax.f32 %v6049_v35, %v1975_v20  ;;  %v1978_v5 = vmax.f32 %v1942_v56, %v1976_v25  ;;  %v510_v59 = vmul.f32 %v5597_v1, %v6117_v37  ;;  %v9453_v49 = vld [vmem:[#allocation21_spill] sm:$0xff] }
  0xfc   : > { %v511_v63 = vmul.f32 %v5602_v2, %v6117_v37  ;;  %v507_v14 = vadd.f32 %v505_v48, %v502_v38  ;;  %v508_v51 = vadd.f32 %v506_v40, %v503_v52  ;;  %v6125_v61 = vstv %s6084_s15  ;;  %s6823_s15 = sld [smem:[#allocation3 + $0x602]] }
  0xfd   : > { %4310 = vmatprep.subr.bf16.mxu1 %v4309_v36  ;;  %v6128_v60 = vstv %s6086_s16  ;;  %v9450_v35 = vmax.f32 %v5932_v55, %v5990_v8  ;;  %v9451_v26 = vmax.f32 %v5934_v19, %v5992_v31  ;;  %v515_v27 = vmul.f32 %v9452_v50, %v6125_v61  ;;  %s6845_s16 = sld [smem:[#allocation3 + $0x603]] }
  0xfe   : > { %v516_v12 = vmul.f32 %v9453_v49, %v6125_v61  ;;  %v512_v20 = vadd.f32 %v510_v59, %v507_v14  ;;  %v513_v25 = vadd.f32 %v511_v63, %v508_v51  ;;  %v520_v36 = vmul.f32 %v5624_v45, %v6128_v60 }
  0xff   : > { %v1979_v56 = vmax.f32 %v9450_v35, %v1977_v47  ;;  %v1980_v23 = vmax.f32 %v9451_v26, %v1978_v5  ;;  %v521_v48 = vmul.f32 %v5629_v33, %v6128_v60  ;;  %v9454_v8 = vstv %s6011_s7  ;;  %s6630_s7 = sld [smem:[#allocation3 + $0x185]] }
 0x100   : > { %v9455_v38 = vmov %v9454_v8  ;;  %v6149_v19 = vstv %s6103_s17  ;;  %v529_v31 = vmul.f32 %v5543_v32, %v6066_v29  ;;  %v517_v40 = vadd.f32 %v515_v27, %v512_v20  ;;  %s6847_s17 = sld [smem:[#allocation3 + $0x604]] }
 0x101   : > { %v1983_v55 = vadd.f32 %v9454_v8, %v1979_v56  ;;  %v1984_v52 = vadd.f32 %v9455_v38, %v1980_v23  ;;  %v518_v47 = vadd.f32 %v516_v12, %v513_v25  ;;  %v525_v5 = vmul.f32 %v5698_v41, %v6149_v19  ;;  %v9456_v23 = vld [vmem:[#allocation22_spill] sm:$0xff]  ;;  %v9457_v25 = vld [vmem:[#allocation23_spill] sm:$0xff] }
 0x102   : > { %v526_v59 = vmul.f32 %v5703_v54, %v6149_v19  ;;  %v530_v51 = vmul.f32 %v5548_v34, %v6066_v29  ;;  %v531_v35 = vmul.f32 %v5561_v17, %v6076_v4  ;;  %v522_v56 = vadd.f32 %v520_v36, %v517_v40 }
 0x103   : > { %v1985_v63 = vmax.f32 %v1983_v55, 0.0  ;;  %v1986_v14 = vmax.f32 %v1984_v52, 0.0  ;;  %v523_v26 = vadd.f32 %v521_v48, %v518_v47  ;;  %v532_v32 = vmul.f32 %v5566_v6, %v6076_v4 }
 0x104   : > { %v535_v27 = vmul.f32 %v9456_v23, %v6091_v24  ;;  %v533_v20 = vadd.f32 %v531_v35, %v529_v31  ;;  %v536_v8 = vmul.f32 %v9457_v25, %v6091_v24  ;;  %v539_v34 = vmul.f32 %v5587_v10, %v6094_v39 }
 0x105   : > { %1988 = vst [vmem:[#allocation2 + $0xa8] sm:$0x3f] %v1986_v14  ;;  %v2929_v12 = vand.u32 4294901760, %v1985_v63  ;;  %v6169_v55 = vadd.f32 %v525_v5, %v522_v56  ;;  %v6171_v17 = vadd.f32 %v526_v59, %v523_v26  ;;  %v534_v36 = vadd.f32 %v532_v32, %v530_v51 }
 0x106   : > { %v540_v6 = vmul.f32 %v5592_v62, %v6094_v39  ;;  %v537_v38 = vadd.f32 %v535_v27, %v533_v20  ;;  %v543_v52 = vmul.f32 %v5597_v1, %v6110_v42  ;;  %v544_v31 = vmul.f32 %v5602_v2, %v6110_v42 }
 0x107   : > { %v6175_v48 = vsub.f32 %v1985_v63, %v2929_v12  ;;  %v538_v40 = vadd.f32 %v536_v8, %v534_v36  ;;  %v547_v47 = vmul.f32 %v5682_v7, %v6117_v37  ;;  %v548_v5 = vmul.f32 %v5687_v44, %v6117_v37 }
 0x108   : > { %v551_v59 = vmul.f32 %v5624_v45, %v6125_v61  ;;  %v541_v14 = vadd.f32 %v539_v34, %v537_v38  ;;  %v552_v63 = vmul.f32 %v5629_v33, %v6125_v61  ;;  %v555_v51 = vmul.f32 %v5698_v41, %v6128_v60 }
 0x109   : > { %9458 = vst [vmem:[#allocation14_spill] sm:$0xff] %v6175_v48  ;;  %v556_v35 = vmul.f32 %v5703_v54, %v6128_v60  ;;  %v542_v56 = vadd.f32 %v540_v6, %v538_v40  ;;  %v559_v26 = vmul.f32 %v5708_v21, %v6149_v19  ;;  %v560_v32 = vmul.f32 %v5713_v3, %v6149_v19 }
 0x10a   : > { %v565_v23 = vmul.f32 %v5571_v13, %v6066_v29  ;;  %v545_v27 = vadd.f32 %v543_v52, %v541_v14  ;;  %v566_v20 = vmul.f32 %v9449_v0, %v6066_v29  ;;  %v567_v25 = vmul.f32 %v5587_v10, %v6076_v4 }
 0x10b   : > { %v568_v8 = vmul.f32 %v5592_v62, %v6076_v4  ;;  %v546_v36 = vadd.f32 %v544_v31, %v542_v56  ;;  %v571_v6 = vmul.f32 %v5597_v1, %v6091_v24  ;;  %v572_v38 = vmul.f32 %v5602_v2, %v6091_v24 }
 0x10c   : > { %v2857_v34 = vld [vmem:[#allocation2 + $0xa8] sm:$0xff]  ;;  %v575_v13 = vmul.f32 %v9452_v50, %v6094_v39  ;;  %v549_v40 = vadd.f32 %v547_v47, %v545_v27  ;;  %v569_v0 = vadd.f32 %v567_v25, %v565_v23  ;;  %v576_v53 = vmul.f32 %v9453_v49, %v6094_v39 }
 0x10d   : > { %v2932_v52 = vand.u32 4294901760, %v2857_v34  ;;  %v570_v14 = vadd.f32 %v568_v8, %v566_v20  ;;  %v550_v18 = vadd.f32 %v548_v5, %v546_v36  ;;  %v579_v31 = vmul.f32 %v5624_v45, %v6110_v42 }
 0x10e   : > { %v580_v56 = vmul.f32 %v5629_v33, %v6110_v42  ;;  %v553_v48 = vadd.f32 %v551_v59, %v549_v40  ;;  %v573_v50 = vadd.f32 %v571_v6, %v569_v0  ;;  %v583_v5 = vmul.f32 %v5698_v41, %v6117_v37 }
 0x10f   : > { %v6217_v15 = vpack.c.bf16 %v2932_v52, %v2929_v12  ;;  %v6219_v46 = vsub.f32 %v2857_v34, %v2932_v52  ;;  %v554_v43 = vadd.f32 %v552_v63, %v550_v18  ;;  %v574_v47 = vadd.f32 %v572_v38, %v570_v14 }
 0x110   : > { %v584_v49 = vmul.f32 %v5703_v54, %v6117_v37  ;;  %v557_v23 = vadd.f32 %v555_v51, %v553_v48  ;;  %v577_v27 = vadd.f32 %v575_v13, %v573_v50  ;;  %v587_v12 = vmul.f32 %v9437_v28, %v6125_v61 }
 0x111   : > { %9459 = vst [vmem:[#allocation18_spill] sm:$0xff] %v6217_v15  ;;  %9460 = vst [vmem:[#allocation11_spill] sm:$0xff] %v6219_v46  ;;  %4286 = vmatprep.subr.bf16.mxu0 %v6217_v15  ;;  %v588_v20 = vmul.f32 %v9438_v11, %v6125_v61  ;;  %v558_v59 = vadd.f32 %v556_v35, %v554_v43  ;;  %v578_v25 = vadd.f32 %v576_v53, %v574_v47 }
 0x112   : > { %v591_v18 = vmul.f32 %v5752_v9, %v6128_v60  ;;  %v592_v63 = vmul.f32 %v5765_v30, %v6128_v60  ;;  %v6234_v8 = vadd.f32 %v559_v26, %v557_v23  ;;  %v581_v34 = vadd.f32 %v579_v31, %v577_v27  ;;  %v9462_v23 = vld [vmem:[#allocation17_spill] sm:$0xff] }
 0x113   : > { %v595_v48 = vmul.f32 %v5770_v16, %v6149_v19  ;;  %v596_v28 = vmul.f32 %v5778_v22, %v6149_v19  ;;  %v6240_v51 = vadd.f32 %v560_v32, %v558_v59  ;;  %v582_v11 = vadd.f32 %v580_v56, %v578_v25 }
 0x114   : > { %v599_v43 = vmul.f32 %v5587_v10, %v6066_v29  ;;  %v600_v53 = vmul.f32 %v5592_v62, %v6066_v29  ;;  %v563_v35 = vmax.f32 %v6169_v55, %v6234_v8  ;;  %v585_v26 = vadd.f32 %v583_v5, %v581_v34  ;;  %v9461_v5 = vld [vmem:[#allocation15_spill] sm:$0xff] }
 0x115   : > { %v601_v36 = vmul.f32 %v5597_v1, %v6076_v4  ;;  %v602_v6 = vmul.f32 %v5602_v2, %v6076_v4  ;;  %v564_v10 = vmax.f32 %v6171_v17, %v6240_v51  ;;  %v586_v32 = vadd.f32 %v584_v49, %v582_v11  ;;  %v6331_v34 = vld [vmem:[%s4778_s13 + $0x10] sm:$0xff] }
 0x116   : > { %v605_v62 = vmul.f32 %v5682_v7, %v6091_v24  ;;  %v606_v29 = vmul.f32 %v5687_v44, %v6091_v24  ;;  %v589_v1 = vadd.f32 %v587_v12, %v585_v26  ;;  %v609_v38 = vmul.f32 %v5624_v45, %v6094_v39 }
 0x117   : > { %v603_v2 = vadd.f32 %v601_v36, %v599_v43  ;;  %v604_v4 = vadd.f32 %v602_v6, %v600_v53  ;;  %v590_v13 = vadd.f32 %v588_v20, %v586_v32  ;;  %v610_v52 = vmul.f32 %v5629_v33, %v6094_v39  ;;  %v6318_v20 = vld [vmem:[%s4778_s13] sm:$0xff] }
 0x118   : > { %v613_v7 = vmul.f32 %v5698_v41, %v6110_v42  ;;  %v614_v44 = vmul.f32 %v5703_v54, %v6110_v42  ;;  %v593_v24 = vadd.f32 %v591_v18, %v589_v1  ;;  %v617_v14 = vmul.f32 %v5708_v21, %v6117_v37  ;;  %9463 = vst [vmem:[#allocation12_spill] sm:$0xff] %v6318_v20  ;;  %v6326_v18 = vld [vmem:[%s4778_s13 + $0x8] sm:$0x3f] }
 0x119   : > { %v607_v40 = vadd.f32 %v605_v62, %v603_v2  ;;  %v608_v0 = vadd.f32 %v606_v29, %v604_v4  ;;  %v594_v31 = vadd.f32 %v592_v63, %v590_v13  ;;  %v618_v45 = vmul.f32 %v5713_v3, %v6117_v37  ;;  %9464 = vst [vmem:[#allocation13_spill] sm:$0xff] %v6326_v18  ;;  %v6343_v36 = vld [vmem:[%s4778_s13 + $0x1] sm:$0xff]  ;;  %v6350_v1 = vld [vmem:[%s4778_s13 + $0x9] sm:$0x3f] }
 0x11a   : > { %v621_v33 = vmul.f32 %v5752_v9, %v6125_v61  ;;  %v622_v39 = vmul.f32 %v5765_v30, %v6125_v61  ;;  %v6282_v56 = vadd.f32 %v595_v48, %v593_v24  ;;  %v625_v21 = vmul.f32 %v5770_v16, %v6128_v60  ;;  %9466 = vst [vmem:[#allocation22_spill] sm:$0xff] %v6343_v36 }
 0x11b   : > { %v611_v42 = vadd.f32 %v609_v38, %v607_v40  ;;  %v612_v50 = vadd.f32 %v610_v52, %v608_v0  ;;  %v6290_v3 = vadd.f32 %v596_v28, %v594_v31  ;;  %v626_v9 = vmul.f32 %v5778_v22, %v6128_v60  ;;  %v6336_v28 = vld [vmem:[%s4778_s13 + $0x18] sm:$0x3f]  ;;  %9467 = vst [vmem:[#allocation23_spill] sm:$0xff] %v6350_v1  ;;  %v6361_v40 = vld [vmem:[%s4778_s13 + $0x20] sm:$0xff] }
 0x11c   : > { %v629_v30 = vmul.f32 %v5831_v57, %v6149_v19  ;;  %v630_v37 = vmul.f32 %v9441_v58, %v6149_v19  ;;  %v638_v47 = vstv %s6252_s18  ;;  %v9267_v49 = vand.u32 4294901760, %v9461_v5  ;;  %9465 = vst [vmem:[#allocation21_spill] sm:$0xff] %v6336_v28  ;;  %9468 = vst [vmem:[#allocation31_spill] sm:$0xff] %v6361_v40  ;;  %s6858_s18 = sld [smem:[#allocation3 + $0x605]] }
 0x11d   : > { %v615_v61 = vadd.f32 %v613_v7, %v611_v42  ;;  %v616_v16 = vadd.f32 %v614_v44, %v612_v50  ;;  %v9266_v27 = vand.u32 4294901760, %v9462_v23  ;;  %v6306_v22 = vstv %s6254_s19  ;;  %s6860_s19 = sld [smem:[#allocation3 + $0x606]] }
 0x11e   : > { %v6309_v57 = vstv %s6262_s20  ;;  %v6312_v60 = vstv %s6264_s21  ;;  %v2999_v12 = vsub.f32 %v9461_v5, %v9267_v49  ;;  %v1999_v59 = vmul.f32 %v6318_v20, %v6306_v22  ;;  %s6885_s20 = sld [smem:[#allocation3 + $0x607]]  ;;  %s6889_s21 = sld [smem:[#allocation3 + $0x608]] }
 0x11f   : > { %v619_v58 = vadd.f32 %v617_v14, %v615_v61  ;;  %v620_v19 = vadd.f32 %v618_v45, %v616_v16  ;;  %v3006_v25 = vsub.f32 %v9462_v23, %v9266_v27  ;;  %v2000_v63 = vmul.f32 %v6326_v18, %v6306_v22  ;;  %v6366_v45 = vld [vmem:[%s4778_s13 + $0x28] sm:$0x3f] }
 0x120   : > { %v2002_v48 = vmul.f32 %v6331_v34, %v6309_v57  ;;  %v2003_v11 = vmul.f32 %v6336_v28, %v6309_v57  ;;  %v3000_v26 = vand.u32 4294901760, %v2999_v12  ;;  %v2007_v6 = vmul.f32 %v6343_v36, %v6312_v60  ;;  %9469 = vst [vmem:[#allocation32_spill] sm:$0xff] %v6366_v45 }
 0x121   : > { %v623_v43 = vadd.f32 %v621_v33, %v619_v58  ;;  %v624_v53 = vadd.f32 %v622_v39, %v620_v19  ;;  %v3007_v32 = vand.u32 4294901760, %v3006_v25  ;;  %v2008_v2 = vmul.f32 %v6350_v1, %v6312_v60  ;;  %v6371_v39 = vld [vmem:[%s4778_s13 + $0x30] sm:$0xff]  ;;  %v6389_v19 = vld [vmem:[%s4778_s13 + $0x21] sm:$0xff]  ;;  %v6394_v25 = vld [vmem:[%s4778_s13 + $0x29] sm:$0x3f] }
 0x122   : > { %v2004_v62 = vadd.f32 %v2002_v48, %v1999_v59  ;;  %v2005_v29 = vadd.f32 %v2003_v11, %v2000_v63  ;;  %v6355_v13 = vstv %s6286_s22  ;;  %v6358_v52 = vstv %s6288_s23  ;;  %v6404_v48 = vld [vmem:[%s4778_s13 + $0x48] sm:$0x3f]  ;;  %s7039_s22 = sld [smem:[#allocation5 + $0xc]]  ;;  %s7041_s23 = sld [smem:[#allocation3 + $0x200]] }
 0x123   : > { %v627_v4 = vadd.f32 %v625_v21, %v623_v43  ;;  %v628_v38 = vadd.f32 %v626_v9, %v624_v53  ;;  %v4311_v7 = vpack.c.bf16 %v3007_v32, %v3000_v26  ;;  %v2012_v0 = vmul.f32 %v6361_v40, %v6355_v13  ;;  %v6376_v21 = vld [vmem:[%s4778_s13 + $0x38] sm:$0x3f] }
 0x124   : > { %v2009_v44 = vadd.f32 %v2007_v6, %v2004_v62  ;;  %v2010_v24 = vadd.f32 %v2008_v2, %v2005_v29  ;;  %v2013_v33 = vmul.f32 %v6366_v45, %v6355_v13  ;;  %v2017_v42 = vmul.f32 %v6371_v39, %v6358_v52  ;;  %v6418_v62 = vld [vmem:[%s4778_s13 + $0x50] sm:$0xff]  ;;  %v6423_v2 = vld [vmem:[%s4778_s13 + $0x58] sm:$0x3f] }
 0x125   : > { %v631_v14 = vadd.f32 %v629_v30, %v627_v4  ;;  %v632_v31 = vadd.f32 %v630_v37, %v628_v38  ;;  %4312 = vmatpush3.bf16.msra.mxu1 %v4311_v7  ;;  %v2018_v9 = vmul.f32 %v6376_v21, %v6358_v52  ;;  %v6381_v30 = vstv %s6301_s24  ;;  %s7049_s24 = sld [smem:[#allocation3 + $0x201]] }
 0x126   : > { %v2014_v50 = vadd.f32 %v2012_v0, %v2009_v44  ;;  %v6384_v37 = vstv %s6303_s25  ;;  %v2015_v58 = vadd.f32 %v2013_v33, %v2010_v24  ;;  %v2022_v12 = vmul.f32 %v6389_v19, %v6381_v30  ;;  %v6447_v33 = vld [vmem:[%s4778_s13 + $0x11] sm:$0xff]  ;;  %s7051_s25 = sld [smem:[#allocation3 + $0x202]] }
 0x127   : > { %v633_v61 = vmax.f32 %v6282_v56, %v631_v14  ;;  %v634_v16 = vmax.f32 %v6290_v3, %v632_v31  ;;  %v2023_v63 = vmul.f32 %v6394_v25, %v6381_v30  ;;  %v6399_v56 = vld [vmem:[%s4778_s13 + $0x40] sm:$0xff]  ;;  %v2028_v11 = vmul.f32 %v6404_v48, %v6384_v37  ;;  %9471 = vst [vmem:[#allocation34_spill] sm:$0xff] %v6447_v33 }
 0x128   : > { %v2019_v59 = vadd.f32 %v2017_v42, %v2014_v50  ;;  %9470 = vst [vmem:[#allocation33_spill] sm:$0xff] %v6399_v56  ;;  %v2027_v3 = vmul.f32 %v6399_v56, %v6384_v37  ;;  %v2020_v26 = vadd.f32 %v2018_v9, %v2015_v58  ;;  %v6415_v6 = vstv %s6340_s26  ;;  %v6452_v42 = vld [vmem:[%s4778_s13 + $0x19] sm:$0x3f]  ;;  %s7073_s26 = sld [smem:[#allocation3 + $0x203]] }
 0x129   : > { %v635_v43 = vmax.f32 %v563_v35, %v633_v61  ;;  %v636_v53 = vmax.f32 %v564_v10, %v634_v16  ;;  %v2032_v29 = vmul.f32 %v6418_v62, %v6415_v6  ;;  %v2033_v4 = vmul.f32 %v6423_v2, %v6415_v6  ;;  %9472 = vst [vmem:[#allocation35_spill] sm:$0xff] %v6452_v42 }
 0x12a   : > { %v2024_v32 = vadd.f32 %v2022_v12, %v2019_v59  ;;  %v6428_v55 = vstv %s6347_s27  ;;  %v2025_v51 = vadd.f32 %v2023_v63, %v2020_v26  ;;  %v2041_v7 = vmul.f32 %v6331_v34, %v6306_v22  ;;  %s7075_s27 = sld [smem:[#allocation3 + $0x204]] }
 0x12b   : > { %v639_v17 = vadd.f32 %v638_v47, %v635_v43  ;;  %v640_v8 = vadd.f32 %v638_v47, %v636_v53  ;;  %v2037_v35 = vmul.f32 %v5698_v41, %v6428_v55  ;;  %v2038_v38 = vmul.f32 %v5703_v54, %v6428_v55 }
 0x12c   : > { %v2029_v10 = vadd.f32 %v2027_v3, %v2024_v32  ;;  %v2042_v44 = vmul.f32 %v6336_v28, %v6306_v22  ;;  %v2030_v14 = vadd.f32 %v2028_v11, %v2025_v51  ;;  %v2043_v47 = vmul.f32 %v6343_v36, %v6309_v57 }
 0x12d   : > { %v641_v24 = vmax.f32 %v639_v17, 0.0  ;;  %v642_v0 = vmax.f32 %v640_v8, 0.0  ;;  %v2044_v41 = vmul.f32 %v6350_v1, %v6309_v57  ;;  %v2047_v54 = vmul.f32 %v6447_v33, %v6312_v60  ;;  %v6476_v17 = vld [vmem:[%s4778_s13 + $0x39] sm:$0x3f] }
 0x12e   : > { %v2034_v31 = vadd.f32 %v2032_v29, %v2029_v10  ;;  %v2048_v50 = vmul.f32 %v6452_v42, %v6312_v60  ;;  %v2035_v61 = vadd.f32 %v2033_v4, %v2030_v14  ;;  %v2045_v16 = vadd.f32 %v2043_v47, %v2041_v7  ;;  %v6471_v29 = vld [vmem:[%s4778_s13 + $0x31] sm:$0xff] }
 0x12f   : > { %644 = vst [vmem:[#allocation2 + $0x28] sm:$0x3f] %v642_v0  ;;  %v2881_v9 = vand.u32 4294901760, %v641_v24  ;;  %v2051_v58 = vmul.f32 %v6371_v39, %v6355_v13  ;;  %v2046_v59 = vadd.f32 %v2044_v41, %v2042_v44  ;;  %v2052_v63 = vmul.f32 %v6376_v21, %v6355_v13  ;;  %v6490_v44 = vld [vmem:[%s4778_s13 + $0x49] sm:$0x3f]  ;;  %v6495_v14 = vld [vmem:[%s4778_s13 + $0x51] sm:$0xff] }
 0x130   : > { %v6458_v12 = vadd.f32 %v2037_v35, %v2034_v31  ;;  %v2055_v3 = vmul.f32 %v6389_v19, %v6358_v52  ;;  %v6466_v43 = vadd.f32 %v2038_v38, %v2035_v61  ;;  %v2049_v53 = vadd.f32 %v2047_v54, %v2045_v16  ;;  %v6485_v38 = vld [vmem:[%s4778_s13 + $0x41] sm:$0xff]  ;;  %v6500_v31 = vld [vmem:[%s4778_s13 + $0x59] sm:$0x3f] }
 0x131   : > { %v6464_v11 = vsub.f32 %v641_v24, %v2881_v9  ;;  %v2056_v26 = vmul.f32 %v6394_v25, %v6358_v52  ;;  %v2050_v32 = vadd.f32 %v2048_v50, %v2046_v59  ;;  %v2059_v4 = vmul.f32 %v6471_v29, %v6381_v30 }
 0x132   : > { %v2060_v8 = vmul.f32 %v6476_v17, %v6381_v30  ;;  %v2063_v51 = vmul.f32 %v6418_v62, %v6384_v37  ;;  %v2053_v35 = vadd.f32 %v2051_v58, %v2049_v53  ;;  %v2064_v10 = vmul.f32 %v6423_v2, %v6384_v37 }
 0x133   : > { %9473 = vst [vmem:[#allocation36_spill] sm:$0xff] %v6464_v11  ;;  %v2067_v7 = vmul.f32 %v6485_v38, %v6415_v6  ;;  %v2068_v24 = vmul.f32 %v6490_v44, %v6415_v6  ;;  %v2054_v0 = vadd.f32 %v2052_v63, %v2050_v32  ;;  %v2071_v47 = vmul.f32 %v6495_v14, %v6428_v55 }
 0x134   : > { %v2072_v41 = vmul.f32 %v6500_v31, %v6428_v55  ;;  %v2077_v54 = vmul.f32 %v6361_v40, %v6306_v22  ;;  %v2057_v50 = vadd.f32 %v2055_v3, %v2053_v35  ;;  %v2078_v61 = vmul.f32 %v6366_v45, %v6306_v22 }
 0x135   : > { %v2079_v16 = vmul.f32 %v6371_v39, %v6309_v57  ;;  %v2080_v58 = vmul.f32 %v6376_v21, %v6309_v57  ;;  %v2058_v63 = vadd.f32 %v2056_v26, %v2054_v0  ;;  %v2083_v53 = vmul.f32 %v6389_v19, %v6312_v60 }
 0x136   : > { %v2841_v59 = vld [vmem:[#allocation2 + $0x28] sm:$0xff]  ;;  %v2084_v32 = vmul.f32 %v6394_v25, %v6312_v60  ;;  %v2087_v3 = vmul.f32 %v6399_v56, %v6355_v13  ;;  %v2061_v27 = vadd.f32 %v2059_v4, %v2057_v50  ;;  %v2088_v5 = vmul.f32 %v6404_v48, %v6355_v13 }
 0x137   : > { %v2884_v35 = vand.u32 4294901760, %v2841_v59  ;;  %v2081_v49 = vadd.f32 %v2079_v16, %v2077_v54  ;;  %v2082_v15 = vadd.f32 %v2080_v58, %v2078_v61  ;;  %v2062_v23 = vadd.f32 %v2060_v8, %v2058_v63 }
 0x138   : > { %v2091_v26 = vmul.f32 %v6418_v62, %v6358_v52  ;;  %v2092_v0 = vmul.f32 %v6423_v2, %v6358_v52  ;;  %v2065_v4 = vadd.f32 %v2063_v51, %v2061_v27  ;;  %v2095_v61 = vmul.f32 %v6485_v38, %v6381_v30  ;;  %v6539_v27 = vld [vmem:[%s4778_s13 + $0x68] sm:$0x3f] }
 0x139   : > { %v6524_v11 = vpack.c.bf16 %v2884_v35, %v2881_v9  ;;  %v6526_v46 = vsub.f32 %v2841_v59, %v2884_v35  ;;  %v2085_v54 = vadd.f32 %v2083_v53, %v2081_v49  ;;  %v2066_v50 = vadd.f32 %v2064_v10, %v2062_v23  ;;  %v6534_v59 = vld [vmem:[%s4778_s13 + $0x60] sm:$0xff]  ;;  %9476 = vst [vmem:[#allocation39_spill] sm:$0xff] %v6539_v27  ;;  %v6544_v10 = vld [vmem:[%s4778_s13 + $0x70] sm:$0xff] }
 0x13a   : > { %v2086_v8 = vadd.f32 %v2084_v32, %v2082_v15  ;;  %v2096_v16 = vmul.f32 %v6490_v44, %v6381_v30  ;;  %v2069_v58 = vadd.f32 %v2067_v7, %v2065_v4  ;;  %v2099_v49 = vmul.f32 %v6534_v59, %v6384_v37  ;;  %v6549_v7 = vld [vmem:[%s4778_s13 + $0x78] sm:$0x3f]  ;;  %v6556_v35 = vld [vmem:[%s4778_s13 + $0x61] sm:$0xff] }
 0x13b   : > { %9474 = vst [vmem:[#allocation37_spill] sm:$0xff] %v6524_v11  ;;  %9475 = vst [vmem:[#allocation38_spill] sm:$0xff] %v6526_v46  ;;  %4288 = vmatpush3.bf16.msra.mxu0 %v6524_v11  ;;  %v2089_v9 = vadd.f32 %v2087_v3, %v2085_v54  ;;  %v2100_v15 = vmul.f32 %v6539_v27, %v6384_v37  ;;  %v2070_v23 = vadd.f32 %v2068_v24, %v2066_v50  ;;  %v6561_v24 = vld [vmem:[%s4778_s13 + $0x69] sm:$0x3f] }
 0x13c   : > { %v2090_v51 = vadd.f32 %v2088_v5, %v2086_v8  ;;  %v2103_v63 = vmul.f32 %v6544_v10, %v6415_v6  ;;  %v2104_v53 = vmul.f32 %v6549_v7, %v6415_v6  ;;  %v6553_v32 = vadd.f32 %v2071_v47, %v2069_v58 }
 0x13d   : > { %v2093_v3 = vadd.f32 %v2091_v26, %v2089_v9  ;;  %v2107_v4 = vmul.f32 %v6556_v35, %v6428_v55  ;;  %v2108_v5 = vmul.f32 %v6561_v24, %v6428_v55  ;;  %v6565_v54 = vadd.f32 %v2072_v41, %v2070_v23 }
 0x13e   : > { %v2094_v50 = vadd.f32 %v2092_v0, %v2090_v51  ;;  %v2111_v8 = vmul.f32 %v6371_v39, %v6306_v22  ;;  %v2112_v47 = vmul.f32 %v6376_v21, %v6306_v22  ;;  %v2113_v9 = vmul.f32 %v6389_v19, %v6309_v57 }
 0x13f   : > { %v2097_v58 = vadd.f32 %v2095_v61, %v2093_v3  ;;  %v2114_v11 = vmul.f32 %v6394_v25, %v6309_v57  ;;  %v2117_v22 = vmul.f32 %v6471_v29, %v6312_v60  ;;  %v2118_v61 = vmul.f32 %v6476_v17, %v6312_v60 }
 0x140   : > { %v2098_v0 = vadd.f32 %v2096_v16, %v2094_v50  ;;  %v2115_v57 = vadd.f32 %v2113_v9, %v2111_v8  ;;  %v2121_v3 = vmul.f32 %v6418_v62, %v6355_v13  ;;  %v2122_v16 = vmul.f32 %v6423_v2, %v6355_v13 }
 0x141   : > { %v2101_v23 = vadd.f32 %v2099_v49, %v2097_v58  ;;  %v2116_v51 = vadd.f32 %v2114_v11, %v2112_v47  ;;  %v2125_v50 = vmul.f32 %v6485_v38, %v6358_v52  ;;  %v2126_v60 = vmul.f32 %v6490_v44, %v6358_v52 }
 0x142   : > { %v2102_v26 = vadd.f32 %v2100_v15, %v2098_v0  ;;  %v2119_v46 = vadd.f32 %v2117_v22, %v2115_v57  ;;  %v2129_v11 = vmul.f32 %v6495_v14, %v6381_v30  ;;  %v2130_v15 = vmul.f32 %v6500_v31, %v6381_v30  ;;  %v9477_v0 = vld [vmem:[#allocation24_spill] sm:$0xff] }
 0x143   : > { %v2105_v41 = vadd.f32 %v2103_v63, %v2101_v23  ;;  %v2120_v27 = vadd.f32 %v2118_v61, %v2116_v51  ;;  %v2133_v13 = vmul.f32 %v6544_v10, %v6384_v37  ;;  %v2134_v8 = vmul.f32 %v6549_v7, %v6384_v37  ;;  %v6623_v37 = vld [vmem:[%s4778_s13 + $0x79] sm:$0x3f] }
 0x144   : > { %v2106_v49 = vadd.f32 %v2104_v53, %v2102_v26  ;;  %v2123_v63 = vadd.f32 %v2121_v3, %v2119_v46  ;;  %v2137_v58 = vmul.f32 %v6556_v35, %v6415_v6  ;;  %v2138_v53 = vmul.f32 %v6561_v24, %v6415_v6  ;;  %v6618_v26 = vld [vmem:[%s4778_s13 + $0x71] sm:$0xff] }
 0x145   : > { %v6607_v52 = vadd.f32 %v2107_v4, %v2105_v41  ;;  %v2124_v47 = vadd.f32 %v2122_v16, %v2120_v27  ;;  %v2141_v46 = vmul.f32 %v6618_v26, %v6428_v55  ;;  %v2142_v27 = vmul.f32 %v6623_v37, %v6428_v55  ;;  %v9478_v61 = vld [vmem:[#allocation28_spill] sm:$0xff] }
 0x146   : > { %v2110_v30 = vadd.f32 %v2108_v5, %v2106_v49  ;;  %v2127_v4 = vadd.f32 %v2125_v50, %v2123_v63  ;;  %v2150_v41 = vstv %s6577_s28  ;;  %v9280_v22 = vand.u32 4294901760, %v9477_v0  ;;  %s7088_s28 = sld [smem:[#allocation3 + $0x205]] }
 0x147   : > { %v2128_v9 = vadd.f32 %v2126_v60, %v2124_v47  ;;  %v9279_v5 = vand.u32 4294901760, %v9478_v61  ;;  %v6635_v6 = vstv %s6579_s0  ;;  %v6638_v23 = vstv %s6587_s1  ;;  %s7090_s0 = sld [smem:[#allocation3 + $0x206]]  ;;  %s7127_s1 = sld [smem:[#allocation3 + $0x207]] }
 0x148   : > { %v6641_v57 = vstv %s6589_s29  ;;  %v2131_v51 = vadd.f32 %v2129_v11, %v2127_v4  ;;  %v3125_v55 = vsub.f32 %v9477_v0, %v9280_v22  ;;  %v655_v16 = vmul.f32 %v6318_v20, %v6635_v6  ;;  %s7134_s29 = sld [smem:[#allocation3 + $0x208]] }
 0x149   : > { %v2132_v3 = vadd.f32 %v2130_v15, %v2128_v9  ;;  %v3132_v50 = vsub.f32 %v9478_v61, %v9279_v5  ;;  %v656_v60 = vmul.f32 %v6326_v18, %v6635_v6  ;;  %v658_v11 = vmul.f32 %v6331_v34, %v6638_v23 }
 0x14a   : > { %v659_v49 = vmul.f32 %v6336_v28, %v6638_v23  ;;  %v2135_v15 = vadd.f32 %v2133_v13, %v2131_v51  ;;  %v3126_v47 = vand.u32 4294901760, %v3125_v55  ;;  %v663_v4 = vmul.f32 %v6343_v36, %v6641_v57 }
 0x14b   : > { %v2136_v63 = vadd.f32 %v2134_v8, %v2132_v3  ;;  %v3133_v9 = vand.u32 4294901760, %v3132_v50  ;;  %v660_v5 = vadd.f32 %v658_v11, %v655_v16  ;;  %v664_v61 = vmul.f32 %v6350_v1, %v6641_v57 }
 0x14c   : > { %v661_v22 = vadd.f32 %v659_v49, %v656_v60  ;;  %v2139_v0 = vadd.f32 %v2137_v58, %v2135_v15  ;;  %v6666_v13 = vstv %s6611_s30  ;;  %v6669_v8 = vstv %s6613_s6  ;;  %s7364_s30 = sld [smem:[#allocation5 + $0x4]]  ;;  %s7366_s6 = sld [smem:[#allocation3 + $0x680]] }
 0x14d   : > { %v2140_v18 = vadd.f32 %v2138_v53, %v2136_v63  ;;  %v4313_v51 = vpack.c.bf16 %v3133_v9, %v3126_v47  ;;  %v665_v3 = vadd.f32 %v663_v4, %v660_v5  ;;  %v668_v50 = vmul.f32 %v6361_v40, %v6666_v13 }
 0x14e   : > { %v666_v55 = vadd.f32 %v664_v61, %v661_v22  ;;  %v2143_v20 = vadd.f32 %v2141_v46, %v2139_v0  ;;  %v669_v60 = vmul.f32 %v6366_v45, %v6666_v13  ;;  %v673_v58 = vmul.f32 %v6371_v39, %v6669_v8 }
 0x14f   : > { %v2144_v16 = vadd.f32 %v2142_v27, %v2140_v18  ;;  %4314 = vmatprep.subr.bf16.mxu1 %v4313_v51  ;;  %v670_v53 = vadd.f32 %v668_v50, %v665_v3  ;;  %v674_v11 = vmul.f32 %v6376_v21, %v6669_v8  ;;  %v6680_v49 = vstv %s6630_s7  ;;  %s7374_s7 = sld [smem:[#allocation3 + $0x681]] }
 0x150   : > { %v6683_v22 = vstv %s6632_s8  ;;  %v2145_v46 = vmax.f32 %v6607_v52, %v2143_v20  ;;  %v671_v27 = vadd.f32 %v669_v60, %v666_v55  ;;  %v678_v0 = vmul.f32 %v6389_v19, %v6680_v49  ;;  %s7376_s8 = sld [smem:[#allocation3 + $0x682]] }
 0x151   : > { %v2146_v18 = vmax.f32 %v2110_v30, %v2144_v16  ;;  %v675_v61 = vadd.f32 %v673_v58, %v670_v53  ;;  %v679_v5 = vmul.f32 %v6394_v25, %v6680_v49  ;;  %v683_v15 = vmul.f32 %v6399_v56, %v6683_v22 }
 0x152   : > { %v684_v63 = vmul.f32 %v6404_v48, %v6683_v22  ;;  %v9479_v47 = vmax.f32 %v6458_v12, %v6553_v32  ;;  %v9480_v20 = vmax.f32 %v6466_v43, %v6565_v54  ;;  %v676_v30 = vadd.f32 %v674_v11, %v671_v27 }
 0x153   : > { %v6701_v9 = vstv %s6657_s9  ;;  %v680_v51 = vadd.f32 %v678_v0, %v675_v61  ;;  %v6708_v50 = vstv %s6661_s10  ;;  %v697_v58 = vmul.f32 %v6331_v34, %v6635_v6  ;;  %s7398_s9 = sld [smem:[#allocation3 + $0x683]]  ;;  %s7400_s10 = sld [smem:[#allocation3 + $0x684]] }
 0x154   : > { %v2147_v4 = vmax.f32 %v9479_v47, %v2145_v46  ;;  %v2148_v52 = vmax.f32 %v9480_v20, %v2146_v18  ;;  %v688_v3 = vmul.f32 %v6418_v62, %v6701_v9  ;;  %v689_v55 = vmul.f32 %v6423_v2, %v6701_v9 }
 0x155   : > { %v681_v12 = vadd.f32 %v679_v5, %v676_v30  ;;  %v693_v32 = vmul.f32 %v6485_v38, %v6708_v50  ;;  %v685_v43 = vadd.f32 %v683_v15, %v680_v51  ;;  %v694_v54 = vmul.f32 %v6490_v44, %v6708_v50 }
 0x156   : > { %v2151_v16 = vadd.f32 %v2150_v41, %v2147_v4  ;;  %v2152_v60 = vadd.f32 %v2150_v41, %v2148_v52  ;;  %v698_v53 = vmul.f32 %v6336_v28, %v6635_v6  ;;  %v699_v41 = vmul.f32 %v6343_v36, %v6638_v23 }
 0x157   : > { %v686_v18 = vadd.f32 %v684_v63, %v681_v12  ;;  %v690_v27 = vadd.f32 %v688_v3, %v685_v43  ;;  %v700_v0 = vmul.f32 %v6350_v1, %v6638_v23  ;;  %v703_v61 = vmul.f32 %v6447_v33, %v6641_v57 }
 0x158   : > { %v2153_v11 = vmax.f32 %v2151_v16, 0.0  ;;  %v2154_v46 = vmax.f32 %v2152_v60, 0.0  ;;  %v704_v5 = vmul.f32 %v6452_v42, %v6641_v57  ;;  %v701_v4 = vadd.f32 %v699_v41, %v697_v58 }
 0x159   : > { %v691_v47 = vadd.f32 %v689_v55, %v686_v18  ;;  %v707_v63 = vmul.f32 %v6371_v39, %v6666_v13  ;;  %v6728_v20 = vadd.f32 %v693_v32, %v690_v27  ;;  %v702_v52 = vadd.f32 %v700_v0, %v698_v53 }
 0x15a   : > { %2156 = vst [vmem:[#allocation2 + $0xb8] sm:$0x3f] %v2154_v46  ;;  %v2935_v15 = vand.u32 4294901760, %v2153_v11  ;;  %v708_v30 = vmul.f32 %v6376_v21, %v6666_v13  ;;  %v711_v51 = vmul.f32 %v6389_v19, %v6669_v8  ;;  %v705_v60 = vadd.f32 %v703_v61, %v701_v4 }
 0x15b   : > { %v6736_v16 = vadd.f32 %v694_v54, %v691_v47  ;;  %v712_v55 = vmul.f32 %v6394_v25, %v6669_v8  ;;  %v706_v12 = vadd.f32 %v704_v5, %v702_v52  ;;  %v715_v32 = vmul.f32 %v6471_v29, %v6680_v49 }
 0x15c   : > { %v6734_v3 = vsub.f32 %v2153_v11, %v2935_v15  ;;  %v716_v43 = vmul.f32 %v6476_v17, %v6680_v49  ;;  %v719_v58 = vmul.f32 %v6418_v62, %v6683_v22  ;;  %v709_v53 = vadd.f32 %v707_v63, %v705_v60 }
 0x15d   : > { %v720_v11 = vmul.f32 %v6423_v2, %v6683_v22  ;;  %v723_v54 = vmul.f32 %v6485_v38, %v6701_v9  ;;  %v724_v46 = vmul.f32 %v6490_v44, %v6701_v9  ;;  %v710_v18 = vadd.f32 %v708_v30, %v706_v12 }
 0x15e   : > { %9481 = vst [vmem:[#allocation40_spill] sm:$0xff] %v6734_v3  ;;  %v727_v41 = vmul.f32 %v6495_v14, %v6708_v50  ;;  %v728_v27 = vmul.f32 %v6500_v31, %v6708_v50  ;;  %v733_v0 = vmul.f32 %v6361_v40, %v6635_v6  ;;  %v713_v61 = vadd.f32 %v711_v51, %v709_v53 }
 0x15f   : > { %v734_v5 = vmul.f32 %v6366_v45, %v6635_v6  ;;  %v735_v47 = vmul.f32 %v6371_v39, %v6638_v23  ;;  %v736_v4 = vmul.f32 %v6376_v21, %v6638_v23  ;;  %v714_v52 = vadd.f32 %v712_v55, %v710_v18 }
 0x160   : > { %v739_v30 = vmul.f32 %v6389_v19, %v6641_v57  ;;  %v740_v60 = vmul.f32 %v6394_v25, %v6641_v57  ;;  %v743_v51 = vmul.f32 %v6399_v56, %v6666_v13  ;;  %v717_v53 = vadd.f32 %v715_v32, %v713_v61 }
 0x161   : > { %v2859_v63 = vld [vmem:[#allocation2 + $0xb8] sm:$0xff]  ;;  %v737_v3 = vadd.f32 %v735_v47, %v733_v0  ;;  %v738_v42 = vadd.f32 %v736_v4, %v734_v5  ;;  %v718_v33 = vadd.f32 %v716_v43, %v714_v52  ;;  %v744_v45 = vmul.f32 %v6404_v48, %v6666_v13  ;;  %v9484_v47 = vld [vmem:[#allocation39_spill] sm:$0xff] }
 0x162   : > { %v2938_v12 = vand.u32 4294901760, %v2859_v63  ;;  %v747_v55 = vmul.f32 %v6418_v62, %v6669_v8  ;;  %v748_v18 = vmul.f32 %v6423_v2, %v6669_v8  ;;  %v721_v36 = vadd.f32 %v719_v58, %v717_v53 }
 0x163   : > { %v741_v56 = vadd.f32 %v739_v30, %v737_v3  ;;  %v722_v28 = vadd.f32 %v720_v11, %v718_v33  ;;  %v742_v32 = vadd.f32 %v740_v60, %v738_v42  ;;  %v751_v43 = vmul.f32 %v6485_v38, %v6680_v49 }
 0x164   : > { %v6776_v40 = vpack.c.bf16 %v2938_v12, %v2935_v15  ;;  %v6778_v1 = vsub.f32 %v2859_v63, %v2938_v12  ;;  %v752_v0 = vmul.f32 %v6490_v44, %v6680_v49  ;;  %v725_v61 = vadd.f32 %v723_v54, %v721_v36 }
 0x165   : > { %v745_v5 = vadd.f32 %v743_v51, %v741_v56  ;;  %v755_v15 = vmul.f32 %v6534_v59, %v6683_v22  ;;  %v756_v4 = vmul.f32 %v9484_v47, %v6683_v22  ;;  %v726_v58 = vadd.f32 %v724_v46, %v722_v28 }
 0x166   : > { %9482 = vst [vmem:[#allocation41_spill] sm:$0xff] %v6776_v40  ;;  %9483 = vst [vmem:[#allocation42_spill] sm:$0xff] %v6778_v1  ;;  %4290 = vmatprep.subr.bf16.mxu0 %v6776_v40  ;;  %v746_v3 = vadd.f32 %v744_v45, %v742_v32  ;;  %v759_v33 = vmul.f32 %v6544_v10, %v6701_v9  ;;  %v760_v42 = vmul.f32 %v6549_v7, %v6701_v9 }
 0x167   : > { %v6793_v11 = vadd.f32 %v727_v41, %v725_v61  ;;  %v749_v63 = vadd.f32 %v747_v55, %v745_v5  ;;  %v763_v36 = vmul.f32 %v6556_v35, %v6708_v50  ;;  %v764_v56 = vmul.f32 %v6561_v24, %v6708_v50 }
 0x168   : > { %v6799_v54 = vadd.f32 %v728_v27, %v726_v58  ;;  %v750_v52 = vadd.f32 %v748_v18, %v746_v3  ;;  %v767_v28 = vmul.f32 %v6371_v39, %v6635_v6  ;;  %v768_v45 = vmul.f32 %v6376_v21, %v6635_v6 }
 0x169   : > { %v753_v41 = vadd.f32 %v751_v43, %v749_v63  ;;  %v769_v30 = vmul.f32 %v6389_v19, %v6638_v23  ;;  %v770_v60 = vmul.f32 %v6394_v25, %v6638_v23  ;;  %v773_v6 = vmul.f32 %v6471_v29, %v6641_v57 }
 0x16a   : > { %v754_v51 = vadd.f32 %v752_v0, %v750_v52  ;;  %v774_v12 = vmul.f32 %v6476_v17, %v6641_v57  ;;  %v777_v18 = vmul.f32 %v6418_v62, %v6666_v13  ;;  %v778_v43 = vmul.f32 %v6423_v2, %v6666_v13 }
 0x16b   : > { %v757_v53 = vadd.f32 %v755_v15, %v753_v41  ;;  %v771_v23 = vadd.f32 %v769_v30, %v767_v28  ;;  %v772_v55 = vadd.f32 %v770_v60, %v768_v45  ;;  %v781_v0 = vmul.f32 %v6485_v38, %v6669_v8  ;;  %v9485_v60 = vld [vmem:[#allocation30_spill] sm:$0xff] }
 0x16c   : > { %v758_v32 = vadd.f32 %v756_v4, %v754_v51  ;;  %v782_v57 = vmul.f32 %v6490_v44, %v6669_v8  ;;  %v785_v15 = vmul.f32 %v6495_v14, %v6680_v49  ;;  %v786_v4 = vmul.f32 %v6500_v31, %v6680_v49 }
 0x16d   : > { %v761_v61 = vadd.f32 %v759_v33, %v757_v53  ;;  %v775_v5 = vadd.f32 %v773_v6, %v771_v23  ;;  %v776_v58 = vadd.f32 %v774_v12, %v772_v55  ;;  %v789_v13 = vmul.f32 %v6544_v10, %v6683_v22  ;;  %v9486_v6 = vld [vmem:[#allocation26_spill] sm:$0xff] }
 0x16e   : > { %v762_v3 = vadd.f32 %v760_v42, %v758_v32  ;;  %v790_v63 = vmul.f32 %v6549_v7, %v6683_v22  ;;  %v793_v28 = vmul.f32 %v6556_v35, %v6701_v9  ;;  %v794_v42 = vmul.f32 %v6561_v24, %v6701_v9 }
 0x16f   : > { %v6841_v52 = vadd.f32 %v763_v36, %v761_v61  ;;  %v779_v8 = vadd.f32 %v777_v18, %v775_v5  ;;  %v780_v33 = vadd.f32 %v778_v43, %v776_v58  ;;  %v797_v22 = vmul.f32 %v6618_v26, %v6708_v50  ;;  %v9487_v18 = vld [vmem:[#allocation12_spill] sm:$0xff]  ;;  %v9489_v5 = vld [vmem:[#allocation21_spill] sm:$0xff] }
 0x170   : > { %v766_v49 = vadd.f32 %v764_v56, %v762_v3  ;;  %v798_v36 = vmul.f32 %v6623_v37, %v6708_v50  ;;  %v806_v30 = vstv %s6811_s11  ;;  %v9301_v51 = vand.u32 4294901760, %v9485_v60  ;;  %s7417_s11 = sld [smem:[#allocation3 + $0x685]] }
 0x171   : > { %v783_v45 = vadd.f32 %v781_v0, %v779_v8  ;;  %v784_v41 = vadd.f32 %v782_v57, %v780_v33  ;;  %v9300_v12 = vand.u32 4294901760, %v9486_v6  ;;  %v6863_v56 = vstv %s6813_s12  ;;  %v9488_v0 = vld [vmem:[#allocation13_spill] sm:$0xff]  ;;  %v9490_v8 = vld [vmem:[#allocation22_spill] sm:$0xff]  ;;  %s7419_s12 = sld [smem:[#allocation3 + $0x686]] }
 0x172   : > { %v6866_v9 = vstv %s6821_s14  ;;  %v6869_v53 = vstv %s6823_s15  ;;  %v3013_v50 = vsub.f32 %v9485_v60, %v9301_v51  ;;  %v2167_v32 = vmul.f32 %v9487_v18, %v6863_v56  ;;  %s7444_s14 = sld [smem:[#allocation3 + $0x687]]  ;;  %s7448_s15 = sld [smem:[#allocation3 + $0x688]] }
 0x173   : > { %v787_v23 = vadd.f32 %v785_v15, %v783_v45  ;;  %v788_v55 = vadd.f32 %v786_v4, %v784_v41  ;;  %v3020_v43 = vsub.f32 %v9486_v6, %v9300_v12  ;;  %v2168_v57 = vmul.f32 %v9488_v0, %v6863_v56  ;;  %v9491_v0 = vld [vmem:[#allocation23_spill] sm:$0xff] }
 0x174   : > { %v2170_v61 = vmul.f32 %v6331_v34, %v6866_v9  ;;  %v2171_v58 = vmul.f32 %v9489_v5, %v6866_v9  ;;  %v3014_v4 = vand.u32 4294901760, %v3013_v50  ;;  %v2175_v33 = vmul.f32 %v9490_v8, %v6869_v53 }
 0x175   : > { %v791_v15 = vadd.f32 %v789_v13, %v787_v23  ;;  %v792_v3 = vadd.f32 %v790_v63, %v788_v55  ;;  %v3021_v45 = vand.u32 4294901760, %v3020_v43  ;;  %v2176_v12 = vmul.f32 %v9491_v0, %v6869_v53  ;;  %v9492_v43 = vld [vmem:[#allocation31_spill] sm:$0xff] }
 0x176   : > { %v2172_v41 = vadd.f32 %v2170_v61, %v2167_v32  ;;  %v2173_v18 = vadd.f32 %v2171_v58, %v2168_v57  ;;  %v6894_v13 = vstv %s6845_s16  ;;  %v6897_v63 = vstv %s6847_s17  ;;  %v9493_v57 = vld [vmem:[#allocation32_spill] sm:$0xff]  ;;  %s7598_s16 = sld [smem:[#allocation5 + $0xd]]  ;;  %s7600_s17 = sld [smem:[#allocation3 + $0x280]] }
 0x177   : > { %v795_v51 = vadd.f32 %v793_v28, %v791_v15  ;;  %v796_v27 = vadd.f32 %v794_v42, %v792_v3  ;;  %v4315_v23 = vpack.c.bf16 %v3021_v45, %v3014_v4  ;;  %v2180_v46 = vmul.f32 %v9492_v43, %v6894_v13 }
 0x178   : > { %v2177_v55 = vadd.f32 %v2175_v33, %v2172_v41  ;;  %v2178_v50 = vadd.f32 %v2176_v12, %v2173_v18  ;;  %v2181_v61 = vmul.f32 %v9493_v57, %v6894_v13  ;;  %v2185_v28 = vmul.f32 %v6371_v39, %v6897_v63 }
 0x179   : > { %v799_v40 = vadd.f32 %v797_v22, %v795_v51  ;;  %v800_v32 = vadd.f32 %v798_v36, %v796_v27  ;;  %4316 = vmatpush3.bf16.msra.mxu1 %v4315_v23  ;;  %v2186_v58 = vmul.f32 %v6376_v21, %v6897_v63  ;;  %v6908_v15 = vstv %s6858_s18  ;;  %s7608_s18 = sld [smem:[#allocation3 + $0x281]] }
 0x17a   : > { %v2182_v42 = vadd.f32 %v2180_v46, %v2177_v55  ;;  %v6911_v12 = vstv %s6860_s19  ;;  %v2183_v36 = vadd.f32 %v2181_v61, %v2178_v50  ;;  %v2190_v51 = vmul.f32 %v6389_v19, %v6908_v15  ;;  %v9494_v46 = vld [vmem:[#allocation33_spill] sm:$0xff]  ;;  %s7610_s19 = sld [smem:[#allocation3 + $0x282]] }
 0x17b   : > { %v801_v22 = vmax.f32 %v6841_v52, %v799_v40  ;;  %v802_v27 = vmax.f32 %v766_v49, %v800_v32  ;;  %v2191_v4 = vmul.f32 %v6394_v25, %v6908_v15  ;;  %v2195_v33 = vmul.f32 %v9494_v46, %v6911_v12 }
 0x17c   : > { %v2187_v3 = vadd.f32 %v2185_v28, %v2182_v42  ;;  %v2196_v45 = vmul.f32 %v6404_v48, %v6911_v12  ;;  %v9495_v41 = vmax.f32 %v6728_v20, %v6793_v11  ;;  %v9496_v40 = vmax.f32 %v6736_v16, %v6799_v54 }
 0x17d   : > { %v2188_v49 = vadd.f32 %v2186_v58, %v2183_v36  ;;  %v6929_v23 = vstv %s6885_s20  ;;  %v6936_v61 = vstv %s6889_s21  ;;  %v2209_v58 = vmul.f32 %v6331_v34, %v6863_v56  ;;  %s7632_s20 = sld [smem:[#allocation3 + $0x283]]  ;;  %s7634_s21 = sld [smem:[#allocation3 + $0x284]] }
 0x17e   : > { %v803_v18 = vmax.f32 %v9495_v41, %v801_v22  ;;  %v804_v52 = vmax.f32 %v9496_v40, %v802_v27  ;;  %v2192_v55 = vadd.f32 %v2190_v51, %v2187_v3  ;;  %v2200_v50 = vmul.f32 %v6418_v62, %v6929_v23 }
 0x17f   : > { %v2201_v32 = vmul.f32 %v6423_v2, %v6929_v23  ;;  %v2193_v20 = vadd.f32 %v2191_v4, %v2188_v49  ;;  %v2205_v11 = vmul.f32 %v6485_v38, %v6936_v61  ;;  %v2206_v54 = vmul.f32 %v6490_v44, %v6936_v61 }
 0x180   : > { %v807_v28 = vadd.f32 %v806_v30, %v803_v18  ;;  %v808_v42 = vadd.f32 %v806_v30, %v804_v52  ;;  %v2197_v16 = vadd.f32 %v2195_v33, %v2192_v55  ;;  %v2210_v22 = vmul.f32 %v9489_v5, %v6863_v56  ;;  %v9497_v33 = vld [vmem:[#allocation34_spill] sm:$0xff]  ;;  %v9498_v18 = vld [vmem:[#allocation35_spill] sm:$0xff] }
 0x181   : > { %v2198_v51 = vadd.f32 %v2196_v45, %v2193_v20  ;;  %v2211_v30 = vmul.f32 %v9490_v8, %v6866_v9  ;;  %v2212_v4 = vmul.f32 %v9491_v0, %v6866_v9  ;;  %v2215_v41 = vmul.f32 %v9497_v33, %v6869_v53 }
 0x182   : > { %v809_v27 = vmax.f32 %v807_v28, 0.0  ;;  %v810_v36 = vmax.f32 %v808_v42, 0.0  ;;  %v2202_v3 = vadd.f32 %v2200_v50, %v2197_v16  ;;  %v2216_v40 = vmul.f32 %v9498_v18, %v6869_v53 }
 0x183   : > { %v2203_v52 = vadd.f32 %v2201_v32, %v2198_v51  ;;  %v2213_v5 = vadd.f32 %v2211_v30, %v2209_v58  ;;  %v2219_v45 = vmul.f32 %v6371_v39, %v6894_v13  ;;  %v2214_v8 = vadd.f32 %v2212_v4, %v2210_v22 }
 0x184   : > { %812 = vst [vmem:[#allocation2 + $0x38] sm:$0x3f] %v810_v36  ;;  %v2887_v34 = vand.u32 4294901760, %v809_v27  ;;  %v6956_v49 = vadd.f32 %v2205_v11, %v2202_v3  ;;  %v2220_v55 = vmul.f32 %v6376_v21, %v6894_v13  ;;  %v2223_v0 = vmul.f32 %v6389_v19, %v6897_v63 }
 0x185   : > { %v6964_v28 = vadd.f32 %v2206_v54, %v2203_v52  ;;  %v2217_v42 = vadd.f32 %v2215_v41, %v2213_v5  ;;  %v2224_v32 = vmul.f32 %v6394_v25, %v6897_v63  ;;  %v2218_v20 = vadd.f32 %v2216_v40, %v2214_v8 }
 0x186   : > { %v6962_v50 = vsub.f32 %v809_v27, %v2887_v34  ;;  %v2227_v11 = vmul.f32 %v6471_v29, %v6908_v15  ;;  %v2228_v16 = vmul.f32 %v6476_v17, %v6908_v15  ;;  %v2231_v58 = vmul.f32 %v6418_v62, %v6911_v12 }
 0x187   : > { %v2221_v22 = vadd.f32 %v2219_v45, %v2217_v42  ;;  %v2232_v27 = vmul.f32 %v6423_v2, %v6911_v12  ;;  %v2235_v54 = vmul.f32 %v6485_v38, %v6929_v23  ;;  %v2236_v36 = vmul.f32 %v6490_v44, %v6929_v23 }
 0x188   : > { %9499 = vst [vmem:[#allocation39_spill] sm:$0xff] %v6962_v50  ;;  %v2222_v51 = vadd.f32 %v2220_v55, %v2218_v20  ;;  %v2239_v30 = vmul.f32 %v6495_v14, %v6936_v61  ;;  %v2240_v3 = vmul.f32 %v6500_v31, %v6936_v61  ;;  %v2245_v4 = vmul.f32 %v9492_v43, %v6863_v56 }
 0x189   : > { %v2225_v33 = vadd.f32 %v2223_v0, %v2221_v22  ;;  %v2246_v41 = vmul.f32 %v9493_v57, %v6863_v56  ;;  %v2247_v18 = vmul.f32 %v6371_v39, %v6866_v9  ;;  %v2248_v40 = vmul.f32 %v6376_v21, %v6866_v9 }
 0x18a   : > { %v2226_v5 = vadd.f32 %v2224_v32, %v2222_v51  ;;  %v2251_v45 = vmul.f32 %v6389_v19, %v6869_v53  ;;  %v2252_v8 = vmul.f32 %v6394_v25, %v6869_v53  ;;  %v2255_v43 = vmul.f32 %v9494_v46, %v6894_v13 }
 0x18b   : > { %v2843_v52 = vld [vmem:[#allocation2 + $0x38] sm:$0xff]  ;;  %v2229_v0 = vadd.f32 %v2227_v11, %v2225_v33  ;;  %v2249_v57 = vadd.f32 %v2247_v18, %v2245_v4  ;;  %v2250_v42 = vadd.f32 %v2248_v40, %v2246_v41  ;;  %v2256_v22 = vmul.f32 %v6404_v48, %v6894_v13 }
 0x18c   : > { %v2890_v55 = vand.u32 4294901760, %v2843_v52  ;;  %v2230_v20 = vadd.f32 %v2228_v16, %v2226_v5  ;;  %v2259_v32 = vmul.f32 %v6418_v62, %v6897_v63  ;;  %v2260_v51 = vmul.f32 %v6423_v2, %v6897_v63 }
 0x18d   : > { %v2233_v50 = vadd.f32 %v2231_v58, %v2229_v0  ;;  %v2253_v46 = vadd.f32 %v2251_v45, %v2249_v57  ;;  %v2254_v11 = vadd.f32 %v2252_v8, %v2250_v42  ;;  %v2263_v16 = vmul.f32 %v6485_v38, %v6908_v15 }
 0x18e   : > { %v7004_v6 = vpack.c.bf16 %v2890_v55, %v2887_v34  ;;  %v7006_v60 = vsub.f32 %v2843_v52, %v2890_v55  ;;  %v2234_v1 = vadd.f32 %v2232_v27, %v2230_v20  ;;  %v2264_v48 = vmul.f32 %v6490_v44, %v6908_v15 }
 0x18f   : > { %v2237_v4 = vadd.f32 %v2235_v54, %v2233_v50  ;;  %v2257_v33 = vadd.f32 %v2255_v43, %v2253_v46  ;;  %v2267_v34 = vmul.f32 %v6534_v59, %v6911_v12  ;;  %v2268_v41 = vmul.f32 %v9484_v47, %v6911_v12  ;;  %v9502_v46 = vld [vmem:[#allocation14_spill] sm:$0xff] }
 0x190   : > { %9500 = vst [vmem:[#allocation12_spill] sm:$0xff] %v7004_v6  ;;  %9501 = vst [vmem:[#allocation13_spill] sm:$0xff] %v7006_v60  ;;  %4292 = vmatpush3.bf16.msra.mxu0 %v7004_v6  ;;  %v2238_v58 = vadd.f32 %v2236_v36, %v2234_v1  ;;  %v2258_v18 = vadd.f32 %v2256_v22, %v2254_v11  ;;  %v2271_v27 = vmul.f32 %v6544_v10, %v6929_v23 }
 0x191   : > { %v2272_v40 = vmul.f32 %v6549_v7, %v6929_v23  ;;  %v7021_v52 = vadd.f32 %v2239_v30, %v2237_v4  ;;  %v2261_v5 = vadd.f32 %v2259_v32, %v2257_v33  ;;  %v2275_v50 = vmul.f32 %v6556_v35, %v6936_v61  ;;  %v7105_v33 = vld [vmem:[%s4778_s13] sm:$0xff] }
 0x192   : > { %v2276_v59 = vmul.f32 %v6561_v24, %v6936_v61  ;;  %v7027_v54 = vadd.f32 %v2240_v3, %v2238_v58  ;;  %v2262_v47 = vadd.f32 %v2260_v51, %v2258_v18  ;;  %v2279_v1 = vmul.f32 %v6371_v39, %v6863_v56  ;;  %9504 = vst [vmem:[#allocation21_spill] sm:$0xff] %v7105_v33  ;;  %v7113_v58 = vld [vmem:[%s4778_s13 + $0x8] sm:$0x3f] }
 0x193   : > { %v2280_v36 = vmul.f32 %v6376_v21, %v6863_v56  ;;  %v2243_v30 = vmax.f32 %v6956_v49, %v7021_v52  ;;  %v2265_v45 = vadd.f32 %v2263_v16, %v2261_v5  ;;  %v2281_v8 = vmul.f32 %v6389_v19, %v6866_v9  ;;  %v9503_v16 = vld [vmem:[#allocation11_spill] sm:$0xff]  ;;  %9505 = vst [vmem:[#allocation22_spill] sm:$0xff] %v7113_v58  ;;  %v7123_v5 = vld [vmem:[%s4778_s13 + $0x18] sm:$0x3f] }
 0x194   : > { %v2282_v43 = vmul.f32 %v6394_v25, %v6866_v9  ;;  %v2244_v39 = vmax.f32 %v6964_v28, %v7027_v54  ;;  %v2266_v3 = vadd.f32 %v2264_v48, %v2262_v47  ;;  %v2285_v21 = vmul.f32 %v6471_v29, %v6869_v53  ;;  %9506 = vst [vmem:[#allocation23_spill] sm:$0xff] %v7123_v5 }
 0x195   : > { %v2286_v56 = vmul.f32 %v6476_v17, %v6869_v53  ;;  %v2269_v19 = vadd.f32 %v2267_v34, %v2265_v45  ;;  %v2283_v25 = vadd.f32 %v2281_v8, %v2279_v1  ;;  %v2289_v55 = vmul.f32 %v6418_v62, %v6894_v13 }
 0x196   : > { %v2284_v9 = vadd.f32 %v2282_v43, %v2280_v36  ;;  %v2270_v0 = vadd.f32 %v2268_v41, %v2266_v3  ;;  %v2290_v57 = vmul.f32 %v6423_v2, %v6894_v13  ;;  %v2293_v29 = vmul.f32 %v6485_v38, %v6897_v63  ;;  %v7130_v36 = vld [vmem:[%s4778_s13 + $0x1] sm:$0xff] }
 0x197   : > { %v2294_v17 = vmul.f32 %v6490_v44, %v6897_v63  ;;  %v2273_v53 = vadd.f32 %v2271_v27, %v2269_v19  ;;  %v2287_v42 = vadd.f32 %v2285_v21, %v2283_v25  ;;  %v2297_v22 = vmul.f32 %v6495_v14, %v6908_v15  ;;  %v7118_v27 = vld [vmem:[%s4778_s13 + $0x10] sm:$0xff]  ;;  %9507 = vst [vmem:[#allocation31_spill] sm:$0xff] %v7130_v36  ;;  %v7137_v21 = vld [vmem:[%s4778_s13 + $0x9] sm:$0x3f] }
 0x198   : > { %v2288_v20 = vadd.f32 %v2286_v56, %v2284_v9  ;;  %v2274_v32 = vadd.f32 %v2272_v40, %v2270_v0  ;;  %v2298_v62 = vmul.f32 %v6500_v31, %v6908_v15  ;;  %v2301_v2 = vmul.f32 %v6544_v10, %v6911_v12  ;;  %9508 = vst [vmem:[#allocation32_spill] sm:$0xff] %v7137_v21 }
 0x199   : > { %v2302_v38 = vmul.f32 %v6549_v7, %v6911_v12  ;;  %v7069_v13 = vadd.f32 %v2275_v50, %v2273_v53  ;;  %v2291_v44 = vadd.f32 %v2289_v55, %v2287_v42  ;;  %v2305_v14 = vmul.f32 %v6556_v35, %v6929_v23 }
 0x19a   : > { %v2292_v63 = vadd.f32 %v2290_v57, %v2288_v20  ;;  %v7077_v31 = vadd.f32 %v2276_v59, %v2274_v32  ;;  %v2306_v10 = vmul.f32 %v6561_v24, %v6929_v23  ;;  %v2309_v7 = vmul.f32 %v6618_v26, %v6936_v61 }
 0x19b   : > { %v2310_v15 = vmul.f32 %v6623_v37, %v6936_v61  ;;  %v2295_v12 = vadd.f32 %v2293_v29, %v2291_v44  ;;  %v2318_v51 = vstv %s7039_s22  ;;  %v9309_v11 = vand.u32 4294901760, %v9502_v46  ;;  %v7163_v44 = vld [vmem:[%s4778_s13 + $0x38] sm:$0x3f]  ;;  %s7645_s22 = sld [smem:[#allocation3 + $0x285]] }
 0x19c   : > { %v2296_v35 = vadd.f32 %v2294_v17, %v2292_v63  ;;  %v9308_v48 = vand.u32 4294901760, %v9503_v16  ;;  %v7093_v24 = vstv %s7041_s23  ;;  %v7096_v26 = vstv %s7049_s24  ;;  %v7148_v17 = vld [vmem:[%s4778_s13 + $0x20] sm:$0xff]  ;;  %s7647_s23 = sld [smem:[#allocation3 + $0x286]]  ;;  %s7672_s24 = sld [smem:[#allocation3 + $0x287]] }
 0x19d   : > { %v7099_v23 = vstv %s7051_s25  ;;  %v2299_v37 = vadd.f32 %v2297_v22, %v2295_v12  ;;  %v3139_v4 = vsub.f32 %v9502_v46, %v9309_v11  ;;  %v823_v34 = vmul.f32 %v7105_v33, %v7093_v24  ;;  %9509 = vst [vmem:[#allocation33_spill] sm:$0xff] %v7148_v17  ;;  %v7153_v22 = vld [vmem:[%s4778_s13 + $0x28] sm:$0x3f]  ;;  %s7676_s25 = sld [smem:[#allocation3 + $0x288]] }
 0x19e   : > { %v2300_v61 = vadd.f32 %v2298_v62, %v2296_v35  ;;  %v3146_v41 = vsub.f32 %v9503_v16, %v9308_v48  ;;  %v824_v18 = vmul.f32 %v7113_v58, %v7093_v24  ;;  %v826_v40 = vmul.f32 %v7118_v27, %v7096_v26  ;;  %9510 = vst [vmem:[#allocation34_spill] sm:$0xff] %v7153_v22  ;;  %v7158_v62 = vld [vmem:[%s4778_s13 + $0x30] sm:$0xff]  ;;  %v7176_v35 = vld [vmem:[%s4778_s13 + $0x21] sm:$0xff] }
 0x19f   : > { %v827_v50 = vmul.f32 %v7123_v5, %v7096_v26  ;;  %v2303_v59 = vadd.f32 %v2301_v2, %v2299_v37  ;;  %v3140_v1 = vand.u32 4294901760, %v3139_v4  ;;  %v831_v45 = vmul.f32 %v7130_v36, %v7099_v23  ;;  %v7181_v4 = vld [vmem:[%s4778_s13 + $0x29] sm:$0x3f] }
 0x1a0   : > { %v2304_v47 = vadd.f32 %v2302_v38, %v2300_v61  ;;  %v3147_v8 = vand.u32 4294901760, %v3146_v41  ;;  %v828_v43 = vadd.f32 %v826_v40, %v823_v34  ;;  %v832_v56 = vmul.f32 %v7137_v21, %v7099_v23  ;;  %v7191_v41 = vld [vmem:[%s4778_s13 + $0x48] sm:$0x3f] }
 0x1a1   : > { %v829_v3 = vadd.f32 %v827_v50, %v824_v18  ;;  %v2307_v19 = vadd.f32 %v2305_v14, %v2303_v59  ;;  %v7142_v9 = vstv %s7073_s26  ;;  %v7145_v55 = vstv %s7075_s27  ;;  %s7826_s26 = sld [smem:[#allocation5 + $0x5]]  ;;  %s7828_s27 = sld [smem:[#allocation3 + $0x700]] }
 0x1a2   : > { %v2308_v25 = vadd.f32 %v2306_v10, %v2304_v47  ;;  %v4317_v0 = vpack.c.bf16 %v3147_v8, %v3140_v1  ;;  %v833_v57 = vadd.f32 %v831_v45, %v828_v43  ;;  %v836_v53 = vmul.f32 %v7148_v17, %v7142_v9  ;;  %v7205_v45 = vld [vmem:[%s4778_s13 + $0x50] sm:$0xff]  ;;  %v7210_v43 = vld [vmem:[%s4778_s13 + $0x58] sm:$0x3f] }
 0x1a3   : > { %v834_v29 = vadd.f32 %v832_v56, %v829_v3  ;;  %v2311_v42 = vadd.f32 %v2309_v7, %v2307_v19  ;;  %v837_v32 = vmul.f32 %v7153_v22, %v7142_v9  ;;  %v841_v2 = vmul.f32 %v7158_v62, %v7145_v55  ;;  %v7227_v19 = vld [vmem:[%s4778_s13 + $0x49] sm:$0x3f] }
 0x1a4   : > { %v2312_v20 = vadd.f32 %v2310_v15, %v2308_v25  ;;  %4318 = vmatprep.subr.bf16.mxu1 %v4317_v0  ;;  %v838_v38 = vadd.f32 %v836_v53, %v833_v57  ;;  %v842_v63 = vmul.f32 %v7163_v44, %v7145_v55  ;;  %v7168_v14 = vstv %s7088_s28  ;;  %s7836_s28 = sld [smem:[#allocation3 + $0x701]] }
 0x1a5   : > { %v7171_v10 = vstv %s7090_s0  ;;  %v2313_v7 = vmax.f32 %v7069_v13, %v2311_v42  ;;  %v839_v12 = vadd.f32 %v837_v32, %v834_v29  ;;  %v846_v37 = vmul.f32 %v7176_v35, %v7168_v14  ;;  %v7186_v13 = vld [vmem:[%s4778_s13 + $0x40] sm:$0xff]  ;;  %s7838_s0 = sld [smem:[#allocation3 + $0x702]] }
 0x1a6   : > { %v2314_v15 = vmax.f32 %v7077_v31, %v2312_v20  ;;  %v843_v61 = vadd.f32 %v841_v2, %v838_v38  ;;  %v847_v34 = vmul.f32 %v7181_v4, %v7168_v14  ;;  %9511 = vst [vmem:[#allocation35_spill] sm:$0xff] %v7186_v13  ;;  %v851_v31 = vmul.f32 %v7186_v13, %v7171_v10  ;;  %v7240_v2 = vld [vmem:[%s4778_s13 + $0x11] sm:$0xff] }
 0x1a7   : > { %v852_v18 = vmul.f32 %v7191_v41, %v7171_v10  ;;  %v2315_v40 = vmax.f32 %v2243_v30, %v2313_v7  ;;  %v844_v59 = vadd.f32 %v842_v63, %v839_v12  ;;  %v7202_v47 = vstv %s7127_s1  ;;  %9512 = vst [vmem:[#allocation43_spill] sm:$0xff] %v7240_v2  ;;  %v7245_v63 = vld [vmem:[%s4778_s13 + $0x19] sm:$0x3f]  ;;  %s7860_s1 = sld [smem:[#allocation3 + $0x703]] }
 0x1a8   : > { %v2316_v50 = vmax.f32 %v2244_v39, %v2314_v15  ;;  %v848_v1 = vadd.f32 %v846_v37, %v843_v61  ;;  %v856_v8 = vmul.f32 %v7205_v45, %v7202_v47  ;;  %v857_v49 = vmul.f32 %v7210_v43, %v7202_v47  ;;  %v7222_v39 = vld [vmem:[%s4778_s13 + $0x41] sm:$0xff]  ;;  %9513 = vst [vmem:[#allocation44_spill] sm:$0xff] %v7245_v63 }
 0x1a9   : > { %v7215_v52 = vstv %s7134_s29  ;;  %v2319_v28 = vadd.f32 %v2318_v51, %v2315_v40  ;;  %v849_v30 = vadd.f32 %v847_v34, %v844_v59  ;;  %v865_v0 = vmul.f32 %v7118_v27, %v7093_v24  ;;  %s7862_s29 = sld [smem:[#allocation3 + $0x704]] }
 0x1aa   : > { %v2320_v54 = vadd.f32 %v2318_v51, %v2316_v50  ;;  %v861_v3 = vmul.f32 %v7222_v39, %v7215_v52  ;;  %v853_v56 = vadd.f32 %v851_v31, %v848_v1  ;;  %v862_v25 = vmul.f32 %v7227_v19, %v7215_v52 }
 0x1ab   : > { %v866_v57 = vmul.f32 %v7123_v5, %v7093_v24  ;;  %v2321_v51 = vmax.f32 %v2319_v28, 0.0  ;;  %v854_v53 = vadd.f32 %v852_v18, %v849_v30  ;;  %v867_v42 = vmul.f32 %v7130_v36, %v7096_v26  ;;  %v7264_v28 = vld [vmem:[%s4778_s13 + $0x31] sm:$0xff]  ;;  %v7269_v30 = vld [vmem:[%s4778_s13 + $0x39] sm:$0x3f] }
 0x1ac   : > { %v2322_v29 = vmax.f32 %v2320_v54, 0.0  ;;  %v858_v20 = vadd.f32 %v856_v8, %v853_v56  ;;  %v868_v32 = vmul.f32 %v7137_v21, %v7096_v26  ;;  %v871_v38 = vmul.f32 %v7240_v2, %v7099_v23 }
 0x1ad   : > { %v872_v7 = vmul.f32 %v7245_v63, %v7099_v23  ;;  %v2941_v15 = vand.u32 4294901760, %v2321_v51  ;;  %v859_v12 = vadd.f32 %v857_v49, %v854_v53  ;;  %v869_v37 = vadd.f32 %v867_v42, %v865_v0  ;;  %v7282_v53 = vld [vmem:[%s4778_s13 + $0x51] sm:$0xff] }
 0x1ae   : > { %2324 = vst [vmem:[#allocation2 + $0xc8] sm:$0x3f] %v2322_v29  ;;  %v875_v61 = vmul.f32 %v7158_v62, %v7142_v9  ;;  %v7251_v34 = vadd.f32 %v861_v3, %v858_v20  ;;  %v870_v31 = vadd.f32 %v868_v32, %v866_v57  ;;  %v876_v18 = vmul.f32 %v7163_v44, %v7142_v9  ;;  %v7287_v20 = vld [vmem:[%s4778_s13 + $0x59] sm:$0x3f] }
 0x1af   : > { %v879_v40 = vmul.f32 %v7176_v35, %v7145_v55  ;;  %v7257_v50 = vsub.f32 %v2321_v51, %v2941_v15  ;;  %v7259_v59 = vadd.f32 %v862_v25, %v859_v12  ;;  %v873_v1 = vadd.f32 %v871_v38, %v869_v37 }
 0x1b0   : > { %v880_v8 = vmul.f32 %v7181_v4, %v7145_v55  ;;  %v874_v49 = vadd.f32 %v872_v7, %v870_v31  ;;  %v883_v54 = vmul.f32 %v7264_v28, %v7168_v14  ;;  %v884_v3 = vmul.f32 %v7269_v30, %v7168_v14 }
 0x1b1   : > { %9514 = vst [vmem:[#allocation45_spill] sm:$0xff] %v7257_v50  ;;  %v887_v56 = vmul.f32 %v7205_v45, %v7171_v10  ;;  %v877_v25 = vadd.f32 %v875_v61, %v873_v1  ;;  %v888_v0 = vmul.f32 %v7210_v43, %v7171_v10  ;;  %v891_v57 = vmul.f32 %v7222_v39, %v7202_v47 }
 0x1b2   : > { %v892_v51 = vmul.f32 %v7227_v19, %v7202_v47  ;;  %v878_v29 = vadd.f32 %v876_v18, %v874_v49  ;;  %v895_v42 = vmul.f32 %v7282_v53, %v7215_v52  ;;  %v896_v32 = vmul.f32 %v7287_v20, %v7215_v52 }
 0x1b3   : > { %v901_v38 = vmul.f32 %v7148_v17, %v7093_v24  ;;  %v881_v7 = vadd.f32 %v879_v40, %v877_v25  ;;  %v902_v12 = vmul.f32 %v7153_v22, %v7093_v24  ;;  %v903_v37 = vmul.f32 %v7158_v62, %v7096_v26 }
 0x1b4   : > { %v904_v61 = vmul.f32 %v7163_v44, %v7096_v26  ;;  %v882_v18 = vadd.f32 %v880_v8, %v878_v29  ;;  %v907_v1 = vmul.f32 %v7176_v35, %v7099_v23  ;;  %v908_v49 = vmul.f32 %v7181_v4, %v7099_v23 }
 0x1b5   : > { %v2861_v31 = vld [vmem:[#allocation2 + $0xc8] sm:$0xff]  ;;  %v911_v40 = vmul.f32 %v7186_v13, %v7142_v9  ;;  %v885_v48 = vadd.f32 %v883_v54, %v881_v7  ;;  %v905_v11 = vadd.f32 %v903_v37, %v901_v38  ;;  %v912_v46 = vmul.f32 %v7191_v41, %v7142_v9 }
 0x1b6   : > { %v2944_v25 = vand.u32 4294901760, %v2861_v31  ;;  %v906_v6 = vadd.f32 %v904_v61, %v902_v12  ;;  %v886_v16 = vadd.f32 %v884_v3, %v882_v18  ;;  %v915_v8 = vmul.f32 %v7205_v45, %v7145_v55 }
 0x1b7   : > { %v916_v29 = vmul.f32 %v7210_v43, %v7145_v55  ;;  %v889_v54 = vadd.f32 %v887_v56, %v885_v48  ;;  %v909_v38 = vadd.f32 %v907_v1, %v905_v11  ;;  %v919_v12 = vmul.f32 %v7222_v39, %v7168_v14  ;;  %v7326_v48 = vld [vmem:[%s4778_s13 + $0x68] sm:$0x3f] }
 0x1b8   : > { %v7311_v50 = vpack.c.bf16 %v2944_v25, %v2941_v15  ;;  %v7313_v60 = vsub.f32 %v2861_v31, %v2944_v25  ;;  %v890_v7 = vadd.f32 %v888_v0, %v886_v16  ;;  %v910_v3 = vadd.f32 %v908_v49, %v906_v6  ;;  %v7321_v31 = vld [vmem:[%s4778_s13 + $0x60] sm:$0xff]  ;;  %9517 = vst [vmem:[#allocation48_spill] sm:$0xff] %v7326_v48  ;;  %v7331_v0 = vld [vmem:[%s4778_s13 + $0x70] sm:$0xff] }
 0x1b9   : > { %v920_v37 = vmul.f32 %v7227_v19, %v7168_v14  ;;  %v893_v61 = vadd.f32 %v891_v57, %v889_v54  ;;  %v913_v15 = vadd.f32 %v911_v40, %v909_v38  ;;  %v923_v11 = vmul.f32 %v7321_v31, %v7171_v10  ;;  %v7336_v57 = vld [vmem:[%s4778_s13 + $0x78] sm:$0x3f]  ;;  %v7343_v25 = vld [vmem:[%s4778_s13 + $0x61] sm:$0xff] }
 0x1ba   : > { %9515 = vst [vmem:[#allocation46_spill] sm:$0xff] %v7311_v50  ;;  %9516 = vst [vmem:[#allocation47_spill] sm:$0xff] %v7313_v60  ;;  %4294 = vmatprep.subr.bf16.mxu0 %v7311_v50  ;;  %v924_v6 = vmul.f32 %v7326_v48, %v7171_v10  ;;  %v894_v16 = vadd.f32 %v892_v51, %v890_v7  ;;  %v914_v56 = vadd.f32 %v912_v46, %v910_v3  ;;  %v7348_v51 = vld [vmem:[%s4778_s13 + $0x69] sm:$0x3f] }
 0x1bb   : > { %v927_v18 = vmul.f32 %v7331_v0, %v7202_v47  ;;  %v928_v1 = vmul.f32 %v7336_v57, %v7202_v47  ;;  %v7340_v49 = vadd.f32 %v895_v42, %v893_v61  ;;  %v917_v40 = vadd.f32 %v915_v8, %v913_v15 }
 0x1bc   : > { %v931_v54 = vmul.f32 %v7343_v25, %v7215_v52  ;;  %v932_v46 = vmul.f32 %v7348_v51, %v7215_v52  ;;  %v7352_v38 = vadd.f32 %v896_v32, %v894_v16  ;;  %v918_v7 = vadd.f32 %v916_v29, %v914_v56 }
 0x1bd   : > { %v935_v3 = vmul.f32 %v7158_v62, %v7093_v24  ;;  %v936_v42 = vmul.f32 %v7163_v44, %v7093_v24  ;;  %v921_v61 = vadd.f32 %v919_v12, %v917_v40  ;;  %v937_v15 = vmul.f32 %v7176_v35, %v7096_v26 }
 0x1be   : > { %v938_v50 = vmul.f32 %v7181_v4, %v7096_v26  ;;  %v922_v29 = vadd.f32 %v920_v37, %v918_v7  ;;  %v941_v24 = vmul.f32 %v7264_v28, %v7099_v23  ;;  %v942_v12 = vmul.f32 %v7269_v30, %v7099_v23 }
 0x1bf   : > { %v925_v16 = vadd.f32 %v923_v11, %v921_v61  ;;  %v939_v26 = vadd.f32 %v937_v15, %v935_v3  ;;  %v945_v40 = vmul.f32 %v7205_v45, %v7142_v9  ;;  %v946_v37 = vmul.f32 %v7210_v43, %v7142_v9 }
 0x1c0   : > { %v940_v56 = vadd.f32 %v938_v50, %v936_v42  ;;  %v926_v8 = vadd.f32 %v924_v6, %v922_v29  ;;  %v949_v7 = vmul.f32 %v7222_v39, %v7145_v55  ;;  %v950_v23 = vmul.f32 %v7227_v19, %v7145_v55  ;;  %v9518_v29 = vld [vmem:[#allocation36_spill] sm:$0xff] }
 0x1c1   : > { %v929_v32 = vadd.f32 %v927_v18, %v925_v16  ;;  %v943_v60 = vadd.f32 %v941_v24, %v939_v26  ;;  %v953_v50 = vmul.f32 %v7282_v53, %v7168_v14  ;;  %v954_v6 = vmul.f32 %v7287_v20, %v7168_v14 }
 0x1c2   : > { %v944_v48 = vadd.f32 %v942_v12, %v940_v56  ;;  %v930_v11 = vadd.f32 %v928_v1, %v926_v8  ;;  %v957_v9 = vmul.f32 %v7331_v0, %v7171_v10  ;;  %v958_v3 = vmul.f32 %v7336_v57, %v7171_v10  ;;  %v7405_v8 = vld [vmem:[%s4778_s13 + $0x71] sm:$0xff]  ;;  %v7410_v10 = vld [vmem:[%s4778_s13 + $0x79] sm:$0x3f]  ;;  %v9519_v12 = vld [vmem:[#allocation38_spill] sm:$0xff] }
 0x1c3   : > { %v7394_v55 = vadd.f32 %v931_v54, %v929_v32  ;;  %v947_v18 = vadd.f32 %v945_v40, %v943_v60  ;;  %v961_v61 = vmul.f32 %v7343_v25, %v7202_v47  ;;  %v962_v1 = vmul.f32 %v7348_v51, %v7202_v47 }
 0x1c4   : > { %v948_v42 = vadd.f32 %v946_v37, %v944_v48  ;;  %v934_v14 = vadd.f32 %v932_v46, %v930_v11  ;;  %v965_v60 = vmul.f32 %v7405_v8, %v7215_v52  ;;  %v966_v48 = vmul.f32 %v7410_v10, %v7215_v52 }
 0x1c5   : > { %v951_v54 = vadd.f32 %v949_v7, %v947_v18  ;;  %v974_v32 = vstv %s7364_s30  ;;  %v9322_v24 = vand.u32 4294901760, %v9518_v29  ;;  %v9321_v46 = vand.u32 4294901760, %v9519_v12  ;;  %s7875_s30 = sld [smem:[#allocation3 + $0x705]] }
 0x1c6   : > { %v952_v15 = vadd.f32 %v950_v23, %v948_v42  ;;  %v7422_v47 = vstv %s7366_s6  ;;  %v7425_v16 = vstv %s7374_s7  ;;  %v7428_v26 = vstv %s7376_s8  ;;  %s7877_s6 = sld [smem:[#allocation3 + $0x706]]  ;;  %s7914_s7 = sld [smem:[#allocation3 + $0x707]] }
 0x1c7   : > { %v955_v56 = vadd.f32 %v953_v50, %v951_v54  ;;  %v3027_v52 = vsub.f32 %v9518_v29, %v9322_v24  ;;  %v2335_v37 = vmul.f32 %v7105_v33, %v7422_v47  ;;  %v3034_v7 = vsub.f32 %v9519_v12, %v9321_v46  ;;  %s7921_s8 = sld [smem:[#allocation3 + $0x708]] }
 0x1c8   : > { %v956_v40 = vadd.f32 %v954_v6, %v952_v15  ;;  %v2336_v23 = vmul.f32 %v7113_v58, %v7422_v47  ;;  %v2338_v50 = vmul.f32 %v7118_v27, %v7425_v16  ;;  %v2339_v11 = vmul.f32 %v7123_v5, %v7425_v16 }
 0x1c9   : > { %v959_v6 = vadd.f32 %v957_v9, %v955_v56  ;;  %v3028_v42 = vand.u32 4294901760, %v3027_v52  ;;  %v2343_v54 = vmul.f32 %v7130_v36, %v7428_v26  ;;  %v3035_v15 = vand.u32 4294901760, %v3034_v7 }
 0x1ca   : > { %v960_v18 = vadd.f32 %v958_v3, %v956_v40  ;;  %v2340_v46 = vadd.f32 %v2338_v50, %v2335_v37  ;;  %v2341_v24 = vadd.f32 %v2339_v11, %v2336_v23  ;;  %v2344_v12 = vmul.f32 %v7137_v21, %v7428_v26 }
 0x1cb   : > { %v963_v29 = vadd.f32 %v961_v61, %v959_v6  ;;  %v7453_v9 = vstv %s7398_s9  ;;  %v7456_v3 = vstv %s7400_s10  ;;  %v4319_v56 = vpack.c.bf16 %v3035_v15, %v3028_v42  ;;  %s8151_s9 = sld [smem:[#allocation5 + $0xe]]  ;;  %s8153_s10 = sld [smem:[#allocation3 + $0x300]] }
 0x1cc   : > { %v964_v58 = vadd.f32 %v962_v1, %v960_v18  ;;  %v2345_v40 = vadd.f32 %v2343_v54, %v2340_v46  ;;  %v2346_v52 = vadd.f32 %v2344_v12, %v2341_v24  ;;  %v2348_v7 = vmul.f32 %v7148_v17, %v7453_v9 }
 0x1cd   : > { %v967_v33 = vadd.f32 %v965_v60, %v963_v29  ;;  %v2349_v23 = vmul.f32 %v7153_v22, %v7453_v9  ;;  %v2353_v61 = vmul.f32 %v7158_v62, %v7456_v3  ;;  %4320 = vmatpush3.bf16.msra.mxu1 %v4319_v56  ;;  %v2354_v50 = vmul.f32 %v7163_v44, %v7456_v3 }
 0x1ce   : > { %v968_v37 = vadd.f32 %v966_v48, %v964_v58  ;;  %v2350_v1 = vadd.f32 %v2348_v7, %v2345_v40  ;;  %v7467_v11 = vstv %s7417_s11  ;;  %v7470_v24 = vstv %s7419_s12  ;;  %s8161_s11 = sld [smem:[#allocation3 + $0x301]]  ;;  %s8163_s12 = sld [smem:[#allocation3 + $0x302]] }
 0x1cf   : > { %v969_v60 = vmax.f32 %v7394_v55, %v967_v33  ;;  %v2351_v48 = vadd.f32 %v2349_v23, %v2346_v52  ;;  %v2358_v29 = vmul.f32 %v7176_v35, %v7467_v11  ;;  %v2359_v46 = vmul.f32 %v7181_v4, %v7467_v11 }
 0x1d0   : > { %v970_v58 = vmax.f32 %v934_v14, %v968_v37  ;;  %v2355_v12 = vadd.f32 %v2353_v61, %v2350_v1  ;;  %v2363_v6 = vmul.f32 %v7186_v13, %v7470_v24  ;;  %v2364_v18 = vmul.f32 %v7191_v41, %v7470_v24 }
 0x1d1   : > { %v9520_v42 = vmax.f32 %v7251_v34, %v7340_v49  ;;  %v9521_v33 = vmax.f32 %v7259_v59, %v7352_v38  ;;  %v2356_v14 = vadd.f32 %v2354_v50, %v2351_v48  ;;  %v7488_v15 = vstv %s7444_s14  ;;  %s8185_s14 = sld [smem:[#allocation3 + $0x303]] }
 0x1d2   : > { %v2360_v56 = vadd.f32 %v2358_v29, %v2355_v12  ;;  %v2368_v40 = vmul.f32 %v7205_v45, %v7488_v15  ;;  %v2369_v52 = vmul.f32 %v7210_v43, %v7488_v15  ;;  %v7495_v7 = vstv %s7448_s15  ;;  %s8187_s15 = sld [smem:[#allocation3 + $0x304]] }
 0x1d3   : > { %v971_v54 = vmax.f32 %v9520_v42, %v969_v60  ;;  %v972_v55 = vmax.f32 %v9521_v33, %v970_v58  ;;  %v2361_v34 = vadd.f32 %v2359_v46, %v2356_v14  ;;  %v2373_v49 = vmul.f32 %v7222_v39, %v7495_v7 }
 0x1d4   : > { %v2365_v59 = vadd.f32 %v2363_v6, %v2360_v56  ;;  %v2374_v38 = vmul.f32 %v7227_v19, %v7495_v7  ;;  %v2377_v61 = vmul.f32 %v7118_v27, %v7422_v47  ;;  %v2378_v1 = vmul.f32 %v7123_v5, %v7422_v47 }
 0x1d5   : > { %v975_v37 = vadd.f32 %v974_v32, %v971_v54  ;;  %v976_v23 = vadd.f32 %v974_v32, %v972_v55  ;;  %v2366_v58 = vadd.f32 %v2364_v18, %v2361_v34  ;;  %v2379_v32 = vmul.f32 %v7130_v36, %v7425_v16 }
 0x1d6   : > { %v2370_v48 = vadd.f32 %v2368_v40, %v2365_v59  ;;  %v2380_v29 = vmul.f32 %v7137_v21, %v7425_v16  ;;  %v2383_v12 = vmul.f32 %v7240_v2, %v7428_v26  ;;  %v2384_v46 = vmul.f32 %v7245_v63, %v7428_v26 }
 0x1d7   : > { %v977_v50 = vmax.f32 %v975_v37, 0.0  ;;  %v978_v60 = vmax.f32 %v976_v23, 0.0  ;;  %v2371_v42 = vadd.f32 %v2369_v52, %v2366_v58  ;;  %v2381_v54 = vadd.f32 %v2379_v32, %v2377_v61 }
 0x1d8   : > { %v2387_v18 = vmul.f32 %v7158_v62, %v7453_v9  ;;  %v7515_v33 = vadd.f32 %v2373_v49, %v2370_v48  ;;  %v2382_v55 = vadd.f32 %v2380_v29, %v2378_v1  ;;  %v2388_v14 = vmul.f32 %v7163_v44, %v7453_v9 }
 0x1d9   : > { %980 = vst [vmem:[#allocation2 + $0x48] sm:$0x3f] %v978_v60  ;;  %v2893_v6 = vand.u32 4294901760, %v977_v50  ;;  %v2391_v56 = vmul.f32 %v7176_v35, %v7456_v3  ;;  %v7523_v37 = vadd.f32 %v2374_v38, %v2371_v42  ;;  %v2385_v23 = vadd.f32 %v2383_v12, %v2381_v54 }
 0x1da   : > { %v2392_v52 = vmul.f32 %v7181_v4, %v7456_v3  ;;  %v2386_v34 = vadd.f32 %v2384_v46, %v2382_v55  ;;  %v2395_v49 = vmul.f32 %v7264_v28, %v7467_v11  ;;  %v2396_v59 = vmul.f32 %v7269_v30, %v7467_v11 }
 0x1db   : > { %v7521_v40 = vsub.f32 %v977_v50, %v2893_v6  ;;  %v2399_v61 = vmul.f32 %v7205_v45, %v7470_v24  ;;  %v2389_v1 = vadd.f32 %v2387_v18, %v2385_v23  ;;  %v2400_v50 = vmul.f32 %v7210_v43, %v7470_v24 }
 0x1dc   : > { %v2403_v38 = vmul.f32 %v7222_v39, %v7488_v15  ;;  %v2404_v60 = vmul.f32 %v7227_v19, %v7488_v15  ;;  %v2390_v58 = vadd.f32 %v2388_v14, %v2386_v34  ;;  %v2407_v32 = vmul.f32 %v7282_v53, %v7495_v7 }
 0x1dd   : > { %9522 = vst [vmem:[#allocation49_spill] sm:$0xff] %v7521_v40  ;;  %v2408_v48 = vmul.f32 %v7287_v20, %v7495_v7  ;;  %v2413_v29 = vmul.f32 %v7148_v17, %v7422_v47  ;;  %v2393_v12 = vadd.f32 %v2391_v56, %v2389_v1  ;;  %v2414_v46 = vmul.f32 %v7153_v22, %v7422_v47 }
 0x1de   : > { %v2415_v42 = vmul.f32 %v7158_v62, %v7425_v16  ;;  %v2416_v54 = vmul.f32 %v7163_v44, %v7425_v16  ;;  %v2394_v55 = vadd.f32 %v2392_v52, %v2390_v58  ;;  %v2419_v14 = vmul.f32 %v7176_v35, %v7428_v26 }
 0x1df   : > { %v2420_v23 = vmul.f32 %v7181_v4, %v7428_v26  ;;  %v2423_v56 = vmul.f32 %v7186_v13, %v7453_v9  ;;  %v2397_v1 = vadd.f32 %v2395_v49, %v2393_v12  ;;  %v2424_v22 = vmul.f32 %v7191_v41, %v7453_v9 }
 0x1e0   : > { %v2845_v18 = vld [vmem:[#allocation2 + $0x48] sm:$0xff]  ;;  %v2417_v40 = vadd.f32 %v2415_v42, %v2413_v29  ;;  %v2418_v63 = vadd.f32 %v2416_v54, %v2414_v46  ;;  %v2398_v2 = vadd.f32 %v2396_v59, %v2394_v55  ;;  %v2427_v52 = vmul.f32 %v7205_v45, %v7456_v3  ;;  %v9525_v42 = vld [vmem:[#allocation48_spill] sm:$0xff] }
 0x1e1   : > { %v2896_v34 = vand.u32 4294901760, %v2845_v18  ;;  %v2428_v58 = vmul.f32 %v7210_v43, %v7456_v3  ;;  %v2401_v36 = vadd.f32 %v2399_v61, %v2397_v1  ;;  %v2431_v59 = vmul.f32 %v7222_v39, %v7467_v11 }
 0x1e2   : > { %v2421_v13 = vadd.f32 %v2419_v14, %v2417_v40  ;;  %v2402_v5 = vadd.f32 %v2400_v50, %v2398_v2  ;;  %v2422_v49 = vadd.f32 %v2420_v23, %v2418_v63  ;;  %v2432_v29 = vmul.f32 %v7227_v19, %v7467_v11 }
 0x1e3   : > { %v7563_v17 = vpack.c.bf16 %v2896_v34, %v2893_v6  ;;  %v7565_v21 = vsub.f32 %v2845_v18, %v2896_v34  ;;  %v2405_v12 = vadd.f32 %v2403_v38, %v2401_v36  ;;  %v2435_v6 = vmul.f32 %v7321_v31, %v7470_v24 }
 0x1e4   : > { %v2425_v46 = vadd.f32 %v2423_v56, %v2421_v13  ;;  %v2436_v54 = vmul.f32 %v9525_v42, %v7470_v24  ;;  %v2406_v61 = vadd.f32 %v2404_v60, %v2402_v5  ;;  %v2426_v40 = vadd.f32 %v2424_v22, %v2422_v49 }
 0x1e5   : > { %9523 = vst [vmem:[#allocation50_spill] sm:$0xff] %v7563_v17  ;;  %9524 = vst [vmem:[#allocation51_spill] sm:$0xff] %v7565_v21  ;;  %4296 = vmatpush3.bf16.msra.mxu0 %v7563_v17  ;;  %v2439_v2 = vmul.f32 %v7331_v0, %v7488_v15  ;;  %v2440_v63 = vmul.f32 %v7336_v57, %v7488_v15  ;;  %v7580_v50 = vadd.f32 %v2407_v32, %v2405_v12 }
 0x1e6   : > { %v2429_v18 = vadd.f32 %v2427_v52, %v2425_v46  ;;  %v2443_v36 = vmul.f32 %v7343_v25, %v7495_v7  ;;  %v2444_v13 = vmul.f32 %v7348_v51, %v7495_v7  ;;  %v7586_v38 = vadd.f32 %v2408_v48, %v2406_v61 }
 0x1e7   : > { %v2430_v55 = vadd.f32 %v2428_v58, %v2426_v40  ;;  %v2447_v5 = vmul.f32 %v7158_v62, %v7422_v47  ;;  %v2448_v22 = vmul.f32 %v7163_v44, %v7422_v47  ;;  %v2449_v14 = vmul.f32 %v7176_v35, %v7425_v16 }
 0x1e8   : > { %v2433_v32 = vadd.f32 %v2431_v59, %v2429_v18  ;;  %v2450_v23 = vmul.f32 %v7181_v4, %v7425_v16  ;;  %v2453_v47 = vmul.f32 %v7264_v28, %v7428_v26  ;;  %v2454_v34 = vmul.f32 %v7269_v30, %v7428_v26 }
 0x1e9   : > { %v2434_v56 = vadd.f32 %v2432_v29, %v2430_v55  ;;  %v2451_v16 = vadd.f32 %v2449_v14, %v2447_v5  ;;  %v2457_v58 = vmul.f32 %v7205_v45, %v7453_v9  ;;  %v2458_v59 = vmul.f32 %v7210_v43, %v7453_v9 }
 0x1ea   : > { %v2437_v1 = vadd.f32 %v2435_v6, %v2433_v32  ;;  %v2452_v52 = vadd.f32 %v2450_v23, %v2448_v22  ;;  %v2461_v29 = vmul.f32 %v7222_v39, %v7456_v3  ;;  %v2462_v26 = vmul.f32 %v7227_v19, %v7456_v3  ;;  %v9526_v23 = vld [vmem:[#allocation40_spill] sm:$0xff] }
 0x1eb   : > { %v2438_v49 = vadd.f32 %v2436_v54, %v2434_v56  ;;  %v2455_v46 = vadd.f32 %v2453_v47, %v2451_v16  ;;  %v2465_v6 = vmul.f32 %v7282_v53, %v7467_v11  ;;  %v2466_v54 = vmul.f32 %v7287_v20, %v7467_v11  ;;  %v9527_v47 = vld [vmem:[#allocation42_spill] sm:$0xff] }
 0x1ec   : > { %v2441_v12 = vadd.f32 %v2439_v2, %v2437_v1  ;;  %v2456_v61 = vadd.f32 %v2454_v34, %v2452_v52  ;;  %v2469_v9 = vmul.f32 %v7331_v0, %v7470_v24  ;;  %v2470_v18 = vmul.f32 %v7336_v57, %v7470_v24 }
 0x1ed   : > { %v2442_v40 = vadd.f32 %v2440_v63, %v2438_v49  ;;  %v2459_v3 = vadd.f32 %v2457_v58, %v2455_v46  ;;  %v2473_v5 = vmul.f32 %v7343_v25, %v7488_v15  ;;  %v2474_v63 = vmul.f32 %v7348_v51, %v7488_v15  ;;  %v9528_v58 = vld [vmem:[#allocation21_spill] sm:$0xff]  ;;  %v9530_v46 = vld [vmem:[#allocation23_spill] sm:$0xff] }
 0x1ee   : > { %v7628_v55 = vadd.f32 %v2443_v36, %v2441_v12  ;;  %v2460_v2 = vadd.f32 %v2458_v59, %v2456_v61  ;;  %v2477_v24 = vmul.f32 %v7405_v8, %v7495_v7  ;;  %v2478_v36 = vmul.f32 %v7410_v10, %v7495_v7 }
 0x1ef   : > { %v2446_v11 = vadd.f32 %v2444_v13, %v2442_v40  ;;  %v2463_v22 = vadd.f32 %v2461_v29, %v2459_v3  ;;  %v2486_v14 = vstv %s7598_s16  ;;  %v9343_v56 = vand.u32 4294901760, %v9526_v23  ;;  %v9529_v29 = vld [vmem:[#allocation22_spill] sm:$0xff]  ;;  %v9531_v3 = vld [vmem:[#allocation31_spill] sm:$0xff]  ;;  %s8204_s16 = sld [smem:[#allocation3 + $0x305]] }
 0x1f0   : > { %v2464_v32 = vadd.f32 %v2462_v26, %v2460_v2  ;;  %v9342_v34 = vand.u32 4294901760, %v9527_v47  ;;  %v7650_v13 = vstv %s7600_s17  ;;  %v7653_v15 = vstv %s7608_s18  ;;  %s8206_s17 = sld [smem:[#allocation3 + $0x306]]  ;;  %s8231_s18 = sld [smem:[#allocation3 + $0x307]] }
 0x1f1   : > { %v7656_v1 = vstv %s7610_s19  ;;  %v2467_v16 = vadd.f32 %v2465_v6, %v2463_v22  ;;  %v3153_v7 = vsub.f32 %v9526_v23, %v9343_v56  ;;  %v991_v49 = vmul.f32 %v9528_v58, %v7650_v13  ;;  %s8235_s19 = sld [smem:[#allocation3 + $0x308]] }
 0x1f2   : > { %v2468_v52 = vadd.f32 %v2466_v54, %v2464_v32  ;;  %v3160_v59 = vsub.f32 %v9527_v47, %v9342_v34  ;;  %v992_v26 = vmul.f32 %v9529_v29, %v7650_v13  ;;  %v994_v12 = vmul.f32 %v7118_v27, %v7653_v15  ;;  %v9532_v29 = vld [vmem:[#allocation32_spill] sm:$0xff] }
 0x1f3   : > { %v995_v61 = vmul.f32 %v9530_v46, %v7653_v15  ;;  %v2471_v6 = vadd.f32 %v2469_v9, %v2467_v16  ;;  %v3154_v54 = vand.u32 4294901760, %v3153_v7  ;;  %v999_v2 = vmul.f32 %v9531_v3, %v7656_v1 }
 0x1f4   : > { %v2472_v40 = vadd.f32 %v2470_v18, %v2468_v52  ;;  %v3161_v22 = vand.u32 4294901760, %v3160_v59  ;;  %v996_v32 = vadd.f32 %v994_v12, %v991_v49  ;;  %v1000_v34 = vmul.f32 %v9532_v29, %v7656_v1  ;;  %v9533_v59 = vld [vmem:[#allocation33_spill] sm:$0xff] }
 0x1f5   : > { %v997_v58 = vadd.f32 %v995_v61, %v992_v26  ;;  %v2475_v56 = vadd.f32 %v2473_v5, %v2471_v6  ;;  %v7681_v9 = vstv %s7632_s20  ;;  %v7684_v18 = vstv %s7634_s21  ;;  %v9534_v26 = vld [vmem:[#allocation34_spill] sm:$0xff]  ;;  %s8385_s20 = sld [smem:[#allocation5 + $0x6]]  ;;  %s8387_s21 = sld [smem:[#allocation3 + $0x780]] }
 0x1f6   : > { %v2476_v48 = vadd.f32 %v2474_v63, %v2472_v40  ;;  %v4321_v16 = vpack.c.bf16 %v3161_v22, %v3154_v54  ;;  %v1001_v52 = vadd.f32 %v999_v2, %v996_v32  ;;  %v1004_v60 = vmul.f32 %v9533_v59, %v7681_v9 }
 0x1f7   : > { %v1002_v7 = vadd.f32 %v1000_v34, %v997_v58  ;;  %v2479_v17 = vadd.f32 %v2477_v24, %v2475_v56  ;;  %v1005_v12 = vmul.f32 %v9534_v26, %v7681_v9  ;;  %v1009_v5 = vmul.f32 %v7158_v62, %v7684_v18 }
 0x1f8   : > { %v2480_v49 = vadd.f32 %v2478_v36, %v2476_v48  ;;  %4322 = vmatprep.subr.bf16.mxu1 %v4321_v16  ;;  %v1006_v63 = vadd.f32 %v1004_v60, %v1001_v52  ;;  %v1010_v61 = vmul.f32 %v7163_v44, %v7684_v18  ;;  %v7695_v6 = vstv %s7645_s22  ;;  %v9535_v60 = vld [vmem:[#allocation35_spill] sm:$0xff]  ;;  %s8395_s22 = sld [smem:[#allocation3 + $0x781]] }
 0x1f9   : > { %v7698_v34 = vstv %s7647_s23  ;;  %v2481_v24 = vmax.f32 %v7628_v55, %v2479_v17  ;;  %v1007_v36 = vadd.f32 %v1005_v12, %v1002_v7  ;;  %v1014_v56 = vmul.f32 %v7176_v35, %v7695_v6  ;;  %s8397_s23 = sld [smem:[#allocation3 + $0x782]] }
 0x1fa   : > { %v2482_v48 = vmax.f32 %v2446_v11, %v2480_v49  ;;  %v1011_v40 = vadd.f32 %v1009_v5, %v1006_v63  ;;  %v1015_v54 = vmul.f32 %v7181_v4, %v7695_v6  ;;  %v1019_v2 = vmul.f32 %v9535_v60, %v7698_v34 }
 0x1fb   : > { %v1020_v22 = vmul.f32 %v7191_v41, %v7698_v34  ;;  %v9536_v32 = vmax.f32 %v7515_v33, %v7580_v50  ;;  %v9537_v17 = vmax.f32 %v7523_v37, %v7586_v38  ;;  %v1012_v11 = vadd.f32 %v1010_v61, %v1007_v36 }
 0x1fc   : > { %v7716_v16 = vstv %s7672_s24  ;;  %v1016_v52 = vadd.f32 %v1014_v56, %v1011_v40  ;;  %v7723_v12 = vstv %s7676_s25  ;;  %v1033_v61 = vmul.f32 %v7118_v27, %v7650_v13  ;;  %s8419_s24 = sld [smem:[#allocation3 + $0x783]]  ;;  %s8421_s25 = sld [smem:[#allocation3 + $0x784]] }
 0x1fd   : > { %v2483_v58 = vmax.f32 %v9536_v32, %v2481_v24  ;;  %v2484_v55 = vmax.f32 %v9537_v17, %v2482_v48  ;;  %v1024_v7 = vmul.f32 %v7205_v45, %v7716_v16  ;;  %v1025_v49 = vmul.f32 %v7210_v43, %v7716_v16 }
 0x1fe   : > { %v1017_v33 = vadd.f32 %v1015_v54, %v1012_v11  ;;  %v1029_v50 = vmul.f32 %v7222_v39, %v7723_v12  ;;  %v1021_v37 = vadd.f32 %v1019_v2, %v1016_v52  ;;  %v1030_v38 = vmul.f32 %v7227_v19, %v7723_v12  ;;  %v9538_v2 = vld [vmem:[#allocation43_spill] sm:$0xff] }
 0x1ff   : > { %v2487_v5 = vadd.f32 %v2486_v14, %v2483_v58  ;;  %v2488_v63 = vadd.f32 %v2486_v14, %v2484_v55  ;;  %v1034_v24 = vmul.f32 %v9530_v46, %v7650_v13  ;;  %v1035_v14 = vmul.f32 %v9531_v3, %v7653_v15  ;;  %v9539_v58 = vld [vmem:[#allocation44_spill] sm:$0xff] }
 0x200   : > { %v1022_v56 = vadd.f32 %v1020_v22, %v1017_v33  ;;  %v1026_v40 = vadd.f32 %v1024_v7, %v1021_v37  ;;  %v1036_v54 = vmul.f32 %v9532_v29, %v7653_v15  ;;  %v1039_v32 = vmul.f32 %v9538_v2, %v7656_v1 }
 0x201   : > { %v2489_v48 = vmax.f32 %v2487_v5, 0.0  ;;  %v2490_v36 = vmax.f32 %v2488_v63, 0.0  ;;  %v1040_v17 = vmul.f32 %v9539_v58, %v7656_v1  ;;  %v1037_v46 = vadd.f32 %v1035_v14, %v1033_v61 }
 0x202   : > { %v1027_v55 = vadd.f32 %v1025_v49, %v1022_v56  ;;  %v1043_v22 = vmul.f32 %v7158_v62, %v7681_v9  ;;  %v7743_v11 = vadd.f32 %v1029_v50, %v1026_v40  ;;  %v1038_v3 = vadd.f32 %v1036_v54, %v1034_v24 }
 0x203   : > { %2492 = vst [vmem:[#allocation2 + $0xd8] sm:$0x3f] %v2490_v36  ;;  %v2947_v27 = vand.u32 4294901760, %v2489_v48  ;;  %v1044_v52 = vmul.f32 %v7163_v44, %v7681_v9  ;;  %v1047_v29 = vmul.f32 %v7176_v35, %v7684_v18  ;;  %v1041_v63 = vadd.f32 %v1039_v32, %v1037_v46 }
 0x204   : > { %v7751_v5 = vadd.f32 %v1030_v38, %v1027_v55  ;;  %v1048_v49 = vmul.f32 %v7181_v4, %v7684_v18  ;;  %v1042_v33 = vadd.f32 %v1040_v17, %v1038_v3  ;;  %v1051_v50 = vmul.f32 %v7264_v28, %v7695_v6 }
 0x205   : > { %v7749_v7 = vsub.f32 %v2489_v48, %v2947_v27  ;;  %v1052_v37 = vmul.f32 %v7269_v30, %v7695_v6  ;;  %v1055_v61 = vmul.f32 %v7205_v45, %v7698_v34  ;;  %v1045_v24 = vadd.f32 %v1043_v22, %v1041_v63 }
 0x206   : > { %v1056_v48 = vmul.f32 %v7210_v43, %v7698_v34  ;;  %v1059_v38 = vmul.f32 %v7222_v39, %v7716_v16  ;;  %v1060_v36 = vmul.f32 %v7227_v19, %v7716_v16  ;;  %v1046_v56 = vadd.f32 %v1044_v52, %v1042_v33 }
 0x207   : > { %9540 = vst [vmem:[#allocation48_spill] sm:$0xff] %v7749_v7  ;;  %v1063_v14 = vmul.f32 %v7282_v53, %v7723_v12  ;;  %v1064_v40 = vmul.f32 %v7287_v20, %v7723_v12  ;;  %v1069_v54 = vmul.f32 %v9533_v59, %v7650_v13  ;;  %v1049_v2 = vadd.f32 %v1047_v29, %v1045_v24 }
 0x208   : > { %v1070_v32 = vmul.f32 %v9534_v26, %v7650_v13  ;;  %v1071_v58 = vmul.f32 %v7158_v62, %v7653_v15  ;;  %v1072_v17 = vmul.f32 %v7163_v44, %v7653_v15  ;;  %v1050_v46 = vadd.f32 %v1048_v49, %v1046_v56 }
 0x209   : > { %v1075_v22 = vmul.f32 %v7176_v35, %v7656_v1  ;;  %v1076_v3 = vmul.f32 %v7181_v4, %v7656_v1  ;;  %v1079_v59 = vmul.f32 %v9535_v60, %v7681_v9  ;;  %v1053_v29 = vadd.f32 %v1051_v50, %v1049_v2 }
 0x20a   : > { %v2863_v55 = vld [vmem:[#allocation2 + $0xd8] sm:$0xff]  ;;  %v1073_v26 = vadd.f32 %v1071_v58, %v1069_v54  ;;  %v1074_v63 = vadd.f32 %v1072_v17, %v1070_v32  ;;  %v1054_v33 = vadd.f32 %v1052_v37, %v1050_v46  ;;  %v1080_v24 = vmul.f32 %v7191_v41, %v7681_v9 }
 0x20b   : > { %v2950_v52 = vand.u32 4294901760, %v2863_v55  ;;  %v1083_v49 = vmul.f32 %v7205_v45, %v7684_v18  ;;  %v1084_v56 = vmul.f32 %v7210_v43, %v7684_v18  ;;  %v1057_v7 = vadd.f32 %v1055_v61, %v1053_v29 }
 0x20c   : > { %v1077_v60 = vadd.f32 %v1075_v22, %v1073_v26  ;;  %v1058_v21 = vadd.f32 %v1056_v48, %v1054_v33  ;;  %v1078_v50 = vadd.f32 %v1076_v3, %v1074_v63  ;;  %v1087_v37 = vmul.f32 %v7222_v39, %v7695_v6 }
 0x20d   : > { %v7791_v47 = vpack.c.bf16 %v2950_v52, %v2947_v27  ;;  %v7793_v23 = vsub.f32 %v2863_v55, %v2950_v52  ;;  %v1088_v41 = vmul.f32 %v7227_v19, %v7695_v6  ;;  %v1061_v54 = vadd.f32 %v1059_v38, %v1057_v7 }
 0x20e   : > { %v1081_v2 = vadd.f32 %v1079_v59, %v1077_v60  ;;  %v1091_v27 = vmul.f32 %v7321_v31, %v7698_v34  ;;  %v1092_v32 = vmul.f32 %v9525_v42, %v7698_v34  ;;  %v1062_v61 = vadd.f32 %v1060_v36, %v1058_v21  ;;  %v9543_v60 = vld [vmem:[#allocation39_spill] sm:$0xff] }
 0x20f   : > { %9541 = vst [vmem:[#allocation21_spill] sm:$0xff] %v7791_v47  ;;  %9542 = vst [vmem:[#allocation22_spill] sm:$0xff] %v7793_v23  ;;  %4298 = vmatprep.subr.bf16.mxu0 %v7791_v47  ;;  %v1082_v58 = vadd.f32 %v1080_v24, %v1078_v50  ;;  %v1095_v48 = vmul.f32 %v7331_v0, %v7716_v16  ;;  %v1096_v17 = vmul.f32 %v7336_v57, %v7716_v16 }
 0x210   : > { %v7808_v55 = vadd.f32 %v1063_v14, %v1061_v54  ;;  %v1085_v46 = vadd.f32 %v1083_v49, %v1081_v2  ;;  %v1099_v7 = vmul.f32 %v7343_v25, %v7723_v12  ;;  %v1100_v31 = vmul.f32 %v7348_v51, %v7723_v12  ;;  %v7892_v2 = vld [vmem:[%s4778_s13] sm:$0xff] }
 0x211   : > { %v7814_v38 = vadd.f32 %v1064_v40, %v1062_v61  ;;  %v1086_v42 = vadd.f32 %v1084_v56, %v1082_v58  ;;  %v1103_v21 = vmul.f32 %v7158_v62, %v7650_v13  ;;  %v1104_v36 = vmul.f32 %v7163_v44, %v7650_v13  ;;  %9545 = vst [vmem:[#allocation23_spill] sm:$0xff] %v7892_v2  ;;  %v7900_v61 = vld [vmem:[%s4778_s13 + $0x8] sm:$0x3f] }
 0x212   : > { %v1067_v14 = vmax.f32 %v7743_v11, %v7808_v55  ;;  %v1089_v22 = vadd.f32 %v1087_v37, %v1085_v46  ;;  %v1105_v3 = vmul.f32 %v7176_v35, %v7653_v15  ;;  %v1106_v59 = vmul.f32 %v7181_v4, %v7653_v15  ;;  %v9544_v37 = vld [vmem:[#allocation13_spill] sm:$0xff]  ;;  %9546 = vst [vmem:[#allocation31_spill] sm:$0xff] %v7900_v61  ;;  %v7910_v46 = vld [vmem:[%s4778_s13 + $0x18] sm:$0x3f] }
 0x213   : > { %v1068_v62 = vmax.f32 %v7751_v5, %v7814_v38  ;;  %v1090_v40 = vadd.f32 %v1088_v41, %v1086_v42  ;;  %v1109_v44 = vmul.f32 %v7264_v28, %v7656_v1  ;;  %v1110_v13 = vmul.f32 %v7269_v30, %v7656_v1  ;;  %9547 = vst [vmem:[#allocation32_spill] sm:$0xff] %v7910_v46 }
 0x214   : > { %v1093_v35 = vadd.f32 %v1091_v27, %v1089_v22  ;;  %v1107_v4 = vadd.f32 %v1105_v3, %v1103_v21  ;;  %v1108_v15 = vadd.f32 %v1106_v59, %v1104_v36  ;;  %v1113_v52 = vmul.f32 %v7205_v45, %v7681_v9  ;;  %v7917_v36 = vld [vmem:[%s4778_s13 + $0x1] sm:$0xff] }
 0x215   : > { %v1094_v29 = vadd.f32 %v1092_v32, %v1090_v40  ;;  %v1114_v26 = vmul.f32 %v7210_v43, %v7681_v9  ;;  %v1117_v28 = vmul.f32 %v7222_v39, %v7684_v18  ;;  %v1118_v30 = vmul.f32 %v7227_v19, %v7684_v18  ;;  %9548 = vst [vmem:[#allocation33_spill] sm:$0xff] %v7917_v36 }
 0x216   : > { %v1097_v1 = vadd.f32 %v1095_v48, %v1093_v35  ;;  %v1111_v63 = vadd.f32 %v1109_v44, %v1107_v4  ;;  %v1112_v33 = vadd.f32 %v1110_v13, %v1108_v15  ;;  %v1121_v24 = vmul.f32 %v7282_v53, %v7695_v6  ;;  %v7905_v48 = vld [vmem:[%s4778_s13 + $0x10] sm:$0xff]  ;;  %v7924_v44 = vld [vmem:[%s4778_s13 + $0x9] sm:$0x3f] }
 0x217   : > { %v1098_v49 = vadd.f32 %v1096_v17, %v1094_v29  ;;  %v1122_v45 = vmul.f32 %v7287_v20, %v7695_v6  ;;  %v1125_v43 = vmul.f32 %v7331_v0, %v7698_v34  ;;  %v1126_v39 = vmul.f32 %v7336_v57, %v7698_v34  ;;  %9549 = vst [vmem:[#allocation34_spill] sm:$0xff] %v7924_v44 }
 0x218   : > { %v7856_v9 = vadd.f32 %v1099_v7, %v1097_v1  ;;  %v1115_v19 = vadd.f32 %v1113_v52, %v1111_v63  ;;  %v1116_v18 = vadd.f32 %v1114_v26, %v1112_v33  ;;  %v1129_v53 = vmul.f32 %v7343_v25, %v7716_v16 }
 0x219   : > { %v7864_v20 = vadd.f32 %v1100_v31, %v1098_v49  ;;  %v1130_v0 = vmul.f32 %v7348_v51, %v7716_v16  ;;  %v1133_v57 = vmul.f32 %v7405_v8, %v7723_v12  ;;  %v1134_v6 = vmul.f32 %v7410_v10, %v7723_v12 }
 0x21a   : > { %v1119_v34 = vadd.f32 %v1117_v28, %v1115_v19  ;;  %v1120_v25 = vadd.f32 %v1118_v30, %v1116_v18  ;;  %v1142_v56 = vstv %s7826_s26  ;;  %v9351_v50 = vand.u32 4294901760, %v9543_v60  ;;  %v7935_v30 = vld [vmem:[%s4778_s13 + $0x20] sm:$0xff]  ;;  %v7950_v19 = vld [vmem:[%s4778_s13 + $0x38] sm:$0x3f]  ;;  %s8432_s26 = sld [smem:[#allocation3 + $0x785]] }
 0x21b   : > { %v9350_v41 = vand.u32 4294901760, %v9544_v37  ;;  %v7880_v51 = vstv %s7828_s27  ;;  %v7883_v8 = vstv %s7836_s28  ;;  %v7886_v16 = vstv %s7838_s0  ;;  %9550 = vst [vmem:[#allocation35_spill] sm:$0xff] %v7935_v30  ;;  %s8434_s27 = sld [smem:[#allocation3 + $0x786]]  ;;  %s8459_s28 = sld [smem:[#allocation3 + $0x787]] }
 0x21c   : > { %v1123_v10 = vadd.f32 %v1121_v24, %v1119_v34  ;;  %v1124_v12 = vadd.f32 %v1122_v45, %v1120_v25  ;;  %v3041_v54 = vsub.f32 %v9543_v60, %v9351_v50  ;;  %v2503_v27 = vmul.f32 %v7892_v2, %v7880_v51  ;;  %v7940_v24 = vld [vmem:[%s4778_s13 + $0x28] sm:$0x3f]  ;;  %v7945_v45 = vld [vmem:[%s4778_s13 + $0x30] sm:$0xff]  ;;  %s8463_s0 = sld [smem:[#allocation3 + $0x788]] }
 0x21d   : > { %v3048_v32 = vsub.f32 %v9544_v37, %v9350_v41  ;;  %v2504_v58 = vmul.f32 %v7900_v61, %v7880_v51  ;;  %v2506_v17 = vmul.f32 %v7905_v48, %v7883_v8  ;;  %v2507_v7 = vmul.f32 %v7910_v46, %v7883_v8  ;;  %9551 = vst [vmem:[#allocation43_spill] sm:$0xff] %v7940_v24  ;;  %v7963_v25 = vld [vmem:[%s4778_s13 + $0x21] sm:$0xff] }
 0x21e   : > { %v1127_v31 = vadd.f32 %v1125_v43, %v1123_v10  ;;  %v1128_v42 = vadd.f32 %v1126_v39, %v1124_v12  ;;  %v3042_v21 = vand.u32 4294901760, %v3041_v54  ;;  %v2511_v22 = vmul.f32 %v7917_v36, %v7886_v16  ;;  %v7968_v54 = vld [vmem:[%s4778_s13 + $0x29] sm:$0x3f] }
 0x21f   : > { %v3049_v3 = vand.u32 4294901760, %v3048_v32  ;;  %v2508_v59 = vadd.f32 %v2506_v17, %v2503_v27  ;;  %v2509_v40 = vadd.f32 %v2507_v7, %v2504_v58  ;;  %v2512_v13 = vmul.f32 %v7924_v44, %v7886_v16  ;;  %v7978_v32 = vld [vmem:[%s4778_s13 + $0x48] sm:$0x3f] }
 0x220   : > { %v1131_v35 = vadd.f32 %v1129_v53, %v1127_v31  ;;  %v1132_v4 = vadd.f32 %v1130_v0, %v1128_v42  ;;  %v7929_v15 = vstv %s7860_s1  ;;  %v7932_v52 = vstv %s7862_s29  ;;  %s8622_s1 = sld [smem:[#allocation5 + $0xf]]  ;;  %s8624_s29 = sld [smem:[#allocation3 + $0x380]] }
 0x221   : > { %v4323_v29 = vpack.c.bf16 %v3049_v3, %v3042_v21  ;;  %v2513_v26 = vadd.f32 %v2511_v22, %v2508_v59  ;;  %v2514_v28 = vadd.f32 %v2512_v13, %v2509_v40  ;;  %v2516_v1 = vmul.f32 %v7935_v30, %v7929_v15  ;;  %v7992_v22 = vld [vmem:[%s4778_s13 + $0x50] sm:$0xff]  ;;  %v7997_v59 = vld [vmem:[%s4778_s13 + $0x58] sm:$0x3f] }
 0x222   : > { %v1135_v63 = vadd.f32 %v1133_v57, %v1131_v35  ;;  %v1136_v33 = vadd.f32 %v1134_v6, %v1132_v4  ;;  %v2517_v49 = vmul.f32 %v7940_v24, %v7929_v15  ;;  %v2521_v43 = vmul.f32 %v7945_v45, %v7932_v52  ;;  %v8014_v35 = vld [vmem:[%s4778_s13 + $0x49] sm:$0x3f] }
 0x223   : > { %4324 = vmatpush3.bf16.msra.mxu1 %v4323_v29  ;;  %v2518_v39 = vadd.f32 %v2516_v1, %v2513_v26  ;;  %v2522_v18 = vmul.f32 %v7950_v19, %v7932_v52  ;;  %v7955_v53 = vstv %s7875_s30  ;;  %v7958_v0 = vstv %s7877_s6  ;;  %s8632_s30 = sld [smem:[#allocation3 + $0x381]]  ;;  %s8634_s6 = sld [smem:[#allocation3 + $0x382]] }
 0x224   : > { %v1137_v57 = vmax.f32 %v7856_v9, %v1135_v63  ;;  %v1138_v6 = vmax.f32 %v7864_v20, %v1136_v33  ;;  %v2519_v34 = vadd.f32 %v2517_v49, %v2514_v28  ;;  %v2526_v10 = vmul.f32 %v7963_v25, %v7955_v53  ;;  %v7973_v9 = vld [vmem:[%s4778_s13 + $0x40] sm:$0xff] }
 0x225   : > { %v2523_v12 = vadd.f32 %v2521_v43, %v2518_v39  ;;  %v2527_v27 = vmul.f32 %v7968_v54, %v7955_v53  ;;  %9552 = vst [vmem:[#allocation44_spill] sm:$0xff] %v7973_v9  ;;  %v2531_v20 = vmul.f32 %v7973_v9, %v7958_v0  ;;  %v2532_v58 = vmul.f32 %v7978_v32, %v7958_v0  ;;  %v8027_v43 = vld [vmem:[%s4778_s13 + $0x11] sm:$0xff] }
 0x226   : > { %v1139_v17 = vmax.f32 %v1067_v14, %v1137_v57  ;;  %v1140_v7 = vmax.f32 %v1068_v62, %v1138_v6  ;;  %v2524_v31 = vadd.f32 %v2522_v18, %v2519_v34  ;;  %v7989_v42 = vstv %s7914_s7  ;;  %v8009_v62 = vld [vmem:[%s4778_s13 + $0x41] sm:$0xff]  ;;  %9553 = vst [vmem:[#allocation52_spill] sm:$0xff] %v8027_v43  ;;  %v8032_v18 = vld [vmem:[%s4778_s13 + $0x19] sm:$0x3f]  ;;  %s8656_s7 = sld [smem:[#allocation3 + $0x383]] }
 0x227   : > { %v2528_v21 = vadd.f32 %v2526_v10, %v2523_v12  ;;  %v2536_v3 = vmul.f32 %v7992_v22, %v7989_v42  ;;  %v2537_v11 = vmul.f32 %v7997_v59, %v7989_v42  ;;  %v8002_v55 = vstv %s7921_s8  ;;  %9554 = vst [vmem:[#allocation53_spill] sm:$0xff] %v8032_v18  ;;  %s8658_s8 = sld [smem:[#allocation3 + $0x384]] }
 0x228   : > { %v1143_v5 = vadd.f32 %v1142_v56, %v1139_v17  ;;  %v1144_v38 = vadd.f32 %v1142_v56, %v1140_v7  ;;  %v2529_v14 = vadd.f32 %v2527_v27, %v2524_v31  ;;  %v2541_v40 = vmul.f32 %v8009_v62, %v8002_v55 }
 0x229   : > { %v2533_v13 = vadd.f32 %v2531_v20, %v2528_v21  ;;  %v2542_v4 = vmul.f32 %v8014_v35, %v8002_v55  ;;  %v2545_v29 = vmul.f32 %v7905_v48, %v7880_v51  ;;  %v2546_v26 = vmul.f32 %v7910_v46, %v7880_v51 }
 0x22a   : > { %v1145_v56 = vmax.f32 %v1143_v5, 0.0  ;;  %v1146_v28 = vmax.f32 %v1144_v38, 0.0  ;;  %v2534_v1 = vadd.f32 %v2532_v58, %v2529_v14  ;;  %v2547_v63 = vmul.f32 %v7917_v36, %v7883_v8  ;;  %v8051_v5 = vld [vmem:[%s4778_s13 + $0x31] sm:$0xff]  ;;  %v8056_v14 = vld [vmem:[%s4778_s13 + $0x39] sm:$0x3f] }
 0x22b   : > { %v2538_v33 = vadd.f32 %v2536_v3, %v2533_v13  ;;  %v2548_v49 = vmul.f32 %v7924_v44, %v7883_v8  ;;  %v2551_v39 = vmul.f32 %v8027_v43, %v7886_v16  ;;  %v2552_v57 = vmul.f32 %v8032_v18, %v7886_v16 }
 0x22c   : > { %1148 = vst [vmem:[#allocation2 + $0x58] sm:$0x3f] %v1146_v28  ;;  %v2899_v6 = vand.u32 4294901760, %v1145_v56  ;;  %v2539_v34 = vadd.f32 %v2537_v11, %v2534_v1  ;;  %v2549_v10 = vadd.f32 %v2547_v63, %v2545_v29  ;;  %v2555_v12 = vmul.f32 %v7945_v45, %v7929_v15  ;;  %v8069_v1 = vld [vmem:[%s4778_s13 + $0x51] sm:$0xff] }
 0x22d   : > { %v8038_v27 = vadd.f32 %v2541_v40, %v2538_v33  ;;  %v2550_v20 = vadd.f32 %v2548_v49, %v2546_v26  ;;  %v2556_v58 = vmul.f32 %v7950_v19, %v7929_v15  ;;  %v2559_v17 = vmul.f32 %v7963_v25, %v7932_v52  ;;  %v8074_v33 = vld [vmem:[%s4778_s13 + $0x59] sm:$0x3f] }
 0x22e   : > { %v8044_v7 = vsub.f32 %v1145_v56, %v2899_v6  ;;  %v8046_v31 = vadd.f32 %v2542_v4, %v2539_v34  ;;  %v2553_v21 = vadd.f32 %v2551_v39, %v2549_v10  ;;  %v2560_v3 = vmul.f32 %v7968_v54, %v7932_v52 }
 0x22f   : > { %v2554_v11 = vadd.f32 %v2552_v57, %v2550_v20  ;;  %v2563_v38 = vmul.f32 %v8051_v5, %v7955_v53  ;;  %v2564_v40 = vmul.f32 %v8056_v14, %v7955_v53  ;;  %v2567_v13 = vmul.f32 %v7992_v22, %v7958_v0 }
 0x230   : > { %9555 = vst [vmem:[#allocation54_spill] sm:$0xff] %v8044_v7  ;;  %v2557_v4 = vadd.f32 %v2555_v12, %v2553_v21  ;;  %v2568_v29 = vmul.f32 %v7997_v59, %v7958_v0  ;;  %v2571_v26 = vmul.f32 %v8009_v62, %v7989_v42  ;;  %v2572_v56 = vmul.f32 %v8014_v35, %v7989_v42 }
 0x231   : > { %v2558_v28 = vadd.f32 %v2556_v58, %v2554_v11  ;;  %v2575_v63 = vmul.f32 %v8069_v1, %v8002_v55  ;;  %v2576_v49 = vmul.f32 %v8074_v33, %v8002_v55  ;;  %v2581_v39 = vmul.f32 %v7935_v30, %v7880_v51 }
 0x232   : > { %v2561_v57 = vadd.f32 %v2559_v17, %v2557_v4  ;;  %v2582_v34 = vmul.f32 %v7940_v24, %v7880_v51  ;;  %v2583_v10 = vmul.f32 %v7945_v45, %v7883_v8  ;;  %v2584_v12 = vmul.f32 %v7950_v19, %v7883_v8 }
 0x233   : > { %v2847_v20 = vld [vmem:[#allocation2 + $0x58] sm:$0xff]  ;;  %v2562_v58 = vadd.f32 %v2560_v3, %v2558_v28  ;;  %v2587_v21 = vmul.f32 %v7963_v25, %v7886_v16  ;;  %v2588_v11 = vmul.f32 %v7968_v54, %v7886_v16  ;;  %v2591_v17 = vmul.f32 %v7973_v9, %v7929_v15 }
 0x234   : > { %v2902_v4 = vand.u32 4294901760, %v2847_v20  ;;  %v2565_v41 = vadd.f32 %v2563_v38, %v2561_v57  ;;  %v2585_v50 = vadd.f32 %v2583_v10, %v2581_v39  ;;  %v2586_v47 = vadd.f32 %v2584_v12, %v2582_v34 }
 0x235   : > { %v2566_v37 = vadd.f32 %v2564_v40, %v2562_v58  ;;  %v2592_v60 = vmul.f32 %v7978_v32, %v7929_v15  ;;  %v2595_v3 = vmul.f32 %v7992_v22, %v7932_v52  ;;  %v2596_v28 = vmul.f32 %v7997_v59, %v7932_v52 }
 0x236   : > { %v8098_v7 = vpack.c.bf16 %v2902_v4, %v2899_v6  ;;  %v8100_v23 = vsub.f32 %v2847_v20, %v2902_v4  ;;  %v2569_v38 = vadd.f32 %v2567_v13, %v2565_v41  ;;  %v2589_v39 = vadd.f32 %v2587_v21, %v2585_v50  ;;  %v8108_v20 = vld [vmem:[%s4778_s13 + $0x60] sm:$0xff]  ;;  %v8113_v41 = vld [vmem:[%s4778_s13 + $0x68] sm:$0x3f] }
 0x237   : > { %v2570_v57 = vadd.f32 %v2568_v29, %v2566_v37  ;;  %v2590_v40 = vadd.f32 %v2588_v11, %v2586_v47  ;;  %v2599_v34 = vmul.f32 %v8009_v62, %v7955_v53  ;;  %v2600_v10 = vmul.f32 %v8014_v35, %v7955_v53  ;;  %9558 = vst [vmem:[#allocation57_spill] sm:$0xff] %v8113_v41  ;;  %v8118_v29 = vld [vmem:[%s4778_s13 + $0x70] sm:$0xff]  ;;  %v8130_v4 = vld [vmem:[%s4778_s13 + $0x61] sm:$0xff] }
 0x238   : > { %9556 = vst [vmem:[#allocation55_spill] sm:$0xff] %v8098_v7  ;;  %9557 = vst [vmem:[#allocation56_spill] sm:$0xff] %v8100_v23  ;;  %4300 = vmatpush3.bf16.msra.mxu0 %v8098_v7  ;;  %v2573_v12 = vadd.f32 %v2571_v26, %v2569_v38  ;;  %v2593_v6 = vadd.f32 %v2591_v17, %v2589_v39  ;;  %v2603_v50 = vmul.f32 %v8108_v20, %v7958_v0  ;;  %v8123_v26 = vld [vmem:[%s4778_s13 + $0x78] sm:$0x3f] }
 0x239   : > { %v2604_v47 = vmul.f32 %v8113_v41, %v7958_v0  ;;  %v2574_v37 = vadd.f32 %v2572_v56, %v2570_v57  ;;  %v2594_v13 = vadd.f32 %v2592_v60, %v2590_v40  ;;  %v2607_v58 = vmul.f32 %v8118_v29, %v7989_v42  ;;  %v8135_v56 = vld [vmem:[%s4778_s13 + $0x69] sm:$0x3f] }
 0x23a   : > { %v2608_v21 = vmul.f32 %v8123_v26, %v7989_v42  ;;  %v8127_v11 = vadd.f32 %v2575_v63, %v2573_v12  ;;  %v2597_v17 = vadd.f32 %v2595_v3, %v2593_v6  ;;  %v2611_v38 = vmul.f32 %v8130_v4, %v8002_v55 }
 0x23b   : > { %v2612_v60 = vmul.f32 %v8135_v56, %v8002_v55  ;;  %v8139_v39 = vadd.f32 %v2576_v49, %v2574_v37  ;;  %v2598_v57 = vadd.f32 %v2596_v28, %v2594_v13  ;;  %v2615_v40 = vmul.f32 %v7945_v45, %v7880_v51 }
 0x23c   : > { %v2616_v63 = vmul.f32 %v7950_v19, %v7880_v51  ;;  %v2601_v12 = vadd.f32 %v2599_v34, %v2597_v17  ;;  %v2617_v6 = vmul.f32 %v7963_v25, %v7883_v8  ;;  %v2618_v7 = vmul.f32 %v7968_v54, %v7883_v8 }
 0x23d   : > { %v2602_v28 = vadd.f32 %v2600_v10, %v2598_v57  ;;  %v2621_v51 = vmul.f32 %v8051_v5, %v7886_v16  ;;  %v2622_v34 = vmul.f32 %v8056_v14, %v7886_v16  ;;  %v2625_v17 = vmul.f32 %v7992_v22, %v7929_v15 }
 0x23e   : > { %v2605_v37 = vadd.f32 %v2603_v50, %v2601_v12  ;;  %v2619_v8 = vadd.f32 %v2617_v6, %v2615_v40  ;;  %v2620_v13 = vadd.f32 %v2618_v7, %v2616_v63  ;;  %v2626_v10 = vmul.f32 %v7997_v59, %v7929_v15 }
 0x23f   : > { %v2606_v3 = vadd.f32 %v2604_v47, %v2602_v28  ;;  %v2629_v57 = vmul.f32 %v8009_v62, %v7932_v52  ;;  %v2630_v16 = vmul.f32 %v8014_v35, %v7932_v52  ;;  %v2633_v7 = vmul.f32 %v8069_v1, %v7955_v53  ;;  %v9559_v28 = vld [vmem:[#allocation45_spill] sm:$0xff] }
 0x240   : > { %v2609_v49 = vadd.f32 %v2607_v58, %v2605_v37  ;;  %v2623_v23 = vadd.f32 %v2621_v51, %v2619_v8  ;;  %v2624_v41 = vadd.f32 %v2622_v34, %v2620_v13  ;;  %v2634_v47 = vmul.f32 %v8074_v33, %v7955_v53  ;;  %v9560_v34 = vld [vmem:[#allocation47_spill] sm:$0xff] }
 0x241   : > { %v2610_v50 = vadd.f32 %v2608_v21, %v2606_v3  ;;  %v2637_v15 = vmul.f32 %v8118_v29, %v7958_v0  ;;  %v2638_v40 = vmul.f32 %v8123_v26, %v7958_v0  ;;  %v2641_v12 = vmul.f32 %v8130_v4, %v7989_v42  ;;  %v8192_v3 = vld [vmem:[%s4778_s13 + $0x71] sm:$0xff]  ;;  %v8197_v0 = vld [vmem:[%s4778_s13 + $0x79] sm:$0x3f] }
 0x242   : > { %v8181_v52 = vadd.f32 %v2611_v38, %v2609_v49  ;;  %v2627_v58 = vadd.f32 %v2625_v17, %v2623_v23  ;;  %v2628_v63 = vadd.f32 %v2626_v10, %v2624_v41  ;;  %v2642_v21 = vmul.f32 %v8135_v56, %v7989_v42 }
 0x243   : > { %v2614_v53 = vadd.f32 %v2612_v60, %v2610_v50  ;;  %v2645_v23 = vmul.f32 %v8192_v3, %v8002_v55  ;;  %v2646_v41 = vmul.f32 %v8197_v0, %v8002_v55  ;;  %v2654_v49 = vstv %s8151_s9  ;;  %s8671_s9 = sld [smem:[#allocation3 + $0x385]] }
 0x244   : > { %v2631_v38 = vadd.f32 %v2629_v57, %v2627_v58  ;;  %v2632_v6 = vadd.f32 %v2630_v16, %v2628_v63  ;;  %v9364_v51 = vand.u32 4294901760, %v9559_v28  ;;  %v9363_v60 = vand.u32 4294901760, %v9560_v34 }
 0x245   : > { %v8209_v42 = vstv %s8153_s10  ;;  %v8212_v37 = vstv %s8161_s11  ;;  %v8215_v8 = vstv %s8163_s12  ;;  %s8673_s10 = sld [smem:[#allocation3 + $0x386]]  ;;  %s8704_s11 = sld [smem:[#allocation3 + $0x387]] }
 0x246   : > { %v2635_v13 = vadd.f32 %v2633_v7, %v2631_v38  ;;  %v2636_v17 = vadd.f32 %v2634_v47, %v2632_v6  ;;  %v3167_v55 = vsub.f32 %v9559_v28, %v9364_v51  ;;  %v1159_v10 = vmul.f32 %v7892_v2, %v8209_v42  ;;  %s8710_s12 = sld [smem:[#allocation3 + $0x388]] }
 0x247   : > { %v3174_v57 = vsub.f32 %v9560_v34, %v9363_v60  ;;  %v1160_v16 = vmul.f32 %v7900_v61, %v8209_v42  ;;  %v1162_v7 = vmul.f32 %v7905_v48, %v8212_v37  ;;  %v1163_v50 = vmul.f32 %v7910_v46, %v8212_v37 }
 0x248   : > { %v2639_v47 = vadd.f32 %v2637_v15, %v2635_v13  ;;  %v2640_v58 = vadd.f32 %v2638_v40, %v2636_v17  ;;  %v3168_v63 = vand.u32 4294901760, %v3167_v55  ;;  %v1167_v38 = vmul.f32 %v7917_v36, %v8215_v8 }
 0x249   : > { %v3175_v6 = vand.u32 4294901760, %v3174_v57  ;;  %v1164_v60 = vadd.f32 %v1162_v7, %v1159_v10  ;;  %v1165_v51 = vadd.f32 %v1163_v50, %v1160_v16  ;;  %v1168_v34 = vmul.f32 %v7924_v44, %v8215_v8 }
 0x24a   : > { %v2643_v28 = vadd.f32 %v2641_v12, %v2639_v47  ;;  %v2644_v61 = vadd.f32 %v2642_v21, %v2640_v58  ;;  %v8240_v15 = vstv %s8185_s14  ;;  %v8243_v40 = vstv %s8187_s15  ;;  %s4048_s14 = sshll.u32 %s4710_s3, 5  ;;  %s86_s3 = sadd.s32 1, %s4710_s3  }
 0x24b   : > { %v4325_v13 = vpack.c.bf16 %v3175_v6, %v3168_v63  ;;  %v1169_v17 = vadd.f32 %v1167_v38, %v1164_v60  ;;  %v1170_v55 = vadd.f32 %v1168_v34, %v1165_v51  ;;  %v1172_v57 = vmul.f32 %v7935_v30, %v8240_v15  ;;  %p83_p10 = scmp.ge.s32.totalorder %s86_s3, 14  }
 0x24c   : > { %v2647_v2 = vadd.f32 %v2645_v23, %v2643_v28  ;;  %v2648_v10 = vadd.f32 %v2646_v41, %v2644_v61  ;;  %v1173_v16 = vmul.f32 %v7940_v24, %v8240_v15  ;;  %v1177_v12 = vmul.f32 %v7945_v45, %v8243_v40 }
 0x24d   : > { %4326 = vmatprep.subr.bf16.mxu1 %v4325_v13  ;;  %v1174_v21 = vadd.f32 %v1172_v57, %v1169_v17  ;;  %v1178_v7 = vmul.f32 %v7950_v19, %v8243_v40  ;;  %v8254_v50 = vstv %s8204_s16  ;;  %v8257_v51 = vstv %s8206_s17  ;;  %s8917_s17 = scalar_lea.vmem %s9209_s2, %s4048_s14 }
 0x24e   : > { %v2649_v23 = vmax.f32 %v8181_v52, %v2647_v2  ;;  %v2650_v61 = vmax.f32 %v2614_v53, %v2648_v10  ;;  %v1175_v41 = vadd.f32 %v1173_v16, %v1170_v55  ;;  %v1182_v28 = vmul.f32 %v7963_v25, %v8254_v50 }
 0x24f   : > { %v1179_v34 = vadd.f32 %v1177_v12, %v1174_v21  ;;  %v1183_v60 = vmul.f32 %v7968_v54, %v8254_v50  ;;  %v1187_v47 = vmul.f32 %v7973_v9, %v8257_v51  ;;  %v1188_v58 = vmul.f32 %v7978_v32, %v8257_v51 }
 0x250   : > { %v9561_v63 = vmax.f32 %v8038_v27, %v8127_v11  ;;  %v9562_v2 = vmax.f32 %v8046_v31, %v8139_v39  ;;  %v1180_v53 = vadd.f32 %v1178_v7, %v1175_v41  ;;  %v8275_v6 = vstv %s8231_s18  ;;  %s8945_s18 = sld [smem:[#allocation5 + $0x7]] }
 0x251   : > { %v1184_v13 = vadd.f32 %v1182_v28, %v1179_v34  ;;  %v1192_v17 = vmul.f32 %v7992_v22, %v8275_v6  ;;  %v1193_v55 = vmul.f32 %v7997_v59, %v8275_v6  ;;  %v8282_v57 = vstv %s8235_s19 }
 0x252   : > { %v2651_v38 = vmax.f32 %v9561_v63, %v2649_v23  ;;  %v2652_v52 = vmax.f32 %v9562_v2, %v2650_v61  ;;  %v1185_v27 = vadd.f32 %v1183_v60, %v1180_v53  ;;  %v1197_v11 = vmul.f32 %v8009_v62, %v8282_v57 }
 0x253   : > { %v1189_v31 = vadd.f32 %v1187_v47, %v1184_v13  ;;  %v1198_v39 = vmul.f32 %v8014_v35, %v8282_v57  ;;  %v1201_v12 = vmul.f32 %v7905_v48, %v8209_v42  ;;  %v1202_v21 = vmul.f32 %v7910_v46, %v8209_v42 }
 0x254   : > { %v2655_v10 = vadd.f32 %v2654_v49, %v2651_v38  ;;  %v2656_v16 = vadd.f32 %v2654_v49, %v2652_v52  ;;  %v1190_v61 = vadd.f32 %v1188_v58, %v1185_v27  ;;  %v1203_v49 = vmul.f32 %v7917_v36, %v8212_v37 }
 0x255   : > { %v1194_v41 = vadd.f32 %v1192_v17, %v1189_v31  ;;  %v1204_v28 = vmul.f32 %v7924_v44, %v8212_v37  ;;  %v1207_v34 = vmul.f32 %v8027_v43, %v8215_v8  ;;  %v1208_v60 = vmul.f32 %v8032_v18, %v8215_v8 }
 0x256   : > { %v2657_v7 = vmax.f32 %v2655_v10, 0.0  ;;  %v2658_v23 = vmax.f32 %v2656_v16, 0.0  ;;  %v1195_v63 = vadd.f32 %v1193_v55, %v1190_v61  ;;  %v1205_v38 = vadd.f32 %v1203_v49, %v1201_v12 }
 0x257   : > { %v1211_v58 = vmul.f32 %v7945_v45, %v8240_v15  ;;  %v8302_v2 = vadd.f32 %v1197_v11, %v1194_v41  ;;  %v1206_v52 = vadd.f32 %v1204_v28, %v1202_v21  ;;  %v1212_v53 = vmul.f32 %v7950_v19, %v8240_v15 }
 0x258   : > { %2660 = vst [vmem:[#allocation2 + $0xe8] sm:$0x3f] %v2658_v23  ;;  %v2953_v47 = vand.u32 4294901760, %v2657_v7  ;;  %v1215_v13 = vmul.f32 %v7963_v25, %v8243_v40  ;;  %v8310_v10 = vadd.f32 %v1198_v39, %v1195_v63  ;;  %v1209_v16 = vadd.f32 %v1207_v34, %v1205_v38 }
 0x259   : > { %v1216_v55 = vmul.f32 %v7968_v54, %v8243_v40  ;;  %v1210_v27 = vadd.f32 %v1208_v60, %v1206_v52  ;;  %v1219_v11 = vmul.f32 %v8051_v5, %v8254_v50  ;;  %v1220_v31 = vmul.f32 %v8056_v14, %v8254_v50 }
 0x25a   : > { %v8308_v17 = vsub.f32 %v2657_v7, %v2953_v47  ;;  %v1223_v12 = vmul.f32 %v7992_v22, %v8257_v51  ;;  %v1213_v21 = vadd.f32 %v1211_v58, %v1209_v16  ;;  %v1224_v7 = vmul.f32 %v7997_v59, %v8257_v51 }
 0x25b   : > { %v1227_v39 = vmul.f32 %v8009_v62, %v8275_v6  ;;  %v1228_v23 = vmul.f32 %v8014_v35, %v8275_v6  ;;  %v1214_v61 = vadd.f32 %v1212_v53, %v1210_v27  ;;  %v1231_v49 = vmul.f32 %v8069_v1, %v8282_v57 }
 0x25c   : > { %9563 = vst [vmem:[#allocation58_spill] sm:$0xff] %v8308_v17  ;;  %v1232_v41 = vmul.f32 %v8074_v33, %v8282_v57  ;;  %v1237_v28 = vmul.f32 %v7935_v30, %v8209_v42  ;;  %v1217_v34 = vadd.f32 %v1215_v13, %v1213_v21  ;;  %v1238_v60 = vmul.f32 %v7940_v24, %v8209_v42 }
 0x25d   : > { %v1239_v63 = vmul.f32 %v7945_v45, %v8212_v37  ;;  %v1240_v38 = vmul.f32 %v7950_v19, %v8212_v37  ;;  %v1218_v52 = vadd.f32 %v1216_v55, %v1214_v61  ;;  %v1243_v53 = vmul.f32 %v7963_v25, %v8215_v8 }
 0x25e   : > { %v1244_v16 = vmul.f32 %v7968_v54, %v8215_v8  ;;  %v1247_v13 = vmul.f32 %v7973_v9, %v8240_v15  ;;  %v1221_v21 = vadd.f32 %v1219_v11, %v1217_v34  ;;  %v1248_v24 = vmul.f32 %v7978_v32, %v8240_v15 }
 0x25f   : > { %v2865_v58 = vld [vmem:[#allocation2 + $0xe8] sm:$0xff]  ;;  %v1241_v17 = vadd.f32 %v1239_v63, %v1237_v28  ;;  %v1242_v18 = vadd.f32 %v1240_v38, %v1238_v60  ;;  %v1222_v43 = vadd.f32 %v1220_v31, %v1218_v52  ;;  %v1251_v55 = vmul.f32 %v7992_v22, %v8243_v40  ;;  %v9565_v63 = vld [vmem:[#allocation57_spill] sm:$0xff] }
 0x260   : > { %v2956_v27 = vand.u32 4294901760, %v2865_v58  ;;  %v1252_v61 = vmul.f32 %v7997_v59, %v8243_v40  ;;  %v1225_v36 = vadd.f32 %v1223_v12, %v1221_v21  ;;  %v1255_v31 = vmul.f32 %v8009_v62, %v8254_v50 }
 0x261   : > { %v1245_v9 = vadd.f32 %v1243_v53, %v1241_v17  ;;  %v1226_v46 = vadd.f32 %v1224_v7, %v1222_v43  ;;  %v1246_v11 = vadd.f32 %v1244_v16, %v1242_v18  ;;  %v1256_v28 = vmul.f32 %v8014_v35, %v8254_v50 }
 0x262   : > { %v8350_v30 = vpack.c.bf16 %v2956_v27, %v2953_v47  ;;  %v8352_v44 = vsub.f32 %v2865_v58, %v2956_v27  ;;  %v1229_v34 = vadd.f32 %v1227_v39, %v1225_v36  ;;  %v1259_v47 = vmul.f32 %v8108_v20, %v8257_v51 }
 0x263   : > { %v1249_v60 = vadd.f32 %v1247_v13, %v1245_v9  ;;  %v1260_v38 = vmul.f32 %v9565_v63, %v8257_v51  ;;  %v1230_v12 = vadd.f32 %v1228_v23, %v1226_v46  ;;  %v1250_v17 = vadd.f32 %v1248_v24, %v1246_v11 }
 0x264   : > { %9564 = vst [vmem:[#allocation59_spill] sm:$0xff] %v8350_v30  ;;  %4302 = vmatprep.subr.bf16.mxu0 %v8350_v30  ;;  %v1263_v43 = vmul.f32 %v8118_v29, %v8275_v6  ;;  %v1264_v18 = vmul.f32 %v8123_v26, %v8275_v6  ;;  %v8367_v7 = vadd.f32 %v1231_v49, %v1229_v34 }
 0x265   : > { %v1253_v58 = vadd.f32 %v1251_v55, %v1249_v60  ;;  %v1267_v36 = vmul.f32 %v8130_v4, %v8282_v57  ;;  %v1268_v9 = vmul.f32 %v8135_v56, %v8282_v57  ;;  %v8373_v39 = vadd.f32 %v1232_v41, %v1230_v12 }
 0x266   : > { %v1254_v52 = vadd.f32 %v1252_v61, %v1250_v17  ;;  %v1271_v46 = vmul.f32 %v7945_v45, %v8209_v42  ;;  %v1272_v24 = vmul.f32 %v7950_v19, %v8209_v42  ;;  %v1273_v53 = vmul.f32 %v7963_v25, %v8212_v37 }
 0x267   : > { %v1257_v49 = vadd.f32 %v1255_v31, %v1253_v58  ;;  %v1274_v16 = vmul.f32 %v7968_v54, %v8212_v37  ;;  %v1277_v42 = vmul.f32 %v8051_v5, %v8215_v8  ;;  %v1278_v27 = vmul.f32 %v8056_v14, %v8215_v8 }
 0x268   : > { %v1258_v13 = vadd.f32 %v1256_v28, %v1254_v52  ;;  %v1275_v37 = vadd.f32 %v1273_v53, %v1271_v46  ;;  %v1281_v61 = vmul.f32 %v7992_v22, %v8240_v15  ;;  %v1282_v31 = vmul.f32 %v7997_v59, %v8240_v15 }
 0x269   : > { %v1261_v21 = vadd.f32 %v1259_v47, %v1257_v49  ;;  %v1276_v55 = vadd.f32 %v1274_v16, %v1272_v24  ;;  %v1285_v28 = vmul.f32 %v8009_v62, %v8243_v40  ;;  %v1286_v8 = vmul.f32 %v8014_v35, %v8243_v40  ;;  %v9566_v16 = vld [vmem:[#allocation49_spill] sm:$0xff] }
 0x26a   : > { %v1262_v11 = vadd.f32 %v1260_v38, %v1258_v13  ;;  %v1279_v60 = vadd.f32 %v1277_v42, %v1275_v37  ;;  %v1289_v47 = vmul.f32 %v8069_v1, %v8254_v50  ;;  %v1290_v38 = vmul.f32 %v8074_v33, %v8254_v50  ;;  %v9567_v42 = vld [vmem:[#allocation51_spill] sm:$0xff] }
 0x26b   : > { %v1265_v34 = vadd.f32 %v1263_v43, %v1261_v21  ;;  %v1280_v12 = vadd.f32 %v1278_v27, %v1276_v55  ;;  %v1293_v15 = vmul.f32 %v8118_v29, %v8257_v51  ;;  %v1294_v58 = vmul.f32 %v8123_v26, %v8257_v51 }
 0x26c   : > { %v1266_v17 = vadd.f32 %v1264_v18, %v1262_v11  ;;  %v1283_v40 = vadd.f32 %v1281_v61, %v1279_v60  ;;  %v1297_v46 = vmul.f32 %v8130_v4, %v8275_v6  ;;  %v1298_v18 = vmul.f32 %v8135_v56, %v8275_v6  ;;  %v9568_v61 = vld [vmem:[#allocation23_spill] sm:$0xff]  ;;  %v9570_v60 = vld [vmem:[#allocation32_spill] sm:$0xff] }
 0x26d   : > { %v8415_v52 = vadd.f32 %v1267_v36, %v1265_v34  ;;  %v1284_v43 = vadd.f32 %v1282_v31, %v1280_v12  ;;  %v1301_v51 = vmul.f32 %v8192_v3, %v8282_v57  ;;  %v1302_v36 = vmul.f32 %v8197_v0, %v8282_v57 }
 0x26e   : > { %v1270_v50 = vadd.f32 %v1268_v9, %v1266_v17  ;;  %v1287_v24 = vadd.f32 %v1285_v28, %v1283_v40  ;;  %v1310_v53 = vstv %s8385_s20  ;;  %v9385_v13 = vand.u32 4294901760, %v9566_v16  ;;  %v9569_v28 = vld [vmem:[#allocation31_spill] sm:$0xff]  ;;  %v9571_v40 = vld [vmem:[#allocation33_spill] sm:$0xff] }
 0x26f   : > { %v1288_v49 = vadd.f32 %v1286_v8, %v1284_v43  ;;  %v9384_v27 = vand.u32 4294901760, %v9567_v42  ;;  %v8437_v9 = vstv %s8387_s21  ;;  %v8440_v6 = vstv %s8395_s22 }
 0x270   : > { %v8443_v21 = vstv %s8397_s23  ;;  %v1291_v37 = vadd.f32 %v1289_v47, %v1287_v24  ;;  %v3055_v57 = vsub.f32 %v9566_v16, %v9385_v13  ;;  %v2671_v11 = vmul.f32 %v9568_v61, %v8437_v9 }
 0x271   : > { %v1292_v55 = vadd.f32 %v1290_v38, %v1288_v49  ;;  %v3062_v31 = vsub.f32 %v9567_v42, %v9384_v27  ;;  %v2672_v8 = vmul.f32 %v9569_v28, %v8437_v9  ;;  %v2674_v34 = vmul.f32 %v7905_v48, %v8440_v6  ;;  %v9572_v28 = vld [vmem:[#allocation34_spill] sm:$0xff] }
 0x272   : > { %v2675_v12 = vmul.f32 %v9570_v60, %v8440_v6  ;;  %v1295_v47 = vadd.f32 %v1293_v15, %v1291_v37  ;;  %v3056_v38 = vand.u32 4294901760, %v3055_v57  ;;  %v2679_v43 = vmul.f32 %v9571_v40, %v8443_v21 }
 0x273   : > { %v1296_v17 = vadd.f32 %v1294_v58, %v1292_v55  ;;  %v3063_v24 = vand.u32 4294901760, %v3062_v31  ;;  %v2676_v49 = vadd.f32 %v2674_v34, %v2671_v11  ;;  %v2680_v27 = vmul.f32 %v9572_v28, %v8443_v21  ;;  %v9573_v31 = vld [vmem:[#allocation35_spill] sm:$0xff] }
 0x274   : > { %v2677_v61 = vadd.f32 %v2675_v12, %v2672_v8  ;;  %v1299_v13 = vadd.f32 %v1297_v46, %v1295_v47  ;;  %v8468_v15 = vstv %s8419_s24  ;;  %v8471_v58 = vstv %s8421_s25  ;;  %v9574_v8 = vld [vmem:[#allocation43_spill] sm:$0xff] }
 0x275   : > { %v1300_v41 = vadd.f32 %v1298_v18, %v1296_v17  ;;  %v4327_v37 = vpack.c.bf16 %v3063_v24, %v3056_v38  ;;  %v2681_v55 = vadd.f32 %v2679_v43, %v2676_v49  ;;  %v2684_v23 = vmul.f32 %v9573_v31, %v8468_v15 }
 0x276   : > { %v2682_v57 = vadd.f32 %v2680_v27, %v2677_v61  ;;  %v1303_v30 = vadd.f32 %v1301_v51, %v1299_v13  ;;  %v2685_v34 = vmul.f32 %v9574_v8, %v8468_v15  ;;  %v2689_v46 = vmul.f32 %v7945_v45, %v8471_v58 }
 0x277   : > { %v1304_v11 = vadd.f32 %v1302_v36, %v1300_v41  ;;  %4328 = vmatpush3.bf16.msra.mxu1 %v4327_v37  ;;  %v2686_v18 = vadd.f32 %v2684_v23, %v2681_v55  ;;  %v2690_v12 = vmul.f32 %v7950_v19, %v8471_v58  ;;  %v8482_v47 = vstv %s8432_s26  ;;  %v9575_v23 = vld [vmem:[#allocation44_spill] sm:$0xff] }
 0x278   : > { %v8485_v27 = vstv %s8434_s27  ;;  %v1305_v51 = vmax.f32 %v8415_v52, %v1303_v30  ;;  %v2687_v36 = vadd.f32 %v2685_v34, %v2682_v57  ;;  %v2694_v13 = vmul.f32 %v7963_v25, %v8482_v47 }
 0x279   : > { %v1306_v41 = vmax.f32 %v1270_v50, %v1304_v11  ;;  %v2691_v17 = vadd.f32 %v2689_v46, %v2686_v18  ;;  %v2695_v38 = vmul.f32 %v7968_v54, %v8482_v47  ;;  %v2699_v43 = vmul.f32 %v9575_v23, %v8485_v27 }
 0x27a   : > { %v2700_v24 = vmul.f32 %v7978_v32, %v8485_v27  ;;  %v9576_v49 = vmax.f32 %v8302_v2, %v8367_v7  ;;  %v9577_v30 = vmax.f32 %v8310_v10, %v8373_v39  ;;  %v2692_v50 = vadd.f32 %v2690_v12, %v2687_v36 }
 0x27b   : > { %v8503_v37 = vstv %s8459_s28  ;;  %v2696_v55 = vadd.f32 %v2694_v13, %v2691_v17  ;;  %v8510_v34 = vstv %s8463_s0  ;;  %v2713_v12 = vmul.f32 %v7905_v48, %v8437_v9 }
 0x27c   : > { %v1307_v61 = vmax.f32 %v9576_v49, %v1305_v51  ;;  %v1308_v52 = vmax.f32 %v9577_v30, %v1306_v41  ;;  %v2704_v57 = vmul.f32 %v7992_v22, %v8503_v37  ;;  %v2705_v11 = vmul.f32 %v7997_v59, %v8503_v37 }
 0x27d   : > { %v2697_v7 = vadd.f32 %v2695_v38, %v2692_v50  ;;  %v2709_v10 = vmul.f32 %v8009_v62, %v8510_v34  ;;  %v2701_v39 = vadd.f32 %v2699_v43, %v2696_v55  ;;  %v2710_v18 = vmul.f32 %v8014_v35, %v8510_v34  ;;  %v9578_v43 = vld [vmem:[#allocation52_spill] sm:$0xff] }
 0x27e   : > { %v8512_v46 = vadd.f32 %v1310_v53, %v1307_v61  ;;  %v1312_v2 = vadd.f32 %v1310_v53, %v1308_v52  ;;  %v2714_v51 = vmul.f32 %v9570_v60, %v8437_v9  ;;  %v2715_v53 = vmul.f32 %v9571_v40, %v8440_v6  ;;  %v9579_v61 = vld [vmem:[#allocation53_spill] sm:$0xff] }
 0x27f   : > { %v2702_v13 = vadd.f32 %v2700_v24, %v2697_v7  ;;  %v2706_v17 = vadd.f32 %v2704_v57, %v2701_v39  ;;  %v2716_v38 = vmul.f32 %v9572_v28, %v8440_v6  ;;  %v2719_v49 = vmul.f32 %v9578_v43, %v8443_v21 }
 0x280   : > { %v9388_v41 = vmax.f32 %v8512_v46, 0.0  ;;  %v1314_v36 = vmax.f32 %v1312_v2, 0.0  ;;  %v2720_v48 = vmul.f32 %v9579_v61, %v8443_v21  ;;  %v2717_v60 = vadd.f32 %v2715_v53, %v2713_v12 }
 0x281   : > { %v2707_v30 = vadd.f32 %v2705_v11, %v2702_v13  ;;  %v2723_v52 = vmul.f32 %v7945_v45, %v8468_v15  ;;  %v2718_v40 = vadd.f32 %v2716_v38, %v2714_v51  ;;  %v2724_v28 = vmul.f32 %v7950_v19, %v8468_v15 }
 0x282   : > { %1316 = vst [vmem:[#allocation2 + $0x68] sm:$0x3f] %v1314_v36  ;;  %v8535_v24 = vand.u32 4294901760, %v9388_v41  ;;  %v8539_v50 = vadd.f32 %v2709_v10, %v2706_v17  ;;  %v2721_v57 = vadd.f32 %v2719_v49, %v2717_v60  ;;  %v2727_v11 = vmul.f32 %v7963_v25, %v8471_v58 }
 0x283   : > { %v8541_v55 = vadd.f32 %v2710_v18, %v2707_v30  ;;  %v2722_v2 = vadd.f32 %v2720_v48, %v2718_v40  ;;  %v2728_v7 = vmul.f32 %v7968_v54, %v8471_v58  ;;  %v2731_v39 = vmul.f32 %v8051_v5, %v8482_v47 }
 0x284   : > { %v2732_v12 = vmul.f32 %v8056_v14, %v8482_v47  ;;  %v2725_v51 = vadd.f32 %v2723_v52, %v2721_v57  ;;  %v2735_v10 = vmul.f32 %v7992_v22, %v8485_v27  ;;  %v2736_v18 = vmul.f32 %v7997_v59, %v8485_v27 }
 0x285   : > { %v2739_v36 = vmul.f32 %v8009_v62, %v8503_v37  ;;  %v2726_v13 = vadd.f32 %v2724_v28, %v2722_v2  ;;  %v2740_v53 = vmul.f32 %v8014_v35, %v8503_v37  ;;  %v2743_v17 = vmul.f32 %v8069_v1, %v8510_v34 }
 0x286   : > { %v2749_v38 = vmul.f32 %v9573_v31, %v8437_v9  ;;  %v2729_v43 = vadd.f32 %v2727_v11, %v2725_v51  ;;  %v2750_v49 = vmul.f32 %v9574_v8, %v8437_v9  ;;  %v2751_v61 = vmul.f32 %v7945_v45, %v8440_v6 }
 0x287   : > { %v2752_v48 = vmul.f32 %v7950_v19, %v8440_v6  ;;  %v2730_v60 = vadd.f32 %v2728_v7, %v2726_v13  ;;  %v2755_v52 = vmul.f32 %v7963_v25, %v8443_v21  ;;  %v2756_v40 = vmul.f32 %v7968_v54, %v8443_v21 }
 0x288   : > { %v2759_v31 = vmul.f32 %v9575_v23, %v8468_v15  ;;  %v2733_v28 = vadd.f32 %v2731_v39, %v2729_v43  ;;  %v2753_v57 = vadd.f32 %v2751_v61, %v2749_v38  ;;  %v2744_v51 = vmul.f32 %v8074_v33, %v8510_v34 }
 0x289   : > { %v8569_v30 = vld [vmem:[#allocation2 + $0x68] sm:$0xff]  ;;  %v2754_v11 = vadd.f32 %v2752_v48, %v2750_v49  ;;  %v2734_v2 = vadd.f32 %v2732_v12, %v2730_v60  ;;  %v2760_v7 = vmul.f32 %v7978_v32, %v8468_v15  ;;  %v2763_v13 = vmul.f32 %v7992_v22, %v8471_v58 }
 0x28a   : > { %v2908_v8 = vand.u32 4294901760, %v8569_v30  ;;  %v2737_v23 = vadd.f32 %v2735_v10, %v2733_v28  ;;  %v2757_v42 = vadd.f32 %v2755_v52, %v2753_v57  ;;  %v2764_v39 = vmul.f32 %v7997_v59, %v8471_v58 }
 0x28b   : > { %v2738_v12 = vadd.f32 %v2736_v18, %v2734_v2  ;;  %v2758_v38 = vadd.f32 %v2756_v40, %v2754_v11  ;;  %v2767_v43 = vmul.f32 %v8009_v62, %v8482_v47  ;;  %v2768_v32 = vmul.f32 %v8014_v35, %v8482_v47 }
 0x28c   : > { %v8587_v41 = vpack.c.bf16 %v2908_v8, %v8535_v24  ;;  %v2741_v49 = vadd.f32 %v2739_v36, %v2737_v23  ;;  %v2761_v61 = vadd.f32 %v2759_v31, %v2757_v42  ;;  %v2771_v48 = vmul.f32 %v8108_v20, %v8485_v27 }
 0x28d   : > { %v2772_v10 = vmul.f32 %v9565_v63, %v8485_v27  ;;  %v2742_v60 = vadd.f32 %v2740_v53, %v2738_v12  ;;  %v2762_v52 = vadd.f32 %v2760_v7, %v2758_v38  ;;  %v2775_v18 = vmul.f32 %v8118_v29, %v8503_v37 }
 0x28e   : > { %4304 = vmatpush3.bf16.msra.mxu0 %v8587_v41  ;;  %v2776_v40 = vmul.f32 %v8123_v26, %v8503_v37  ;;  %v8604_v28 = vadd.f32 %v2743_v17, %v2741_v49  ;;  %v2765_v57 = vadd.f32 %v2763_v13, %v2761_v61  ;;  %v2779_v42 = vmul.f32 %v8130_v4, %v8510_v34  ;;  %v9580_v61 = vld [vmem:[#allocation48_spill] sm:$0xff] }
 0x28f   : > { %v2780_v20 = vmul.f32 %v8135_v56, %v8510_v34  ;;  %v8610_v36 = vadd.f32 %v2744_v51, %v2742_v60  ;;  %v2766_v63 = vadd.f32 %v2764_v39, %v2762_v52  ;;  %v2783_v53 = vmul.f32 %v7945_v45, %v8437_v9 }
 0x290   : > { %v2784_v31 = vmul.f32 %v7950_v19, %v8437_v9  ;;  %v2747_v17 = vmax.f32 %v8539_v50, %v8604_v28  ;;  %v2769_v11 = vadd.f32 %v2767_v43, %v2765_v57  ;;  %v2785_v2 = vmul.f32 %v7963_v25, %v8440_v6 }
 0x291   : > { %v2786_v7 = vmul.f32 %v7968_v54, %v8440_v6  ;;  %v2748_v45 = vmax.f32 %v8541_v55, %v8610_v36  ;;  %v2770_v51 = vadd.f32 %v2768_v32, %v2766_v63  ;;  %v2789_v19 = vmul.f32 %v8051_v5, %v8443_v21  ;;  %v8695_v63 = vld [vmem:[%s4778_s13 + $0x10] sm:$0xff] }
 0x292   : > { %v2790_v9 = vmul.f32 %v8056_v14, %v8443_v21  ;;  %v2773_v25 = vadd.f32 %v2771_v48, %v2769_v11  ;;  %v2787_v54 = vadd.f32 %v2785_v2, %v2783_v53  ;;  %v2793_v13 = vmul.f32 %v7992_v22, %v8468_v15 }
 0x293   : > { %v2788_v6 = vadd.f32 %v2786_v7, %v2784_v31  ;;  %v2774_v23 = vadd.f32 %v2772_v10, %v2770_v51  ;;  %v2794_v39 = vmul.f32 %v7997_v59, %v8468_v15  ;;  %v2797_v5 = vmul.f32 %v8009_v62, %v8471_v58  ;;  %v9581_v10 = vld [vmem:[#allocation22_spill] sm:$0xff]  ;;  %v8700_v31 = vld [vmem:[%s4778_s13 + $0x18] sm:$0x3f] }
 0x294   : > { %v2798_v14 = vmul.f32 %v8014_v35, %v8471_v58  ;;  %v2777_v21 = vadd.f32 %v2775_v18, %v2773_v25  ;;  %v2791_v12 = vadd.f32 %v2789_v19, %v2787_v54  ;;  %v2801_v43 = vmul.f32 %v8069_v1, %v8482_v47  ;;  %v4628_v18 = vld [vmem:[%s4778_s13] sm:$0xff] }
 0x295   : > { %v2792_v38 = vadd.f32 %v2790_v9, %v2788_v6  ;;  %v2778_v32 = vadd.f32 %v2776_v40, %v2774_v23  ;;  %v2802_v22 = vmul.f32 %v8074_v33, %v8482_v47  ;;  %v2805_v59 = vmul.f32 %v8118_v29, %v8485_v27  ;;  %v4632_v19 = vld [vmem:[%s4778_s13 + $0x1] sm:$0xff] }
 0x296   : > { %v2806_v62 = vmul.f32 %v8123_v26, %v8485_v27  ;;  %v8652_v15 = vadd.f32 %v2779_v42, %v2777_v21  ;;  %v2795_v35 = vadd.f32 %v2793_v13, %v2791_v12  ;;  %v2809_v1 = vmul.f32 %v8130_v4, %v8503_v37  ;;  %v4629_v42 = vld [vmem:[%s4778_s13 + $0x8] sm:$0x3f] }
 0x297   : > { %v2796_v58 = vadd.f32 %v2794_v39, %v2792_v38  ;;  %v8660_v33 = vadd.f32 %v2780_v20, %v2778_v32  ;;  %v2810_v29 = vmul.f32 %v8135_v56, %v8503_v37  ;;  %v2813_v26 = vmul.f32 %v8192_v3, %v8510_v34  ;;  %v4633_v13 = vld [vmem:[%s4778_s13 + $0x9] sm:$0x3f]  ;;  %v8719_v32 = vld [vmem:[%s4778_s13 + $0x20] sm:$0xff] }
 0x298   : > { %v2814_v47 = vmul.f32 %v8197_v0, %v8510_v34  ;;  %v2799_v27 = vadd.f32 %v2797_v5, %v2795_v35  ;;  %v2822_v49 = vstv %s8622_s1  ;;  %v3180_v48 = vand.u32 4294901760, %v9580_v61  ;;  %v8724_v35 = vld [vmem:[%s4778_s13 + $0x28] sm:$0x3f] }
 0x299   : > { %v2800_v4 = vadd.f32 %v2798_v14, %v2796_v58  ;;  %v3187_v60 = vand.u32 4294901760, %v9581_v10  ;;  %v8676_v56 = vstv %s8624_s29  ;;  %v8679_v3 = vstv %s8632_s30 }
 0x29a   : > { %v8682_v37 = vstv %s8634_s6  ;;  %v2803_v0 = vadd.f32 %v2801_v43, %v2799_v27  ;;  %v3181_v52 = vsub.f32 %v9580_v61, %v3180_v48  ;;  %v1327_v40 = vmul.f32 %v4628_v18, %v8676_v56 }
 0x29b   : > { %v2804_v34 = vadd.f32 %v2802_v22, %v2800_v4  ;;  %v3188_v57 = vsub.f32 %v9581_v10, %v3187_v60  ;;  %v1328_v20 = vmul.f32 %v4629_v42, %v8676_v56  ;;  %v1330_v53 = vmul.f32 %v8695_v63, %v8679_v3  ;;  %v8734_v4 = vld [vmem:[%s4778_s13 + $0x38] sm:$0x3f] }
 0x29c   : > { %v1331_v11 = vmul.f32 %v8700_v31, %v8679_v3  ;;  %v2807_v2 = vadd.f32 %v2805_v59, %v2803_v0  ;;  %v3182_v51 = vand.u32 4294901760, %v3181_v52  ;;  %v1335_v9 = vmul.f32 %v4632_v19, %v8682_v37 }
 0x29d   : > { %v2808_v7 = vadd.f32 %v2806_v62, %v2804_v34  ;;  %v3189_v25 = vand.u32 4294901760, %v3188_v57  ;;  %v1332_v54 = vadd.f32 %v1330_v53, %v1327_v40  ;;  %v1336_v23 = vmul.f32 %v4633_v13, %v8682_v37  ;;  %v8747_v40 = vld [vmem:[%s4778_s13 + $0x21] sm:$0xff] }
 0x29e   : > { %v1333_v6 = vadd.f32 %v1331_v11, %v1328_v20  ;;  %v2811_v39 = vadd.f32 %v2809_v1, %v2807_v2  ;;  %v8713_v14 = vstv %s8656_s7  ;;  %v8716_v21 = vstv %s8658_s8  ;;  %v8729_v1 = vld [vmem:[%s4778_s13 + $0x30] sm:$0xff]  ;;  %v8752_v20 = vld [vmem:[%s4778_s13 + $0x29] sm:$0x3f] }
 0x29f   : > { %v2812_v5 = vadd.f32 %v2810_v29, %v2808_v7  ;;  %v4329_v12 = vpack.c.bf16 %v3189_v25, %v3182_v51  ;;  %v1337_v38 = vadd.f32 %v1335_v9, %v1332_v54  ;;  %v1340_v22 = vmul.f32 %v8719_v32, %v8713_v14  ;;  %v8757_v11 = vld [vmem:[%s4778_s13 + $0x40] sm:$0xff] }
 0x2a0   : > { %v1338_v43 = vadd.f32 %v1336_v23, %v1333_v6  ;;  %v2815_v59 = vadd.f32 %v2813_v26, %v2811_v39  ;;  %v1341_v58 = vmul.f32 %v8724_v35, %v8713_v14  ;;  %v1345_v29 = vmul.f32 %v8729_v1, %v8716_v21  ;;  %v8776_v6 = vld [vmem:[%s4778_s13 + $0x50] sm:$0xff]  ;;  %v8781_v39 = vld [vmem:[%s4778_s13 + $0x58] sm:$0x3f] }
 0x2a1   : > { %v2816_v62 = vadd.f32 %v2814_v47, %v2812_v5  ;;  %4330 = vmatprep.subr.bf16.mxu1 %v4329_v12  ;;  %v1342_v27 = vadd.f32 %v1340_v22, %v1337_v38  ;;  %v1346_v26 = vmul.f32 %v8734_v4, %v8716_v21  ;;  %v8739_v47 = vstv %s8671_s9 }
 0x2a2   : > { %v8742_v0 = vstv %s8673_s10  ;;  %v2817_v34 = vmax.f32 %v8652_v15, %v2815_v59  ;;  %v1343_v18 = vadd.f32 %v1341_v58, %v1338_v43  ;;  %v1350_v57 = vmul.f32 %v8747_v40, %v8739_v47 }
 0x2a3   : > { %v2818_v52 = vmax.f32 %v8660_v33, %v2816_v62  ;;  %v1347_v42 = vadd.f32 %v1345_v29, %v1342_v27  ;;  %v1351_v53 = vmul.f32 %v8752_v20, %v8739_v47  ;;  %v1355_v15 = vmul.f32 %v8757_v11, %v8742_v0  ;;  %v8762_v33 = vld [vmem:[%s4778_s13 + $0x48] sm:$0x3f]  ;;  %v4645_v27 = vld [vmem:[%s4778_s13 + $0x11] sm:$0xff] }
 0x2a4   : > { %v1356_v2 = vmul.f32 %v8762_v33, %v8742_v0  ;;  %v2819_v7 = vmax.f32 %v2747_v17, %v2817_v34  ;;  %v1348_v9 = vadd.f32 %v1346_v26, %v1343_v18  ;;  %v8773_v25 = vstv %s8704_s11  ;;  %v4646_v34 = vld [vmem:[%s4778_s13 + $0x19] sm:$0x3f] }
 0x2a5   : > { %v2820_v51 = vmax.f32 %v2748_v45, %v2818_v52  ;;  %v1352_v54 = vadd.f32 %v1350_v57, %v1347_v42  ;;  %v1360_v23 = vmul.f32 %v8776_v6, %v8773_v25  ;;  %v1361_v5 = vmul.f32 %v8781_v39, %v8773_v25  ;;  %v8793_v45 = vld [vmem:[%s4778_s13 + $0x41] sm:$0xff] }
 0x2a6   : > { %v2823_v50 = vadd.f32 %v2822_v49, %v2819_v7  ;;  %v1353_v28 = vadd.f32 %v1351_v53, %v1348_v9  ;;  %v8790_v36 = vstv %s8710_s12  ;;  %v1369_v38 = vmul.f32 %v8695_v63, %v8676_v56 }
 0x2a7   : > { %v2824_v55 = vadd.f32 %v2822_v49, %v2820_v51  ;;  %v1357_v17 = vadd.f32 %v1355_v15, %v1352_v54  ;;  %v1365_v12 = vmul.f32 %v8793_v45, %v8790_v36  ;;  %v1370_v43 = vmul.f32 %v8700_v31, %v8676_v56  ;;  %v8822_v15 = vld [vmem:[%s4778_s13 + $0x49] sm:$0x3f] }
 0x2a8   : > { %v2825_v22 = vmax.f32 %v2823_v50, 0.0  ;;  %v1358_v62 = vadd.f32 %v1356_v2, %v1353_v28  ;;  %v1371_v49 = vmul.f32 %v4632_v19, %v8679_v3  ;;  %v1372_v29 = vmul.f32 %v4633_v13, %v8679_v3 }
 0x2a9   : > { %v2826_v59 = vmax.f32 %v2824_v55, 0.0  ;;  %v1362_v58 = vadd.f32 %v1360_v23, %v1357_v17  ;;  %v1375_v26 = vmul.f32 %v4645_v27, %v8682_v37  ;;  %v1376_v52 = vmul.f32 %v4646_v34, %v8682_v37  ;;  %v4649_v55 = vld [vmem:[%s4778_s13 + $0x39] sm:$0x3f] }
 0x2aa   : > { %v2959_v63 = vand.u32 4294901760, %v2825_v22  ;;  %v1373_v18 = vadd.f32 %v1371_v49, %v1369_v38  ;;  %v1379_v31 = vmul.f32 %v8729_v1, %v8713_v14  ;;  %v9582_v57 = vmax.f32 %v8512_v46, 0.0 }
 0x2ab   : > { %2828 = vst [vmem:[#allocation2 + $0xf8] sm:$0x3f] %v2826_v59  ;;  %v1374_v13 = vadd.f32 %v1372_v29, %v1370_v43  ;;  %v1380_v42 = vmul.f32 %v8734_v4, %v8713_v14  ;;  %v8819_v53 = vsub.f32 %v8569_v30, %v2908_v8  ;;  %v1366_v2 = vmul.f32 %v8822_v15, %v8790_v36  ;;  %v8835_v8 = vld [vmem:[%s4778_s13 + $0x31] sm:$0xff] }
 0x2ac   : > { %v8812_v19 = vsub.f32 %v9582_v57, %v8535_v24  ;;  %v1377_v7 = vadd.f32 %v1375_v26, %v1373_v18  ;;  %v1383_v46 = vmul.f32 %v8747_v40, %v8716_v21  ;;  %v1363_v24 = vadd.f32 %v1361_v5, %v1358_v62 }
 0x2ad   : > { %v8828_v51 = vadd.f32 %v1365_v12, %v1362_v58  ;;  %v1378_v9 = vadd.f32 %v1376_v52, %v1374_v13  ;;  %v1384_v54 = vmul.f32 %v8752_v20, %v8716_v21  ;;  %v8832_v23 = vsub.f32 %v2825_v22, %v2959_v63 }
 0x2ae   : > { %v1381_v30 = vadd.f32 %v1379_v31, %v1377_v7  ;;  %v1387_v50 = vmul.f32 %v8835_v8, %v8739_v47  ;;  %v1388_v28 = vmul.f32 %v4649_v55, %v8739_v47  ;;  %v1391_v5 = vmul.f32 %v8776_v6, %v8742_v0 }
 0x2af   : > { %v1382_v17 = vadd.f32 %v1380_v42, %v1378_v9  ;;  %v1392_v12 = vmul.f32 %v8781_v39, %v8742_v0  ;;  %v1405_v38 = vmul.f32 %v8719_v32, %v8676_v56  ;;  %v1406_v22 = vmul.f32 %v8724_v35, %v8676_v56 }
 0x2b0   : > { %v1385_v43 = vadd.f32 %v1383_v46, %v1381_v30  ;;  %v1407_v59 = vmul.f32 %v8729_v1, %v8679_v3  ;;  %v1408_v62 = vmul.f32 %v8734_v4, %v8679_v3  ;;  %v1411_v29 = vmul.f32 %v8747_v40, %v8682_v37 }
 0x2b1   : > { %v1386_v58 = vadd.f32 %v1384_v54, %v1382_v17  ;;  %v1412_v27 = vmul.f32 %v8752_v20, %v8682_v37  ;;  %v1415_v32 = vmul.f32 %v8757_v11, %v8713_v14  ;;  %v1395_v31 = vmul.f32 %v8793_v45, %v8773_v25 }
 0x2b2   : > { %v2867_v49 = vld [vmem:[#allocation2 + $0xf8] sm:$0xff]  ;;  %v1389_v34 = vadd.f32 %v1387_v50, %v1385_v43  ;;  %v1409_v35 = vadd.f32 %v1407_v59, %v1405_v38  ;;  %v1410_v52 = vadd.f32 %v1408_v62, %v1406_v22  ;;  %v1396_v57 = vmul.f32 %v8822_v15, %v8773_v25  ;;  %v4652_v62 = vld [vmem:[%s4778_s13 + $0x60] sm:$0xff] }
 0x2b3   : > { %v2962_v26 = vand.u32 4294901760, %v2867_v49  ;;  %v1390_v18 = vadd.f32 %v1388_v28, %v1386_v58  ;;  %v1416_v13 = vmul.f32 %v8762_v33, %v8713_v14  ;;  %v1419_v46 = vmul.f32 %v8776_v6, %v8716_v21  ;;  %v4650_v28 = vld [vmem:[%s4778_s13 + $0x51] sm:$0xff] }
 0x2b4   : > { %v1393_v7 = vadd.f32 %v1391_v5, %v1389_v34  ;;  %v1413_v11 = vadd.f32 %v1411_v29, %v1409_v35  ;;  %v8869_v9 = vadd.f32 %v1366_v2, %v1363_v24  ;;  %v1414_v30 = vadd.f32 %v1412_v27, %v1410_v52  ;;  %v4653_v29 = vld [vmem:[%s4778_s13 + $0x68] sm:$0x3f]  ;;  %v4654_v34 = vld [vmem:[%s4778_s13 + $0x70] sm:$0xff] }
 0x2b5   : > { %v8865_v42 = vpack.c.bf16 %v2962_v26, %v2959_v63  ;;  %v1394_v54 = vadd.f32 %v1392_v12, %v1390_v18  ;;  %v1420_v50 = vmul.f32 %v8781_v39, %v8716_v21  ;;  %v1399_v33 = vmul.f32 %v4650_v28, %v8790_v36  ;;  %v4651_v63 = vld [vmem:[%s4778_s13 + $0x59] sm:$0x3f] }
 0x2b6   : > { %v1400_v17 = vmul.f32 %v4651_v63, %v8790_v36  ;;  %v1417_v5 = vadd.f32 %v1415_v32, %v1413_v11  ;;  %v1423_v2 = vmul.f32 %v8793_v45, %v8739_v47  ;;  %v8880_v24 = vsub.f32 %v2867_v49, %v2962_v26  ;;  %v4655_v18 = vld [vmem:[%s4778_s13 + $0x78] sm:$0x3f] }
 0x2b7   : > { %4306 = vmatprep.subr.bf16.mxu0 %v8865_v42  ;;  %v1397_v12 = vadd.f32 %v1395_v31, %v1393_v7  ;;  %v1418_v38 = vadd.f32 %v1416_v13, %v1414_v30  ;;  %v1424_v43 = vmul.f32 %v8822_v15, %v8739_v47  ;;  %v1398_v22 = vadd.f32 %v1396_v57, %v1394_v54 }
 0x2b8   : > { %v1421_v59 = vadd.f32 %v1419_v46, %v1417_v5  ;;  %v1427_v58 = vmul.f32 %v4652_v62, %v8742_v0  ;;  %v1428_v27 = vmul.f32 %v4653_v29, %v8742_v0  ;;  %v1431_v49 = vmul.f32 %v4654_v34, %v8773_v25  ;;  %v2833_v62 = vld [vmem:[%s8917_s17 + $0x8] sm:$0xff] }
 0x2b9   : > { %v1422_v32 = vadd.f32 %v1420_v50, %v1418_v38  ;;  %v1439_v26 = vmul.f32 %v8729_v1, %v8676_v56  ;;  %v1440_v35 = vmul.f32 %v8734_v4, %v8676_v56  ;;  %v1432_v31 = vmul.f32 %v4655_v18, %v8773_v25  ;;  %v4656_v50 = vld [vmem:[%s4778_s13 + $0x61] sm:$0xff] }
 0x2ba   : > { %v1425_v52 = vadd.f32 %v1423_v2, %v1421_v59  ;;  %v1441_v57 = vmul.f32 %v8747_v40, %v8679_v3  ;;  %v1442_v13 = vmul.f32 %v8752_v20, %v8679_v3  ;;  %v8901_v7 = vadd.f32 %v1399_v33, %v1397_v12 }
 0x2bb   : > { %v1426_v11 = vadd.f32 %v1424_v43, %v1422_v32  ;;  %v1445_v1 = vmul.f32 %v8835_v8, %v8682_v37  ;;  %v1446_v56 = vmul.f32 %v4649_v55, %v8682_v37  ;;  %v1449_v30 = vmul.f32 %v8776_v6, %v8713_v14  ;;  %v9583_v32 = vld [vmem:[#allocation54_spill] sm:$0xff] }
 0x2bc   : > { %v1429_v4 = vadd.f32 %v1427_v58, %v1425_v52  ;;  %v1443_v46 = vadd.f32 %v1441_v57, %v1439_v26  ;;  %v1444_v54 = vadd.f32 %v1442_v13, %v1440_v35  ;;  %v1435_v3 = vmul.f32 %v4656_v50, %v8790_v36 }
 0x2bd   : > { %v1430_v40 = vadd.f32 %v1428_v27, %v1426_v11  ;;  %v1450_v20 = vmul.f32 %v8781_v39, %v8713_v14  ;;  %v1453_v33 = vmul.f32 %v8793_v45, %v8716_v21  ;;  %v1454_v6 = vmul.f32 %v8822_v15, %v8716_v21  ;;  %v4657_v39 = vld [vmem:[%s4778_s13 + $0x69] sm:$0x3f] }
 0x2be   : > { %v1433_v37 = vadd.f32 %v1431_v49, %v1429_v4  ;;  %v1447_v8 = vadd.f32 %v1445_v1, %v1443_v46  ;;  %v1448_v55 = vadd.f32 %v1446_v56, %v1444_v54  ;;  %v8921_v5 = vadd.f32 %v1400_v17, %v1398_v22  ;;  %v9584_v49 = vld [vmem:[#allocation56_spill] sm:$0xff] }
 0x2bf   : > { %v1403_v14 = vmax.f32 %v8828_v51, %v8901_v7  ;;  %v1436_v45 = vmul.f32 %v4657_v39, %v8790_v36  ;;  %v1457_v2 = vmul.f32 %v4650_v28, %v8739_v47  ;;  %v1434_v12 = vadd.f32 %v1432_v31, %v1430_v40  ;;  %v4659_v46 = vld [vmem:[%s4778_s13 + $0x79] sm:$0x3f] }
 0x2c0   : > { %v1451_v38 = vadd.f32 %v1449_v30, %v1447_v8  ;;  %v1452_v43 = vadd.f32 %v1450_v20, %v1448_v55  ;;  %v1458_v59 = vmul.f32 %v4651_v63, %v8739_v47  ;;  %v1437_v58 = vadd.f32 %v1435_v3, %v1433_v37  ;;  %v9585_v47 = vld [vmem:[#allocation58_spill] sm:$0xff] }
 0x2c1   : > { %v1461_v21 = vmul.f32 %v4654_v34, %v8742_v0  ;;  %v1462_v15 = vmul.f32 %v4655_v18, %v8742_v0  ;;  %v1465_v17 = vmul.f32 %v4656_v50, %v8773_v25  ;;  %v1466_v27 = vmul.f32 %v4657_v39, %v8773_v25  ;;  %v4658_v0 = vld [vmem:[%s4778_s13 + $0x71] sm:$0xff] }
 0x2c2   : > { %v1455_v22 = vadd.f32 %v1453_v33, %v1451_v38  ;;  %v1456_v29 = vadd.f32 %v1454_v6, %v1452_v43  ;;  %v3068_v28 = vand.u32 4294901760, %v9583_v32  ;;  %v3075_v26 = vand.u32 4294901760, %v9584_v49 }
 0x2c3   : > { %v8936_v35 = vand.u32 4294901760, %v2833_v62  ;;  %v3194_v63 = vand.u32 4294901760, %v9585_v47  ;;  %v3201_v52 = vand.u32 4294901760, %v8352_v44  ;;  %v1469_v18 = vmul.f32 %v4658_v0, %v8790_v36 }
 0x2c4   : > { %v1459_v34 = vadd.f32 %v1457_v2, %v1455_v22  ;;  %v1460_v31 = vadd.f32 %v1458_v59, %v1456_v29  ;;  %v3069_v25 = vsub.f32 %v9583_v32, %v3068_v28  ;;  %v3076_v57 = vsub.f32 %v9584_v49, %v3075_v26  ;;  %v2832_v22 = vld [vmem:[%s8917_s17] sm:$0xff] }
 0x2c5   : > { %v8951_v13 = vsub.f32 %v2833_v62, %v8936_v35  ;;  %v3195_v11 = vsub.f32 %v9585_v47, %v3194_v63  ;;  %v3202_v1 = vsub.f32 %v8352_v44, %v3201_v52  ;;  %3220 = vmatprep.mubr.f32.mxu1 %v8936_v35  ;;  %v1470_v54 = vmul.f32 %v4659_v46, %v8790_v36  ;;  %v2834_v46 = vld [vmem:[%s8917_s17 + $0x10] sm:$0xff] }
 0x2c6   : > { %v1463_v56 = vadd.f32 %v1461_v21, %v1459_v34  ;;  %v1464_v4 = vadd.f32 %v1462_v15, %v1460_v31  ;;  %v3070_v30 = vand.u32 4294901760, %v3069_v25  ;;  %v3077_v40 = vand.u32 4294901760, %v3076_v57 }
 0x2c7   : > { %v2966_v50 = vand.u32 4294901760, %v8951_v13  ;;  %v3196_v3 = vand.u32 4294901760, %v3195_v11  ;;  %v3203_v20 = vand.u32 4294901760, %v3202_v1  ;;  %v1438_v33 = vadd.f32 %v1436_v45, %v1434_v12 }
 0x2c8   : > { %v1467_v37 = vadd.f32 %v1465_v17, %v1463_v56  ;;  %v1468_v8 = vadd.f32 %v1466_v27, %v1464_v4  ;;  %v3082_v55 = vand.u32 4294901760, %v8812_v19  ;;  %v4331_v6 = vpack.c.bf16 %v3077_v40, %v3070_v30  ;;  %v2835_v56 = vld [vmem:[%s8917_s17 + $0x18] sm:$0xff] }
 0x2c9   : > { %v2967_v39 = vsub.f32 %v8951_v13, %v2966_v50  ;;  %v4333_v2 = vpack.c.bf16 %v3203_v20, %v3196_v3  ;;  %v3089_v36 = vand.u32 4294901760, %v8819_v53  ;;  %v1404_v38 = vmax.f32 %v8869_v9, %v8921_v5 }
 0x2ca   : > { %v1471_v43 = vadd.f32 %v1469_v18, %v1467_v37  ;;  %v1472_v59 = vadd.f32 %v1470_v54, %v1468_v8  ;;  %v3083_v45 = vsub.f32 %v8812_v19, %v3082_v55  ;;  %4332 = vmatpush3.bf16.msra.mxu1 %v4331_v6  ;;  %v3208_v21 = vand.u32 4294901760, %v8832_v23 }
 0x2cb   : > { %v2968_v12 = vand.u32 4294901760, %v2967_v39  ;;  %v3090_v62 = vsub.f32 %v8819_v53, %v3089_v36  ;;  %4334 = vmatprep.subr.bf16.mxu1 %v4333_v2  ;;  %v1478_v27 = vstv %s8945_s18  ;;  %v3215_v34 = vand.u32 4294901760, %v8880_v24 }
 0x2cc   : > { %v1473_v15 = vmax.f32 %v1437_v58, %v1471_v43  ;;  %v1474_v17 = vmax.f32 %v1438_v33, %v1472_v59  ;;  %v3084_v29 = vand.u32 4294901760, %v3083_v45  ;;  %v3209_v5 = vsub.f32 %v8832_v23, %v3208_v21 }
 0x2cd   : > { %2969 = vmatprep.mubr.f32.mxu0 %v2968_v12  ;;  %v3091_v9 = vand.u32 4294901760, %v3090_v62  ;;  %v8980_v18 = vand.u32 4294901760, %v2832_v22  ;;  %v3216_v57 = vsub.f32 %v8880_v24, %v3215_v34  ;;  %v4361_v40 = vpack.c.bf16 %v9581_v10, %v9580_v61  ;;  %v9614_v10 = vld [vmem:[#allocation50_spill] sm:$0xff] }
 0x2ce   : > { %v1475_v31 = vmax.f32 %v1403_v14, %v1473_v15  ;;  %v1476_v0 = vmax.f32 %v1404_v38, %v1474_v17  ;;  %v3210_v25 = vand.u32 4294901760, %v3209_v5  ;;  %v4363_v51 = vpack.c.bf16 %v9584_v49, %v9583_v32  ;;  %v9589_v5 = vld [vmem:[#allocation17_spill] sm:$0xff] }
 0x2cf   : > { %v4335_v58 = vpack.c.bf16 %v3091_v9, %v3084_v29  ;;  %v3217_v4 = vand.u32 4294901760, %v3216_v57  ;;  %v8990_v7 = vsub.f32 %v2832_v22, %v8980_v18  ;;  %v4365_v3 = vpack.c.bf16 %v8352_v44, %v9585_v47  ;;  %v9588_v9 = vld [vmem:[#allocation15_spill] sm:$0xff]  ;;  %v9615_v49 = vld [vmem:[#allocation21_spill] sm:$0xff] }
 0x2d0   : > { %v1479_v11 = vadd.f32 %v1478_v27, %v1475_v31  ;;  %v1480_v1 = vadd.f32 %v1478_v27, %v1476_v0  ;;  %v8994_v20 = vand.u32 4294901760, %v2835_v56  ;;  %v8996_v37 = vand.u32 4294901760, %v2834_v46  ;;  %v9618_v47 = vld [vmem:[#allocation55_spill] sm:$0xff] }
 0x2d1   : > { %4336 = vmatpush3.bf16.msra.mxu1 %v4335_v58  ;;  %v4337_v14 = vpack.c.bf16 %v3217_v4, %v3210_v25  ;;  %v2972_v39 = vand.u32 4294901760, %v8990_v7  ;;  %v9012_v43 = vpack.c.bf16 %v3187_v60, %v3180_v48  ;;  %v9018_v59 = vpack.c.bf16 %v3075_v26, %v3068_v28  ;;  %v9590_v58 = vld [vmem:[#allocation24_spill] sm:$0xff] }
 0x2d2   : > { %v1481_v54 = vmax.f32 %v1479_v11, 0.0  ;;  %v1482_v30 = vmax.f32 %v1480_v1, 0.0  ;;  %v8999_v8 = vsub.f32 %v2835_v56, %v8994_v20  ;;  %v9005_v2 = vsub.f32 %v2834_v46, %v8996_v37  ;;  %v9591_v25 = vld [vmem:[#allocation28_spill] sm:$0xff]  ;;  %v9592_v46 = vld [vmem:[#allocation30_spill] sm:$0xff] }
 0x2d3   : > { %4338 = vmatprep.subr.bf16.mxu1 %v4337_v14  ;;  %v9024_v45 = vpack.c.bf16 %v3201_v52, %v3194_v63  ;;  %v9026_v12 = vpack.c.bf16 %v3089_v36, %v3082_v55  ;;  %v9029_v15 = vpack.c.bf16 %v3215_v34, %v3208_v21  ;;  %v2973_v60 = vsub.f32 %v8990_v7, %v2972_v39  ;;  %v9586_v63 = vld [vmem:[#allocation29_spill] sm:$0xff]  ;;  %v9587_v52 = vld [vmem:[#allocation19_spill] sm:$0xff]  ;;  %v9594_v14 = vld [vmem:[#allocation14_spill] sm:$0xff] }
 0x2d4   : > { %1484 = vst [vmem:[#allocation2 + $0x78] sm:$0x3f] %v1482_v30  ;;  %v2911_v33 = vand.u32 4294901760, %v1481_v54  ;;  %v2981_v38 = vand.u32 4294901760, %v8999_v8  ;;  %v9392_v28 = vand.u32 4294901760, %v9005_v2  ;;  %v4341_v55 = vpack.c.bf16 %v9587_v52, %v9586_v63 }
 0x2d5   : > { %v2974_v29 = vand.u32 4294901760, %v2973_v60  ;;  %v4343_v34 = vpack.c.bf16 %v9589_v5, %v9588_v9  ;;  %v4345_v57 = vpack.c.bf16 %v9591_v25, %v9590_v58  ;;  %v4369_v61 = vpack.c.bf16 %v8880_v24, %v8832_v23 }
 0x2d6   : > { %v9001_v6 = vsub.f32 %v1481_v54, %v2911_v33  ;;  %v2982_v17 = vsub.f32 %v8999_v8, %v2981_v38  ;;  %v2988_v27 = vsub.f32 %v9005_v2, %v9392_v28  ;;  %v9593_v54 = vld [vmem:[#allocation26_spill] sm:$0xff]  ;;  %v9611_v28 = vld [vmem:[#allocation41_spill] sm:$0xff]  ;;  %v9620_v23 = vand.u32 4294901760, %v9589_v5 }
 0x2d7   : > { %v4347_v30 = vpack.c.bf16 %v9593_v54, %v9592_v46  ;;  %v9626_v5 = vand.u32 4294901760, %v9594_v14 }
 0x2d8   : > { %v9391_v62 = vand.u32 4294901760, %v9001_v6  ;;  %v2983_v0 = vand.u32 4294901760, %v2982_v17  ;;  %v2989_v56 = vand.u32 4294901760, %v2988_v27  ;;  %v9597_v17 = vld [vmem:[#allocation38_spill] sm:$0xff] }
 0x2d9   : > { %v9600_v27 = vld [vmem:[#allocation42_spill] sm:$0xff] }
 0x2da   : > { %v3097_v21 = vsub.f32 %v9001_v6, %v9391_v62  ;;  %v9609_v62 = vld [vmem:[#allocation18_spill] sm:$0xff] }
 0x2db   : > { %v2851_v48 = vld [vmem:[#allocation2 + $0x78] sm:$0xff] }
 0x2dc   : > { %v2914_v26 = vand.u32 4294901760, %v2851_v48  ;;  %v3098_v11 = vand.u32 4294901760, %v3097_v21  ;;  %v9598_v21 = vld [vmem:[#allocation20_spill] sm:$0xff] }
 0x2de   : > { %v9040_v36 = vpack.c.bf16 %v2914_v26, %v2911_v33  ;;  %v9042_v22 = vsub.f32 %v2851_v48, %v2914_v26  ;;  %v9595_v33 = vld [vmem:[#allocation11_spill] sm:$0xff]  ;;  %v9596_v26 = vld [vmem:[#allocation36_spill] sm:$0xff] }
 0x2df   : > { %v4349_v48 = vpack.c.bf16 %v9595_v33, %v9594_v14  ;;  %v9631_v14 = vand.u32 4294901760, %v9600_v27 }
 0x2e0   : > { %4308 = vmatpush3.bf16.msra.mxu0 %v9040_v36  ;;  %v9390_v31 = vand.u32 4294901760, %v9042_v22  ;;  %v4371_v32 = vpack.c.bf16 %v9042_v22, %v9001_v6 }
 0x2e1   : > { %4342 = vmatprep.subr.bf16.mxu0 %v4341_v55  ;;  %v4351_v55 = vpack.c.bf16 %v9597_v17, %v9596_v26 }
 0x2e2   : > { %v3104_v1 = vsub.f32 %v9042_v22, %v9390_v31 }
 0x2e3   : > { %2975 = vmatmul.mubr.f32.vlgmr.msra.gmra.mrb[0].mxu0 %v2974_v29  ;;  %v9599_v29 = vld [vmem:[#allocation40_spill] sm:$0xff] }
 0x2e4   : > { %4344 = vmatpush3.bf16.msra.mxu0 %v4343_v34  ;;  %v3105_v4 = vand.u32 4294901760, %v3104_v1  ;;  %2984 = vmatprep.mubr.f32.mxu0 %v2983_v0  ;;  %v4353_v34 = vpack.c.bf16 %v9600_v27, %v9599_v29  ;;  %v9601_v0 = vld [vmem:[#allocation16_spill] sm:$0xff] }
 0x2e5   : > { %4346 = vmatprep.subr.bf16.mxu0 %v4345_v57  ;;  %v9602_v57 = vld [vmem:[#allocation39_spill] sm:$0xff] }
 0x2e6   : > { %v4339_v60 = vpack.c.bf16 %v3105_v4, %v3098_v11  ;;  %v9603_v11 = vld [vmem:[#allocation13_spill] sm:$0xff] }
 0x2e7   : > { %2990 = vmatmul.mubr.f32.gmra.mrb[2].mxu0 %v2989_v56  ;;  %v4355_v1 = vpack.c.bf16 %v9603_v11, %v9602_v57  ;;  %v9604_v56 = vld [vmem:[#allocation27_spill] sm:$0xff]  ;;  %v9605_v4 = vld [vmem:[#allocation45_spill] sm:$0xff] }
 0x2e8   : > { %4340 = vmatpush3.bf16.msra.mxu1 %v4339_v60  ;;  %4348 = vmatpush3.bf16.msra.mxu0 %v4347_v30  ;;  %v9606_v30 = vld [vmem:[#allocation47_spill] sm:$0xff]  ;;  %v9607_v60 = vld [vmem:[#allocation25_spill] sm:$0xff] }
 0x2e9   : > { %4350 = vmatprep.subr.bf16.mxu0 %v4349_v48  ;;  %4374 = vmatprep.subr.bf16.mxu1 %v9598_v21  ;;  %v4357_v48 = vpack.c.bf16 %v9606_v30, %v9605_v4 }
 0x2ea   : > { %3364 = vmatprep.mubr.f32.mxu0 %v8951_v13  ;;  %v9613_v13 = vld [vmem:[#allocation46_spill] sm:$0xff] }
 0x2eb   : > { %3222 = vmatmul.mubr.f32.vlgmr.msra.gmra.mrb[0].mxu1 %v8980_v18 }
 0x2ec   : > { %4352 = vmatpush3.bf16.msra.mxu0 %v4351_v55  ;;  %4376 = vmatpush3.bf16.msra.mxu1 %v9601_v0  ;;  %v9608_v55 = vld [vmem:[#allocation51_spill] sm:$0xff] }
 0x2ed   : > { %4354 = vmatprep.subr.bf16.mxu0 %v4353_v34  ;;  %4378 = vmatprep.subr.bf16.mxu1 %v9604_v56  ;;  %v4359_v31 = vpack.c.bf16 %v9608_v55, %v9566_v16  ;;  %v9610_v34 = vld [vmem:[#allocation37_spill] sm:$0xff] }
 0x2ee   : > { %3227 = vmatprep.mubr.f32.mxu1 %v8994_v20 }
 0x2ef   : > { %3229 = vmatmul.mubr.f32.gmra.mrb[2].mxu1 %v8996_v37 }
 0x2f0   : > { %4356 = vmatpush3.bf16.msra.mxu0 %v4355_v1  ;;  %4380 = vmatpush3.bf16.msra.mxu1 %v9607_v60  ;;  %v9612_v1 = vld [vmem:[#allocation12_spill] sm:$0xff] }
 0x2f1   : > { %4358 = vmatprep.subr.bf16.mxu0 %v4357_v48  ;;  %4382 = vmatprep.subr.bf16.mxu1 %v9609_v62  ;;  %v4367_v48 = vpack.c.bf16 %v8819_v53, %v8812_v19  ;;  %v9616_v19 = vand.u32 4294901760, %v9586_v63  ;;  %v9617_v53 = vand.u32 4294901760, %v9587_v52  ;;  %v9624_v63 = vand.u32 4294901760, %v9592_v46 }
 0x2f2   : > { %3480 = vmatprep.mubr.f32.mxu1 %v2966_v50  ;;  %v9619_v50 = vand.u32 4294901760, %v9588_v9  ;;  %v9625_v52 = vand.u32 4294901760, %v9593_v54  ;;  %v9628_v46 = vand.u32 4294901760, %v9596_v26  ;;  %v9629_v54 = vand.u32 4294901760, %v9597_v17 }
 0x2f3   : > { %v4405_v44 = vpack.c.bf16 %v9617_v53, %v9616_v19  ;;  %v9632_v26 = vand.u32 4294901760, %v9602_v57  ;;  %v9633_v17 = vand.u32 4294901760, %v9603_v11 }
 0x2f4   : > { %4360 = vmatpush3.bf16.msra.mxu0 %v4359_v31  ;;  %4384 = vmatpush3.bf16.msra.mxu1 %v9610_v34  ;;  %v4407_v24 = vpack.c.bf16 %v9620_v23, %v9619_v50  ;;  %v4411_v9 = vpack.c.bf16 %v9625_v52, %v9624_v63 }
 0x2f5   : > { %4362 = vmatprep.subr.bf16.mxu0 %v4361_v40  ;;  %4386 = vmatprep.subr.bf16.mxu1 %v9611_v28  ;;  %v9621_v40 = vld [vmem:[#allocation59_spill] sm:$0xff] }
 0x2f8   : > { %4364 = vmatpush3.bf16.msra.mxu0 %v4363_v51  ;;  %4388 = vmatpush3.bf16.msra.mxu1 %v9612_v1  ;;  %v9622_v51 = vand.u32 4294901760, %v9590_v58  ;;  %v9627_v58 = vand.u32 4294901760, %v9595_v33 }
 0x2f9   : > { %4366 = vmatprep.subr.bf16.mxu0 %v4365_v3  ;;  %4390 = vmatprep.subr.bf16.mxu1 %v9613_v13  ;;  %v9623_v3 = vand.u32 4294901760, %v9591_v25 }
 0x2fa   : > { %v4413_v25 = vpack.c.bf16 %v9627_v58, %v9626_v5 }
 0x2fb   : > { %v4409_v31 = vpack.c.bf16 %v9623_v3, %v9622_v51 }
 0x2fc   : > { %4368 = vmatpush3.bf16.msra.mxu0 %v4367_v48  ;;  %4392 = vmatpush3.bf16.msra.mxu1 %v9614_v10  ;;  %v4415_v48 = vpack.c.bf16 %v9629_v54, %v9628_v46 }
 0x2fd   : > { %4370 = vmatprep.subr.bf16.mxu0 %v4369_v61  ;;  %4394 = vmatprep.subr.bf16.mxu1 %v9615_v49  ;;  %v9630_v61 = vand.u32 4294901760, %v9599_v29  ;;  %v9635_v29 = vand.u32 4294901760, %v9606_v30 }
 0x2ff   : > { %v4417_v33 = vpack.c.bf16 %v9631_v14, %v9630_v61  ;;  %v9642_v61 = vld [vmem:[#allocation9_spill] sm:$0xff] }
 0x300   : > { %4372 = vmatpush3.bf16.msra.mxu0 %v4371_v32  ;;  %4396 = vmatpush3.bf16.msra.mxu1 %v9618_v47  ;;  %v4419_v32 = vpack.c.bf16 %v9633_v17, %v9632_v26 }
 0x301   : > { %4398 = vmatprep.subr.bf16.mxu1 %v9621_v40  ;;  %4406 = vmatprep.subr.bf16.mxu0 %v4405_v44 }
 0x303   : > { %3367 = vmatmul.mubr.f32.vlgmr.msra.gmra.mrb[4].mxu0 %v8990_v7  ;;  %v9636_v7 = vand.u32 4294901760, %v9005_v2 }
 0x304   : > { %4400 = vmatpush3.bf16.msra.mxu1 %v8587_v41  ;;  %4408 = vmatpush3.bf16.msra.mxu0 %v4407_v24 }
 0x305   : > { %3373 = vmatprep.mubr.f32.mxu0 %v8999_v8  ;;  %4402 = vmatprep.subr.bf16.mxu1 %v8865_v42 }
 0x306   : > { %4410 = vmatprep.subr.bf16.mxu0 %v4409_v31 }
 0x307   : > { %3376 = vmatmul.mubr.f32.gmra.mrb[6].mxu0 %v9005_v2 }
 0x308   : > { %4404 = vmatpush3.bf16.msra.mxu1 %v9040_v36  ;;  %4412 = vmatpush3.bf16.msra.mxu0 %v4411_v9 }
 0x309   : > { %4414 = vmatprep.subr.bf16.mxu0 %v4413_v25  ;;  %4438 = vmatprep.subr.bf16.mxu1 %v9598_v21  ;;  %v9634_v21 = vand.u32 4294901760, %v9605_v4  ;;  %v9641_v25 = vld [vmem:[#allocation10_spill] sm:$0xff] }
 0x30a   : > { %3661 = vmatprep.mubr.f32.mxu0 %v8936_v35 }
 0x30b   : > { %3484 = vmatmul.mubr.f32.vlgmr.msra.gmra.mrb[4].mxu1 %v2972_v39  ;;  %v4421_v27 = vpack.c.bf16 %v9635_v29, %v9634_v21  ;;  %v9637_v39 = vand.u32 4294901760, %v9566_v16  ;;  %v9639_v16 = vand.u32 4294901760, %v9001_v6 }
 0x30c   : > { %4416 = vmatpush3.bf16.msra.mxu0 %v4415_v48  ;;  %4440 = vmatpush3.bf16.msra.mxu1 %v9601_v0  ;;  %v9638_v0 = vand.u32 4294901760, %v9608_v55 }
 0x30d   : > { %3491 = vmatprep.mubr.f32.mxu1 %v2981_v38  ;;  %4418 = vmatprep.subr.bf16.mxu0 %v4417_v33 }
 0x30e   : > { %4442 = vmatprep.subr.bf16.mxu1 %v9604_v56  ;;  %v4423_v8 = vpack.c.bf16 %v9638_v0, %v9637_v39 }
 0x30f   : > { %3495 = vmatmul.mubr.f32.gmra.mrb[6].mxu1 %v9636_v7 }
 0x310   : > { %4420 = vmatpush3.bf16.msra.mxu0 %v4419_v32  ;;  %4444 = vmatpush3.bf16.msra.mxu1 %v9607_v60 }
 0x311   : > { %4422 = vmatprep.subr.bf16.mxu0 %v4421_v27  ;;  %4446 = vmatprep.subr.bf16.mxu1 %v9609_v62 }
 0x312   : > { %3772 = vmatprep.mubr.f32.mxu1 %v8936_v35  ;;  %v9640_v35 = vand.u32 4294901760, %v9042_v22 }
 0x314   : > { %4424 = vmatpush3.bf16.msra.mxu0 %v4423_v8  ;;  %4448 = vmatpush3.bf16.msra.mxu1 %v9610_v34  ;;  %v4435_v2 = vpack.c.bf16 %v9640_v35, %v9639_v16 }
 0x315   : > { %4426 = vmatprep.subr.bf16.mxu0 %v9012_v43  ;;  %4450 = vmatprep.subr.bf16.mxu1 %v9611_v28 }
 0x318   : > { %4428 = vmatpush3.bf16.msra.mxu0 %v9018_v59  ;;  %4452 = vmatpush3.bf16.msra.mxu1 %v9612_v1 }
 0x319   : > { %4430 = vmatprep.subr.bf16.mxu0 %v9024_v45  ;;  %4454 = vmatprep.subr.bf16.mxu1 %v9613_v13 }
 0x31c   : > { %4432 = vmatpush3.bf16.msra.mxu0 %v9026_v12  ;;  %4456 = vmatpush3.bf16.msra.mxu1 %v9614_v10 }
 0x31d   : > { %4434 = vmatprep.subr.bf16.mxu0 %v9029_v15  ;;  %4458 = vmatprep.subr.bf16.mxu1 %v9615_v49 }
 0x320   : > { %4436 = vmatpush3.bf16.msra.mxu0 %v4435_v2  ;;  %4460 = vmatpush3.bf16.msra.mxu1 %v9618_v47 }
 0x321   : > { %4462 = vmatprep.subr.bf16.mxu1 %v9621_v40 }
 0x323   : > { %3663 = vmatmul.mubr.f32.vlgmr.msra.gmra.mrb[8].mxu0 %v8980_v18 }
 0x324   : > { %4464 = vmatpush3.bf16.msra.mxu1 %v8587_v41  ;;  %3668 = vmatprep.mubr.f32.mxu0 %v8994_v20 }
 0x325   : > { %4466 = vmatprep.subr.bf16.mxu1 %v8865_v42 }
 0x327   : > { %3670 = vmatmul.mubr.f32.gmra.mrb[10].mxu0 %v8996_v37 }
 0x328   : > { %4468 = vmatpush3.bf16.msra.mxu1 %v9040_v36 }
 0x32b   : > { %3774 = vmatmul.mubr.f32.vlgmr.msra.gmra.mrb[8].mxu1 %v8980_v18 }
 0x32c   : > { %3779 = vmatprep.mubr.f32.mxu1 %v8994_v20 }
 0x32f   : > { %3781 = vmatmul.mubr.f32.gmra.mrb[10].mxu1 %v8996_v37 }
 0x3b6   : > { %v4081_v6 = vpop.f32.mrb[0].mxu0 }
 0x3b7   : > { %v4082_v38 = vpop.f32.mrb[1].mxu0 }
 0x3b8   : > { %v4083_v43 = vadd.f32 %v4082_v38, %v4081_v6 }
 0x3ba   : > { %v4084_v59 = vpop.f32.mrb[2].mxu0 }
 0x3bb   : > { %v4085_v45 = vpop.f32.mrb[3].mxu0 }
 0x3bc   : > { %v4086_v41 = vadd.f32 %v4085_v45, %v4084_v59 }
 0x3be   : > { %v4119_v12 = vpop.f32.mrb[0].mxu1 }
 0x3bf   : > { %v4120_v62 = vpop.f32.mrb[1].mxu1 }
 0x3c0   : > { %v4121_v15 = vadd.f32 %v4120_v62, %v4119_v12 }
 0x3c2   : > { %v3224_v42 = vadd.f32 %v4121_v15, %v4083_v43  ;;  %v4122_v28 = vpop.f32.mrb[2].mxu1 }
 0x3c3   : > { %v4123_v22 = vpop.f32.mrb[3].mxu1 }
 0x3c4   : > { %v4124_v57 = vadd.f32 %v4123_v22, %v4122_v28 }
 0x3c6   : > { %v3231_v36 = vadd.f32 %v4124_v57, %v4086_v41 }
 0x3d6   : > { %v4157_v11 = vpop.f32.mrb[4].mxu0 }
 0x3d7   : > { %v4158_v18 = vpop.f32.mrb[5].mxu0 }
 0x3d8   : > { %v4159_v56 = vadd.f32 %v4158_v18, %v4157_v11 }
 0x3da   : > { %v3369_v20 = vadd.f32 %v4159_v56, %v3224_v42  ;;  %v4160_v4 = vpop.f32.mrb[6].mxu0 }
 0x3db   : > { %v4161_v37 = vpop.f32.mrb[7].mxu0 }
 0x3dc   : > { %v4162_v30 = vadd.f32 %v4161_v37, %v4160_v4 }
 0x3de   : > { %v3378_v60 = vadd.f32 %v4162_v30, %v3231_v36  ;;  %v4195_v55 = vpop.f32.mrb[4].mxu1 }
 0x3df   : > { %v4196_v34 = vpop.f32.mrb[5].mxu1 }
 0x3e0   : > { %v4197_v1 = vadd.f32 %v4196_v34, %v4195_v55 }
 0x3e2   : > { %v3486_v13 = vadd.f32 %v4197_v1, %v3369_v20  ;;  %v4198_v10 = vpop.f32.mrb[6].mxu1 }
 0x3e3   : > { %v4199_v49 = vpop.f32.mrb[7].mxu1 }
 0x3e4   : > { %v4200_v19 = vadd.f32 %v4199_v49, %v4198_v10 }
 0x3e6   : > { %v3497_v53 = vadd.f32 %v4200_v19, %v3378_v60 }
 0x3f6   : > { %v4233_v44 = vpop.f32.mrb[8].mxu0 }
 0x3f7   : > { %v4234_v47 = vpop.f32.mrb[9].mxu0 }
 0x3f8   : > { %v4235_v50 = vadd.f32 %v4234_v47, %v4233_v44 }
 0x3fa   : > { %v3665_v23 = vadd.f32 %v4235_v50, %v3486_v13  ;;  %v4236_v24 = vpop.f32.mrb[10].mxu0 }
 0x3fb   : > { %v4237_v40 = vpop.f32.mrb[11].mxu0 }
 0x3fc   : > { %v4238_v51 = vadd.f32 %v4237_v40, %v4236_v24 }
 0x3fe   : > { %v3672_v3 = vadd.f32 %v4238_v51, %v3497_v53  ;;  %v4271_v31 = vpop.f32.mrb[8].mxu1 }
 0x3ff   : > { %v4272_v63 = vpop.f32.mrb[9].mxu1 }
 0x400   : > { %v4273_v52 = vadd.f32 %v4272_v63, %v4271_v31 }
 0x402   : > { %v3776_v9 = vadd.f32 %v4273_v52, %v3665_v23  ;;  %v4274_v5 = vpop.f32.mrb[10].mxu1 }
 0x403   : > { %v4275_v58 = vpop.f32.mrb[11].mxu1 }
 0x404   : > { %v3786_v46 = vadd.f32 %v9641_v25, %v3776_v9   ;;  %v4276_v54 = vadd.f32 %v4275_v58, %v4274_v5  ;;  %85 = sbr.rel (!%p83_p10) target bundleno = 39 (0x27), region = 64 }
 0x406   : > { %v3783_v48 = vadd.f32 %v4276_v54, %v3672_v3  ;;  %v9644_v0 = vmov %v3786_v46  ;;  %3788 = vst [vmem:[%s9212_s5] sm:$0xff] (%p83_p10), %v3786_v46 }
 0x408   : > { %v3787_v14 = vadd.f32 %v9642_v61, %v3783_v48  }
 0x40a   : > { %v9643_v1 = vmov %v3787_v14  ;;  %3789 = vst [vmem:[%s9212_s5 + $0x8] sm:$0xff] (%p83_p10), %v3787_v14 }
 0x40b   :  { %3794 = vsyncpa [#allocation4], 1 }
 0x40c   :  { %3795 = vsyncpa [#allocation6], 1 }

</bundles_post_ra>
